<compile_context>
chip_gen: v5e
topology: v5e:2x2
jax: 0.10.0
libtpu: 0.0.40
codegen_flags: <defaults>
</compile_context>

<pallas_src>
import functools

import numpy as np
import jax
import jax.numpy as jnp
from jax.experimental import pallas as pl
from jax.experimental.pallas import tpu as pltpu

NC = 10            # opt.n_classes
TS = 108           # opt.ts_size  (opt.channels = 1)
C1 = 64            # conv1 out channels
C2 = 128           # conv2 out channels
L1 = 54            # conv1 out length: (108 + 2 - 4)//2 + 1
P1 = 27            # after maxpool(2,2)
L2 = 13            # conv2 out length: (27 + 2 - 4)//2 + 1
P2 = 6             # after maxpool(2,2) (drops position 12, like torch)
NE = (P1 + 1) * C1  # 28 "slots" (conv2 left-pad + 27 pooled positions) x 64 ch = 1792


def _round_up(x, m):
    return ((x + m - 1) // m) * m


def _build_conv1_selector():
    """0/1 tensor sel[ch, k, row, par*28+s] mapping conv1 taps onto the band matmul.

    row  = ch*128 + t_in        (position of input sample t_in of channel ch in z)
    col  = (par*28 + s)*64 + c  (conv1 output l = 2*(s-1)+par, channel c; s=0 is
                                 the conv2 left-pad slot and stays all-zero)
    """
    sel = np.zeros((2, 4, 2 * 128, 2 * (P1 + 1)), np.float32)
    for par in range(2):
        for s in range(P1 + 1):
            l = 2 * (s - 1) + par
            if not (0 <= l < L1):
                continue
            for k in range(4):
                t_in = 2 * l + k - 1          # conv1 padding=1
                if not (0 <= t_in < TS):
                    continue
                for ch in range(2):
                    sel[ch, k, ch * 128 + t_in, par * (P1 + 1) + s] = 1.0
    return sel


_CONV1_SEL = _build_conv1_selector()


def _disc_kernel(ts_ref, y_ref, a1_ref, b1x_ref, w2p_ref, b2_ref, wf_ref, bout_ref,
                 out_ref):
    f32 = jnp.float32
    bf16 = jnp.bfloat16

    # --- 2-channel conv1 input: [ts | y], each zero-padded to 128 lanes -------
    z = jnp.concatenate([ts_ref[...], y_ref[...]], axis=1).astype(bf16)        # (BT, 256)

    # --- Conv1d(2,64,4,2,1) + ReLU + MaxPool1d(2,2): one K=256 band matmul ----
    # columns = (pool parity, pooled slot, channel); pad slots are zero columns.
    h1 = jnp.dot(z, a1_ref[...], preferred_element_type=f32)                   # (BT, 2*NE)
    p1 = jnp.maximum(h1[:, :NE], h1[:, NE:])                                   # pool pairs
    p1 = jnp.maximum(p1 + b1x_ref[...], 0.0)                                   # (BT, NE) f32
    p1b = p1.astype(bf16)

    # --- Conv1d(64,128,4,2,1) + ReLU + MaxPool1d(2,2) + Linear(768 -> 1) ------
    # Pooled output position j pairs conv2 positions (2j, 2j+1); their im2col
    # windows overlap, so one (BT,384)@(384,256) dot yields both, the pool is a
    # max of the lane halves, and the final linear is accumulated immediately.
    w2p = w2p_ref[...]                                                         # (384, 256) bf16
    b2 = b2_ref[...]                                                           # (1, 128)  f32
    acc = None
    for j in range(P2):                                                        # unrolled, 6 dots
        win = p1b[:, j * 2 * C2:j * 2 * C2 + 4 * C1 + C2]                      # (BT, 384)
        pair = jnp.dot(win, w2p, preferred_element_type=f32)                   # (BT, 256)
        h_even = pair[:, :C2] + b2                                             # conv2 pos 2j
        h_odd = pair[:, C2:] + b2                                              # conv2 pos 2j+1
        pj = jnp.maximum(jnp.maximum(h_even, h_odd), 0.0)                      # relu∘maxpool
        contrib = jnp.sum(pj * wf_ref[:, j * C2:(j + 1) * C2], axis=1, keepdims=True)
        acc = contrib if acc is None else acc + contrib
    out_ref[...] = acc + bout_ref[...]                                         # (BT, 1)


def prepare_discriminator_params(params):
    """One-time re-layout of the PyTorch parameters into kernel operands."""
    f32, bf16 = jnp.float32, jnp.bfloat16

    # Label path folded on the host: T = emb @ W_ln.T + b_ln, lane-padded.
    ytab = jnp.zeros((NC, 128), f32).at[:, :TS].set(
        params["emb"].astype(f32) @ params["W_ln"].T.astype(f32)
        + params["b_ln"].astype(f32))

    # conv1 band matrix: (256, 2*NE); zero columns implement conv/pool padding.
    a1 = jnp.einsum('ikrq,oik->rqo', jnp.asarray(_CONV1_SEL),
                    params["W_c1"].astype(f32)).reshape(2 * 128, 2 * NE).astype(bf16)
    b1x = jnp.concatenate(
        [jnp.zeros((1, C1), f32),
         jnp.tile(params["b_c1"].reshape(1, C1).astype(f32), (1, P1))], axis=1)  # (1, NE)

    # conv2 paired im2col weight: (384, 256); left half = even position (window
    # lanes 0:256), right half = odd position (window lanes 128:384).
    w2c = jnp.transpose(params["W_c2"].astype(f32), (2, 1, 0)).reshape(4 * C1, C2)
    w2pair = jnp.zeros((4 * C1 + C2, 2 * C2), f32)
    w2pair = (w2pair.at[0:4 * C1, 0:C2].set(w2c)
                    .at[C2:4 * C1 + C2, C2:2 * C2].set(w2c)).astype(bf16)
    b2row = params["b_c2"].reshape(1, C2).astype(f32)

    # final linear, torch flatten order (channel-major) -> position-major lanes.
    wout = params["W_out"].reshape(C2, P2).astype(f32)                           # (c, j)
    wf = wout.T.reshape(1, P2 * C2)                                              # wf[0, j*128+c]
    bout = params["b_out"].reshape(1, 1).astype(f32)

    return dict(ytab=ytab, a1=a1, b1x=b1x, w2pair=w2pair, b2=b2row, wf=wf, bout=bout)


@functools.partial(jax.jit, static_argnames=("block_b",))
def discriminator_pallas(ts, labels, prep, *, block_b=128):
    """ts: (B, 1, 108) f32, labels: (B,) int -> (B, 1) f32."""
    f32 = jnp.float32
    B = ts.shape[0]
    BT = int(min(block_b, _round_up(B, 16)))
    BT = max(16, (BT // 16) * 16)                 # multiple of 16 (bf16 sublane packing)
    Bp = _round_up(B, BT)
    nsteps = Bp // BT

    # --- glue: lane-dense, zero-padded per-sample inputs ------------------------
    ts128 = jnp.zeros((Bp, 128), f32).at[:B, :TS].set(ts.reshape(B, TS).astype(f32))
    y = jnp.zeros((Bp, 128), f32).at[:B].set(prep["ytab"][labels])

    def wspec(shape):
        n = len(shape)
        # grid-invariant weights: single-buffered to halve their VMEM footprint.
        return pl.BlockSpec(shape, lambda b, _n=n: (0,) * _n,
                            pipeline_mode=pl.Buffered(1))

    grid_spec = pltpu.PrefetchScalarGridSpec(
        num_scalar_prefetch=0,
        grid=(nsteps,),
        in_specs=[
            pl.BlockSpec((BT, 128), lambda b: (b, 0)),   # time series (lane-padded)
            pl.BlockSpec((BT, 128), lambda b: (b, 0)),   # label-path y (lane-padded)
            wspec((2 * 128, 2 * NE)),                    # conv1 band matrix (bf16)
            wspec((1, NE)),                              # conv1 bias (zero at pad slot)
            wspec((4 * C1 + C2, 2 * C2)),                # conv2 paired im2col weight (bf16)
            wspec((1, C2)),                              # conv2 bias
            wspec((1, P2 * C2)),                         # final linear weight (reordered)
            wspec((1, 1)),                               # final linear bias
        ],
        out_specs=pl.BlockSpec((BT, 1), lambda b: (b, 0)),
    )

    out = pl.pallas_call(
        _disc_kernel,
        out_shape=jax.ShapeDtypeStruct((Bp, 1), f32),
        grid_spec=grid_spec,
        compiler_params=pltpu.CompilerParams(dimension_semantics=("parallel",)),
    )(ts128, y, prep["a1"], prep["b1x"], prep["w2pair"], prep["b2"], prep["wf"],
      prep["bout"])

    return out[:B]


# --- pure-JAX reference (mirrors the PyTorch forward; matmul dtype selectable) --
def _conv1d_ref(x, w, b, matmul_dtype):  # x: (B,Cin,L), w: (Cout,Cin,K); stride=2, pad=1
    Bn, Cin, L = x.shape
    Cout, _, K = w.shape
    xp = jnp.pad(x, ((0, 0), (0, 0), (1, 1)))
    Lout = (L + 2 - K) // 2 + 1
    cols = [xp[:, :, 2 * l:2 * l + K].reshape(Bn, Cin * K) for l in range(Lout)]
    patches = jnp.stack(cols, axis=1).astype(matmul_dtype)    # (B, Lout, Cin*K)
    wm = w.reshape(Cout, Cin * K).astype(matmul_dtype)
    out = jnp.einsum('blk,ok->blo', patches, wm,
                     preferred_element_type=jnp.float32) + b  # (B, Lout, Cout)
    return jnp.transpose(out, (0, 2, 1))                      # (B, Cout, Lout)


def _maxpool_ref(x):  # (B, C, L), kernel=2, stride=2
    Lout = x.shape[2] // 2
    return jnp.maximum(x[:, :, 0:2 * Lout:2], x[:, :, 1:2 * Lout:2])


def discriminator_ref(ts, labels, P, matmul_dtype=jnp.float32):
    emb = P["emb"][labels]                                    # (B, NC)
    y = emb @ P["W_ln"].T + P["b_ln"]                         # (B, 108)  (f32, like kernel)
    x = jnp.concatenate([ts.reshape(-1, 1, TS), y.reshape(-1, 1, TS)], axis=1)
    h = jax.nn.relu(_conv1d_ref(x, P["W_c1"], P["b_c1"], matmul_dtype))
    h = _maxpool_ref(h)
    h = jax.nn.relu(_conv1d_ref(h, P["W_c2"], P["b_c2"], matmul_dtype))
    h = _maxpool_ref(h)
    h = h.reshape(h.shape[0], -1)                             # (B, 768) torch flatten
    return h @ P["W_out"].T + P["b_out"]                      # final linear in f32


if __name__ == "__main__":
    key = jax.random.PRNGKey(0)
    keys = jax.random.split(key, 11)

    params = {
        "emb":   0.1 * jax.random.normal(keys[0], (NC, NC), jnp.float32),
        "W_ln":  0.1 * jax.random.normal(keys[1], (TS, NC), jnp.float32),
        "b_ln":  0.1 * jax.random.normal(keys[2], (TS,), jnp.float32),
        "W_c1":  0.1 * jax.random.normal(keys[3], (C1, 2, 4), jnp.float32),
        "b_c1":  0.1 * jax.random.normal(keys[4], (C1,), jnp.float32),
        "W_c2":  0.1 * jax.random.normal(keys[5], (C2, C1, 4), jnp.float32),
        "b_c2":  0.1 * jax.random.normal(keys[6], (C2,), jnp.float32),
        "W_out": 0.1 * jax.random.normal(keys[7], (1, P2 * C2), jnp.float32),
        "b_out": 0.1 * jax.random.normal(keys[8], (1,), jnp.float32),
    }

    B = 128
    ts = jax.random.normal(keys[9], (B, 1, TS), jnp.float32)   # (B, channels=1, ts_size=108)
    labels = jax.random.randint(keys[10], (B,), 0, NC, jnp.int32)

    prep = prepare_discriminator_params(params)                # one-time weight re-layout
    out = discriminator_pallas(ts, labels, prep, block_b=64)   # grid of 2 batch tiles, M=64
    out = jax.block_until_ready(out)

    # Reference with matmul operands rounded to bf16 (matching the kernel's MXU
    # dtype); everything else, including accumulation, is f32 in both paths.
    ref = jax.block_until_ready(
        discriminator_ref(ts, labels, params, matmul_dtype=jnp.bfloat16))
    np.testing.assert_allclose(np.asarray(out), np.asarray(ref), rtol=1e-2, atol=1e-2)

    print("KERNEL_OK")
</pallas_src>

<mosaic_0001>
module attributes {stable_mosaic.version = 11 : i64} {
  func.func @_disc_kernel(%arg0: i32, %arg1: memref<64x128xf32, #tpu.memory_space<vmem>>, %arg2: memref<64x128xf32, #tpu.memory_space<vmem>>, %arg3: memref<256x3584xbf16, #tpu.memory_space<vmem>>, %arg4: memref<1x1792xf32, #tpu.memory_space<vmem>>, %arg5: memref<384x256xbf16, #tpu.memory_space<vmem>>, %arg6: memref<1x128xf32, #tpu.memory_space<vmem>>, %arg7: memref<1x768xf32, #tpu.memory_space<vmem>>, %arg8: memref<1x1xf32, #tpu.memory_space<vmem>>, %arg9: memref<64x1xf32, #tpu.memory_space<vmem>>) attributes {dimension_semantics = [#tpu.dimension_semantics<parallel>], iteration_bounds = array<i64: 2>, scalar_prefetch = 0 : i64, scratch_operands = 0 : i64, tpu.core_type = #tpu.core_type<tc>, window_params = [{transform_indices = @transform_0, window_bounds = array<i64: 64, 128>}, {transform_indices = @transform_1, window_bounds = array<i64: 64, 128>}, {pipeline_mode = #tpu.pipeline_mode<synchronous>, transform_indices = @transform_2, window_bounds = array<i64: 256, 3584>}, {pipeline_mode = #tpu.pipeline_mode<synchronous>, transform_indices = @transform_3, window_bounds = array<i64: 1, 1792>}, {pipeline_mode = #tpu.pipeline_mode<synchronous>, transform_indices = @transform_4, window_bounds = array<i64: 384, 256>}, {pipeline_mode = #tpu.pipeline_mode<synchronous>, transform_indices = @transform_5, window_bounds = array<i64: 1, 128>}, {pipeline_mode = #tpu.pipeline_mode<synchronous>, transform_indices = @transform_6, window_bounds = array<i64: 1, 768>}, {pipeline_mode = #tpu.pipeline_mode<synchronous>, transform_indices = @transform_7, window_bounds = array<i64: 1, 1>}, {transform_indices = @transform_8, window_bounds = array<i64: 64, 1>}]} {
    %c0 = arith.constant 0 : index
    %c0_0 = arith.constant 0 : index
    %0 = vector.load %arg1[%c0, %c0_0] : memref<64x128xf32, #tpu.memory_space<vmem>>, vector<64x128xf32>
    %c0_1 = arith.constant 0 : index
    %c0_2 = arith.constant 0 : index
    %1 = vector.load %arg2[%c0_1, %c0_2] : memref<64x128xf32, #tpu.memory_space<vmem>>, vector<64x128xf32>
    %2 = tpu.concatenate %0, %1 in 1 : vector<64x128xf32>, vector<64x128xf32> -> vector<64x256xf32>
    %3 = arith.truncf %2 : vector<64x256xf32> to vector<64x256xbf16>
    %c0_3 = arith.constant 0 : index
    %c0_4 = arith.constant 0 : index
    %4 = vector.load %arg3[%c0_3, %c0_4] : memref<256x3584xbf16, #tpu.memory_space<vmem>>, vector<256x3584xbf16>
    %cst = arith.constant dense<0.000000e+00> : vector<64x3584xf32>
    %5 = tpu.matmul %3, %4, %cst {dimension_numbers = #tpu.dot_dimension_numbers<[1], [0], [0], [1], [0, 0, 1, 1], [], []>} : vector<64x256xbf16>, vector<256x3584xbf16>, vector<64x3584xf32> -> vector<64x3584xf32>
    %6 = vector.extract_strided_slice %5 {offsets = [0, 0], sizes = [64, 1792], strides = [1, 1]} : vector<64x3584xf32> to vector<64x1792xf32>
    %7 = vector.extract_strided_slice %5 {offsets = [0, 1792], sizes = [64, 1792], strides = [1, 1]} : vector<64x3584xf32> to vector<64x1792xf32>
    %8 = arith.maximumf %6, %7 : vector<64x1792xf32>
    %c0_5 = arith.constant 0 : index
    %c0_6 = arith.constant 0 : index
    %9 = vector.load %arg4[%c0_5, %c0_6] : memref<1x1792xf32, #tpu.memory_space<vmem>>, vector<1x1792xf32>
    %10 = vector.broadcast %9 : vector<1x1792xf32> to vector<64x1792xf32>
    %11 = arith.addf %8, %10 : vector<64x1792xf32>
    %cst_7 = arith.constant 0.000000e+00 : f32
    %12 = vector.broadcast %cst_7 : f32 to vector<64x1792xf32>
    %13 = arith.maximumf %11, %12 : vector<64x1792xf32>
    %14 = arith.truncf %13 : vector<64x1792xf32> to vector<64x1792xbf16>
    %c0_8 = arith.constant 0 : index
    %c0_9 = arith.constant 0 : index
    %15 = vector.load %arg5[%c0_8, %c0_9] : memref<384x256xbf16, #tpu.memory_space<vmem>>, vector<384x256xbf16>
    %c0_10 = arith.constant 0 : index
    %c0_11 = arith.constant 0 : index
    %16 = vector.load %arg6[%c0_10, %c0_11] : memref<1x128xf32, #tpu.memory_space<vmem>>, vector<1x128xf32>
    %17 = vector.extract_strided_slice %14 {offsets = [0, 0], sizes = [64, 384], strides = [1, 1]} : vector<64x1792xbf16> to vector<64x384xbf16>
    %cst_12 = arith.constant dense<0.000000e+00> : vector<64x256xf32>
    %18 = tpu.matmul %17, %15, %cst_12 {dimension_numbers = #tpu.dot_dimension_numbers<[1], [0], [0], [1], [0, 0, 1, 1], [], []>} : vector<64x384xbf16>, vector<384x256xbf16>, vector<64x256xf32> -> vector<64x256xf32>
    %19 = vector.extract_strided_slice %18 {offsets = [0, 0], sizes = [64, 128], strides = [1, 1]} : vector<64x256xf32> to vector<64x128xf32>
    %20 = vector.broadcast %16 : vector<1x128xf32> to vector<64x128xf32>
    %21 = arith.addf %19, %20 : vector<64x128xf32>
    %22 = vector.extract_strided_slice %18 {offsets = [0, 128], sizes = [64, 128], strides = [1, 1]} : vector<64x256xf32> to vector<64x128xf32>
    %23 = vector.broadcast %16 : vector<1x128xf32> to vector<64x128xf32>
    %24 = arith.addf %22, %23 : vector<64x128xf32>
    %25 = arith.maximumf %21, %24 : vector<64x128xf32>
    %cst_13 = arith.constant 0.000000e+00 : f32
    %26 = vector.broadcast %cst_13 : f32 to vector<64x128xf32>
    %27 = arith.maximumf %25, %26 : vector<64x128xf32>
    %c0_14 = arith.constant 0 : index
    %c0_15 = arith.constant 0 : index
    %28 = vector.load %arg7[%c0_14, %c0_15] : memref<1x768xf32, #tpu.memory_space<vmem>>, vector<1x128xf32>
    %29 = vector.broadcast %28 : vector<1x128xf32> to vector<64x128xf32>
    %30 = arith.mulf %27, %29 : vector<64x128xf32>
    %cst_16 = arith.constant dense<0.000000e+00> : vector<64xf32>
    %31 = vector.multi_reduction <add>, %30, %cst_16 [1] : vector<64x128xf32> to vector<64xf32>
    %32 = vector.shape_cast %31 : vector<64xf32> to vector<64x1xf32>
    %33 = vector.extract_strided_slice %14 {offsets = [0, 256], sizes = [64, 384], strides = [1, 1]} : vector<64x1792xbf16> to vector<64x384xbf16>
    %cst_17 = arith.constant dense<0.000000e+00> : vector<64x256xf32>
    %34 = tpu.matmul %33, %15, %cst_17 {dimension_numbers = #tpu.dot_dimension_numbers<[1], [0], [0], [1], [0, 0, 1, 1], [], []>} : vector<64x384xbf16>, vector<384x256xbf16>, vector<64x256xf32> -> vector<64x256xf32>
    %35 = vector.extract_strided_slice %34 {offsets = [0, 0], sizes = [64, 128], strides = [1, 1]} : vector<64x256xf32> to vector<64x128xf32>
    %36 = vector.broadcast %16 : vector<1x128xf32> to vector<64x128xf32>
    %37 = arith.addf %35, %36 : vector<64x128xf32>
    %38 = vector.extract_strided_slice %34 {offsets = [0, 128], sizes = [64, 128], strides = [1, 1]} : vector<64x256xf32> to vector<64x128xf32>
    %39 = vector.broadcast %16 : vector<1x128xf32> to vector<64x128xf32>
    %40 = arith.addf %38, %39 : vector<64x128xf32>
    %41 = arith.maximumf %37, %40 : vector<64x128xf32>
    %cst_18 = arith.constant 0.000000e+00 : f32
    %42 = vector.broadcast %cst_18 : f32 to vector<64x128xf32>
    %43 = arith.maximumf %41, %42 : vector<64x128xf32>
    %c0_19 = arith.constant 0 : index
    %c128 = arith.constant 128 : index
    %44 = vector.load %arg7[%c0_19, %c128] : memref<1x768xf32, #tpu.memory_space<vmem>>, vector<1x128xf32>
    %45 = vector.broadcast %44 : vector<1x128xf32> to vector<64x128xf32>
    %46 = arith.mulf %43, %45 : vector<64x128xf32>
    %cst_20 = arith.constant dense<0.000000e+00> : vector<64xf32>
    %47 = vector.multi_reduction <add>, %46, %cst_20 [1] : vector<64x128xf32> to vector<64xf32>
    %48 = vector.shape_cast %47 : vector<64xf32> to vector<64x1xf32>
    %49 = arith.addf %32, %48 : vector<64x1xf32>
    %50 = vector.extract_strided_slice %14 {offsets = [0, 512], sizes = [64, 384], strides = [1, 1]} : vector<64x1792xbf16> to vector<64x384xbf16>
    %cst_21 = arith.constant dense<0.000000e+00> : vector<64x256xf32>
    %51 = tpu.matmul %50, %15, %cst_21 {dimension_numbers = #tpu.dot_dimension_numbers<[1], [0], [0], [1], [0, 0, 1, 1], [], []>} : vector<64x384xbf16>, vector<384x256xbf16>, vector<64x256xf32> -> vector<64x256xf32>
    %52 = vector.extract_strided_slice %51 {offsets = [0, 0], sizes = [64, 128], strides = [1, 1]} : vector<64x256xf32> to vector<64x128xf32>
    %53 = vector.broadcast %16 : vector<1x128xf32> to vector<64x128xf32>
    %54 = arith.addf %52, %53 : vector<64x128xf32>
    %55 = vector.extract_strided_slice %51 {offsets = [0, 128], sizes = [64, 128], strides = [1, 1]} : vector<64x256xf32> to vector<64x128xf32>
    %56 = vector.broadcast %16 : vector<1x128xf32> to vector<64x128xf32>
    %57 = arith.addf %55, %56 : vector<64x128xf32>
    %58 = arith.maximumf %54, %57 : vector<64x128xf32>
    %cst_22 = arith.constant 0.000000e+00 : f32
    %59 = vector.broadcast %cst_22 : f32 to vector<64x128xf32>
    %60 = arith.maximumf %58, %59 : vector<64x128xf32>
    %c0_23 = arith.constant 0 : index
    %c256 = arith.constant 256 : index
    %61 = vector.load %arg7[%c0_23, %c256] : memref<1x768xf32, #tpu.memory_space<vmem>>, vector<1x128xf32>
    %62 = vector.broadcast %61 : vector<1x128xf32> to vector<64x128xf32>
    %63 = arith.mulf %60, %62 : vector<64x128xf32>
    %cst_24 = arith.constant dense<0.000000e+00> : vector<64xf32>
    %64 = vector.multi_reduction <add>, %63, %cst_24 [1] : vector<64x128xf32> to vector<64xf32>
    %65 = vector.shape_cast %64 : vector<64xf32> to vector<64x1xf32>
    %66 = arith.addf %49, %65 : vector<64x1xf32>
    %67 = vector.extract_strided_slice %14 {offsets = [0, 768], sizes = [64, 384], strides = [1, 1]} : vector<64x1792xbf16> to vector<64x384xbf16>
    %cst_25 = arith.constant dense<0.000000e+00> : vector<64x256xf32>
    %68 = tpu.matmul %67, %15, %cst_25 {dimension_numbers = #tpu.dot_dimension_numbers<[1], [0], [0], [1], [0, 0, 1, 1], [], []>} : vector<64x384xbf16>, vector<384x256xbf16>, vector<64x256xf32> -> vector<64x256xf32>
    %69 = vector.extract_strided_slice %68 {offsets = [0, 0], sizes = [64, 128], strides = [1, 1]} : vector<64x256xf32> to vector<64x128xf32>
    %70 = vector.broadcast %16 : vector<1x128xf32> to vector<64x128xf32>
    %71 = arith.addf %69, %70 : vector<64x128xf32>
    %72 = vector.extract_strided_slice %68 {offsets = [0, 128], sizes = [64, 128], strides = [1, 1]} : vector<64x256xf32> to vector<64x128xf32>
    %73 = vector.broadcast %16 : vector<1x128xf32> to vector<64x128xf32>
    %74 = arith.addf %72, %73 : vector<64x128xf32>
    %75 = arith.maximumf %71, %74 : vector<64x128xf32>
    %cst_26 = arith.constant 0.000000e+00 : f32
    %76 = vector.broadcast %cst_26 : f32 to vector<64x128xf32>
    %77 = arith.maximumf %75, %76 : vector<64x128xf32>
    %c0_27 = arith.constant 0 : index
    %c384 = arith.constant 384 : index
    %78 = vector.load %arg7[%c0_27, %c384] : memref<1x768xf32, #tpu.memory_space<vmem>>, vector<1x128xf32>
    %79 = vector.broadcast %78 : vector<1x128xf32> to vector<64x128xf32>
    %80 = arith.mulf %77, %79 : vector<64x128xf32>
    %cst_28 = arith.constant dense<0.000000e+00> : vector<64xf32>
    %81 = vector.multi_reduction <add>, %80, %cst_28 [1] : vector<64x128xf32> to vector<64xf32>
    %82 = vector.shape_cast %81 : vector<64xf32> to vector<64x1xf32>
    %83 = arith.addf %66, %82 : vector<64x1xf32>
    %84 = vector.extract_strided_slice %14 {offsets = [0, 1024], sizes = [64, 384], strides = [1, 1]} : vector<64x1792xbf16> to vector<64x384xbf16>
    %cst_29 = arith.constant dense<0.000000e+00> : vector<64x256xf32>
    %85 = tpu.matmul %84, %15, %cst_29 {dimension_numbers = #tpu.dot_dimension_numbers<[1], [0], [0], [1], [0, 0, 1, 1], [], []>} : vector<64x384xbf16>, vector<384x256xbf16>, vector<64x256xf32> -> vector<64x256xf32>
    %86 = vector.extract_strided_slice %85 {offsets = [0, 0], sizes = [64, 128], strides = [1, 1]} : vector<64x256xf32> to vector<64x128xf32>
    %87 = vector.broadcast %16 : vector<1x128xf32> to vector<64x128xf32>
    %88 = arith.addf %86, %87 : vector<64x128xf32>
    %89 = vector.extract_strided_slice %85 {offsets = [0, 128], sizes = [64, 128], strides = [1, 1]} : vector<64x256xf32> to vector<64x128xf32>
    %90 = vector.broadcast %16 : vector<1x128xf32> to vector<64x128xf32>
    %91 = arith.addf %89, %90 : vector<64x128xf32>
    %92 = arith.maximumf %88, %91 : vector<64x128xf32>
    %cst_30 = arith.constant 0.000000e+00 : f32
    %93 = vector.broadcast %cst_30 : f32 to vector<64x128xf32>
    %94 = arith.maximumf %92, %93 : vector<64x128xf32>
    %c0_31 = arith.constant 0 : index
    %c512 = arith.constant 512 : index
    %95 = vector.load %arg7[%c0_31, %c512] : memref<1x768xf32, #tpu.memory_space<vmem>>, vector<1x128xf32>
    %96 = vector.broadcast %95 : vector<1x128xf32> to vector<64x128xf32>
    %97 = arith.mulf %94, %96 : vector<64x128xf32>
    %cst_32 = arith.constant dense<0.000000e+00> : vector<64xf32>
    %98 = vector.multi_reduction <add>, %97, %cst_32 [1] : vector<64x128xf32> to vector<64xf32>
    %99 = vector.shape_cast %98 : vector<64xf32> to vector<64x1xf32>
    %100 = arith.addf %83, %99 : vector<64x1xf32>
    %101 = vector.extract_strided_slice %14 {offsets = [0, 1280], sizes = [64, 384], strides = [1, 1]} : vector<64x1792xbf16> to vector<64x384xbf16>
    %cst_33 = arith.constant dense<0.000000e+00> : vector<64x256xf32>
    %102 = tpu.matmul %101, %15, %cst_33 {dimension_numbers = #tpu.dot_dimension_numbers<[1], [0], [0], [1], [0, 0, 1, 1], [], []>} : vector<64x384xbf16>, vector<384x256xbf16>, vector<64x256xf32> -> vector<64x256xf32>
    %103 = vector.extract_strided_slice %102 {offsets = [0, 0], sizes = [64, 128], strides = [1, 1]} : vector<64x256xf32> to vector<64x128xf32>
    %104 = vector.broadcast %16 : vector<1x128xf32> to vector<64x128xf32>
    %105 = arith.addf %103, %104 : vector<64x128xf32>
    %106 = vector.extract_strided_slice %102 {offsets = [0, 128], sizes = [64, 128], strides = [1, 1]} : vector<64x256xf32> to vector<64x128xf32>
    %107 = vector.broadcast %16 : vector<1x128xf32> to vector<64x128xf32>
    %108 = arith.addf %106, %107 : vector<64x128xf32>
    %109 = arith.maximumf %105, %108 : vector<64x128xf32>
    %cst_34 = arith.constant 0.000000e+00 : f32
    %110 = vector.broadcast %cst_34 : f32 to vector<64x128xf32>
    %111 = arith.maximumf %109, %110 : vector<64x128xf32>
    %c0_35 = arith.constant 0 : index
    %c640 = arith.constant 640 : index
    %112 = vector.load %arg7[%c0_35, %c640] : memref<1x768xf32, #tpu.memory_space<vmem>>, vector<1x128xf32>
    %113 = vector.broadcast %112 : vector<1x128xf32> to vector<64x128xf32>
    %114 = arith.mulf %111, %113 : vector<64x128xf32>
    %cst_36 = arith.constant dense<0.000000e+00> : vector<64xf32>
    %115 = vector.multi_reduction <add>, %114, %cst_36 [1] : vector<64x128xf32> to vector<64xf32>
    %116 = vector.shape_cast %115 : vector<64xf32> to vector<64x1xf32>
    %117 = arith.addf %100, %116 : vector<64x1xf32>
    %c0_37 = arith.constant 0 : index
    %c0_38 = arith.constant 0 : index
    %118 = vector.load %arg8[%c0_37, %c0_38] : memref<1x1xf32, #tpu.memory_space<vmem>>, vector<1x1xf32>
    %119 = vector.broadcast %118 : vector<1x1xf32> to vector<64x1xf32>
    %120 = arith.addf %117, %119 : vector<64x1xf32>
    %c0_39 = arith.constant 0 : index
    %c0_40 = arith.constant 0 : index
    %121 = vector.load %arg9[%c0_39, %c0_40] : memref<64x1xf32, #tpu.memory_space<vmem>>, vector<64x1xf32>
    tpu.vector_store %arg9[%c0_39, %c0_40], %120 {strides = array<i32>} : memref<64x1xf32, #tpu.memory_space<vmem>>, vector<64x1xf32>,
    return
  }
  func.func @transform_0(%arg0: i32) -> (i32, i32) {
    %c0_i32 = arith.constant 0 : i32
    %c0_i32_0 = arith.constant 0 : i32
    return %arg0, %c0_i32 : i32, i32
  }
  func.func @transform_1(%arg0: i32) -> (i32, i32) {
    %c0_i32 = arith.constant 0 : i32
    %c0_i32_0 = arith.constant 0 : i32
    return %arg0, %c0_i32 : i32, i32
  }
  func.func @transform_2(%arg0: i32) -> (i32, i32) {
    %c0_i32 = arith.constant 0 : i32
    %c0_i32_0 = arith.constant 0 : i32
    %c0_i32_1 = arith.constant 0 : i32
    return %c0_i32, %c0_i32_0 : i32, i32
  }
  func.func @transform_3(%arg0: i32) -> (i32, i32) {
    %c0_i32 = arith.constant 0 : i32
    %c0_i32_0 = arith.constant 0 : i32
    %c0_i32_1 = arith.constant 0 : i32
    return %c0_i32, %c0_i32_0 : i32, i32
  }
  func.func @transform_4(%arg0: i32) -> (i32, i32) {
    %c0_i32 = arith.constant 0 : i32
    %c0_i32_0 = arith.constant 0 : i32
    %c0_i32_1 = arith.constant 0 : i32
    return %c0_i32, %c0_i32_0 : i32, i32
  }
  func.func @transform_5(%arg0: i32) -> (i32, i32) {
    %c0_i32 = arith.constant 0 : i32
    %c0_i32_0 = arith.constant 0 : i32
    %c0_i32_1 = arith.constant 0 : i32
    return %c0_i32, %c0_i32_0 : i32, i32
  }
  func.func @transform_6(%arg0: i32) -> (i32, i32) {
    %c0_i32 = arith.constant 0 : i32
    %c0_i32_0 = arith.constant 0 : i32
    %c0_i32_1 = arith.constant 0 : i32
    return %c0_i32, %c0_i32_0 : i32, i32
  }
  func.func @transform_7(%arg0: i32) -> (i32, i32) {
    %c0_i32 = arith.constant 0 : i32
    %c0_i32_0 = arith.constant 0 : i32
    %c0_i32_1 = arith.constant 0 : i32
    return %c0_i32, %c0_i32_0 : i32, i32
  }
  func.func @transform_8(%arg0: i32) -> (i32, i32) {
    %c0_i32 = arith.constant 0 : i32
    %c0_i32_0 = arith.constant 0 : i32
    return %arg0, %c0_i32 : i32, i32
  }
}

</mosaic_0001>

<bundles_post_ra>
// kernel: discriminator_pallas.1
= control target key start
LH: loop header
LB: loop body
LE: loop exit
PB: predicated region body
PF: predicated region fallthrough
CT: control target
= control target key end

     0   :  { %s12293_s0 = inlined_call_operand.vmem [shape: f32[128,128], index: 0, kind: input, shape index: {}]   ;;  %s12294_s1 = inlined_call_operand.vmem [shape: f32[128,128], index: 1, kind: input, shape index: {}]   ;;  %s12295_s2 = inlined_call_operand.hbm [shape: bf16[256,3584], index: 2, kind: input, shape index: {}]   ;;  %s12296_s3 = inlined_call_operand.hbm [shape: f32[1,1792], index: 3, kind: input, shape index: {}]   ;;  %s12297_s4 = inlined_call_operand.hbm [shape: bf16[384,256], index: 4, kind: input, shape index: {}]   ;;  %s12298_s5 = inlined_call_operand.hbm [shape: f32[1,128], index: 5, kind: input, shape index: {}]   ;;  %s12299_s6 = inlined_call_operand.hbm [shape: f32[1,768], index: 6, kind: input, shape index: {}]   ;;  %s12300_s7 = inlined_call_operand.<no memory space> [shape: f32[1,1], index: 7, kind: input, shape index: {}]   ;;  %s12301_s8 = inlined_call_operand.vmem [shape: f32[128,1], index: 8, kind: output, shape index: {}]  }
   0x1   :  { %v13_v0 = vstv %s12300_s7 }
   0x2   :  { %14 = vst [vmem:[#allocation2] sm:$0x1] %v13_v0 }
   0x3   :  { %15 = vsyncpa [#allocation4], 0 }
   0x4   :  { %16 = vsyncpa [#allocation6], 0 }
   0x5   :  { %17 = vsyncpa [#allocation9], 0  ;;  %s10113_s29 = smov 0  }
   0x6 LB: > { %s258_s10 = sshll.u32 %s12296_s3, 4  ;;  %s7309_s7 = sadd.s32 4294967295, %s10054_s29   ;;  %s10054_s29 = sphi %s10113_s29, %s23_s29   ;;  %s259_s10 = int_to_ptr.hbm [resolvable:$true] %s258_s10 }
   0x7   : > { %p7311_p0 = scmp.ge.s32.totalorder %s10054_s29, 1  ;;  %p232_p1 = scmp.lt.s32.totalorder %s10054_s29, 3 }
   0x8   : > { %p10126_p2 = scmp.eq.s32.totalorder %s7309_s7, 0  ;;  %s10056_s13 = smov [#allocation5]  }
   0x9   : > { %p10130_p3 = pnand %p7311_p0, %p232_p1  ;;  %s260_s14 = sshll.u32 %s10056_s13, 4  ;;  %s261_s14 = int_to_ptr.vmem [resolvable:$true] %s260_s14 }
   0xa   : > { %s284_s17 = sshll.u32 %s12298_s5, 4  ;;  %s243_s20 = sshll.u32 %s12295_s2, 4  ;;  %s285_s17 = int_to_ptr.hbm [resolvable:$true] %s284_s17  ;;  %s244_s20 = int_to_ptr.hbm [resolvable:$true] %s243_s20 }
   0xb   : > { %p9832_p4 = pneg %p10130_p3  ;;  %s10057_s22 = smov [#allocation8]  }
   0xc   : > { %s286_s23 = sshll.u32 %s10057_s22, 4  ;;  %s10058_s24 = smov [#allocation3]   ;;  %s287_s23 = int_to_ptr.vmem [resolvable:$true] %s286_s23 }
   0xd   : > { %p10144_p5 = pnand %p10126_p2, %p9832_p4  ;;  %s245_s25 = sshll.u32 %s10058_s24, 4  ;;  %s246_s25 = int_to_ptr.vmem [resolvable:$true] %s245_s25 }
   0xe   : > { %s10059_s26 = smov 1792   ;;  %s10060_s27 = smov 112  }
   0xf   : > { %9838 = dma.hbm_to_vmem [thread:$0]  (!%p10144_p5), %s259_s10, 224, %s261_s14, [#allocation6]  }
  0x10   : > { %9844 = dma.hbm_to_vmem [thread:$0]  (!%p10144_p5), %s285_s17, 16, %s287_s23, [#allocation9]  }
  0x11   : > { %9835 = dma.hbm_to_vmem [thread:$0]  (!%p10144_p5), %s244_s20, 57344, %s246_s25, [#allocation4], %s10059_s26, %s10059_s26, %s10060_s27  }
  0x12   : > { %s269_s9 = sshll.u32 %s12297_s4, 4  ;;  %s10061_s13 = smov [#allocation7]   ;;  %s270_s9 = int_to_ptr.hbm [resolvable:$true] %s269_s9 }
  0x13   : > { %s271_s15 = sshll.u32 %s10061_s13, 4  ;;  %s296_s16 = sshll.u32 %s12299_s6, 4  ;;  %s272_s15 = int_to_ptr.vmem [resolvable:$true] %s271_s15  ;;  %s297_s16 = int_to_ptr.hbm [resolvable:$true] %s296_s16 }
  0x14   : > { %s10062_s17 = smov 128   ;;  %s10063_s18 = smov 8  }
  0x15   : > { %9841 = dma.hbm_to_vmem [thread:$0]  (!%p10144_p5), %s270_s9, 6144, %s272_s15, [#allocation6], %s10062_s17, %s10062_s17, %s10063_s18  }
  0x16   : > { %s10064_s19 = smov [#allocation10]   ;;  %332 = sbr.rel (%p10130_p3) target bundleno = 1799 (0x707), region = 52 }
  0x17   : > { %s298_s22 = sshll.u32 %s10064_s19, 4  ;;  %s299_s22 = int_to_ptr.vmem [resolvable:$true] %s298_s22 }
  0x18   : > { %9847 = dma.hbm_to_vmem [thread:$0]  (!%p10144_p5), %s297_s16, 96, %s299_s22, [#allocation9]  }
  0x1b   : > { %10041 = dma.done.wait (%p10126_p2), [#allocation4], 57344  }
  0x1c   : > { %10043 = vsyncadd (%p10126_p2), [#allocation4], 4294909952 }
  0x1d   : > { %10045 = dma.done.wait (%p10126_p2), [#allocation6], 6368  }
  0x1e   : > { %10047 = vsyncadd (%p10126_p2), [#allocation6], 4294960928 }
  0x1f   : > { %10049 = dma.done.wait (%p10126_p2), [#allocation9], 112  }
  0x20   : > { %10051 = vsyncadd (%p10126_p2), [#allocation9], 4294967184  ;;  %s10180_s12 = sshll.u32 %s7309_s7, 3  ;;  %v8116_v1 = vld [vmem:[#allocation3 + $0x620] sm:$0xf]  ;;  %vm7182_vm0 = vcmask 7168  }
  0x21   : > { %v9526_v2 = vld [vmem:[#allocation3 + $0x68c] sm:$0xf0]  ;;  %v9012_v3 = vld [vmem:[#allocation3 + $0xd20] sm:$0xf]  ;;  %v9512_v6 = vld [vmem:[#allocation3 + $0x624] sm:$0xf] }
  0x22   : > { %v8117_v4 = vor.u32 %v9526_v2, %v8116_v1  ;;  %v9750_v5 = vld [vmem:[#allocation3 + $0xd8c] sm:$0xf0]  ;;  %v8118_v7 = vld [vmem:[#allocation3 + $0x690] sm:$0xf0]  ;;  %v9736_v10 = vld [vmem:[#allocation3 + $0xd24] sm:$0xf] }
  0x23   : > { %v9013_v8 = vor.u32 %v9750_v5, %v9012_v3  ;;  %v8121_v9 = vor.u32 %v9512_v6, %v8118_v7  ;;  %v9014_v11 = vld [vmem:[#allocation3 + $0xd90] sm:$0xf0]  ;;  %v8004_v12 = vld [vmem:[#allocation3 + $0x540] sm:$0xf]  ;;  %v9498_v14 = vld [vmem:[#allocation3 + $0x5ac] sm:$0xf0] }
  0x24   : > { %3122 = vmatpush.bf16.msra.mxu0 %v8117_v4  ;;  %v9017_v13 = vor.u32 %v9736_v10, %v9014_v11  ;;  %v8900_v15 = vld [vmem:[#allocation3 + $0xc40] sm:$0xf]  ;;  %v9722_v16 = vld [vmem:[#allocation3 + $0xcac] sm:$0xf0]  ;;  %v8005_v17 = vor.u32 %v9498_v14, %v8004_v12  ;;  %v9484_v19 = vld [vmem:[#allocation3 + $0x544] sm:$0xf] }
  0x25   : > { %3151 = vmatpush.bf16.msra.mxu1 %v9013_v8  ;;  %3180 = vmatpush.bf16.msra.mxu2 %v8121_v9  ;;  %v8901_v18 = vor.u32 %v9722_v16, %v8900_v15  ;;  %v8006_v20 = vld [vmem:[#allocation3 + $0x5b0] sm:$0xf0]  ;;  %v9708_v21 = vld [vmem:[#allocation3 + $0xc44] sm:$0xf]  ;;  %v7892_v24 = vld [vmem:[#allocation3 + $0x460] sm:$0xf] }
  0x26   : > { %3209 = vmatpush.bf16.msra.mxu3 %v9017_v13  ;;  %v8009_v22 = vor.u32 %v9484_v19, %v8006_v20  ;;  %v8902_v23 = vld [vmem:[#allocation3 + $0xcb0] sm:$0xf0]  ;;  %v9470_v25 = vld [vmem:[#allocation3 + $0x4cc] sm:$0xf0]  ;;  %v8788_v27 = vld [vmem:[#allocation3 + $0xb60] sm:$0xf] }
  0x27   : > { %v8905_v26 = vor.u32 %v9708_v21, %v8902_v23  ;;  %v9694_v28 = vld [vmem:[#allocation3 + $0xbcc] sm:$0xf0]  ;;  %v9456_v29 = vld [vmem:[#allocation3 + $0x464] sm:$0xf]  ;;  %v7893_v30 = vor.u32 %v9470_v25, %v7892_v24  ;;  %v7894_v31 = vld [vmem:[#allocation3 + $0x4d0] sm:$0xf0] }
  0x28   : > { %3123 = vmatpush.bf16.msra.mxu0 %v8005_v17  ;;  %v9680_v32 = vld [vmem:[#allocation3 + $0xb64] sm:$0xf]  ;;  %v8790_v33 = vld [vmem:[#allocation3 + $0xbd0] sm:$0xf0]  ;;  %v8789_v34 = vor.u32 %v9694_v28, %v8788_v27  ;;  %v7897_v35 = vor.u32 %v9456_v29, %v7894_v31  ;;  %v7780_v36 = vld [vmem:[#allocation3 + $0x380] sm:$0xf] }
  0x29   : > { %3152 = vmatpush.bf16.msra.mxu1 %v8901_v18  ;;  %3181 = vmatpush.bf16.msra.mxu2 %v8009_v22  ;;  %v9442_v37 = vld [vmem:[#allocation3 + $0x3ec] sm:$0xf0]  ;;  %v8676_v38 = vld [vmem:[#allocation3 + $0xa80] sm:$0xf]  ;;  %v8793_v39 = vor.u32 %v9680_v32, %v8790_v33  ;;  %v9428_v41 = vld [vmem:[#allocation3 + $0x384] sm:$0xf] }
  0x2a   : > { %3210 = vmatpush.bf16.msra.mxu3 %v8905_v26  ;;  %v9666_v40 = vld [vmem:[#allocation3 + $0xaec] sm:$0xf0]  ;;  %v7782_v42 = vld [vmem:[#allocation3 + $0x3f0] sm:$0xf0]  ;;  %v9652_v43 = vld [vmem:[#allocation3 + $0xa84] sm:$0xf]  ;;  %v7781_v45 = vor.u32 %v9442_v37, %v7780_v36 }
  0x2b   : > { %v8678_v44 = vld [vmem:[#allocation3 + $0xaf0] sm:$0xf0]  ;;  %p393_p6 = scmp.lt.s32.totalorder %s10180_s12, 15  ;;  %v8677_v46 = vor.u32 %v9666_v40, %v8676_v38  ;;  %v7785_v47 = vor.u32 %v9428_v41, %v7782_v42  ;;  %v7668_v48 = vld [vmem:[#allocation3 + $0x2a0] sm:$0xf] }
  0x2c   : > { %3124 = vmatpush.bf16.msra.mxu0 %v7893_v30  ;;  %v9414_v49 = vld [vmem:[#allocation3 + $0x30c] sm:$0xf0]  ;;  %v8564_v50 = vld [vmem:[#allocation3 + $0x9a0] sm:$0xf]  ;;  %v8681_v51 = vor.u32 %v9652_v43, %v8678_v44  ;;  %v9400_v53 = vld [vmem:[#allocation3 + $0x2a4] sm:$0xf] }
  0x2d   : > { %3153 = vmatpush.bf16.msra.mxu1 %v8789_v34  ;;  %3182 = vmatpush.bf16.msra.mxu2 %v7897_v35  ;;  %v9638_v52 = vld [vmem:[#allocation3 + $0xa0c] sm:$0xf0]  ;;  %v7670_v54 = vld [vmem:[#allocation3 + $0x310] sm:$0xf0]  ;;  %v9624_v55 = vld [vmem:[#allocation3 + $0x9a4] sm:$0xf]  ;;  %v7669_v57 = vor.u32 %v9414_v49, %v7668_v48 }
  0x2e   : > { %3211 = vmatpush.bf16.msra.mxu3 %v8793_v39  ;;  %v8566_v56 = vld [vmem:[#allocation3 + $0xa10] sm:$0xf0]  ;;  %s12820_s12 = smov (!%p393_p6, %s10180_s12), 15  ;;  %v8565_v58 = vor.u32 %v9638_v52, %v8564_v50  ;;  %v7673_v59 = vor.u32 %v9400_v53, %v7670_v54  ;;  %v7556_v60 = vld [vmem:[#allocation3 + $0x1c0] sm:$0xf] }
  0x2f   : > { %v9386_v61 = vld [vmem:[#allocation3 + $0x22c] sm:$0xf0]  ;;  %v8452_v62 = vld [vmem:[#allocation3 + $0x8c0] sm:$0xf]  ;;  %v8569_v63 = vor.u32 %v9624_v55, %v8566_v56  ;;  %v9372_v1 = vld [vmem:[#allocation3 + $0x1c4] sm:$0xf] }
  0x30   : > { %3125 = vmatpush.bf16.msra.mxu0 %v7781_v45  ;;  %v9610_v0 = vld [vmem:[#allocation3 + $0x92c] sm:$0xf0]  ;;  %v7558_v2 = vld [vmem:[#allocation3 + $0x230] sm:$0xf0]  ;;  %v9596_v3 = vld [vmem:[#allocation3 + $0x8c4] sm:$0xf]  ;;  %v7557_v5 = vor.u32 %v9386_v61, %v7556_v60 }
  0x31   : > { %3154 = vmatpush.bf16.msra.mxu1 %v8677_v46  ;;  %3183 = vmatpush.bf16.msra.mxu2 %v7785_v47  ;;  %v8454_v4 = vld [vmem:[#allocation3 + $0x930] sm:$0xf0]  ;;  %s10186_s7 = sshll.u32 %s12820_s12, 3  ;;  %v8453_v6 = vor.u32 %v9610_v0, %v8452_v62  ;;  %v7561_v7 = vor.u32 %v9372_v1, %v7558_v2  ;;  %v7444_v8 = vld [vmem:[#allocation3 + $0xe0] sm:$0xf] }
  0x32   : > { %3212 = vmatpush.bf16.msra.mxu3 %v8681_v51  ;;  %v9358_v9 = vld [vmem:[#allocation3 + $0x14c] sm:$0xf0]  ;;  %v8340_v10 = vld [vmem:[#allocation3 + $0x7e0] sm:$0xf]  ;;  %v8457_v11 = vor.u32 %v9596_v3, %v8454_v4  ;;  %v9344_v13 = vld [vmem:[#allocation3 + $0xe4] sm:$0xf]  ;;  %s10192_s21 = scalar_lea.vmem %s12293_s0, %s10186_s7  ;;  %s10198_s25 = scalar_lea.vmem %s12294_s1, %s10186_s7 }
  0x33   : > { %v9582_v12 = vld [vmem:[#allocation3 + $0x84c] sm:$0xf0]  ;;  %v7446_v14 = vld [vmem:[#allocation3 + $0x150] sm:$0xf0]  ;;  %v9568_v15 = vld [vmem:[#allocation3 + $0x7e4] sm:$0xf]  ;;  %v7445_v17 = vor.u32 %v9358_v9, %v7444_v8  ;;  %s12263_s28 = scalar_lea.vmem %s12301_s8, %s10186_s7 }
  0x34   : > { %3126 = vmatpush.bf16.msra.mxu0 %v7669_v57  ;;  %v8342_v16 = vld [vmem:[#allocation3 + $0x850] sm:$0xf0]  ;;  %v7332_v18 = vld [vmem:[#allocation3] sm:$0xf]  ;;  %v9330_v19 = vld [vmem:[#allocation3 + $0x6c] sm:$0xf0]  ;;  %v8341_v20 = vor.u32 %v9582_v12, %v8340_v10  ;;  %v7449_v21 = vor.u32 %v9344_v13, %v7446_v14 }
  0x35   : > { %3155 = vmatpush.bf16.msra.mxu1 %v8565_v58  ;;  %3184 = vmatpush.bf16.msra.mxu2 %v7673_v59  ;;  %v8228_v22 = vld [vmem:[#allocation3 + $0x700] sm:$0xf]  ;;  %v9554_v23 = vld [vmem:[#allocation3 + $0x76c] sm:$0xf0]  ;;  %v9316_v24 = vld [vmem:[#allocation3 + $0x4] sm:$0xf]  ;;  %v8345_v25 = vor.u32 %v9568_v15, %v8342_v16  ;;  %v7333_v32 = vor.u32 %v9330_v19, %v7332_v18 }
  0x36   : > { %3213 = vmatpush.bf16.msra.mxu3 %v8569_v63  ;;  %v7334_v26 = vld [vmem:[#allocation3 + $0x70] sm:$0xf0]  ;;  %v9540_v27 = vld [vmem:[#allocation3 + $0x704] sm:$0xf]  ;;  %v9513_v30 = vld [vmem:[#allocation3 + $0x62c] sm:$0xf]  ;;  %v8229_v36 = vor.u32 %v9554_v23, %v8228_v22 }
  0x37   : > { %v8230_v28 = vld [vmem:[#allocation3 + $0x770] sm:$0xf0]  ;;  %v410_v29 = vld [vmem:[%s10192_s21] sm:$0xff]  ;;  %v411_v33 = vld [vmem:[%s10192_s21 + $0x8] sm:$0xff]  ;;  %v7337_v37 = vor.u32 %v9316_v24, %v7334_v26 }
  0x38   : > { %3127 = vmatpush.bf16.msra.mxu0 %v7557_v5  ;;  %v8126_v31 = vld [vmem:[#allocation3 + $0x698] sm:$0xf0]  ;;  %v9737_v34 = vld [vmem:[#allocation3 + $0xd2c] sm:$0xf]  ;;  %v8233_v40 = vor.u32 %v9540_v27, %v8230_v28  ;;  %v9020_v42 = vld [vmem:[#allocation3 + $0xd28] sm:$0xf]  ;;  %v10204_v45 = vpack.c.bf16 %v411_v33, %v410_v29 }
  0x39   : > { %3156 = vmatpush.bf16.msra.mxu1 %v8453_v6  ;;  %3185 = vmatpush.bf16.msra.mxu2 %v7561_v7  ;;  %v9022_v35 = vld [vmem:[#allocation3 + $0xd98] sm:$0xf0]  ;;  %v419_v39 = vld [vmem:[%s10198_s25 + $0x8] sm:$0xff]  ;;  %v8129_v41 = vor.u32 %v9513_v30, %v8126_v31  ;;  %v9751_v43 = vld [vmem:[#allocation3 + $0xd94] sm:$0xf0] }
  0x3a   : > { %3214 = vmatpush.bf16.msra.mxu3 %v8457_v11  ;;  %v418_v38 = vld [vmem:[%s10198_s25] sm:$0xff]  ;;  %v8124_v44 = vld [vmem:[#allocation3 + $0x628] sm:$0xf]  ;;  %v9025_v46 = vor.u32 %v9737_v34, %v9022_v35  ;;  %v9527_v47 = vld [vmem:[#allocation3 + $0x694] sm:$0xf0]  ;;  %v9021_v53 = vor.u32 %v9751_v43, %v9020_v42 }
  0x3b   : > { %v9485_v48 = vld [vmem:[#allocation3 + $0x54c] sm:$0xf]  ;;  %v8014_v49 = vld [vmem:[#allocation3 + $0x5b8] sm:$0xf0]  ;;  %v10206_v50 = vpack.c.bf16 %v419_v39, %v418_v38  ;;  %v8908_v54 = vld [vmem:[#allocation3 + $0xc48] sm:$0xf]  ;;  %v8125_v55 = vor.u32 %v9527_v47, %v8124_v44 }
  0x3c   : > { %3128 = vmatpush.bf16.msra.mxu0 %v7445_v17  ;;  %v9709_v51 = vld [vmem:[#allocation3 + $0xc4c] sm:$0xf]  ;;  %v8910_v52 = vld [vmem:[#allocation3 + $0xcb8] sm:$0xf0]  ;;  %v8017_v56 = vor.u32 %v9485_v48, %v8014_v49  ;;  %v9723_v57 = vld [vmem:[#allocation3 + $0xcb4] sm:$0xf0] }
  0x3d   : > { %3157 = vmatpush.bf16.msra.mxu1 %v8341_v20  ;;  %3186 = vmatpush.bf16.msra.mxu2 %v7449_v21  ;;  %v8012_v58 = vld [vmem:[#allocation3 + $0x548] sm:$0xf]  ;;  %v9499_v59 = vld [vmem:[#allocation3 + $0x5b4] sm:$0xf0]  ;;  %v8913_v60 = vor.u32 %v9709_v51, %v8910_v52  ;;  %v9457_v61 = vld [vmem:[#allocation3 + $0x46c] sm:$0xf]  ;;  %v8909_v1 = vor.u32 %v9723_v57, %v8908_v54 }
  0x3e   : > { %3215 = vmatpush.bf16.msra.mxu3 %v8345_v25  ;;  %v7902_v62 = vld [vmem:[#allocation3 + $0x4d8] sm:$0xf0]  ;;  %v9681_v63 = vld [vmem:[#allocation3 + $0xb6c] sm:$0xf]  ;;  %v8796_v2 = vld [vmem:[#allocation3 + $0xb68] sm:$0xf]  ;;  %v8013_v3 = vor.u32 %v9499_v59, %v8012_v58 }
  0x3f   : > { %v8798_v0 = vld [vmem:[#allocation3 + $0xbd8] sm:$0xf0]  ;;  %v7905_v4 = vor.u32 %v9457_v61, %v7902_v62  ;;  %v9695_v5 = vld [vmem:[#allocation3 + $0xbd4] sm:$0xf0]  ;;  %v7900_v6 = vld [vmem:[#allocation3 + $0x468] sm:$0xf] }
  0x40   : > { %3129 = vmatpush.bf16.msra.mxu0 %v7333_v32  ;;  %v9471_v7 = vld [vmem:[#allocation3 + $0x4d4] sm:$0xf0]  ;;  %v8801_v8 = vor.u32 %v9681_v63, %v8798_v0  ;;  %v9429_v9 = vld [vmem:[#allocation3 + $0x38c] sm:$0xf]  ;;  %v7790_v10 = vld [vmem:[#allocation3 + $0x3f8] sm:$0xf0]  ;;  %v8797_v15 = vor.u32 %v9695_v5, %v8796_v2 }
  0x41   : > { %3158 = vmatpush.bf16.msra.mxu1 %v8229_v36  ;;  %3187 = vmatpush.bf16.msra.mxu2 %v7337_v37  ;;  %v9653_v11 = vld [vmem:[#allocation3 + $0xa8c] sm:$0xf]  ;;  %v8686_v12 = vld [vmem:[#allocation3 + $0xaf8] sm:$0xf0]  ;;  %v8684_v13 = vld [vmem:[#allocation3 + $0xa88] sm:$0xf]  ;;  %v7901_v21 = vor.u32 %v9471_v7, %v7900_v6  ;;  %v7793_v22 = vor.u32 %v9429_v9, %v7790_v10 }
  0x42   : > { %3216 = vmatpush.bf16.msra.mxu3 %v8233_v40  ;;  %v9667_v14 = vld [vmem:[#allocation3 + $0xaf4] sm:$0xf0]  ;;  %v7788_v16 = vld [vmem:[#allocation3 + $0x388] sm:$0xf]  ;;  %v9401_v18 = vld [vmem:[#allocation3 + $0x2ac] sm:$0xf]  ;;  %v8689_v26 = vor.u32 %v9653_v11, %v8686_v12 }
  0x43   : > { %3130 = vmatmul.bf16.vlgmr.msra.gmra.mxu0 %v10204_v45  ;;  %v9443_v17 = vld [vmem:[#allocation3 + $0x3f4] sm:$0xf0]  ;;  %v412_v19 = vld [vmem:[%s10192_s21 + $0x10] sm:$0xff]  ;;  %v7678_v23 = vld [vmem:[#allocation3 + $0x318] sm:$0xf0]  ;;  %v8685_v29 = vor.u32 %v9667_v14, %v8684_v13 }
  0x44   : > { %3159 = vmatmul.bf16.vlgmr.msra.gmra.mxu1 %v10206_v50  ;;  %3188 = vmatmul.bf16.vlgmr.msra.gmra.mxu2 %v10204_v45  ;;  %v413_v20 = vld [vmem:[%s10192_s21 + $0x18] sm:$0xff]  ;;  %v9625_v24 = vld [vmem:[#allocation3 + $0x9ac] sm:$0xf]  ;;  %v7789_v30 = vor.u32 %v9443_v17, %v7788_v16  ;;  %v7681_v31 = vor.u32 %v9401_v18, %v7678_v23  ;;  %v8572_v32 = vld [vmem:[#allocation3 + $0x9a8] sm:$0xf] }
  0x45   : > { %3296 = vmatpush.bf16.msrb.mxu2 %v8129_v41  ;;  %3217 = vmatmul.bf16.vlgmr.msra.gmra.mxu3 %v10206_v50  ;;  %v8574_v25 = vld [vmem:[#allocation3 + $0xa18] sm:$0xf0]  ;;  %v420_v27 = vld [vmem:[%s10198_s25 + $0x10] sm:$0xff]  ;;  %v9639_v33 = vld [vmem:[#allocation3 + $0xa14] sm:$0xf0]  ;;  %v10216_v35 = vpack.c.bf16 %v413_v20, %v412_v19 }
  0x46   : > { %3325 = vmatpush.bf16.msrb.mxu3 %v9025_v46  ;;  %3267 = vmatpush.bf16.msrb.mxu1 %v9021_v53  ;;  %v421_v28 = vld [vmem:[%s10198_s25 + $0x18] sm:$0xff]  ;;  %v7676_v34 = vld [vmem:[#allocation3 + $0x2a8] sm:$0xf]  ;;  %v8577_v36 = vor.u32 %v9625_v24, %v8574_v25  ;;  %v9373_v38 = vld [vmem:[#allocation3 + $0x1cc] sm:$0xf]  ;;  %v8573_v43 = vor.u32 %v9639_v33, %v8572_v32 }
  0x47   : > { %3238 = vmatpush.bf16.msrb.mxu0 %v8125_v55  ;;  %v9415_v37 = vld [vmem:[#allocation3 + $0x314] sm:$0xf0]  ;;  %v7566_v39 = vld [vmem:[#allocation3 + $0x238] sm:$0xf0]  ;;  %v10218_v40 = vpack.c.bf16 %v421_v28, %v420_v27  ;;  %v9597_v41 = vld [vmem:[#allocation3 + $0x8cc] sm:$0xf] }
  0x48   : > { %v8462_v42 = vld [vmem:[#allocation3 + $0x938] sm:$0xf0]  ;;  %v7677_v44 = vor.u32 %v9415_v37, %v7676_v34  ;;  %v7569_v46 = vor.u32 %v9373_v38, %v7566_v39  ;;  %v8460_v47 = vld [vmem:[#allocation3 + $0x8c8] sm:$0xf]  ;;  %v9611_v48 = vld [vmem:[#allocation3 + $0x934] sm:$0xf0] }
  0x49   : > { %3297 = vmatpush.bf16.msrb.mxu2 %v8017_v56  ;;  %v8465_v49 = vor.u32 %v9597_v41, %v8462_v42  ;;  %v8461_v51 = vor.u32 %v9611_v48, %v8460_v47  ;;  %v7564_v52 = vld [vmem:[#allocation3 + $0x1c8] sm:$0xf]  ;;  %v9387_v53 = vld [vmem:[#allocation3 + $0x234] sm:$0xf0]  ;;  %v9345_v54 = vld [vmem:[#allocation3 + $0xec] sm:$0xf] }
  0x4a   : > { %3326 = vmatpush.bf16.msrb.mxu3 %v8913_v60  ;;  %3268 = vmatpush.bf16.msrb.mxu1 %v8909_v1  ;;  %v7565_v55 = vor.u32 %v9387_v53, %v7564_v52  ;;  %v7454_v56 = vld [vmem:[#allocation3 + $0x158] sm:$0xf0]  ;;  %v9569_v57 = vld [vmem:[#allocation3 + $0x7ec] sm:$0xf]  ;;  %v8348_v61 = vld [vmem:[#allocation3 + $0x7e8] sm:$0xf] }
  0x4b   : > { %3239 = vmatpush.bf16.msrb.mxu0 %v8013_v3  ;;  %v8350_v58 = vld [vmem:[#allocation3 + $0x858] sm:$0xf0]  ;;  %v7457_v59 = vor.u32 %v9345_v54, %v7454_v56  ;;  %v9583_v62 = vld [vmem:[#allocation3 + $0x854] sm:$0xf0]  ;;  %v7452_v63 = vld [vmem:[#allocation3 + $0xe8] sm:$0xf] }
  0x4c   : > { %v8353_v60 = vor.u32 %v9569_v57, %v8350_v58  ;;  %v9359_v0 = vld [vmem:[#allocation3 + $0x154] sm:$0xf0]  ;;  %v9317_v1 = vld [vmem:[#allocation3 + $0xc] sm:$0xf]  ;;  %v7342_v2 = vld [vmem:[#allocation3 + $0x78] sm:$0xf0]  ;;  %v8349_v3 = vor.u32 %v9583_v62, %v8348_v61 }
  0x4d   : > { %3298 = vmatpush.bf16.msrb.mxu2 %v7905_v4  ;;  %v9541_v4 = vld [vmem:[#allocation3 + $0x70c] sm:$0xf]  ;;  %v8238_v5 = vld [vmem:[#allocation3 + $0x778] sm:$0xf0]  ;;  %v7453_v6 = vor.u32 %v9359_v0, %v7452_v63  ;;  %v7345_v7 = vor.u32 %v9317_v1, %v7342_v2  ;;  %v9555_v9 = vld [vmem:[#allocation3 + $0x774] sm:$0xf0] }
  0x4e   : > { %3327 = vmatpush.bf16.msrb.mxu3 %v8801_v8  ;;  %3269 = vmatpush.bf16.msrb.mxu1 %v8797_v15  ;;  %v8236_v8 = vld [vmem:[#allocation3 + $0x708] sm:$0xf]  ;;  %v8241_v10 = vor.u32 %v9541_v4, %v8238_v5  ;;  %v9331_v12 = vld [vmem:[#allocation3 + $0x74] sm:$0xf0]  ;;  %v414_v13 = vld [vmem:[%s10192_s21 + $0x20] sm:$0xff] }
  0x4f   : > { %3240 = vmatpush.bf16.msrb.mxu0 %v7901_v21  ;;  %v7340_v11 = vld [vmem:[#allocation3 + $0x8] sm:$0xf]  ;;  %v422_v15 = vld [vmem:[%s10198_s25 + $0x20] sm:$0xff]  ;;  %v8237_v17 = vor.u32 %v9555_v9, %v8236_v8  ;;  %v9514_v21 = vld [vmem:[#allocation3 + $0x634] sm:$0xf] }
  0x50   : > { %v415_v14 = vld [vmem:[%s10192_s21 + $0x28] sm:$0xff]  ;;  %v7341_v18 = vor.u32 %v9331_v12, %v7340_v11  ;;  %v9738_v23 = vld [vmem:[#allocation3 + $0xd34] sm:$0xf]  ;;  %v9752_v27 = vld [vmem:[#allocation3 + $0xd9c] sm:$0xf0] }
  0x51   : > { %3299 = vmatpush.bf16.msrb.mxu2 %v7793_v22  ;;  %v423_v16 = vld [vmem:[%s10198_s25 + $0x28] sm:$0xff]  ;;  %v10228_v19 = vpack.c.bf16 %v415_v14, %v414_v13  ;;  %v9486_v32 = vld [vmem:[#allocation3 + $0x554] sm:$0xf]  ;;  %v8916_v41 = vld [vmem:[#allocation3 + $0xc50] sm:$0xf] }
  0x52   : > { %3328 = vmatpush.bf16.msrb.mxu3 %v8689_v26  ;;  %3270 = vmatpush.bf16.msrb.mxu1 %v8685_v29  ;;  %v10230_v20 = vpack.c.bf16 %v423_v16, %v422_v15  ;;  %v8134_v22 = vld [vmem:[#allocation3 + $0x6a0] sm:$0xf0]  ;;  %v9028_v26 = vld [vmem:[#allocation3 + $0xd30] sm:$0xf]  ;;  %v9724_v42 = vld [vmem:[#allocation3 + $0xcbc] sm:$0xf0] }
  0x53   : > { %3241 = vmatpush.bf16.msrb.mxu0 %v7789_v30  ;;  %v8137_v24 = vor.u32 %v9514_v21, %v8134_v22  ;;  %v9030_v25 = vld [vmem:[#allocation3 + $0xda0] sm:$0xf0]  ;;  %v9029_v29 = vor.u32 %v9752_v27, %v9028_v26  ;;  %v8132_v30 = vld [vmem:[#allocation3 + $0x630] sm:$0xf]  ;;  %v425_v48 = vld [vmem:[%s10198_s25 + $0x38] sm:$0xff] }
  0x54   : > { %3135 = vmatmul.bf16.gmra.mxu0 %v10216_v35  ;;  %3164 = vmatmul.bf16.gmra.mxu1 %v10218_v40  ;;  %v9033_v28 = vor.u32 %v9738_v23, %v9030_v25  ;;  %v8022_v34 = vld [vmem:[#allocation3 + $0x5c0] sm:$0xf0]  ;;  %v424_v47 = vld [vmem:[%s10198_s25 + $0x30] sm:$0xff]  ;;  %v9500_v53 = vld [vmem:[#allocation3 + $0x5bc] sm:$0xf0] }
  0x55   : > { %3300 = vmatpush.bf16.msrb.mxu2 %v7681_v31  ;;  %3222 = vmatmul.bf16.gmra.mxu3 %v10218_v40  ;;  %v9528_v31 = vld [vmem:[#allocation3 + $0x69c] sm:$0xf0]  ;;  %v8918_v37 = vld [vmem:[#allocation3 + $0xcc0] sm:$0xf0]  ;;  %v8025_v38 = vor.u32 %v9486_v32, %v8022_v34  ;;  %v8020_v52 = vld [vmem:[#allocation3 + $0x550] sm:$0xf] }
  0x56   : > { %3329 = vmatpush.bf16.msrb.mxu3 %v8577_v36  ;;  %3193 = vmatmul.bf16.gmra.mxu2 %v10216_v35  ;;  %v8133_v33 = vor.u32 %v9528_v31, %v8132_v30  ;;  %v9710_v36 = vld [vmem:[#allocation3 + $0xc54] sm:$0xf]  ;;  %v7910_v56 = vld [vmem:[#allocation3 + $0x4e0] sm:$0xf0]  ;;  %v8804_v61 = vld [vmem:[#allocation3 + $0xb70] sm:$0xf] }
  0x57   : > { %3271 = vmatpush.bf16.msrb.mxu1 %v8573_v43  ;;  %3242 = vmatpush.bf16.msrb.mxu0 %v7677_v44  ;;  %v8921_v39 = vor.u32 %v9710_v36, %v8918_v37  ;;  %v8917_v43 = vor.u32 %v9724_v42, %v8916_v41  ;;  %v416_v44 = vld [vmem:[%s10192_s21 + $0x30] sm:$0xff]  ;;  %v8806_v58 = vld [vmem:[#allocation3 + $0xbe0] sm:$0xf0]  ;;  %v9696_v62 = vld [vmem:[#allocation3 + $0xbdc] sm:$0xf0] }
  0x58   : > { %v9458_v54 = vld [vmem:[#allocation3 + $0x474] sm:$0xf]  ;;  %v7908_v63 = vld [vmem:[#allocation3 + $0x470] sm:$0xf]  ;;  %v8805_v0 = vor.u32 %v9696_v62, %v8804_v61  ;;  %v9472_v1 = vld [vmem:[#allocation3 + $0x4dc] sm:$0xf0] }
  0x59   : > { %3301 = vmatpush.bf16.msrb.mxu2 %v7569_v46  ;;  %v417_v46 = vld [vmem:[%s10192_s21 + $0x38] sm:$0xff]  ;;  %v7909_v4 = vor.u32 %v9472_v1, %v7908_v63  ;;  %v8692_v8 = vld [vmem:[#allocation3 + $0xa90] sm:$0xf]  ;;  %v9444_v13 = vld [vmem:[#allocation3 + $0x3fc] sm:$0xf0] }
  0x5a   : > { %3330 = vmatpush.bf16.msrb.mxu3 %v8465_v49  ;;  %v10240_v49 = vpack.c.bf16 %v417_v46, %v416_v44  ;;  %v9682_v57 = vld [vmem:[#allocation3 + $0xb74] sm:$0xf]  ;;  %v7796_v12 = vld [vmem:[#allocation3 + $0x390] sm:$0xf]  ;;  %v7686_v16 = vld [vmem:[#allocation3 + $0x320] sm:$0xf0] }
  0x5b   : > { %3272 = vmatpush.bf16.msrb.mxu1 %v8461_v51  ;;  %3243 = vmatpush.bf16.msrb.mxu0 %v7565_v55  ;;  %v10242_v51 = vpack.c.bf16 %v425_v48, %v424_v47  ;;  %v8021_v55 = vor.u32 %v9500_v53, %v8020_v52  ;;  %v9430_v2 = vld [vmem:[#allocation3 + $0x394] sm:$0xf]  ;;  %v7797_v15 = vor.u32 %v9444_v13, %v7796_v12  ;;  %v8580_v23 = vld [vmem:[#allocation3 + $0x9b0] sm:$0xf]  ;;  %v9416_v27 = vld [vmem:[#allocation3 + $0x31c] sm:$0xf0] }
  0x5c   : > { %v9402_v14 = vld [vmem:[#allocation3 + $0x2b4] sm:$0xf]  ;;  %v7684_v25 = vld [vmem:[#allocation3 + $0x2b0] sm:$0xf]  ;;  %v9612_v37 = vld [vmem:[#allocation3 + $0x93c] sm:$0xf0] }
  0x5d   : > { %3302 = vmatpush.bf16.msrb.mxu2 %v7457_v59  ;;  %v7913_v59 = vor.u32 %v9458_v54, %v7910_v56  ;;  %v7689_v21 = vor.u32 %v9402_v14, %v7686_v16  ;;  %v7685_v30 = vor.u32 %v9416_v27, %v7684_v25  ;;  %v9598_v32 = vld [vmem:[#allocation3 + $0x8d4] sm:$0xf]  ;;  %v8468_v34 = vld [vmem:[#allocation3 + $0x8d0] sm:$0xf]  ;;  %v9388_v41 = vld [vmem:[#allocation3 + $0x23c] sm:$0xf0] }
  0x5e   : > { %3331 = vmatpush.bf16.msrb.mxu3 %v8353_v60  ;;  %v8809_v60 = vor.u32 %v9682_v57, %v8806_v58  ;;  %v9346_v42 = vld [vmem:[#allocation3 + $0xf4] sm:$0xf]  ;;  %v7462_v44 = vld [vmem:[#allocation3 + $0x160] sm:$0xf0]  ;;  %v8356_v53 = vld [vmem:[#allocation3 + $0x7f0] sm:$0xf] }
  0x5f   : > { %3273 = vmatpush.bf16.msrb.mxu1 %v8349_v3  ;;  %3244 = vmatpush.bf16.msrb.mxu0 %v7453_v6  ;;  %v7798_v3 = vld [vmem:[#allocation3 + $0x400] sm:$0xf0]  ;;  %v9654_v6 = vld [vmem:[#allocation3 + $0xa94] sm:$0xf]  ;;  %v7465_v48 = vor.u32 %v9346_v42, %v7462_v44  ;;  %v9584_v54 = vld [vmem:[#allocation3 + $0x85c] sm:$0xf0] }
  0x60   : > { %v7801_v5 = vor.u32 %v9430_v2, %v7798_v3  ;;  %v9570_v46 = vld [vmem:[#allocation3 + $0x7f4] sm:$0xf]  ;;  %v8358_v47 = vld [vmem:[#allocation3 + $0x860] sm:$0xf0]  ;;  %v8357_v56 = vor.u32 %v9584_v54, %v8356_v53  ;;  %v9360_v57 = vld [vmem:[#allocation3 + $0x15c] sm:$0xf0] }
  0x61   : > { %3303 = vmatpush.bf16.msrb.mxu2 %v7345_v7  ;;  %v8694_v7 = vld [vmem:[#allocation3 + $0xb00] sm:$0xf0]  ;;  %v8361_v52 = vor.u32 %v9570_v46, %v8358_v47  ;;  %v9318_v58 = vld [vmem:[#allocation3 + $0x14] sm:$0xf]  ;;  %v7348_v1 = vld [vmem:[#allocation3 + $0x10] sm:$0xf] }
  0x62   : > { %3332 = vmatpush.bf16.msrb.mxu3 %v8241_v10  ;;  %v8697_v9 = vor.u32 %v9654_v6, %v8694_v7  ;;  %v9668_v10 = vld [vmem:[#allocation3 + $0xafc] sm:$0xf0]  ;;  %v9542_v62 = vld [vmem:[#allocation3 + $0x714] sm:$0xf]  ;;  %v8246_v63 = vld [vmem:[#allocation3 + $0x780] sm:$0xf0] }
  0x63   : > { %3274 = vmatpush.bf16.msrb.mxu1 %v8237_v17  ;;  %3245 = vmatpush.bf16.msrb.mxu0 %v7341_v18  ;;  %v8693_v11 = vor.u32 %v9668_v10, %v8692_v8  ;;  %v9626_v17 = vld [vmem:[#allocation3 + $0x9b4] sm:$0xf]  ;;  %v8582_v18 = vld [vmem:[#allocation3 + $0xa20] sm:$0xf0]  ;;  %v9332_v2 = vld [vmem:[#allocation3 + $0x7c] sm:$0xf0] }
  0x64   : > { %3140 = vmatmul.bf16.gmra.mxu0 %v10228_v19  ;;  %3169 = vmatmul.bf16.gmra.mxu1 %v10230_v20  ;;  %v8585_v22 = vor.u32 %v9626_v17, %v8582_v18  ;;  %v8244_v3 = vld [vmem:[#allocation3 + $0x710] sm:$0xf]  ;;  %v9515_v7 = vld [vmem:[#allocation3 + $0x63c] sm:$0xf]  ;;  %v8142_v8 = vld [vmem:[#allocation3 + $0x6a8] sm:$0xf0] }
  0x65   : > { %3227 = vmatmul.bf16.gmra.mxu3 %v10230_v20  ;;  %3412 = vmatpush.bf16.msra.mxu2 %v8137_v24  ;;  %v9640_v24 = vld [vmem:[#allocation3 + $0xa1c] sm:$0xf0]  ;;  %v8145_v10 = vor.u32 %v9515_v7, %v8142_v8  ;;  %v9036_v13 = vld [vmem:[#allocation3 + $0xd38] sm:$0xf]  ;;  %v9753_v14 = vld [vmem:[#allocation3 + $0xda4] sm:$0xf0] }
  0x66   : > { %3198 = vmatmul.bf16.gmra.mxu2 %v10228_v19  ;;  %3441 = vmatpush.bf16.msra.mxu3 %v9033_v28  ;;  %v8581_v26 = vor.u32 %v9640_v24, %v8580_v23  ;;  %v9374_v28 = vld [vmem:[#allocation3 + $0x1d4] sm:$0xf]  ;;  %v9037_v16 = vor.u32 %v9753_v14, %v9036_v13  ;;  %v9529_v17 = vld [vmem:[#allocation3 + $0x6a4] sm:$0xf0]  ;;  %v9487_v18 = vld [vmem:[#allocation3 + $0x55c] sm:$0xf] }
  0x67   : > { %3383 = vmatpush.bf16.msra.mxu1 %v9029_v29  ;;  %3354 = vmatpush.bf16.msra.mxu0 %v8133_v33  ;;  %v7574_v29 = vld [vmem:[#allocation3 + $0x240] sm:$0xf0]  ;;  %v9711_v24 = vld [vmem:[#allocation3 + $0xc5c] sm:$0xf]  ;;  %v8926_v25 = vld [vmem:[#allocation3 + $0xcc8] sm:$0xf0] }
  0x68   : > { %v7577_v31 = vor.u32 %v9374_v28, %v7574_v29  ;;  %v8470_v33 = vld [vmem:[#allocation3 + $0x940] sm:$0xf0]  ;;  %v8924_v27 = vld [vmem:[#allocation3 + $0xc58] sm:$0xf]  ;;  %v9725_v28 = vld [vmem:[#allocation3 + $0xcc4] sm:$0xf0] }
  0x69   : > { %3413 = vmatpush.bf16.msra.mxu2 %v8025_v38  ;;  %v8473_v36 = vor.u32 %v9598_v32, %v8470_v33  ;;  %v8469_v38 = vor.u32 %v9612_v37, %v8468_v34  ;;  %v8925_v29 = vor.u32 %v9725_v28, %v8924_v27  ;;  %v9459_v32 = vld [vmem:[#allocation3 + $0x47c] sm:$0xf]  ;;  %v7918_v34 = vld [vmem:[#allocation3 + $0x4e8] sm:$0xf0]  ;;  %v9697_v42 = vld [vmem:[#allocation3 + $0xbe4] sm:$0xf0] }
  0x6a   : > { %3442 = vmatpush.bf16.msra.mxu3 %v8921_v39  ;;  %v7572_v39 = vld [vmem:[#allocation3 + $0x1d0] sm:$0xf]  ;;  %v8814_v37 = vld [vmem:[#allocation3 + $0xbe8] sm:$0xf0]  ;;  %v9473_v46 = vld [vmem:[#allocation3 + $0x4e4] sm:$0xf0] }
  0x6b   : > { %3384 = vmatpush.bf16.msra.mxu1 %v8917_v43  ;;  %3355 = vmatpush.bf16.msra.mxu0 %v8021_v55  ;;  %v7573_v43 = vor.u32 %v9388_v41, %v7572_v39  ;;  %v7460_v55 = vld [vmem:[#allocation3 + $0xf0] sm:$0xf]  ;;  %v8812_v41 = vld [vmem:[#allocation3 + $0xb78] sm:$0xf]  ;;  %v9431_v47 = vld [vmem:[#allocation3 + $0x39c] sm:$0xf] }
  0x6c   : > { %v8813_v44 = vor.u32 %v9697_v42, %v8812_v41  ;;  %v9655_v54 = vld [vmem:[#allocation3 + $0xa9c] sm:$0xf]  ;;  %v8588_v14 = vld [vmem:[#allocation3 + $0x9b8] sm:$0xf] }
  0x6d   : > { %3414 = vmatpush.bf16.msra.mxu2 %v7913_v59  ;;  %v7350_v59 = vld [vmem:[#allocation3 + $0x80] sm:$0xf0]  ;;  %v9347_v41 = vld [vmem:[#allocation3 + $0xfc] sm:$0xf] }
  0x6e   : > { %3443 = vmatpush.bf16.msra.mxu3 %v8809_v60  ;;  %v7461_v60 = vor.u32 %v9360_v57, %v7460_v55  ;;  %v7353_v61 = vor.u32 %v9318_v58, %v7350_v59  ;;  %v8702_v55 = vld [vmem:[#allocation3 + $0xb08] sm:$0xf0] }
  0x6f   : > { %3385 = vmatpush.bf16.msra.mxu1 %v8805_v0  ;;  %3356 = vmatpush.bf16.msra.mxu0 %v7909_v4  ;;  %v8249_v0 = vor.u32 %v9542_v62, %v8246_v63  ;;  %v7349_v4 = vor.u32 %v9332_v2, %v7348_v1  ;;  %v7804_v63 = vld [vmem:[#allocation3 + $0x398] sm:$0xf]  ;;  %v9403_v1 = vld [vmem:[#allocation3 + $0x2bc] sm:$0xf] }
  0x71   : > { %3415 = vmatpush.bf16.msra.mxu2 %v7801_v5  ;;  %v9556_v5 = vld [vmem:[#allocation3 + $0x77c] sm:$0xf0] }
  0x72   : > { %3444 = vmatpush.bf16.msra.mxu3 %v8697_v9  ;;  %v8245_v6 = vor.u32 %v9556_v5, %v8244_v3  ;;  %v9739_v9 = vld [vmem:[#allocation3 + $0xd3c] sm:$0xf]  ;;  %v7694_v3 = vld [vmem:[#allocation3 + $0x328] sm:$0xf0] }
  0x73   : > { %3386 = vmatpush.bf16.msra.mxu1 %v8693_v11  ;;  %3357 = vmatpush.bf16.msra.mxu0 %v7797_v15  ;;  %v9038_v11 = vld [vmem:[#allocation3 + $0xda8] sm:$0xf0]  ;;  %v8140_v15 = vld [vmem:[#allocation3 + $0x638] sm:$0xf]  ;;  %v7697_v7 = vor.u32 %v9403_v1, %v7694_v3 }
  0x74   : > { %3145 = vmatmul.bf16.gmra.mxu0 %v10240_v49  ;;  %3174 = vmatmul.bf16.gmra.mxu1 %v10242_v51  ;;  %v9041_v12 = vor.u32 %v9739_v9, %v9038_v11  ;;  %v8590_v5 = vld [vmem:[#allocation3 + $0xa28] sm:$0xf0] }
  0x75   : > { %3232 = vmatmul.bf16.gmra.mxu3 %v10242_v51  ;;  %3416 = vmatpush.bf16.msra.mxu2 %v7689_v21  ;;  %v8030_v21 = vld [vmem:[#allocation3 + $0x5c8] sm:$0xf0] }
  0x76   : > { %3203 = vmatmul.bf16.gmra.mxu2 %v10240_v49  ;;  %3445 = vmatpush.bf16.msra.mxu3 %v8585_v22  ;;  %v8141_v22 = vor.u32 %v9529_v17, %v8140_v15  ;;  %v8033_v23 = vor.u32 %v9487_v18, %v8030_v21  ;;  %v9641_v15 = vld [vmem:[#allocation3 + $0xa24] sm:$0xf0]  ;;  %v9375_v21 = vld [vmem:[#allocation3 + $0x1dc] sm:$0xf]  ;;  %v7358_v1 = vld [vmem:[#allocation3 + $0x88] sm:$0xf0] }
  0x77   : > { %3387 = vmatpush.bf16.msra.mxu1 %v8581_v26  ;;  %3358 = vmatpush.bf16.msra.mxu0 %v7685_v30  ;;  %v8929_v26 = vor.u32 %v9711_v24, %v8926_v25  ;;  %v8028_v30 = vld [vmem:[#allocation3 + $0x558] sm:$0xf]  ;;  %v8589_v17 = vor.u32 %v9641_v15, %v8588_v14  ;;  %v9417_v18 = vld [vmem:[#allocation3 + $0x324] sm:$0xf0]  ;;  %v9599_v25 = vld [vmem:[#allocation3 + $0x8dc] sm:$0xf] }
  0x79   : > { %3417 = vmatpush.bf16.msra.mxu2 %v7577_v31  ;;  %v9501_v31 = vld [vmem:[#allocation3 + $0x5c4] sm:$0xf0] }
  0x7a   : > { %3446 = vmatpush.bf16.msra.mxu3 %v8473_v36  ;;  %v8029_v33 = vor.u32 %v9501_v31, %v8028_v30  ;;  %v9683_v36 = vld [vmem:[#allocation3 + $0xb7c] sm:$0xf] }
  0x7b   : > { %3388 = vmatpush.bf16.msra.mxu1 %v8469_v38  ;;  %3359 = vmatpush.bf16.msra.mxu0 %v7573_v43  ;;  %v7921_v38 = vor.u32 %v9459_v32, %v7918_v34  ;;  %v8817_v39 = vor.u32 %v9683_v36, %v8814_v37  ;;  %v7916_v43 = vld [vmem:[#allocation3 + $0x478] sm:$0xf]  ;;  %v9613_v36 = vld [vmem:[#allocation3 + $0x944] sm:$0xf0] }
  0x7c   : > { %v8476_v34 = vld [vmem:[#allocation3 + $0x8d8] sm:$0xf] }
  0x7d   : > { %3418 = vmatpush.bf16.msra.mxu2 %v7465_v48  ;;  %v7806_v48 = vld [vmem:[#allocation3 + $0x408] sm:$0xf0]  ;;  %v8477_v37 = vor.u32 %v9613_v36, %v8476_v34 }
  0x7e   : > { %3447 = vmatpush.bf16.msra.mxu3 %v8361_v52  ;;  %v7917_v52 = vor.u32 %v9473_v46, %v7916_v43  ;;  %v7809_v53 = vor.u32 %v9431_v47, %v7806_v48  ;;  %v7470_v43 = vld [vmem:[#allocation3 + $0x168] sm:$0xf0] }
  0x7f   : > { %3389 = vmatpush.bf16.msra.mxu1 %v8357_v56  ;;  %3360 = vmatpush.bf16.msra.mxu0 %v7461_v60  ;;  %v8705_v56 = vor.u32 %v9655_v54, %v8702_v55  ;;  %v8700_v60 = vld [vmem:[#allocation3 + $0xa98] sm:$0xf]  ;;  %v8366_v46 = vld [vmem:[#allocation3 + $0x868] sm:$0xf0]  ;;  %v7473_v48 = vor.u32 %v9347_v41, %v7470_v43  ;;  %v8148_v41 = vld [vmem:[#allocation3 + $0x640] sm:$0xf] }
  0x80   : > { %v9530_v43 = vld [vmem:[#allocation3 + $0x6ac] sm:$0xf0] }
  0x81   : > { %3419 = vmatpush.bf16.msra.mxu2 %v7353_v61  ;;  %v9669_v61 = vld [vmem:[#allocation3 + $0xb04] sm:$0xf0] }
  0x82   : > { %3448 = vmatpush.bf16.msra.mxu3 %v8249_v0  ;;  %v8701_v62 = vor.u32 %v9669_v61, %v8700_v60  ;;  %v9445_v0 = vld [vmem:[#allocation3 + $0x404] sm:$0xf0]  ;;  %v7468_v61 = vld [vmem:[#allocation3 + $0xf8] sm:$0xf] }
  0x83   : > { %3361 = vmatpush.bf16.msra.mxu0 %v7349_v4  ;;  %3390 = vmatpush.bf16.msra.mxu1 %v8245_v6  ;;  %v7805_v2 = vor.u32 %v9445_v0, %v7804_v63  ;;  %v9627_v4 = vld [vmem:[#allocation3 + $0x9bc] sm:$0xf]  ;;  %v9585_v60 = vld [vmem:[#allocation3 + $0x864] sm:$0xf0] }
  0x84   : > { %3246 = vmatmul.bf16.vlgmr.msrb.gmra.mxu0 %v10204_v45  ;;  %3275 = vmatmul.bf16.vlgmr.msrb.gmra.mxu1 %v10206_v50  ;;  %v8593_v8 = vor.u32 %v9627_v4, %v8590_v5  ;;  %v9361_v63 = vld [vmem:[#allocation3 + $0x164] sm:$0xf0]  ;;  %v9319_v0 = vld [vmem:[#allocation3 + $0x1c] sm:$0xf]  ;;  %v8254_v5 = vld [vmem:[#allocation3 + $0x788] sm:$0xf0] }
  0x85   : > { %3333 = vmatmul.bf16.vlgmr.msrb.gmra.mxu3 %v10206_v50  ;;  %v7361_v3 = vor.u32 %v9319_v0, %v7358_v1  ;;  %v9543_v4 = vld [vmem:[#allocation3 + $0x71c] sm:$0xf]  ;;  %v8932_v0 = vld [vmem:[#allocation3 + $0xc60] sm:$0xf]  ;;  %v9726_v1 = vld [vmem:[#allocation3 + $0xccc] sm:$0xf0] }
  0x86   : > { %3304 = vmatmul.bf16.vlgmr.msrb.gmra.mxu2 %v10204_v45  ;;  %3557 = vmatpush.bf16.msrb.mxu3 %v9041_v12 }
  0x87   : > { %3528 = vmatpush.bf16.msrb.mxu2 %v8145_v10  ;;  %3499 = vmatpush.bf16.msrb.mxu1 %v9037_v16  ;;  %v7692_v16 = vld [vmem:[#allocation3 + $0x2b8] sm:$0xf] }
  0x88   : > { %3470 = vmatpush.bf16.msrb.mxu0 %v8141_v22  ;;  %v7582_v22 = vld [vmem:[#allocation3 + $0x248] sm:$0xf0] }
  0x89   : > { %v7585_v24 = vor.u32 %v9375_v21, %v7582_v22 }
  0x8a   : > { %3558 = vmatpush.bf16.msrb.mxu3 %v8929_v26  ;;  %v8478_v26 = vld [vmem:[#allocation3 + $0x948] sm:$0xf0] }
  0x8b   : > { %3529 = vmatpush.bf16.msrb.mxu2 %v8033_v23  ;;  %3500 = vmatpush.bf16.msrb.mxu1 %v8925_v29  ;;  %v7693_v23 = vor.u32 %v9417_v18, %v7692_v16  ;;  %v8481_v27 = vor.u32 %v9599_v25, %v8478_v26  ;;  %v9557_v16 = vld [vmem:[#allocation3 + $0x784] sm:$0xf0]  ;;  %v9740_v25 = vld [vmem:[#allocation3 + $0xd44] sm:$0xf] }
  0x8c   : > { %3471 = vmatpush.bf16.msrb.mxu0 %v8029_v33 }
  0x8e   : > { %3559 = vmatpush.bf16.msrb.mxu3 %v8817_v39  ;;  %v9389_v39 = vld [vmem:[#allocation3 + $0x244] sm:$0xf0] }
  0x8f   : > { %3530 = vmatpush.bf16.msrb.mxu2 %v7921_v38  ;;  %3501 = vmatpush.bf16.msrb.mxu1 %v8813_v44  ;;  %v7580_v38 = vld [vmem:[#allocation3 + $0x1d8] sm:$0xf]  ;;  %v9571_v44 = vld [vmem:[#allocation3 + $0x7fc] sm:$0xf] }
  0x90   : > { %3472 = vmatpush.bf16.msrb.mxu0 %v7917_v52  ;;  %v7581_v42 = vor.u32 %v9389_v39, %v7580_v38  ;;  %v8369_v52 = vor.u32 %v9571_v44, %v8366_v46  ;;  %v9044_v38 = vld [vmem:[#allocation3 + $0xd40] sm:$0xf]  ;;  %v9754_v39 = vld [vmem:[#allocation3 + $0xdac] sm:$0xf0]  ;;  %v9488_v44 = vld [vmem:[#allocation3 + $0x564] sm:$0xf] }
  0x91   : > { %v8038_v46 = vld [vmem:[#allocation3 + $0x5d0] sm:$0xf0] }
  0x92   : > { %3560 = vmatpush.bf16.msrb.mxu3 %v8705_v56 }
  0x93   : > { %3531 = vmatpush.bf16.msrb.mxu2 %v7809_v53  ;;  %3502 = vmatpush.bf16.msrb.mxu1 %v8701_v62 }
  0x94   : > { %3251 = vmatmul.bf16.gmra.mxu0 %v10216_v35  ;;  %3280 = vmatmul.bf16.gmra.mxu1 %v10218_v40 }
  0x95   : > { %3338 = vmatmul.bf16.gmra.mxu3 %v10218_v40  ;;  %3473 = vmatpush.bf16.msrb.mxu0 %v7805_v2  ;;  %v7469_v2 = vor.u32 %v9361_v63, %v7468_v61 }
  0x96   : > { %3309 = vmatmul.bf16.gmra.mxu2 %v10216_v35  ;;  %3561 = vmatpush.bf16.msrb.mxu3 %v8593_v8  ;;  %v7356_v8 = vld [vmem:[#allocation3 + $0x18] sm:$0xf] }
  0x97   : > { %3532 = vmatpush.bf16.msrb.mxu2 %v7697_v7  ;;  %3503 = vmatpush.bf16.msrb.mxu1 %v8589_v17 }
  0x99   : > { %3474 = vmatpush.bf16.msrb.mxu0 %v7693_v23  ;;  %v9516_v23 = vld [vmem:[#allocation3 + $0x644] sm:$0xf] }
  0x9a   : > { %3562 = vmatpush.bf16.msrb.mxu3 %v8481_v27  ;;  %v9046_v27 = vld [vmem:[#allocation3 + $0xdb0] sm:$0xf0] }
  0x9b   : > { %3533 = vmatpush.bf16.msrb.mxu2 %v7585_v24  ;;  %3504 = vmatpush.bf16.msrb.mxu1 %v8477_v37  ;;  %v8150_v24 = vld [vmem:[#allocation3 + $0x6b0] sm:$0xf0] }
  0x9c   : > { %v8153_v26 = vor.u32 %v9516_v23, %v8150_v24  ;;  %v8820_v24 = vld [vmem:[#allocation3 + $0xb80] sm:$0xf] }
  0x9d   : > { %3475 = vmatpush.bf16.msrb.mxu0 %v7581_v42  ;;  %v9045_v42 = vor.u32 %v9754_v39, %v9044_v38  ;;  %v9656_v38 = vld [vmem:[#allocation3 + $0xaa4] sm:$0xf]  ;;  %v8710_v39 = vld [vmem:[#allocation3 + $0xb10] sm:$0xf0] }
  0x9e   : > { %3563 = vmatpush.bf16.msrb.mxu3 %v8369_v52  ;;  %v9712_v52 = vld [vmem:[#allocation3 + $0xc64] sm:$0xf] }
  0x9f   : > { %3534 = vmatpush.bf16.msrb.mxu2 %v7473_v48  ;;  %v8041_v48 = vor.u32 %v9488_v44, %v8038_v46 }
  0xa1   : > { %3476 = vmatpush.bf16.msrb.mxu0 %v7469_v2  ;;  %v8933_v2 = vor.u32 %v9726_v1, %v8932_v0  ;;  %v7702_v0 = vld [vmem:[#allocation3 + $0x330] sm:$0xf0]  ;;  %v9628_v1 = vld [vmem:[#allocation3 + $0x9c4] sm:$0xf] }
  0xa3   : > { %3535 = vmatpush.bf16.msrb.mxu2 %v7361_v3  ;;  %v8036_v3 = vld [vmem:[#allocation3 + $0x560] sm:$0xf] }
  0xa4   : > { %3256 = vmatmul.bf16.gmra.mxu0 %v10228_v19  ;;  %3285 = vmatmul.bf16.gmra.mxu1 %v10230_v20 }
  0xa5   : > { %3343 = vmatmul.bf16.gmra.mxu3 %v10230_v20 }
  0xa6   : > { %3314 = vmatmul.bf16.gmra.mxu2 %v10228_v19 }
  0xb4   : > { %3261 = vmatmul.bf16.gmra.mxu0 %v10240_v49  ;;  %3290 = vmatmul.bf16.gmra.mxu1 %v10242_v51 }
  0xb5   : > { %3348 = vmatmul.bf16.gmra.mxu3 %v10242_v51 }
  0xb6   : > { %3319 = vmatmul.bf16.gmra.mxu2 %v10240_v49 }
  0xc0   : > { %v3131_v57 = vpop.f32.mrf.mxu0 }
  0xc1   : > { %v3160_v58 = vpop.f32.mrf.mxu1 }
  0xc2   : > { %v10264_v59 = vadd.f32 %v3160_v58, %v3131_v57  ;;  %v8364_v58 = vld [vmem:[#allocation3 + $0x7f8] sm:$0xf] }
  0xc3   : > { %v8365_v62 = vor.u32 %v9585_v60, %v8364_v58 }
  0xc4   : > { %3362 = vmatmul.bf16.vlgmr.msra.gmra.mxu0 %v10204_v45  ;;  %3391 = vmatmul.bf16.vlgmr.msra.gmra.mxu1 %v10206_v50 }
  0xc5   : > { %3449 = vmatmul.bf16.vlgmr.msra.gmra.mxu3 %v10206_v50  ;;  %3505 = vmatpush.bf16.msrb.mxu1 %v8365_v62 }
  0xc6   : > { %3420 = vmatmul.bf16.vlgmr.msra.gmra.mxu2 %v10204_v45 }
  0xc7   : > { %v3189_v6 = vpop.f32.mrf.mxu2  ;;  %3644 = vmatpush.bf16.msra.mxu2 %v8153_v26  ;;  %v7924_v26 = vld [vmem:[#allocation3 + $0x480] sm:$0xf] }
  0xc8   : > { %v3218_v9 = vpop.f32.mrf.mxu3  ;;  %v3133_v10 = vpop.f32.mrf.mxu0 }
  0xc9   : > { %v10270_v11 = vadd.f32 %v3218_v9, %v3189_v6  ;;  %v3162_v12 = vpop.f32.mrf.mxu1  ;;  %v8257_v6 = vor.u32 %v9543_v4, %v8254_v5  ;;  %v9333_v9 = vld [vmem:[#allocation3 + $0x84] sm:$0xf0]  ;;  %v9502_v4 = vld [vmem:[#allocation3 + $0x5cc] sm:$0xf0]  ;;  %v9460_v5 = vld [vmem:[#allocation3 + $0x484] sm:$0xf] }
  0xca   : > { %v10272_v13 = vadd.f32 %v3162_v12, %v3133_v10  ;;  %v8252_v10 = vld [vmem:[#allocation3 + $0x718] sm:$0xf]  ;;  %v7357_v15 = vor.u32 %v9333_v9, %v7356_v8  ;;  %v9684_v8 = vld [vmem:[#allocation3 + $0xb84] sm:$0xf]  ;;  %v8822_v9 = vld [vmem:[#allocation3 + $0xbf0] sm:$0xf0] }
  0xcb   : > { %3564 = vmatpush.bf16.msrb.mxu3 %v8257_v6  ;;  %v8253_v21 = vor.u32 %v9557_v16, %v8252_v10  ;;  %3645 = vmatpush.bf16.msra.mxu2 %v8041_v48  ;;  %v8037_v6 = vor.u32 %v9502_v4, %v8036_v3 }
  0xcc   : > { %3477 = vmatpush.bf16.msrb.mxu0 %v7357_v15 }
  0xcd   : > { %3506 = vmatpush.bf16.msrb.mxu1 %v8253_v21 }
  0xcf   : > { %v3191_v28 = vpop.f32.mrf.mxu2 }
  0xd0   : > { %v3220_v29 = vpop.f32.mrf.mxu3 }
  0xd1   : > { %v3136_v30 = vpop.f32.mrf.mxu0  ;;  %v10274_v31 = vadd.f32 %v3220_v29, %v3191_v28  ;;  %v3165_v32 = vpop.f32.mrf.mxu1  ;;  %v9049_v29 = vor.u32 %v9740_v25, %v9046_v27  ;;  %3615 = vmatpush.bf16.msra.mxu1 %v9045_v42  ;;  %v9698_v25 = vld [vmem:[#allocation3 + $0xbec] sm:$0xf0] }
  0xd2   : > { %v10276_v33 = vadd.f32 %v3165_v32, %v3136_v30  ;;  %v8821_v27 = vor.u32 %v9698_v25, %v8820_v24  ;;  %v9376_v24 = vld [vmem:[#allocation3 + $0x1e4] sm:$0xf]  ;;  %v7590_v25 = vld [vmem:[#allocation3 + $0x250] sm:$0xf0] }
  0xd3   : > { %3673 = vmatpush.bf16.msra.mxu3 %v9049_v29  ;;  %v9432_v29 = vld [vmem:[#allocation3 + $0x3a4] sm:$0xf] }
  0xd4   : > { %3367 = vmatmul.bf16.gmra.mxu0 %v10216_v35  ;;  %3396 = vmatmul.bf16.gmra.mxu1 %v10218_v40 }
  0xd5   : > { %3454 = vmatmul.bf16.gmra.mxu3 %v10218_v40  ;;  %3616 = vmatpush.bf16.msra.mxu1 %v8933_v2  ;;  %v8598_v2 = vld [vmem:[#allocation3 + $0xa30] sm:$0xf0] }
  0xd6   : > { %3425 = vmatmul.bf16.gmra.mxu2 %v10216_v35 }
  0xd8   : > { %v3223_v53 = vpop.f32.mrf.mxu3 }
  0xd9   : > { %v3194_v47 = vpop.f32.mrf.mxu2  ;;  %v3138_v54 = vpop.f32.mrf.mxu0  ;;  %3617 = vmatpush.bf16.msra.mxu1 %v8821_v27  ;;  %v7593_v27 = vor.u32 %v9376_v24, %v7590_v25  ;;  %v7366_v24 = vld [vmem:[#allocation3 + $0x90] sm:$0xf0] }
  0xda   : > { %v10282_v55 = vadd.f32 %v3223_v53, %v3194_v47  ;;  %v3167_v56 = vpop.f32.mrf.mxu1  ;;  %v8149_v47 = vor.u32 %v9530_v43, %v8148_v41  ;;  %v8934_v53 = vld [vmem:[#allocation3 + $0xcd0] sm:$0xf0]  ;;  %v8713_v41 = vor.u32 %v9656_v38, %v8710_v39 }
  0xdb   : > { %v10284_v57 = vadd.f32 %v3167_v56, %v3138_v54  ;;  %v8937_v54 = vor.u32 %v9712_v52, %v8934_v53  ;;  %v8708_v52 = vld [vmem:[#allocation3 + $0xaa0] sm:$0xf]  ;;  %v9670_v53 = vld [vmem:[#allocation3 + $0xb0c] sm:$0xf0] }
  0xdc   : > { %3586 = vmatpush.bf16.msra.mxu0 %v8149_v47 }
  0xdd   : > { %3674 = vmatpush.bf16.msra.mxu3 %v8937_v54  ;;  %v8709_v54 = vor.u32 %v9670_v53, %v8708_v52  ;;  %v7588_v52 = vld [vmem:[#allocation3 + $0x1e0] sm:$0xf]  ;;  %v9390_v53 = vld [vmem:[#allocation3 + $0x24c] sm:$0xf0] }
  0xdf   : > { %3618 = vmatpush.bf16.msra.mxu1 %v8709_v54  ;;  %v9348_v54 = vld [vmem:[#allocation3 + $0x104] sm:$0xf] }
  0xe0   : > { %v3225_v12 = vpop.f32.mrf.mxu3  ;;  %3587 = vmatpush.bf16.msra.mxu0 %v8037_v6 }
  0xe1   : > { %v3196_v7 = vpop.f32.mrf.mxu2  ;;  %v3141_v14 = vpop.f32.mrf.mxu0 }
  0xe2   : > { %v10286_v17 = vadd.f32 %v3225_v12, %v3196_v7  ;;  %v3170_v18 = vpop.f32.mrf.mxu1  ;;  %v7926_v7 = vld [vmem:[#allocation3 + $0x4f0] sm:$0xf0] }
  0xe3   : > { %v10288_v22 = vadd.f32 %v3170_v18, %v3141_v14  ;;  %v7929_v12 = vor.u32 %v9460_v5, %v7926_v7  ;;  %v8825_v14 = vor.u32 %v9684_v8, %v8822_v9  ;;  %v8601_v5 = vor.u32 %v9628_v1, %v8598_v2 }
  0xe4   : > { %3372 = vmatmul.bf16.gmra.mxu0 %v10228_v19  ;;  %3401 = vmatmul.bf16.gmra.mxu1 %v10230_v20 }
  0xe5   : > { %3459 = vmatmul.bf16.gmra.mxu3 %v10230_v20  ;;  %3646 = vmatpush.bf16.msra.mxu2 %v7929_v12  ;;  %v8596_v12 = vld [vmem:[#allocation3 + $0x9c0] sm:$0xf] }
  0xe6   : > { %3430 = vmatmul.bf16.gmra.mxu2 %v10228_v19  ;;  %3675 = vmatpush.bf16.msra.mxu3 %v8825_v14  ;;  %v9642_v14 = vld [vmem:[#allocation3 + $0xa2c] sm:$0xf0] }
  0xe8   : > { %v3228_v30 = vpop.f32.mrf.mxu3 }
  0xe9   : > { %v3199_v28 = vpop.f32.mrf.mxu2  ;;  %v3143_v32 = vpop.f32.mrf.mxu0 }
  0xea   : > { %v10294_v34 = vadd.f32 %v3228_v30, %v3199_v28  ;;  %v3172_v36 = vpop.f32.mrf.mxu1  ;;  %v9474_v28 = vld [vmem:[#allocation3 + $0x4ec] sm:$0xf0]  ;;  %v7814_v30 = vld [vmem:[#allocation3 + $0x410] sm:$0xf0]  ;;  %3676 = vmatpush.bf16.msra.mxu3 %v8713_v41 }
  0xeb   : > { %v10296_v37 = vadd.f32 %v3172_v36, %v3143_v32  ;;  %v7925_v32 = vor.u32 %v9474_v28, %v7924_v26  ;;  %v7817_v36 = vor.u32 %v9432_v29, %v7814_v30  ;;  %v9600_v28 = vld [vmem:[#allocation3 + $0x8e4] sm:$0xf]  ;;  %v8486_v29 = vld [vmem:[#allocation3 + $0x950] sm:$0xf0] }
  0xec   : > { %v8489_v30 = vor.u32 %v9600_v28, %v8486_v29  ;;  %v8262_v28 = vld [vmem:[#allocation3 + $0x790] sm:$0xf0] }
  0xed   : > { %3588 = vmatpush.bf16.msra.mxu0 %v7925_v32  ;;  %3647 = vmatpush.bf16.msra.mxu2 %v7817_v36 }
  0xee   : > { %3677 = vmatpush.bf16.msra.mxu3 %v8601_v5 }
  0xf0   : > { %v3230_v58 = vpop.f32.mrf.mxu3 }
  0xf1   : > { %v3201_v56 = vpop.f32.mrf.mxu2  ;;  %v3146_v60 = vpop.f32.mrf.mxu0 }
  0xf2   : > { %v10298_v61 = vadd.f32 %v3230_v58, %v3201_v56  ;;  %v3175_v62 = vpop.f32.mrf.mxu1  ;;  %v7812_v56 = vld [vmem:[#allocation3 + $0x3a0] sm:$0xf]  ;;  %v9446_v58 = vld [vmem:[#allocation3 + $0x40c] sm:$0xf0]  ;;  %3678 = vmatpush.bf16.msra.mxu3 %v8489_v30 }
  0xf3   : > { %v10300_v63 = vadd.f32 %v3175_v62, %v3146_v60  ;;  %v9404_v60 = vld [vmem:[#allocation3 + $0x2c4] sm:$0xf]  ;;  %v7813_v62 = vor.u32 %v9446_v58, %v7812_v56  ;;  %v7589_v56 = vor.u32 %v9390_v53, %v7588_v52  ;;  %v7478_v58 = vld [vmem:[#allocation3 + $0x170] sm:$0xf0] }
  0xf4   : > { %3377 = vmatmul.bf16.gmra.mxu0 %v10240_v49  ;;  %3406 = vmatmul.bf16.gmra.mxu1 %v10242_v51  ;;  %v7705_v4 = vor.u32 %v9404_v60, %v7702_v0  ;;  %v9572_v60 = vld [vmem:[#allocation3 + $0x804] sm:$0xf]  ;;  %v7481_v1 = vor.u32 %v9348_v54, %v7478_v58  ;;  %v9517_v58 = vld [vmem:[#allocation3 + $0x64c] sm:$0xf] }
  0xf5   : > { %3464 = vmatmul.bf16.gmra.mxu3 %v10242_v51  ;;  %3589 = vmatpush.bf16.msra.mxu0 %v7813_v62  ;;  %v8374_v62 = vld [vmem:[#allocation3 + $0x870] sm:$0xf0] }
  0xf6   : > { %3435 = vmatmul.bf16.gmra.mxu2 %v10240_v49  ;;  %v8377_v2 = vor.u32 %v9572_v60, %v8374_v62  ;;  %v8158_v60 = vld [vmem:[#allocation3 + $0x6b8] sm:$0xf0]  ;;  %v9741_v62 = vld [vmem:[#allocation3 + $0xd4c] sm:$0xf] }
  0xf7   : > { %3648 = vmatpush.bf16.msra.mxu2 %v7705_v4 }
  0xf8   : > { %v3233_v15 = vpop.f32.mrf.mxu3  ;;  %3679 = vmatpush.bf16.msra.mxu3 %v8377_v2 }
  0xf9   : > { %v3204_v10 = vpop.f32.mrf.mxu2  ;;  %v3148_v16 = vpop.f32.mrf.mxu0 }
  0xfa   : > { %v10306_v18 = vadd.f32 %v3233_v15, %v3204_v10  ;;  %v3177_v21 = vpop.f32.mrf.mxu1  ;;  %v7700_v15 = vld [vmem:[#allocation3 + $0x2c0] sm:$0xf] }
  0xfb   : > { %v10308_v23 = vadd.f32 %v3177_v21, %v3148_v16  ;;  %v8597_v16 = vor.u32 %v9642_v14, %v8596_v12  ;;  %v9418_v21 = vld [vmem:[#allocation3 + $0x32c] sm:$0xf0]  ;;  %3649 = vmatpush.bf16.msra.mxu2 %v7593_v27  ;;  %v7476_v14 = vld [vmem:[#allocation3 + $0x100] sm:$0xf]  ;;  %v9544_v27 = vld [vmem:[#allocation3 + $0x724] sm:$0xf] }
  0xfc   : > { %v7701_v26 = vor.u32 %v9418_v21, %v7700_v15  ;;  %v9586_v12 = vld [vmem:[#allocation3 + $0x86c] sm:$0xf0]  ;;  %v9320_v21 = vld [vmem:[#allocation3 + $0x24] sm:$0xf]  ;;  %v8265_v29 = vor.u32 %v9544_v27, %v8262_v28  ;;  %v8046_v27 = vld [vmem:[#allocation3 + $0x5d8] sm:$0xf0] }
  0xfd   : > { %3619 = vmatpush.bf16.msra.mxu1 %v8597_v16  ;;  %v9362_v16 = vld [vmem:[#allocation3 + $0x16c] sm:$0xf0] }
  0xfe   : > { %3590 = vmatpush.bf16.msra.mxu0 %v7701_v26  ;;  %v7477_v25 = vor.u32 %v9362_v16, %v7476_v14  ;;  %v7369_v26 = vor.u32 %v9320_v21, %v7366_v24  ;;  %3680 = vmatpush.bf16.msra.mxu3 %v8265_v29  ;;  %v9755_v16 = vld [vmem:[#allocation3 + $0xdb4] sm:$0xf0]  ;;  %v8156_v21 = vld [vmem:[#allocation3 + $0x648] sm:$0xf] }
  0xff   : > { %3650 = vmatpush.bf16.msra.mxu2 %v7481_v1  ;;  %v9054_v1 = vld [vmem:[#allocation3 + $0xdb8] sm:$0xf0] }
 0x100   : > { %v3235_v43 = vpop.f32.mrf.mxu3 }
 0x101   : > { %v3206_v42 = vpop.f32.mrf.mxu2  ;;  %v3247_v44 = vpop.f32.mrf.mxu0 }
 0x102   : > { %v10310_v46 = vadd.f32 %v3235_v43, %v3206_v42  ;;  %v3276_v47 = vpop.f32.mrf.mxu1  ;;  %v8484_v43 = vld [vmem:[#allocation3 + $0x8e0] sm:$0xf]  ;;  %3591 = vmatpush.bf16.msra.mxu0 %v7589_v56 }
 0x103   : > { %v10312_v48 = vadd.f32 %v3276_v47, %v3247_v44  ;;  %v9614_v44 = vld [vmem:[#allocation3 + $0x94c] sm:$0xf0]  ;;  %3651 = vmatpush.bf16.msra.mxu2 %v7369_v26  ;;  %v9489_v26 = vld [vmem:[#allocation3 + $0x56c] sm:$0xf] }
 0x104   : > { %3478 = vmatmul.bf16.vlgmr.msrb.gmra.mxu0 %v10204_v45  ;;  %3507 = vmatmul.bf16.vlgmr.msrb.gmra.mxu1 %v10206_v50  ;;  %v8485_v47 = vor.u32 %v9614_v44, %v8484_v43  ;;  %v8049_v29 = vor.u32 %v9489_v26, %v8046_v27 }
 0x105   : > { %3565 = vmatmul.bf16.vlgmr.msrb.gmra.mxu3 %v10206_v50 }
 0x106   : > { %3536 = vmatmul.bf16.vlgmr.msrb.gmra.mxu2 %v10204_v45  ;;  %3620 = vmatpush.bf16.msra.mxu1 %v8485_v47  ;;  %v9558_v47 = vld [vmem:[#allocation3 + $0x78c] sm:$0xf0] }
 0x107   : > { %3592 = vmatpush.bf16.msra.mxu0 %v7477_v25  ;;  %v9531_v25 = vld [vmem:[#allocation3 + $0x6b4] sm:$0xf0] }
 0x108   : > { %v3334_v6 = vpop.f32.mrf.mxu3  ;;  %v8157_v28 = vor.u32 %v9531_v25, %v8156_v21 }
 0x109   : > { %v3305_v3 = vpop.f32.mrf.mxu2  ;;  %v3249_v7 = vpop.f32.mrf.mxu0 }
 0x10a   : > { %v10318_v8 = vadd.f32 %v3334_v6, %v3305_v3  ;;  %v3278_v9 = vpop.f32.mrf.mxu1 }
 0x10b   : > { %v10320_v10 = vadd.f32 %v3278_v9, %v3249_v7  ;;  %v8372_v9 = vld [vmem:[#allocation3 + $0x800] sm:$0xf] }
 0x10c   : > { %v8373_v15 = vor.u32 %v9586_v12, %v8372_v9 }
 0x10e   : > { %3621 = vmatpush.bf16.msra.mxu1 %v8373_v15  ;;  %v9052_v15 = vld [vmem:[#allocation3 + $0xd48] sm:$0xf] }
 0x10f   : > { %v9053_v24 = vor.u32 %v9755_v16, %v9052_v15 }
 0x110   : > { %v3336_v36 = vpop.f32.mrf.mxu3 }
 0x111   : > { %v3307_v32 = vpop.f32.mrf.mxu2  ;;  %v3252_v38 = vpop.f32.mrf.mxu0 }
 0x112   : > { %v10322_v39 = vadd.f32 %v3336_v36, %v3307_v32  ;;  %v3281_v41 = vpop.f32.mrf.mxu1  ;;  %v7364_v32 = vld [vmem:[#allocation3 + $0x20] sm:$0xf]  ;;  %v9334_v36 = vld [vmem:[#allocation3 + $0x8c] sm:$0xf0] }
 0x113   : > { %v10324_v42 = vadd.f32 %v3281_v41, %v3252_v38  ;;  %v8260_v38 = vld [vmem:[#allocation3 + $0x720] sm:$0xf]  ;;  %v7365_v44 = vor.u32 %v9334_v36, %v7364_v32  ;;  %v8942_v32 = vld [vmem:[#allocation3 + $0xcd8] sm:$0xf0] }
 0x114   : > { %3483 = vmatmul.bf16.gmra.mxu0 %v10216_v35  ;;  %3512 = vmatmul.bf16.gmra.mxu1 %v10218_v40  ;;  %v8261_v54 = vor.u32 %v9558_v47, %v8260_v38 }
 0x115   : > { %3570 = vmatmul.bf16.gmra.mxu3 %v10218_v40  ;;  %3593 = vmatpush.bf16.msra.mxu0 %v7365_v44 }
 0x116   : > { %3541 = vmatmul.bf16.gmra.mxu2 %v10216_v35  ;;  %3622 = vmatpush.bf16.msra.mxu1 %v8261_v54  ;;  %v8940_v54 = vld [vmem:[#allocation3 + $0xc68] sm:$0xf] }
 0x118   : > { %v3339_v3 = vpop.f32.mrf.mxu3 }
 0x119   : > { %v3310_v0 = vpop.f32.mrf.mxu2  ;;  %v3254_v4 = vpop.f32.mrf.mxu0  ;;  %3702 = vmatpush.bf16.msrb.mxu0 %v8157_v28  ;;  %v8828_v28 = vld [vmem:[#allocation3 + $0xb88] sm:$0xf] }
 0x11a   : > { %v10330_v5 = vadd.f32 %v3339_v3, %v3310_v0  ;;  %v3283_v6 = vpop.f32.mrf.mxu1  ;;  %v8161_v0 = vor.u32 %v9517_v58, %v8158_v60  ;;  %v9057_v3 = vor.u32 %v9741_v62, %v9054_v1  ;;  %3731 = vmatpush.bf16.msrb.mxu1 %v9053_v24  ;;  %v9727_v58 = vld [vmem:[#allocation3 + $0xcd4] sm:$0xf0]  ;;  %v8044_v62 = vld [vmem:[#allocation3 + $0x568] sm:$0xf]  ;;  %v9461_v1 = vld [vmem:[#allocation3 + $0x48c] sm:$0xf] }
 0x11b   : > { %v10332_v7 = vadd.f32 %v3283_v6, %v3254_v4  ;;  %v8941_v60 = vor.u32 %v9727_v58, %v8940_v54  ;;  %v9657_v54 = vld [vmem:[#allocation3 + $0xaac] sm:$0xf]  ;;  %v8718_v58 = vld [vmem:[#allocation3 + $0xb18] sm:$0xf0] }
 0x11c   : > { %3760 = vmatpush.bf16.msrb.mxu2 %v8161_v0  ;;  %3789 = vmatpush.bf16.msrb.mxu3 %v9057_v3  ;;  %v9503_v0 = vld [vmem:[#allocation3 + $0x5d4] sm:$0xf0]  ;;  %v7934_v3 = vld [vmem:[#allocation3 + $0x4f8] sm:$0xf0] }
 0x11d   : > { %v7937_v15 = vor.u32 %v9461_v1, %v7934_v3 }
 0x11e   : > { %3732 = vmatpush.bf16.msrb.mxu1 %v8941_v60  ;;  %v8721_v60 = vor.u32 %v9657_v54, %v8718_v58 }
 0x120   : > { %v3341_v41 = vpop.f32.mrf.mxu3  ;;  %3761 = vmatpush.bf16.msrb.mxu2 %v8049_v29  ;;  %v9699_v29 = vld [vmem:[#allocation3 + $0xbf4] sm:$0xf0] }
 0x121   : > { %v3312_v30 = vpop.f32.mrf.mxu2  ;;  %v3257_v43 = vpop.f32.mrf.mxu0 }
 0x122   : > { %v10334_v52 = vadd.f32 %v3341_v41, %v3312_v30  ;;  %v3286_v53 = vpop.f32.mrf.mxu1  ;;  %v9713_v30 = vld [vmem:[#allocation3 + $0xc6c] sm:$0xf] }
 0x123   : > { %v10336_v56 = vadd.f32 %v3286_v53, %v3257_v43  ;;  %v8945_v36 = vor.u32 %v9713_v30, %v8942_v32  ;;  %v7932_v30 = vld [vmem:[#allocation3 + $0x488] sm:$0xf]  ;;  %v8829_v32 = vor.u32 %v9699_v29, %v8828_v28  ;;  %v7710_v28 = vld [vmem:[#allocation3 + $0x338] sm:$0xf0]  ;;  %v9629_v29 = vld [vmem:[#allocation3 + $0x9cc] sm:$0xf] }
 0x124   : > { %3488 = vmatmul.bf16.gmra.mxu0 %v10228_v19  ;;  %3517 = vmatmul.bf16.gmra.mxu1 %v10230_v20 }
 0x125   : > { %3575 = vmatmul.bf16.gmra.mxu3 %v10230_v20  ;;  %3762 = vmatpush.bf16.msrb.mxu2 %v7937_v15 }
 0x126   : > { %3546 = vmatmul.bf16.gmra.mxu2 %v10228_v19  ;;  %3790 = vmatpush.bf16.msrb.mxu3 %v8945_v36  ;;  %v9475_v36 = vld [vmem:[#allocation3 + $0x4f4] sm:$0xf0] }
 0x127   : > { %3733 = vmatpush.bf16.msrb.mxu1 %v8829_v32 }
 0x128   : > { %v3344_v4 = vpop.f32.mrf.mxu3 }
 0x129   : > { %v3315_v2 = vpop.f32.mrf.mxu2  ;;  %v3259_v6 = vpop.f32.mrf.mxu0 }
 0x12a   : > { %v10342_v9 = vadd.f32 %v3344_v4, %v3315_v2  ;;  %v3288_v12 = vpop.f32.mrf.mxu1  ;;  %v8045_v2 = vor.u32 %v9503_v0, %v8044_v62  ;;  %v9685_v4 = vld [vmem:[#allocation3 + $0xb8c] sm:$0xf] }
 0x12b   : > { %v10344_v14 = vadd.f32 %v3288_v12, %v3259_v6  ;;  %v8830_v6 = vld [vmem:[#allocation3 + $0xbf8] sm:$0xf0] }
 0x12c   : > { %v8833_v16 = vor.u32 %v9685_v4, %v8830_v6  ;;  %3703 = vmatpush.bf16.msrb.mxu0 %v8045_v2  ;;  %v8716_v6 = vld [vmem:[#allocation3 + $0xaa8] sm:$0xf] }
 0x12e   : > { %3791 = vmatpush.bf16.msrb.mxu3 %v8833_v16  ;;  %v7820_v16 = vld [vmem:[#allocation3 + $0x3a8] sm:$0xf] }
 0x130   : > { %v3346_v41 = vpop.f32.mrf.mxu3 }
 0x131   : > { %v3317_v38 = vpop.f32.mrf.mxu2  ;;  %v3262_v43 = vpop.f32.mrf.mxu0 }
 0x132   : > { %v10346_v44 = vadd.f32 %v3346_v41, %v3317_v38  ;;  %v3291_v47 = vpop.f32.mrf.mxu1  ;;  %v9433_v38 = vld [vmem:[#allocation3 + $0x3ac] sm:$0xf]  ;;  %v7822_v41 = vld [vmem:[#allocation3 + $0x418] sm:$0xf0]  ;;  %3792 = vmatpush.bf16.msrb.mxu3 %v8721_v60  ;;  %v8604_v60 = vld [vmem:[#allocation3 + $0x9c8] sm:$0xf] }
 0x133   : > { %v10348_v53 = vadd.f32 %v3291_v47, %v3262_v43  ;;  %v7933_v43 = vor.u32 %v9475_v36, %v7932_v30  ;;  %v7825_v47 = vor.u32 %v9433_v38, %v7822_v41  ;;  %v8606_v30 = vld [vmem:[#allocation3 + $0xa38] sm:$0xf0] }
 0x134   : > { %3493 = vmatmul.bf16.gmra.mxu0 %v10240_v49  ;;  %3522 = vmatmul.bf16.gmra.mxu1 %v10242_v51  ;;  %v8609_v38 = vor.u32 %v9629_v29, %v8606_v30 }
 0x135   : > { %3580 = vmatmul.bf16.gmra.mxu3 %v10242_v51  ;;  %3704 = vmatpush.bf16.msrb.mxu0 %v7933_v43 }
 0x136   : > { %3551 = vmatmul.bf16.gmra.mxu2 %v10240_v49  ;;  %3793 = vmatpush.bf16.msrb.mxu3 %v8609_v38 }
 0x137   : > { %3763 = vmatpush.bf16.msrb.mxu2 %v7825_v47 }
 0x138   : > { %v3349_v21 = vpop.f32.mrf.mxu3 }
 0x139   : > { %v3320_v12 = vpop.f32.mrf.mxu2  ;;  %v3264_v24 = vpop.f32.mrf.mxu0 }
 0x13a   : > { %v10354_v25 = vadd.f32 %v3349_v21, %v3320_v12  ;;  %v3293_v26 = vpop.f32.mrf.mxu1  ;;  %v9671_v12 = vld [vmem:[#allocation3 + $0xb14] sm:$0xf0] }
 0x13b   : > { %v10356_v27 = vadd.f32 %v3293_v26, %v3264_v24  ;;  %v8717_v15 = vor.u32 %v9671_v12, %v8716_v6  ;;  %v9447_v21 = vld [vmem:[#allocation3 + $0x414] sm:$0xf0]  ;;  %v9405_v24 = vld [vmem:[#allocation3 + $0x2cc] sm:$0xf]  ;;  %v7598_v12 = vld [vmem:[#allocation3 + $0x258] sm:$0xf0] }
 0x13c   : > { %v7821_v26 = vor.u32 %v9447_v21, %v7820_v16  ;;  %v7713_v36 = vor.u32 %v9405_v24, %v7710_v28  ;;  %v9377_v6 = vld [vmem:[#allocation3 + $0x1ec] sm:$0xf]  ;;  %v8494_v24 = vld [vmem:[#allocation3 + $0x958] sm:$0xf0] }
 0x13d   : > { %3734 = vmatpush.bf16.msrb.mxu1 %v8717_v15  ;;  %v7601_v16 = vor.u32 %v9377_v6, %v7598_v12  ;;  %v9601_v21 = vld [vmem:[#allocation3 + $0x8ec] sm:$0xf]  ;;  %v8382_v12 = vld [vmem:[#allocation3 + $0x878] sm:$0xf0] }
 0x13e   : > { %3705 = vmatpush.bf16.msrb.mxu0 %v7821_v26  ;;  %3764 = vmatpush.bf16.msrb.mxu2 %v7713_v36  ;;  %v8497_v26 = vor.u32 %v9601_v21, %v8494_v24  ;;  %v9573_v6 = vld [vmem:[#allocation3 + $0x80c] sm:$0xf] }
 0x13f   : > { %v8385_v21 = vor.u32 %v9573_v6, %v8382_v12  ;;  %v8270_v6 = vld [vmem:[#allocation3 + $0x798] sm:$0xf0] }
 0x140   : > { %v3351_v0 = vpop.f32.mrf.mxu3  ;;  %3794 = vmatpush.bf16.msrb.mxu3 %v8497_v26 }
 0x141   : > { %v3322_v62 = vpop.f32.mrf.mxu2  ;;  %v3363_v1 = vpop.f32.mrf.mxu0 }
 0x142   : > { %v10358_v2 = vadd.f32 %v3351_v0, %v3322_v62  ;;  %v3392_v3 = vpop.f32.mrf.mxu1  ;;  %v9643_v62 = vld [vmem:[#allocation3 + $0xa34] sm:$0xf0]  ;;  %v7708_v0 = vld [vmem:[#allocation3 + $0x2c8] sm:$0xf]  ;;  %3765 = vmatpush.bf16.msrb.mxu2 %v7601_v16 }
 0x143   : > { %v10360_v4 = vadd.f32 %v3392_v3, %v3363_v1  ;;  %v8605_v1 = vor.u32 %v9643_v62, %v8604_v60  ;;  %v9419_v3 = vld [vmem:[#allocation3 + $0x334] sm:$0xf0]  ;;  %v7596_v60 = vld [vmem:[#allocation3 + $0x1e8] sm:$0xf] }
 0x144   : > { %3594 = vmatmul.bf16.vlgmr.msra.gmra.mxu0 %v10204_v45  ;;  %3623 = vmatmul.bf16.vlgmr.msra.gmra.mxu1 %v10206_v50  ;;  %v7709_v15 = vor.u32 %v9419_v3, %v7708_v0  ;;  %v9391_v62 = vld [vmem:[#allocation3 + $0x254] sm:$0xf0]  ;;  %v9349_v0 = vld [vmem:[#allocation3 + $0x10c] sm:$0xf]  ;;  %v7486_v3 = vld [vmem:[#allocation3 + $0x178] sm:$0xf0] }
 0x145   : > { %12445 = vst [vmem:[#allocation14_spill] sm:$0xff] %v10360_v4  ;;  %3681 = vmatmul.bf16.vlgmr.msra.gmra.mxu3 %v10206_v50  ;;  %3735 = vmatpush.bf16.msrb.mxu1 %v8605_v1  ;;  %v7597_v1 = vor.u32 %v9391_v62, %v7596_v60  ;;  %v7489_v16 = vor.u32 %v9349_v0, %v7486_v3  ;;  %v9363_v60 = vld [vmem:[#allocation3 + $0x174] sm:$0xf0]  ;;  %v9321_v62 = vld [vmem:[#allocation3 + $0x2c] sm:$0xf] }
 0x146   : > { %3652 = vmatmul.bf16.vlgmr.msra.gmra.mxu2 %v10204_v45  ;;  %3706 = vmatpush.bf16.msrb.mxu0 %v7709_v15  ;;  %v9545_v3 = vld [vmem:[#allocation3 + $0x72c] sm:$0xf] }
 0x147   : > { %3766 = vmatpush.bf16.msrb.mxu2 %v7489_v16  ;;  %3795 = vmatpush.bf16.msrb.mxu3 %v8385_v21  ;;  %v9335_v16 = vld [vmem:[#allocation3 + $0x94] sm:$0xf0]  ;;  %v8268_v21 = vld [vmem:[#allocation3 + $0x728] sm:$0xf] }
 0x148   : > { %v3450_v41 = vpop.f32.mrf.mxu3 }
 0x149   : > { %v3421_v32 = vpop.f32.mrf.mxu2  ;;  %v3365_v43 = vpop.f32.mrf.mxu0 }
 0x14a   : > { %v10366_v47 = vadd.f32 %v3450_v41, %v3421_v32  ;;  %v3394_v54 = vpop.f32.mrf.mxu1  ;;  %v8492_v41 = vld [vmem:[#allocation3 + $0x8e8] sm:$0xf]  ;;  %3707 = vmatpush.bf16.msrb.mxu0 %v7597_v1  ;;  %v8273_v1 = vor.u32 %v9545_v3, %v8270_v6 }
 0x14b   : > { %v10368_v58 = vadd.f32 %v3394_v54, %v3365_v43  ;;  %v9615_v43 = vld [vmem:[#allocation3 + $0x954] sm:$0xf0] }
 0x14c   : > { %12446 = vst [vmem:[#allocation15_spill] sm:$0xff] %v10366_v47  ;;  %v8493_v54 = vor.u32 %v9615_v43, %v8492_v41  ;;  %v9587_v41 = vld [vmem:[#allocation3 + $0x874] sm:$0xf0]  ;;  %v7484_v43 = vld [vmem:[#allocation3 + $0x108] sm:$0xf]  ;;  %3796 = vmatpush.bf16.msrb.mxu3 %v8273_v1 }
 0x14d   : > { %12447 = vst [vmem:[#allocation16_spill] sm:$0xff] %v10368_v58 }
 0x14e   : > { %3736 = vmatpush.bf16.msrb.mxu1 %v8493_v54 }
 0x150   : > { %v3452_v29 = vpop.f32.mrf.mxu3 }
 0x151   : > { %v3423_v28 = vpop.f32.mrf.mxu2  ;;  %v3368_v30 = vpop.f32.mrf.mxu0 }
 0x152   : > { %v10370_v32 = vadd.f32 %v3452_v29, %v3423_v28  ;;  %v3397_v36 = vpop.f32.mrf.mxu1 }
 0x153   : > { %v10372_v38 = vadd.f32 %v3397_v36, %v3368_v30  ;;  %v8380_v36 = vld [vmem:[#allocation3 + $0x808] sm:$0xf] }
 0x154   : > { %12448 = vst [vmem:[#allocation17_spill] sm:$0xff] %v10370_v32  ;;  %3599 = vmatmul.bf16.gmra.mxu0 %v10216_v35  ;;  %3628 = vmatmul.bf16.gmra.mxu1 %v10218_v40  ;;  %v8381_v54 = vor.u32 %v9587_v41, %v8380_v36  ;;  %v7485_v32 = vor.u32 %v9363_v60, %v7484_v43  ;;  %v9559_v36 = vld [vmem:[#allocation3 + $0x794] sm:$0xf0]  ;;  %v9742_v60 = vld [vmem:[#allocation3 + $0xd54] sm:$0xf] }
 0x155   : > { %12449 = vst [vmem:[#allocation18_spill] sm:$0xff] %v10372_v38  ;;  %3686 = vmatmul.bf16.gmra.mxu3 %v10218_v40  ;;  %v7374_v38 = vld [vmem:[#allocation3 + $0x98] sm:$0xf0]  ;;  %v8269_v43 = vor.u32 %v9559_v36, %v8268_v21  ;;  %v9060_v21 = vld [vmem:[#allocation3 + $0xd50] sm:$0xf] }
 0x156   : > { %3657 = vmatmul.bf16.gmra.mxu2 %v10216_v35  ;;  %v7377_v0 = vor.u32 %v9321_v62, %v7374_v38  ;;  %3737 = vmatpush.bf16.msrb.mxu1 %v8381_v54  ;;  %v8166_v54 = vld [vmem:[#allocation3 + $0x6c0] sm:$0xf0]  ;;  %v9532_v36 = vld [vmem:[#allocation3 + $0x6bc] sm:$0xf0] }
 0x157   : > { %3708 = vmatpush.bf16.msrb.mxu0 %v7485_v32  ;;  %v9518_v32 = vld [vmem:[#allocation3 + $0x654] sm:$0xf] }
 0x158   : > { %v3455_v24 = vpop.f32.mrf.mxu3  ;;  %3767 = vmatpush.bf16.msrb.mxu2 %v7377_v0  ;;  %v8169_v62 = vor.u32 %v9518_v32, %v8166_v54  ;;  %v9062_v0 = vld [vmem:[#allocation3 + $0xdc0] sm:$0xf0] }
 0x159   : > { %v3426_v15 = vpop.f32.mrf.mxu2  ;;  %v3370_v26 = vpop.f32.mrf.mxu0  ;;  %v9065_v6 = vor.u32 %v9742_v60, %v9062_v0  ;;  %v8950_v60 = vld [vmem:[#allocation3 + $0xce0] sm:$0xf0] }
 0x15a   : > { %v10378_v28 = vadd.f32 %v3455_v24, %v3426_v15  ;;  %v3399_v29 = vpop.f32.mrf.mxu1  ;;  %v7372_v15 = vld [vmem:[#allocation3 + $0x28] sm:$0xf]  ;;  %3738 = vmatpush.bf16.msrb.mxu1 %v8269_v43  ;;  %v9490_v43 = vld [vmem:[#allocation3 + $0x574] sm:$0xf] }
 0x15b   : > { %v10380_v30 = vadd.f32 %v3399_v29, %v3370_v26  ;;  %v7373_v29 = vor.u32 %v9335_v16, %v7372_v15  ;;  %3905 = vmatpush.bf16.msra.mxu3 %v9065_v6 }
 0x15c   : > { %12450 = vst [vmem:[#allocation19_spill] sm:$0xff] %v10378_v28  ;;  %3876 = vmatpush.bf16.msra.mxu2 %v8169_v62 }
 0x15d   : > { %12451 = vst [vmem:[#allocation20_spill] sm:$0xff] %v10380_v30  ;;  %3709 = vmatpush.bf16.msrb.mxu0 %v7373_v29 }
 0x160   : > { %v3457_v24 = vpop.f32.mrf.mxu3 }
 0x161   : > { %v3428_v12 = vpop.f32.mrf.mxu2  ;;  %v3373_v26 = vpop.f32.mrf.mxu0 }
 0x162   : > { %v10382_v41 = vadd.f32 %v3457_v24, %v3428_v12  ;;  %v3402_v30 = vpop.f32.mrf.mxu1  ;;  %v9756_v24 = vld [vmem:[#allocation3 + $0xdbc] sm:$0xf0] }
 0x163   : > { %v10384_v38 = vadd.f32 %v3402_v30, %v3373_v26  ;;  %v8164_v26 = vld [vmem:[#allocation3 + $0x650] sm:$0xf]  ;;  %v9061_v29 = vor.u32 %v9756_v24, %v9060_v21  ;;  %v9728_v24 = vld [vmem:[#allocation3 + $0xcdc] sm:$0xf0] }
 0x164   : > { %12452 = vst [vmem:[#allocation21_spill] sm:$0xff] %v10382_v41  ;;  %3604 = vmatmul.bf16.gmra.mxu0 %v10228_v19  ;;  %3633 = vmatmul.bf16.gmra.mxu1 %v10230_v20  ;;  %v8165_v32 = vor.u32 %v9532_v36, %v8164_v26  ;;  %v9714_v41 = vld [vmem:[#allocation3 + $0xc74] sm:$0xf]  ;;  %v8948_v21 = vld [vmem:[#allocation3 + $0xc70] sm:$0xf] }
 0x165   : > { %12453 = vst [vmem:[#allocation22_spill] sm:$0xff] %v10384_v38  ;;  %3691 = vmatmul.bf16.gmra.mxu3 %v10230_v20  ;;  %v8054_v38 = vld [vmem:[#allocation3 + $0x5e0] sm:$0xf0]  ;;  %3847 = vmatpush.bf16.msra.mxu1 %v9061_v29  ;;  %v8953_v0 = vor.u32 %v9714_v41, %v8950_v60  ;;  %v8052_v41 = vld [vmem:[#allocation3 + $0x570] sm:$0xf] }
 0x166   : > { %3662 = vmatmul.bf16.gmra.mxu2 %v10228_v19  ;;  %v8057_v54 = vor.u32 %v9490_v43, %v8054_v38  ;;  %3818 = vmatpush.bf16.msra.mxu0 %v8165_v32  ;;  %v8949_v38 = vor.u32 %v9728_v24, %v8948_v21  ;;  %v9504_v26 = vld [vmem:[#allocation3 + $0x5dc] sm:$0xf0]  ;;  %v9462_v29 = vld [vmem:[#allocation3 + $0x494] sm:$0xf]  ;;  %v7942_v43 = vld [vmem:[#allocation3 + $0x500] sm:$0xf0] }
 0x167   : > { %3906 = vmatpush.bf16.msra.mxu3 %v8953_v0  ;;  %v8053_v36 = vor.u32 %v9504_v26, %v8052_v41  ;;  %v9686_v32 = vld [vmem:[#allocation3 + $0xb94] sm:$0xf]  ;;  %v7945_v0 = vor.u32 %v9462_v29, %v7942_v43  ;;  %v9476_v26 = vld [vmem:[#allocation3 + $0x4fc] sm:$0xf0] }
 0x168   : > { %v3460_v1 = vpop.f32.mrf.mxu3  ;;  %3877 = vmatpush.bf16.msra.mxu2 %v8057_v54  ;;  %v8838_v54 = vld [vmem:[#allocation3 + $0xc00] sm:$0xf0]  ;;  %v9658_v43 = vld [vmem:[#allocation3 + $0xab4] sm:$0xf] }
 0x169   : > { %v3431_v3 = vpop.f32.mrf.mxu2  ;;  %v3375_v30 = vpop.f32.mrf.mxu0  ;;  %3848 = vmatpush.bf16.msra.mxu1 %v8949_v38  ;;  %v8836_v38 = vld [vmem:[#allocation3 + $0xb90] sm:$0xf] }
 0x16a   : > { %v10390_v12 = vadd.f32 %v3460_v1, %v3431_v3  ;;  %v3404_v15 = vpop.f32.mrf.mxu1  ;;  %3819 = vmatpush.bf16.msra.mxu0 %v8053_v36 }
 0x16b   : > { %v10392_v16 = vadd.f32 %v3404_v15, %v3375_v30 }
 0x16c   : > { %12454 = vst [vmem:[#allocation23_spill] sm:$0xff] %v10390_v12  ;;  %3878 = vmatpush.bf16.msra.mxu2 %v7945_v0  ;;  %v7830_v12 = vld [vmem:[#allocation3 + $0x420] sm:$0xf0] }
 0x16d   : > { %12455 = vst [vmem:[#allocation24_spill] sm:$0xff] %v10392_v16  ;;  %v9434_v16 = vld [vmem:[#allocation3 + $0x3b4] sm:$0xf] }
 0x16e   : > { %v7833_v29 = vor.u32 %v9434_v16, %v7830_v12  ;;  %v9448_v16 = vld [vmem:[#allocation3 + $0x41c] sm:$0xf0] }
 0x170   : > { %v3462_v3 = vpop.f32.mrf.mxu3  ;;  %3879 = vmatpush.bf16.msra.mxu2 %v7833_v29  ;;  %v8614_v29 = vld [vmem:[#allocation3 + $0xa40] sm:$0xf0] }
 0x171   : > { %v3433_v62 = vpop.f32.mrf.mxu2  ;;  %v3378_v6 = vpop.f32.mrf.mxu0 }
 0x172   : > { %v10394_v1 = vadd.f32 %v3462_v3, %v3433_v62  ;;  %v3407_v30 = vpop.f32.mrf.mxu1  ;;  %v8841_v62 = vor.u32 %v9686_v32, %v8838_v54  ;;  %v8726_v32 = vld [vmem:[#allocation3 + $0xb20] sm:$0xf0] }
 0x173   : > { %v10396_v15 = vadd.f32 %v3407_v30, %v3378_v6  ;;  %v8729_v36 = vor.u32 %v9658_v43, %v8726_v32 }
 0x174   : > { %12456 = vst [vmem:[#allocation25_spill] sm:$0xff] %v10394_v1  ;;  %3609 = vmatmul.bf16.gmra.mxu0 %v10240_v49  ;;  %3638 = vmatmul.bf16.gmra.mxu1 %v10242_v51  ;;  %v7940_v1 = vld [vmem:[#allocation3 + $0x490] sm:$0xf] }
 0x175   : > { %12457 = vst [vmem:[#allocation26_spill] sm:$0xff] %v10396_v15  ;;  %3696 = vmatmul.bf16.gmra.mxu3 %v10242_v51  ;;  %v9700_v15 = vld [vmem:[#allocation3 + $0xbfc] sm:$0xf0]  ;;  %v7941_v28 = vor.u32 %v9476_v26, %v7940_v1  ;;  %v9406_v1 = vld [vmem:[#allocation3 + $0x2d4] sm:$0xf] }
 0x176   : > { %3667 = vmatmul.bf16.gmra.mxu2 %v10240_v49  ;;  %3907 = vmatpush.bf16.msra.mxu3 %v8841_v62  ;;  %v8837_v41 = vor.u32 %v9700_v15, %v8836_v38  ;;  %v8724_v15 = vld [vmem:[#allocation3 + $0xab0] sm:$0xf]  ;;  %v9630_v26 = vld [vmem:[#allocation3 + $0x9d4] sm:$0xf] }
 0x177   : > { %3820 = vmatpush.bf16.msra.mxu0 %v7941_v28  ;;  %v7828_v28 = vld [vmem:[#allocation3 + $0x3b0] sm:$0xf] }
 0x178   : > { %v3465_v3 = vpop.f32.mrf.mxu3  ;;  %3849 = vmatpush.bf16.msra.mxu1 %v8837_v41  ;;  %v7829_v38 = vor.u32 %v9448_v16, %v7828_v28  ;;  %v7718_v41 = vld [vmem:[#allocation3 + $0x340] sm:$0xf0]  ;;  %v9420_v16 = vld [vmem:[#allocation3 + $0x33c] sm:$0xf0] }
 0x179   : > { %v3436_v60 = vpop.f32.mrf.mxu2  ;;  %v3380_v6 = vpop.f32.mrf.mxu0  ;;  %v7721_v32 = vor.u32 %v9406_v1, %v7718_v41  ;;  %v9602_v41 = vld [vmem:[#allocation3 + $0x8f4] sm:$0xf] }
 0x17a   : > { %v10402_v30 = vadd.f32 %v3465_v3, %v3436_v60  ;;  %v3409_v21 = vpop.f32.mrf.mxu1  ;;  %3908 = vmatpush.bf16.msra.mxu3 %v8729_v36  ;;  %v8617_v36 = vor.u32 %v9630_v26, %v8614_v29  ;;  %v8502_v26 = vld [vmem:[#allocation3 + $0x960] sm:$0xf0] }
 0x17b   : > { %v10404_v24 = vadd.f32 %v3409_v21, %v3380_v6  ;;  %v9672_v21 = vld [vmem:[#allocation3 + $0xb1c] sm:$0xf0]  ;;  %3821 = vmatpush.bf16.msra.mxu0 %v7829_v38  ;;  %3880 = vmatpush.bf16.msra.mxu2 %v7721_v32  ;;  %v8505_v38 = vor.u32 %v9602_v41, %v8502_v26 }
 0x17c   : > { %12458 = vst [vmem:[#allocation27_spill] sm:$0xff] %v10402_v30  ;;  %v8725_v12 = vor.u32 %v9672_v21, %v8724_v15  ;;  %v8612_v21 = vld [vmem:[#allocation3 + $0x9d0] sm:$0xf] }
 0x17d   : > { %12459 = vst [vmem:[#allocation28_spill] sm:$0xff] %v10404_v24  ;;  %v7606_v24 = vld [vmem:[#allocation3 + $0x260] sm:$0xf0] }
 0x17e   : > { %3850 = vmatpush.bf16.msra.mxu1 %v8725_v12  ;;  %3909 = vmatpush.bf16.msra.mxu3 %v8617_v36  ;;  %v9644_v12 = vld [vmem:[#allocation3 + $0xa3c] sm:$0xf0] }
 0x17f   : > { %v8613_v28 = vor.u32 %v9644_v12, %v8612_v21  ;;  %v9616_v21 = vld [vmem:[#allocation3 + $0x95c] sm:$0xf0] }
 0x180   : > { %v3467_v60 = vpop.f32.mrf.mxu3 }
 0x181   : > { %v3438_v54 = vpop.f32.mrf.mxu2  ;;  %v3479_v0 = vpop.f32.mrf.mxu0 }
 0x182   : > { %v10406_v62 = vadd.f32 %v3467_v60, %v3438_v54  ;;  %v3508_v3 = vpop.f32.mrf.mxu1  ;;  %3851 = vmatpush.bf16.msra.mxu1 %v8613_v28  ;;  %3910 = vmatpush.bf16.msra.mxu3 %v8505_v38  ;;  %v7494_v28 = vld [vmem:[#allocation3 + $0x180] sm:$0xf0] }
 0x183   : > { %v10408_v6 = vadd.f32 %v3508_v3, %v3479_v0 }
 0x184   : > { %12460 = vst [vmem:[#allocation29_spill] sm:$0xff] %v10406_v62  ;;  %3710 = vmatmul.bf16.vlgmr.msrb.gmra.mxu0 %v10204_v45  ;;  %3739 = vmatmul.bf16.vlgmr.msrb.gmra.mxu1 %v10206_v50  ;;  %v9378_v62 = vld [vmem:[#allocation3 + $0x1f4] sm:$0xf] }
 0x185   : > { %12461 = vst [vmem:[#allocation30_spill] sm:$0xff] %v10408_v6  ;;  %3797 = vmatmul.bf16.vlgmr.msrb.gmra.mxu3 %v10206_v50  ;;  %v7716_v6 = vld [vmem:[#allocation3 + $0x2d0] sm:$0xf]  ;;  %v7609_v1 = vor.u32 %v9378_v62, %v7606_v24  ;;  %v9392_v62 = vld [vmem:[#allocation3 + $0x25c] sm:$0xf0] }
 0x186   : > { %3768 = vmatmul.bf16.vlgmr.msrb.gmra.mxu2 %v10204_v45  ;;  %v7717_v30 = vor.u32 %v9420_v16, %v7716_v6  ;;  %v9350_v6 = vld [vmem:[#allocation3 + $0x114] sm:$0xf] }
 0x187   : > { %3881 = vmatpush.bf16.msra.mxu2 %v7609_v1  ;;  %v9574_v16 = vld [vmem:[#allocation3 + $0x814] sm:$0xf]  ;;  %v8390_v1 = vld [vmem:[#allocation3 + $0x880] sm:$0xf0]  ;;  %v7497_v26 = vor.u32 %v9350_v6, %v7494_v28 }
 0x188   : > { %v3566_v54 = vpop.f32.mrf.mxu3  ;;  %3822 = vmatpush.bf16.msra.mxu0 %v7717_v30  ;;  %v7604_v30 = vld [vmem:[#allocation3 + $0x1f0] sm:$0xf]  ;;  %v8393_v38 = vor.u32 %v9574_v16, %v8390_v1  ;;  %v9546_v28 = vld [vmem:[#allocation3 + $0x734] sm:$0xf]  ;;  %v8278_v16 = vld [vmem:[#allocation3 + $0x7a0] sm:$0xf0] }
 0x189   : > { %v3537_v43 = vpop.f32.mrf.mxu2  ;;  %v3481_v60 = vpop.f32.mrf.mxu0  ;;  %v7605_v12 = vor.u32 %v9392_v62, %v7604_v30  ;;  %v9364_v62 = vld [vmem:[#allocation3 + $0x17c] sm:$0xf0] }
 0x18a   : > { %v10414_v0 = vadd.f32 %v3566_v54, %v3537_v43  ;;  %v3510_v3 = vpop.f32.mrf.mxu1  ;;  %3911 = vmatpush.bf16.msra.mxu3 %v8393_v38  ;;  %v8276_v38 = vld [vmem:[#allocation3 + $0x730] sm:$0xf] }
 0x18b   : > { %v10416_v15 = vadd.f32 %v3510_v3, %v3481_v60  ;;  %v8500_v3 = vld [vmem:[#allocation3 + $0x8f0] sm:$0xf]  ;;  %3882 = vmatpush.bf16.msra.mxu2 %v7497_v26  ;;  %v9336_v26 = vld [vmem:[#allocation3 + $0x9c] sm:$0xf0] }
 0x18c   : > { %12462 = vst [vmem:[#allocation31_spill] sm:$0xff] %v10414_v0  ;;  %v8501_v24 = vor.u32 %v9616_v21, %v8500_v3  ;;  %3823 = vmatpush.bf16.msra.mxu0 %v7605_v12  ;;  %v8388_v21 = vld [vmem:[#allocation3 + $0x810] sm:$0xf]  ;;  %v8281_v12 = vor.u32 %v9546_v28, %v8278_v16 }
 0x18d   : > { %12463 = vst [vmem:[#allocation32_spill] sm:$0xff] %v10416_v15  ;;  %v7382_v15 = vld [vmem:[#allocation3 + $0xa0] sm:$0xf0] }
 0x18e   : > { %3852 = vmatpush.bf16.msra.mxu1 %v8501_v24  ;;  %v9588_v24 = vld [vmem:[#allocation3 + $0x87c] sm:$0xf0]  ;;  %3912 = vmatpush.bf16.msra.mxu3 %v8281_v12 }
 0x18f   : > { %v8389_v30 = vor.u32 %v9588_v24, %v8388_v21  ;;  %v9560_v21 = vld [vmem:[#allocation3 + $0x79c] sm:$0xf0] }
 0x190   : > { %v3568_v43 = vpop.f32.mrf.mxu3 }
 0x191   : > { %v3539_v29 = vpop.f32.mrf.mxu2  ;;  %v3484_v32 = vpop.f32.mrf.mxu0 }
 0x192   : > { %v10418_v36 = vadd.f32 %v3568_v43, %v3539_v29  ;;  %v3513_v54 = vpop.f32.mrf.mxu1  ;;  %3853 = vmatpush.bf16.msra.mxu1 %v8389_v30  ;;  %v9743_v30 = vld [vmem:[#allocation3 + $0xd5c] sm:$0xf] }
 0x193   : > { %v10420_v60 = vadd.f32 %v3513_v54, %v3484_v32 }
 0x194   : > { %12464 = vst [vmem:[#allocation33_spill] sm:$0xff] %v10418_v36  ;;  %3715 = vmatmul.bf16.gmra.mxu0 %v10216_v35  ;;  %3744 = vmatmul.bf16.gmra.mxu1 %v10218_v40  ;;  %v9322_v36 = vld [vmem:[#allocation3 + $0x34] sm:$0xf] }
 0x195   : > { %12465 = vst [vmem:[#allocation34_spill] sm:$0xff] %v10420_v60  ;;  %3802 = vmatmul.bf16.gmra.mxu3 %v10218_v40  ;;  %v7492_v60 = vld [vmem:[#allocation3 + $0x110] sm:$0xf]  ;;  %v7385_v6 = vor.u32 %v9322_v36, %v7382_v15  ;;  %v8174_v36 = vld [vmem:[#allocation3 + $0x6c8] sm:$0xf0] }
 0x196   : > { %3773 = vmatmul.bf16.gmra.mxu2 %v10216_v35  ;;  %v7493_v0 = vor.u32 %v9364_v62, %v7492_v60  ;;  %v8277_v60 = vor.u32 %v9560_v21, %v8276_v38  ;;  %v9068_v38 = vld [vmem:[#allocation3 + $0xd58] sm:$0xf]  ;;  %v9533_v21 = vld [vmem:[#allocation3 + $0x6c4] sm:$0xf0] }
 0x197   : > { %3883 = vmatpush.bf16.msra.mxu2 %v7385_v6  ;;  %v9070_v6 = vld [vmem:[#allocation3 + $0xdc8] sm:$0xf0] }
 0x198   : > { %v3571_v29 = vpop.f32.mrf.mxu3  ;;  %3824 = vmatpush.bf16.msra.mxu0 %v7493_v0  ;;  %3854 = vmatpush.bf16.msra.mxu1 %v8277_v60  ;;  %v9519_v0 = vld [vmem:[#allocation3 + $0x65c] sm:$0xf]  ;;  %v9073_v16 = vor.u32 %v9743_v30, %v9070_v6  ;;  %v8958_v30 = vld [vmem:[#allocation3 + $0xce8] sm:$0xf0] }
 0x199   : > { %v3542_v41 = vpop.f32.mrf.mxu2  ;;  %v3486_v43 = vpop.f32.mrf.mxu0  ;;  %v8177_v62 = vor.u32 %v9519_v0, %v8174_v36  ;;  %v9491_v60 = vld [vmem:[#allocation3 + $0x57c] sm:$0xf] }
 0x19a   : > { %v10426_v32 = vadd.f32 %v3571_v29, %v3542_v41  ;;  %v3515_v54 = vpop.f32.mrf.mxu1  ;;  %v7380_v41 = vld [vmem:[#allocation3 + $0x30] sm:$0xf]  ;;  %4021 = vmatpush.bf16.msrb.mxu3 %v9073_v16 }
 0x19b   : > { %v10428_v3 = vadd.f32 %v3515_v54, %v3486_v43  ;;  %v7381_v54 = vor.u32 %v9336_v26, %v7380_v41  ;;  %3992 = vmatpush.bf16.msrb.mxu2 %v8177_v62 }
 0x19c   : > { %12466 = vst [vmem:[#allocation35_spill] sm:$0xff] %v10426_v32 }
 0x19d   : > { %12467 = vst [vmem:[#allocation36_spill] sm:$0xff] %v10428_v3  ;;  %3825 = vmatpush.bf16.msra.mxu0 %v7381_v54 }
 0x1a0   : > { %v3573_v29 = vpop.f32.mrf.mxu3 }
 0x1a1   : > { %v3544_v1 = vpop.f32.mrf.mxu2  ;;  %v3489_v43 = vpop.f32.mrf.mxu0 }
 0x1a2   : > { %v10430_v24 = vadd.f32 %v3573_v29, %v3544_v1  ;;  %v3518_v3 = vpop.f32.mrf.mxu1  ;;  %v9757_v29 = vld [vmem:[#allocation3 + $0xdc4] sm:$0xf0] }
 0x1a3   : > { %v10432_v15 = vadd.f32 %v3518_v3, %v3489_v43  ;;  %v8172_v43 = vld [vmem:[#allocation3 + $0x658] sm:$0xf]  ;;  %v9069_v54 = vor.u32 %v9757_v29, %v9068_v38  ;;  %v9729_v29 = vld [vmem:[#allocation3 + $0xce4] sm:$0xf0] }
 0x1a4   : > { %12468 = vst [vmem:[#allocation37_spill] sm:$0xff] %v10430_v24  ;;  %3720 = vmatmul.bf16.gmra.mxu0 %v10228_v19  ;;  %3749 = vmatmul.bf16.gmra.mxu1 %v10230_v20  ;;  %v8173_v0 = vor.u32 %v9533_v21, %v8172_v43  ;;  %v9715_v24 = vld [vmem:[#allocation3 + $0xc7c] sm:$0xf]  ;;  %v8956_v38 = vld [vmem:[#allocation3 + $0xc78] sm:$0xf] }
 0x1a5   : > { %12469 = vst [vmem:[#allocation38_spill] sm:$0xff] %v10432_v15  ;;  %3807 = vmatmul.bf16.gmra.mxu3 %v10230_v20  ;;  %v8062_v15 = vld [vmem:[#allocation3 + $0x5e8] sm:$0xf0]  ;;  %3963 = vmatpush.bf16.msrb.mxu1 %v9069_v54  ;;  %v8961_v6 = vor.u32 %v9715_v24, %v8958_v30  ;;  %v8060_v24 = vld [vmem:[#allocation3 + $0x578] sm:$0xf] }
 0x1a6   : > { %3778 = vmatmul.bf16.gmra.mxu2 %v10228_v19  ;;  %v8065_v36 = vor.u32 %v9491_v60, %v8062_v15  ;;  %3934 = vmatpush.bf16.msrb.mxu0 %v8173_v0  ;;  %v8957_v15 = vor.u32 %v9729_v29, %v8956_v38  ;;  %v9505_v43 = vld [vmem:[#allocation3 + $0x5e4] sm:$0xf0]  ;;  %v9463_v54 = vld [vmem:[#allocation3 + $0x49c] sm:$0xf]  ;;  %v7950_v60 = vld [vmem:[#allocation3 + $0x508] sm:$0xf0] }
 0x1a7   : > { %4022 = vmatpush.bf16.msrb.mxu3 %v8961_v6  ;;  %v8061_v21 = vor.u32 %v9505_v43, %v8060_v24  ;;  %v9687_v0 = vld [vmem:[#allocation3 + $0xb9c] sm:$0xf]  ;;  %v7953_v6 = vor.u32 %v9463_v54, %v7950_v60  ;;  %v9477_v43 = vld [vmem:[#allocation3 + $0x504] sm:$0xf0] }
 0x1a8   : > { %v3576_v12 = vpop.f32.mrf.mxu3  ;;  %3993 = vmatpush.bf16.msrb.mxu2 %v8065_v36  ;;  %v8846_v36 = vld [vmem:[#allocation3 + $0xc08] sm:$0xf0]  ;;  %v9659_v60 = vld [vmem:[#allocation3 + $0xabc] sm:$0xf] }
 0x1a9   : > { %v3547_v28 = vpop.f32.mrf.mxu2  ;;  %v3491_v3 = vpop.f32.mrf.mxu0  ;;  %3964 = vmatpush.bf16.msrb.mxu1 %v8957_v15  ;;  %v8844_v15 = vld [vmem:[#allocation3 + $0xb98] sm:$0xf] }
 0x1aa   : > { %v10438_v1 = vadd.f32 %v3576_v12, %v3547_v28  ;;  %v3520_v41 = vpop.f32.mrf.mxu1  ;;  %3935 = vmatpush.bf16.msrb.mxu0 %v8061_v21 }
 0x1ab   : > { %v10440_v26 = vadd.f32 %v3520_v41, %v3491_v3 }
 0x1ac   : > { %12470 = vst [vmem:[#allocation39_spill] sm:$0xff] %v10438_v1  ;;  %3994 = vmatpush.bf16.msrb.mxu2 %v7953_v6  ;;  %v7838_v1 = vld [vmem:[#allocation3 + $0x428] sm:$0xf0] }
 0x1ad   : > { %12471 = vst [vmem:[#allocation40_spill] sm:$0xff] %v10440_v26  ;;  %v9435_v26 = vld [vmem:[#allocation3 + $0x3bc] sm:$0xf] }
 0x1ae   : > { %v7841_v54 = vor.u32 %v9435_v26, %v7838_v1  ;;  %v9449_v26 = vld [vmem:[#allocation3 + $0x424] sm:$0xf0] }
 0x1b0   : > { %v3578_v28 = vpop.f32.mrf.mxu3  ;;  %3995 = vmatpush.bf16.msrb.mxu2 %v7841_v54  ;;  %v8622_v54 = vld [vmem:[#allocation3 + $0xa48] sm:$0xf0] }
 0x1b1   : > { %v3549_v62 = vpop.f32.mrf.mxu2  ;;  %v3494_v16 = vpop.f32.mrf.mxu0 }
 0x1b2   : > { %v10442_v12 = vadd.f32 %v3578_v28, %v3549_v62  ;;  %v3523_v3 = vpop.f32.mrf.mxu1  ;;  %v8849_v62 = vor.u32 %v9687_v0, %v8846_v36  ;;  %v8734_v0 = vld [vmem:[#allocation3 + $0xb28] sm:$0xf0] }
 0x1b3   : > { %v10444_v41 = vadd.f32 %v3523_v3, %v3494_v16  ;;  %v8737_v21 = vor.u32 %v9659_v60, %v8734_v0 }
 0x1b4   : > { %12472 = vst [vmem:[#allocation41_spill] sm:$0xff] %v10442_v12  ;;  %3725 = vmatmul.bf16.gmra.mxu0 %v10240_v49  ;;  %3754 = vmatmul.bf16.gmra.mxu1 %v10242_v51  ;;  %v7948_v12 = vld [vmem:[#allocation3 + $0x498] sm:$0xf] }
 0x1b5   : > { %12473 = vst [vmem:[#allocation42_spill] sm:$0xff] %v10444_v41  ;;  %3812 = vmatmul.bf16.gmra.mxu3 %v10242_v51  ;;  %v9701_v41 = vld [vmem:[#allocation3 + $0xc04] sm:$0xf0]  ;;  %v7949_v32 = vor.u32 %v9477_v43, %v7948_v12  ;;  %v9407_v12 = vld [vmem:[#allocation3 + $0x2dc] sm:$0xf] }
 0x1b6   : > { %3783 = vmatmul.bf16.gmra.mxu2 %v10240_v49  ;;  %4023 = vmatpush.bf16.msrb.mxu3 %v8849_v62  ;;  %v8845_v24 = vor.u32 %v9701_v41, %v8844_v15  ;;  %v8732_v41 = vld [vmem:[#allocation3 + $0xab8] sm:$0xf]  ;;  %v9631_v43 = vld [vmem:[#allocation3 + $0x9dc] sm:$0xf] }
 0x1b7   : > { %3936 = vmatpush.bf16.msrb.mxu0 %v7949_v32  ;;  %v7836_v32 = vld [vmem:[#allocation3 + $0x3b8] sm:$0xf] }
 0x1b8   : > { %v3581_v28 = vpop.f32.mrf.mxu3  ;;  %3965 = vmatpush.bf16.msrb.mxu1 %v8845_v24  ;;  %v7837_v15 = vor.u32 %v9449_v26, %v7836_v32  ;;  %v7726_v24 = vld [vmem:[#allocation3 + $0x348] sm:$0xf0]  ;;  %v9421_v26 = vld [vmem:[#allocation3 + $0x344] sm:$0xf0] }
 0x1b9   : > { %v3552_v30 = vpop.f32.mrf.mxu2  ;;  %v3496_v16 = vpop.f32.mrf.mxu0  ;;  %v7729_v0 = vor.u32 %v9407_v12, %v7726_v24  ;;  %v9603_v24 = vld [vmem:[#allocation3 + $0x8fc] sm:$0xf] }
 0x1ba   : > { %v10450_v3 = vadd.f32 %v3581_v28, %v3552_v30  ;;  %v3525_v38 = vpop.f32.mrf.mxu1  ;;  %4024 = vmatpush.bf16.msrb.mxu3 %v8737_v21  ;;  %v8625_v21 = vor.u32 %v9631_v43, %v8622_v54  ;;  %v8510_v43 = vld [vmem:[#allocation3 + $0x968] sm:$0xf0] }
 0x1bb   : > { %v10452_v29 = vadd.f32 %v3525_v38, %v3496_v16  ;;  %v9673_v38 = vld [vmem:[#allocation3 + $0xb24] sm:$0xf0]  ;;  %3937 = vmatpush.bf16.msrb.mxu0 %v7837_v15  ;;  %3996 = vmatpush.bf16.msrb.mxu2 %v7729_v0  ;;  %v8513_v15 = vor.u32 %v9603_v24, %v8510_v43 }
 0x1bc   : > { %12474 = vst [vmem:[#allocation43_spill] sm:$0xff] %v10450_v3  ;;  %v8733_v1 = vor.u32 %v9673_v38, %v8732_v41  ;;  %v8620_v38 = vld [vmem:[#allocation3 + $0x9d8] sm:$0xf] }
 0x1bd   : > { %12475 = vst [vmem:[#allocation44_spill] sm:$0xff] %v10452_v29  ;;  %v7614_v29 = vld [vmem:[#allocation3 + $0x268] sm:$0xf0] }
 0x1be   : > { %3966 = vmatpush.bf16.msrb.mxu1 %v8733_v1  ;;  %4025 = vmatpush.bf16.msrb.mxu3 %v8625_v21  ;;  %v9645_v1 = vld [vmem:[#allocation3 + $0xa44] sm:$0xf0] }
 0x1bf   : > { %v8621_v32 = vor.u32 %v9645_v1, %v8620_v38  ;;  %v9617_v38 = vld [vmem:[#allocation3 + $0x964] sm:$0xf0] }
 0x1c0   : > { %v3583_v30 = vpop.f32.mrf.mxu3 }
 0x1c1   : > { %v3554_v36 = vpop.f32.mrf.mxu2  ;;  %v3595_v6 = vpop.f32.mrf.mxu0 }
 0x1c2   : > { %v10454_v62 = vadd.f32 %v3583_v30, %v3554_v36  ;;  %v3624_v28 = vpop.f32.mrf.mxu1  ;;  %3967 = vmatpush.bf16.msrb.mxu1 %v8621_v32  ;;  %4026 = vmatpush.bf16.msrb.mxu3 %v8513_v15  ;;  %v7502_v32 = vld [vmem:[#allocation3 + $0x188] sm:$0xf0] }
 0x1c3   : > { %v10456_v16 = vadd.f32 %v3624_v28, %v3595_v6 }
 0x1c4   : > { %12476 = vst [vmem:[#allocation45_spill] sm:$0xff] %v10454_v62  ;;  %3826 = vmatmul.bf16.vlgmr.msra.gmra.mxu0 %v10204_v45  ;;  %3855 = vmatmul.bf16.vlgmr.msra.gmra.mxu1 %v10206_v50  ;;  %v9379_v62 = vld [vmem:[#allocation3 + $0x1fc] sm:$0xf] }
 0x1c5   : > { %12477 = vst [vmem:[#allocation46_spill] sm:$0xff] %v10456_v16  ;;  %3913 = vmatmul.bf16.vlgmr.msra.gmra.mxu3 %v10206_v50  ;;  %v7724_v16 = vld [vmem:[#allocation3 + $0x2d8] sm:$0xf]  ;;  %v7617_v12 = vor.u32 %v9379_v62, %v7614_v29  ;;  %v9393_v62 = vld [vmem:[#allocation3 + $0x264] sm:$0xf0] }
 0x1c6   : > { %3884 = vmatmul.bf16.vlgmr.msra.gmra.mxu2 %v10204_v45  ;;  %v7725_v3 = vor.u32 %v9421_v26, %v7724_v16  ;;  %v9351_v16 = vld [vmem:[#allocation3 + $0x11c] sm:$0xf] }
 0x1c7   : > { %3997 = vmatpush.bf16.msrb.mxu2 %v7617_v12  ;;  %v9575_v26 = vld [vmem:[#allocation3 + $0x81c] sm:$0xf]  ;;  %v8398_v12 = vld [vmem:[#allocation3 + $0x888] sm:$0xf0]  ;;  %v7505_v43 = vor.u32 %v9351_v16, %v7502_v32 }
 0x1c8   : > { %v3682_v36 = vpop.f32.mrf.mxu3  ;;  %3938 = vmatpush.bf16.msrb.mxu0 %v7725_v3  ;;  %v7612_v3 = vld [vmem:[#allocation3 + $0x1f8] sm:$0xf]  ;;  %v8401_v15 = vor.u32 %v9575_v26, %v8398_v12  ;;  %v9547_v32 = vld [vmem:[#allocation3 + $0x73c] sm:$0xf]  ;;  %v8286_v26 = vld [vmem:[#allocation3 + $0x7a8] sm:$0xf0] }
 0x1c9   : > { %v3653_v60 = vpop.f32.mrf.mxu2  ;;  %v3597_v30 = vpop.f32.mrf.mxu0  ;;  %v7613_v1 = vor.u32 %v9393_v62, %v7612_v3  ;;  %v9365_v62 = vld [vmem:[#allocation3 + $0x184] sm:$0xf0] }
 0x1ca   : > { %v10462_v6 = vadd.f32 %v3682_v36, %v3653_v60  ;;  %v3626_v28 = vpop.f32.mrf.mxu1  ;;  %4027 = vmatpush.bf16.msrb.mxu3 %v8401_v15  ;;  %v8284_v15 = vld [vmem:[#allocation3 + $0x738] sm:$0xf] }
 0x1cb   : > { %v10464_v41 = vadd.f32 %v3626_v28, %v3597_v30  ;;  %v8508_v28 = vld [vmem:[#allocation3 + $0x8f8] sm:$0xf]  ;;  %3998 = vmatpush.bf16.msrb.mxu2 %v7505_v43  ;;  %v9337_v43 = vld [vmem:[#allocation3 + $0xa4] sm:$0xf0] }
 0x1cc   : > { %12478 = vst [vmem:[#allocation47_spill] sm:$0xff] %v10462_v6  ;;  %v8509_v29 = vor.u32 %v9617_v38, %v8508_v28  ;;  %3939 = vmatpush.bf16.msrb.mxu0 %v7613_v1  ;;  %v8396_v38 = vld [vmem:[#allocation3 + $0x818] sm:$0xf]  ;;  %v8289_v1 = vor.u32 %v9547_v32, %v8286_v26 }
 0x1cd   : > { %12479 = vst [vmem:[#allocation48_spill] sm:$0xff] %v10464_v41  ;;  %v7390_v41 = vld [vmem:[#allocation3 + $0xa8] sm:$0xf0] }
 0x1ce   : > { %3968 = vmatpush.bf16.msrb.mxu1 %v8509_v29  ;;  %v9589_v29 = vld [vmem:[#allocation3 + $0x884] sm:$0xf0]  ;;  %4028 = vmatpush.bf16.msrb.mxu3 %v8289_v1 }
 0x1cf   : > { %v8397_v3 = vor.u32 %v9589_v29, %v8396_v38  ;;  %v9561_v38 = vld [vmem:[#allocation3 + $0x7a4] sm:$0xf0] }
 0x1d0   : > { %v3684_v60 = vpop.f32.mrf.mxu3 }
 0x1d1   : > { %v3655_v54 = vpop.f32.mrf.mxu2  ;;  %v3600_v0 = vpop.f32.mrf.mxu0 }
 0x1d2   : > { %v10466_v21 = vadd.f32 %v3684_v60, %v3655_v54  ;;  %v3629_v36 = vpop.f32.mrf.mxu1  ;;  %3969 = vmatpush.bf16.msrb.mxu1 %v8397_v3  ;;  %v9744_v3 = vld [vmem:[#allocation3 + $0xd64] sm:$0xf] }
 0x1d3   : > { %v10468_v30 = vadd.f32 %v3629_v36, %v3600_v0 }
 0x1d4   : > { %12480 = vst [vmem:[#allocation49_spill] sm:$0xff] %v10466_v21  ;;  %3831 = vmatmul.bf16.gmra.mxu0 %v10216_v35  ;;  %3860 = vmatmul.bf16.gmra.mxu1 %v10218_v40  ;;  %v9323_v21 = vld [vmem:[#allocation3 + $0x3c] sm:$0xf] }
 0x1d5   : > { %12481 = vst [vmem:[#allocation50_spill] sm:$0xff] %v10468_v30  ;;  %3918 = vmatmul.bf16.gmra.mxu3 %v10218_v40  ;;  %v7500_v30 = vld [vmem:[#allocation3 + $0x118] sm:$0xf]  ;;  %v7393_v16 = vor.u32 %v9323_v21, %v7390_v41  ;;  %v8182_v21 = vld [vmem:[#allocation3 + $0x6d0] sm:$0xf0] }
 0x1d6   : > { %3889 = vmatmul.bf16.gmra.mxu2 %v10216_v35  ;;  %v7501_v6 = vor.u32 %v9365_v62, %v7500_v30  ;;  %v8285_v30 = vor.u32 %v9561_v38, %v8284_v15  ;;  %v9076_v15 = vld [vmem:[#allocation3 + $0xd60] sm:$0xf]  ;;  %v9534_v38 = vld [vmem:[#allocation3 + $0x6cc] sm:$0xf0] }
 0x1d7   : > { %3999 = vmatpush.bf16.msrb.mxu2 %v7393_v16  ;;  %v9078_v16 = vld [vmem:[#allocation3 + $0xdd0] sm:$0xf0] }
 0x1d8   : > { %v3687_v54 = vpop.f32.mrf.mxu3  ;;  %3940 = vmatpush.bf16.msrb.mxu0 %v7501_v6  ;;  %3970 = vmatpush.bf16.msrb.mxu1 %v8285_v30  ;;  %v9520_v6 = vld [vmem:[#allocation3 + $0x664] sm:$0xf]  ;;  %v9081_v26 = vor.u32 %v9744_v3, %v9078_v16  ;;  %v8966_v3 = vld [vmem:[#allocation3 + $0xcf0] sm:$0xf0] }
 0x1d9   : > { %v3658_v24 = vpop.f32.mrf.mxu2  ;;  %v3602_v60 = vpop.f32.mrf.mxu0  ;;  %v8185_v62 = vor.u32 %v9520_v6, %v8182_v21  ;;  %v9492_v30 = vld [vmem:[#allocation3 + $0x584] sm:$0xf] }
 0x1da   : > { %v10474_v0 = vadd.f32 %v3687_v54, %v3658_v24  ;;  %v3631_v36 = vpop.f32.mrf.mxu1  ;;  %v7388_v24 = vld [vmem:[#allocation3 + $0x38] sm:$0xf]  ;;  %4137 = vmatpush.bf16.msra.mxu3 %v9081_v26 }
 0x1db   : > { %v10476_v28 = vadd.f32 %v3631_v36, %v3602_v60  ;;  %v7389_v36 = vor.u32 %v9337_v43, %v7388_v24  ;;  %4108 = vmatpush.bf16.msra.mxu2 %v8185_v62 }
 0x1dc   : > { %12482 = vst [vmem:[#allocation51_spill] sm:$0xff] %v10474_v0 }
 0x1dd   : > { %12483 = vst [vmem:[#allocation52_spill] sm:$0xff] %v10476_v28  ;;  %3941 = vmatpush.bf16.msrb.mxu0 %v7389_v36 }
 0x1e0   : > { %v3689_v54 = vpop.f32.mrf.mxu3 }
 0x1e1   : > { %v3660_v12 = vpop.f32.mrf.mxu2  ;;  %v3605_v60 = vpop.f32.mrf.mxu0 }
 0x1e2   : > { %v10478_v29 = vadd.f32 %v3689_v54, %v3660_v12  ;;  %v3634_v28 = vpop.f32.mrf.mxu1  ;;  %v9758_v54 = vld [vmem:[#allocation3 + $0xdcc] sm:$0xf0] }
 0x1e3   : > { %v10480_v41 = vadd.f32 %v3634_v28, %v3605_v60  ;;  %v8180_v60 = vld [vmem:[#allocation3 + $0x660] sm:$0xf]  ;;  %v9077_v36 = vor.u32 %v9758_v54, %v9076_v15  ;;  %v9730_v54 = vld [vmem:[#allocation3 + $0xcec] sm:$0xf0] }
 0x1e4   : > { %12484 = vst [vmem:[#allocation53_spill] sm:$0xff] %v10478_v29  ;;  %3836 = vmatmul.bf16.gmra.mxu0 %v10228_v19  ;;  %3865 = vmatmul.bf16.gmra.mxu1 %v10230_v20  ;;  %v8181_v6 = vor.u32 %v9534_v38, %v8180_v60  ;;  %v9716_v29 = vld [vmem:[#allocation3 + $0xc84] sm:$0xf]  ;;  %v8964_v15 = vld [vmem:[#allocation3 + $0xc80] sm:$0xf] }
 0x1e5   : > { %12485 = vst [vmem:[#allocation54_spill] sm:$0xff] %v10480_v41  ;;  %3923 = vmatmul.bf16.gmra.mxu3 %v10230_v20  ;;  %v8070_v41 = vld [vmem:[#allocation3 + $0x5f0] sm:$0xf0]  ;;  %4079 = vmatpush.bf16.msra.mxu1 %v9077_v36  ;;  %v8969_v16 = vor.u32 %v9716_v29, %v8966_v3  ;;  %v8068_v29 = vld [vmem:[#allocation3 + $0x580] sm:$0xf] }
 0x1e6   : > { %3894 = vmatmul.bf16.gmra.mxu2 %v10228_v19  ;;  %v8073_v21 = vor.u32 %v9492_v30, %v8070_v41  ;;  %4050 = vmatpush.bf16.msra.mxu0 %v8181_v6  ;;  %v8965_v41 = vor.u32 %v9730_v54, %v8964_v15  ;;  %v9506_v60 = vld [vmem:[#allocation3 + $0x5ec] sm:$0xf0]  ;;  %v9464_v36 = vld [vmem:[#allocation3 + $0x4a4] sm:$0xf]  ;;  %v7958_v30 = vld [vmem:[#allocation3 + $0x510] sm:$0xf0] }
 0x1e7   : > { %4138 = vmatpush.bf16.msra.mxu3 %v8969_v16  ;;  %v8069_v38 = vor.u32 %v9506_v60, %v8068_v29  ;;  %v9688_v6 = vld [vmem:[#allocation3 + $0xba4] sm:$0xf]  ;;  %v7961_v16 = vor.u32 %v9464_v36, %v7958_v30  ;;  %v9478_v60 = vld [vmem:[#allocation3 + $0x50c] sm:$0xf0] }
 0x1e8   : > { %v3692_v1 = vpop.f32.mrf.mxu3  ;;  %4109 = vmatpush.bf16.msra.mxu2 %v8073_v21  ;;  %v8854_v21 = vld [vmem:[#allocation3 + $0xc10] sm:$0xf0]  ;;  %v9660_v30 = vld [vmem:[#allocation3 + $0xac4] sm:$0xf] }
 0x1e9   : > { %v3663_v32 = vpop.f32.mrf.mxu2  ;;  %v3607_v28 = vpop.f32.mrf.mxu0  ;;  %4080 = vmatpush.bf16.msra.mxu1 %v8965_v41  ;;  %v8852_v41 = vld [vmem:[#allocation3 + $0xba0] sm:$0xf] }
 0x1ea   : > { %v10486_v12 = vadd.f32 %v3692_v1, %v3663_v32  ;;  %v3636_v24 = vpop.f32.mrf.mxu1  ;;  %4051 = vmatpush.bf16.msra.mxu0 %v8069_v38 }
 0x1eb   : > { %v10488_v43 = vadd.f32 %v3636_v24, %v3607_v28 }
 0x1ec   : > { %12486 = vst [vmem:[#allocation55_spill] sm:$0xff] %v10486_v12  ;;  %4110 = vmatpush.bf16.msra.mxu2 %v7961_v16  ;;  %v7846_v12 = vld [vmem:[#allocation3 + $0x430] sm:$0xf0] }
 0x1ed   : > { %12487 = vst [vmem:[#allocation56_spill] sm:$0xff] %v10488_v43  ;;  %v9436_v43 = vld [vmem:[#allocation3 + $0x3c4] sm:$0xf] }
 0x1ee   : > { %v7849_v36 = vor.u32 %v9436_v43, %v7846_v12  ;;  %v9450_v43 = vld [vmem:[#allocation3 + $0x42c] sm:$0xf0] }
 0x1f0   : > { %v3694_v32 = vpop.f32.mrf.mxu3  ;;  %4111 = vmatpush.bf16.msra.mxu2 %v7849_v36  ;;  %v8630_v36 = vld [vmem:[#allocation3 + $0xa50] sm:$0xf0] }
 0x1f1   : > { %v3665_v62 = vpop.f32.mrf.mxu2  ;;  %v3610_v26 = vpop.f32.mrf.mxu0 }
 0x1f2   : > { %v10490_v1 = vadd.f32 %v3694_v32, %v3665_v62  ;;  %v3639_v28 = vpop.f32.mrf.mxu1  ;;  %v8857_v62 = vor.u32 %v9688_v6, %v8854_v21  ;;  %v8742_v6 = vld [vmem:[#allocation3 + $0xb30] sm:$0xf0] }
 0x1f3   : > { %v10492_v24 = vadd.f32 %v3639_v28, %v3610_v26  ;;  %v8745_v38 = vor.u32 %v9660_v30, %v8742_v6 }
 0x1f4   : > { %12488 = vst [vmem:[#allocation57_spill] sm:$0xff] %v10490_v1  ;;  %3841 = vmatmul.bf16.gmra.mxu0 %v10240_v49  ;;  %3870 = vmatmul.bf16.gmra.mxu1 %v10242_v51  ;;  %v7956_v1 = vld [vmem:[#allocation3 + $0x4a0] sm:$0xf] }
 0x1f5   : > { %12489 = vst [vmem:[#allocation58_spill] sm:$0xff] %v10492_v24  ;;  %3928 = vmatmul.bf16.gmra.mxu3 %v10242_v51  ;;  %v9702_v24 = vld [vmem:[#allocation3 + $0xc0c] sm:$0xf0]  ;;  %v7957_v0 = vor.u32 %v9478_v60, %v7956_v1  ;;  %v9408_v1 = vld [vmem:[#allocation3 + $0x2e4] sm:$0xf] }
 0x1f6   : > { %3899 = vmatmul.bf16.gmra.mxu2 %v10240_v49  ;;  %4139 = vmatpush.bf16.msra.mxu3 %v8857_v62  ;;  %v8853_v29 = vor.u32 %v9702_v24, %v8852_v41  ;;  %v8740_v24 = vld [vmem:[#allocation3 + $0xac0] sm:$0xf]  ;;  %v9632_v60 = vld [vmem:[#allocation3 + $0x9e4] sm:$0xf] }
 0x1f7   : > { %4052 = vmatpush.bf16.msra.mxu0 %v7957_v0  ;;  %v7844_v0 = vld [vmem:[#allocation3 + $0x3c0] sm:$0xf] }
 0x1f8   : > { %v3697_v32 = vpop.f32.mrf.mxu3  ;;  %4081 = vmatpush.bf16.msra.mxu1 %v8853_v29  ;;  %v7845_v41 = vor.u32 %v9450_v43, %v7844_v0  ;;  %v7734_v29 = vld [vmem:[#allocation3 + $0x350] sm:$0xf0]  ;;  %v9422_v43 = vld [vmem:[#allocation3 + $0x34c] sm:$0xf0] }
 0x1f9   : > { %v3668_v3 = vpop.f32.mrf.mxu2  ;;  %v3612_v26 = vpop.f32.mrf.mxu0  ;;  %v7737_v6 = vor.u32 %v9408_v1, %v7734_v29  ;;  %v9604_v29 = vld [vmem:[#allocation3 + $0x904] sm:$0xf] }
 0x1fa   : > { %v10498_v28 = vadd.f32 %v3697_v32, %v3668_v3  ;;  %v3641_v15 = vpop.f32.mrf.mxu1  ;;  %4140 = vmatpush.bf16.msra.mxu3 %v8745_v38  ;;  %v8633_v38 = vor.u32 %v9632_v60, %v8630_v36  ;;  %v8518_v60 = vld [vmem:[#allocation3 + $0x970] sm:$0xf0] }
 0x1fb   : > { %v10500_v54 = vadd.f32 %v3641_v15, %v3612_v26  ;;  %v9674_v15 = vld [vmem:[#allocation3 + $0xb2c] sm:$0xf0]  ;;  %4053 = vmatpush.bf16.msra.mxu0 %v7845_v41  ;;  %4112 = vmatpush.bf16.msra.mxu2 %v7737_v6  ;;  %v8521_v41 = vor.u32 %v9604_v29, %v8518_v60 }
 0x1fc   : > { %12490 = vst [vmem:[#allocation59_spill] sm:$0xff] %v10498_v28  ;;  %v8741_v12 = vor.u32 %v9674_v15, %v8740_v24  ;;  %v8628_v15 = vld [vmem:[#allocation3 + $0x9e0] sm:$0xf] }
 0x1fd   : > { %12491 = vst [vmem:[#allocation60_spill] sm:$0xff] %v10500_v54  ;;  %v7622_v54 = vld [vmem:[#allocation3 + $0x270] sm:$0xf0] }
 0x1fe   : > { %4082 = vmatpush.bf16.msra.mxu1 %v8741_v12  ;;  %4141 = vmatpush.bf16.msra.mxu3 %v8633_v38  ;;  %v9646_v12 = vld [vmem:[#allocation3 + $0xa4c] sm:$0xf0] }
 0x1ff   : > { %v8629_v0 = vor.u32 %v9646_v12, %v8628_v15  ;;  %v9618_v15 = vld [vmem:[#allocation3 + $0x96c] sm:$0xf0] }
 0x200   : > { %v3699_v3 = vpop.f32.mrf.mxu3 }
 0x201   : > { %v3670_v21 = vpop.f32.mrf.mxu2  ;;  %v3711_v16 = vpop.f32.mrf.mxu0 }
 0x202   : > { %v10502_v62 = vadd.f32 %v3699_v3, %v3670_v21  ;;  %v3740_v32 = vpop.f32.mrf.mxu1  ;;  %4083 = vmatpush.bf16.msra.mxu1 %v8629_v0  ;;  %4142 = vmatpush.bf16.msra.mxu3 %v8521_v41  ;;  %v7510_v0 = vld [vmem:[#allocation3 + $0x190] sm:$0xf0] }
 0x203   : > { %v10504_v26 = vadd.f32 %v3740_v32, %v3711_v16 }
 0x204   : > { %12492 = vst [vmem:[#allocation61_spill] sm:$0xff] %v10502_v62  ;;  %3942 = vmatmul.bf16.vlgmr.msrb.gmra.mxu0 %v10204_v45  ;;  %3971 = vmatmul.bf16.vlgmr.msrb.gmra.mxu1 %v10206_v50  ;;  %v9380_v62 = vld [vmem:[#allocation3 + $0x204] sm:$0xf] }
 0x205   : > { %12493 = vst [vmem:[#allocation62_spill] sm:$0xff] %v10504_v26  ;;  %4029 = vmatmul.bf16.vlgmr.msrb.gmra.mxu3 %v10206_v50  ;;  %v7732_v26 = vld [vmem:[#allocation3 + $0x2e0] sm:$0xf]  ;;  %v7625_v1 = vor.u32 %v9380_v62, %v7622_v54  ;;  %v9394_v62 = vld [vmem:[#allocation3 + $0x26c] sm:$0xf0] }
 0x206   : > { %4000 = vmatmul.bf16.vlgmr.msrb.gmra.mxu2 %v10204_v45  ;;  %v7733_v28 = vor.u32 %v9422_v43, %v7732_v26  ;;  %v9352_v26 = vld [vmem:[#allocation3 + $0x124] sm:$0xf] }
 0x207   : > { %4113 = vmatpush.bf16.msra.mxu2 %v7625_v1  ;;  %v9576_v43 = vld [vmem:[#allocation3 + $0x824] sm:$0xf]  ;;  %v8406_v1 = vld [vmem:[#allocation3 + $0x890] sm:$0xf0]  ;;  %v7513_v60 = vor.u32 %v9352_v26, %v7510_v0 }
 0x208   : > { %v3798_v21 = vpop.f32.mrf.mxu3  ;;  %4054 = vmatpush.bf16.msra.mxu0 %v7733_v28  ;;  %v7620_v28 = vld [vmem:[#allocation3 + $0x200] sm:$0xf]  ;;  %v8409_v41 = vor.u32 %v9576_v43, %v8406_v1  ;;  %v9548_v0 = vld [vmem:[#allocation3 + $0x744] sm:$0xf]  ;;  %v8294_v43 = vld [vmem:[#allocation3 + $0x7b0] sm:$0xf0] }
 0x209   : > { %v3769_v30 = vpop.f32.mrf.mxu2  ;;  %v3713_v3 = vpop.f32.mrf.mxu0  ;;  %v7621_v12 = vor.u32 %v9394_v62, %v7620_v28  ;;  %v9366_v62 = vld [vmem:[#allocation3 + $0x18c] sm:$0xf0] }
 0x20a   : > { %v10510_v16 = vadd.f32 %v3798_v21, %v3769_v30  ;;  %v3742_v32 = vpop.f32.mrf.mxu1  ;;  %4143 = vmatpush.bf16.msra.mxu3 %v8409_v41  ;;  %v8292_v41 = vld [vmem:[#allocation3 + $0x740] sm:$0xf] }
 0x20b   : > { %v10512_v24 = vadd.f32 %v3742_v32, %v3713_v3  ;;  %v8516_v32 = vld [vmem:[#allocation3 + $0x900] sm:$0xf]  ;;  %4114 = vmatpush.bf16.msra.mxu2 %v7513_v60  ;;  %v9338_v60 = vld [vmem:[#allocation3 + $0xac] sm:$0xf0] }
 0x20c   : > { %12494 = vst [vmem:[#allocation63_spill] sm:$0xff] %v10510_v16  ;;  %v8517_v54 = vor.u32 %v9618_v15, %v8516_v32  ;;  %4055 = vmatpush.bf16.msra.mxu0 %v7621_v12  ;;  %v8404_v15 = vld [vmem:[#allocation3 + $0x820] sm:$0xf]  ;;  %v8297_v12 = vor.u32 %v9548_v0, %v8294_v43 }
 0x20d   : > { %12495 = vst [vmem:[#allocation64_spill] sm:$0xff] %v10512_v24  ;;  %v7398_v24 = vld [vmem:[#allocation3 + $0xb0] sm:$0xf0] }
 0x20e   : > { %4084 = vmatpush.bf16.msra.mxu1 %v8517_v54  ;;  %v9590_v54 = vld [vmem:[#allocation3 + $0x88c] sm:$0xf0]  ;;  %4144 = vmatpush.bf16.msra.mxu3 %v8297_v12 }
 0x20f   : > { %v8405_v28 = vor.u32 %v9590_v54, %v8404_v15  ;;  %v9562_v15 = vld [vmem:[#allocation3 + $0x7ac] sm:$0xf0] }
 0x210   : > { %v3800_v30 = vpop.f32.mrf.mxu3 }
 0x211   : > { %v3771_v36 = vpop.f32.mrf.mxu2  ;;  %v3716_v6 = vpop.f32.mrf.mxu0 }
 0x212   : > { %v10514_v38 = vadd.f32 %v3800_v30, %v3771_v36  ;;  %v3745_v21 = vpop.f32.mrf.mxu1  ;;  %4085 = vmatpush.bf16.msra.mxu1 %v8405_v28  ;;  %v9745_v28 = vld [vmem:[#allocation3 + $0xd6c] sm:$0xf] }
 0x213   : > { %v10516_v3 = vadd.f32 %v3745_v21, %v3716_v6 }
 0x214   : > { %12496 = vst [vmem:[#allocation65_spill] sm:$0xff] %v10514_v38  ;;  %3947 = vmatmul.bf16.gmra.mxu0 %v10216_v35  ;;  %3976 = vmatmul.bf16.gmra.mxu1 %v10218_v40  ;;  %v9324_v38 = vld [vmem:[#allocation3 + $0x44] sm:$0xf] }
 0x215   : > { %12497 = vst [vmem:[#allocation66_spill] sm:$0xff] %v10516_v3  ;;  %4034 = vmatmul.bf16.gmra.mxu3 %v10218_v40  ;;  %v7508_v3 = vld [vmem:[#allocation3 + $0x120] sm:$0xf]  ;;  %v7401_v26 = vor.u32 %v9324_v38, %v7398_v24  ;;  %v8190_v38 = vld [vmem:[#allocation3 + $0x6d8] sm:$0xf0] }
 0x216   : > { %4005 = vmatmul.bf16.gmra.mxu2 %v10216_v35  ;;  %v7509_v16 = vor.u32 %v9366_v62, %v7508_v3  ;;  %v8293_v3 = vor.u32 %v9562_v15, %v8292_v41  ;;  %v9084_v41 = vld [vmem:[#allocation3 + $0xd68] sm:$0xf]  ;;  %v9535_v15 = vld [vmem:[#allocation3 + $0x6d4] sm:$0xf0] }
 0x217   : > { %4115 = vmatpush.bf16.msra.mxu2 %v7401_v26  ;;  %v9086_v26 = vld [vmem:[#allocation3 + $0xdd8] sm:$0xf0] }
 0x218   : > { %v3803_v36 = vpop.f32.mrf.mxu3  ;;  %4056 = vmatpush.bf16.msra.mxu0 %v7509_v16  ;;  %4086 = vmatpush.bf16.msra.mxu1 %v8293_v3  ;;  %v9521_v16 = vld [vmem:[#allocation3 + $0x66c] sm:$0xf]  ;;  %v9089_v43 = vor.u32 %v9745_v28, %v9086_v26  ;;  %v8974_v28 = vld [vmem:[#allocation3 + $0xcf8] sm:$0xf0] }
 0x219   : > { %v3774_v29 = vpop.f32.mrf.mxu2  ;;  %v3718_v30 = vpop.f32.mrf.mxu0  ;;  %v8193_v62 = vor.u32 %v9521_v16, %v8190_v38  ;;  %v9493_v3 = vld [vmem:[#allocation3 + $0x58c] sm:$0xf] }
 0x21a   : > { %v10522_v6 = vadd.f32 %v3803_v36, %v3774_v29  ;;  %v3747_v21 = vpop.f32.mrf.mxu1  ;;  %v7396_v29 = vld [vmem:[#allocation3 + $0x40] sm:$0xf]  ;;  %4253 = vmatpush.bf16.msrb.mxu3 %v9089_v43 }
 0x21b   : > { %v10524_v32 = vadd.f32 %v3747_v21, %v3718_v30  ;;  %v7397_v21 = vor.u32 %v9338_v60, %v7396_v29  ;;  %4224 = vmatpush.bf16.msrb.mxu2 %v8193_v62 }
 0x21c   : > { %12498 = vst [vmem:[#allocation67_spill] sm:$0xff] %v10522_v6 }
 0x21d   : > { %12499 = vst [vmem:[#allocation68_spill] sm:$0xff] %v10524_v32  ;;  %4057 = vmatpush.bf16.msra.mxu0 %v7397_v21 }
 0x220   : > { %v3805_v36 = vpop.f32.mrf.mxu3 }
 0x221   : > { %v3776_v1 = vpop.f32.mrf.mxu2  ;;  %v3721_v30 = vpop.f32.mrf.mxu0 }
 0x222   : > { %v10526_v54 = vadd.f32 %v3805_v36, %v3776_v1  ;;  %v3750_v32 = vpop.f32.mrf.mxu1  ;;  %v9759_v36 = vld [vmem:[#allocation3 + $0xdd4] sm:$0xf0] }
 0x223   : > { %v10528_v24 = vadd.f32 %v3750_v32, %v3721_v30  ;;  %v8188_v30 = vld [vmem:[#allocation3 + $0x668] sm:$0xf]  ;;  %v9085_v21 = vor.u32 %v9759_v36, %v9084_v41  ;;  %v9731_v36 = vld [vmem:[#allocation3 + $0xcf4] sm:$0xf0] }
 0x224   : > { %12500 = vst [vmem:[#allocation69_spill] sm:$0xff] %v10526_v54  ;;  %3952 = vmatmul.bf16.gmra.mxu0 %v10228_v19  ;;  %3981 = vmatmul.bf16.gmra.mxu1 %v10230_v20  ;;  %v8189_v16 = vor.u32 %v9535_v15, %v8188_v30  ;;  %v9717_v54 = vld [vmem:[#allocation3 + $0xc8c] sm:$0xf]  ;;  %v8972_v41 = vld [vmem:[#allocation3 + $0xc88] sm:$0xf] }
 0x225   : > { %12501 = vst [vmem:[#allocation70_spill] sm:$0xff] %v10528_v24  ;;  %4039 = vmatmul.bf16.gmra.mxu3 %v10230_v20  ;;  %v8078_v24 = vld [vmem:[#allocation3 + $0x5f8] sm:$0xf0]  ;;  %4195 = vmatpush.bf16.msrb.mxu1 %v9085_v21  ;;  %v8977_v26 = vor.u32 %v9717_v54, %v8974_v28  ;;  %v8076_v54 = vld [vmem:[#allocation3 + $0x588] sm:$0xf] }
 0x226   : > { %4010 = vmatmul.bf16.gmra.mxu2 %v10228_v19  ;;  %v8081_v38 = vor.u32 %v9493_v3, %v8078_v24  ;;  %4166 = vmatpush.bf16.msrb.mxu0 %v8189_v16  ;;  %v8973_v24 = vor.u32 %v9731_v36, %v8972_v41  ;;  %v9507_v30 = vld [vmem:[#allocation3 + $0x5f4] sm:$0xf0]  ;;  %v9465_v21 = vld [vmem:[#allocation3 + $0x4ac] sm:$0xf]  ;;  %v7966_v3 = vld [vmem:[#allocation3 + $0x518] sm:$0xf0] }
 0x227   : > { %4254 = vmatpush.bf16.msrb.mxu3 %v8977_v26  ;;  %v8077_v15 = vor.u32 %v9507_v30, %v8076_v54  ;;  %v9689_v16 = vld [vmem:[#allocation3 + $0xbac] sm:$0xf]  ;;  %v7969_v26 = vor.u32 %v9465_v21, %v7966_v3  ;;  %v9479_v30 = vld [vmem:[#allocation3 + $0x514] sm:$0xf0] }
 0x228   : > { %v3808_v12 = vpop.f32.mrf.mxu3  ;;  %4225 = vmatpush.bf16.msrb.mxu2 %v8081_v38  ;;  %v8862_v38 = vld [vmem:[#allocation3 + $0xc18] sm:$0xf0]  ;;  %v9661_v3 = vld [vmem:[#allocation3 + $0xacc] sm:$0xf] }
 0x229   : > { %v3779_v0 = vpop.f32.mrf.mxu2  ;;  %v3723_v32 = vpop.f32.mrf.mxu0  ;;  %4196 = vmatpush.bf16.msrb.mxu1 %v8973_v24  ;;  %v8860_v24 = vld [vmem:[#allocation3 + $0xba8] sm:$0xf] }
 0x22a   : > { %v10534_v1 = vadd.f32 %v3808_v12, %v3779_v0  ;;  %v3752_v29 = vpop.f32.mrf.mxu1  ;;  %4167 = vmatpush.bf16.msrb.mxu0 %v8077_v15 }
 0x22b   : > { %v10536_v60 = vadd.f32 %v3752_v29, %v3723_v32 }
 0x22c   : > { %12502 = vst [vmem:[#allocation71_spill] sm:$0xff] %v10534_v1  ;;  %4226 = vmatpush.bf16.msrb.mxu2 %v7969_v26  ;;  %v7854_v1 = vld [vmem:[#allocation3 + $0x438] sm:$0xf0] }
 0x22d   : > { %12503 = vst [vmem:[#allocation72_spill] sm:$0xff] %v10536_v60  ;;  %v9437_v60 = vld [vmem:[#allocation3 + $0x3cc] sm:$0xf] }
 0x22e   : > { %v7857_v21 = vor.u32 %v9437_v60, %v7854_v1  ;;  %v9451_v60 = vld [vmem:[#allocation3 + $0x434] sm:$0xf0] }
 0x230   : > { %v3810_v0 = vpop.f32.mrf.mxu3  ;;  %4227 = vmatpush.bf16.msrb.mxu2 %v7857_v21  ;;  %v8638_v21 = vld [vmem:[#allocation3 + $0xa58] sm:$0xf0] }
 0x231   : > { %v3781_v62 = vpop.f32.mrf.mxu2  ;;  %v3726_v43 = vpop.f32.mrf.mxu0 }
 0x232   : > { %v10538_v12 = vadd.f32 %v3810_v0, %v3781_v62  ;;  %v3755_v32 = vpop.f32.mrf.mxu1  ;;  %v8865_v62 = vor.u32 %v9689_v16, %v8862_v38  ;;  %v8750_v16 = vld [vmem:[#allocation3 + $0xb38] sm:$0xf0] }
 0x233   : > { %v10540_v29 = vadd.f32 %v3755_v32, %v3726_v43  ;;  %v8753_v15 = vor.u32 %v9661_v3, %v8750_v16 }
 0x234   : > { %12504 = vst [vmem:[#allocation73_spill] sm:$0xff] %v10538_v12  ;;  %3957 = vmatmul.bf16.gmra.mxu0 %v10240_v49  ;;  %3986 = vmatmul.bf16.gmra.mxu1 %v10242_v51  ;;  %v7964_v12 = vld [vmem:[#allocation3 + $0x4a8] sm:$0xf] }
 0x235   : > { %12505 = vst [vmem:[#allocation74_spill] sm:$0xff] %v10540_v29  ;;  %4044 = vmatmul.bf16.gmra.mxu3 %v10242_v51  ;;  %v9703_v29 = vld [vmem:[#allocation3 + $0xc14] sm:$0xf0]  ;;  %v7965_v6 = vor.u32 %v9479_v30, %v7964_v12  ;;  %v9409_v12 = vld [vmem:[#allocation3 + $0x2ec] sm:$0xf] }
 0x236   : > { %4015 = vmatmul.bf16.gmra.mxu2 %v10240_v49  ;;  %4255 = vmatpush.bf16.msrb.mxu3 %v8865_v62  ;;  %v8861_v54 = vor.u32 %v9703_v29, %v8860_v24  ;;  %v8748_v29 = vld [vmem:[#allocation3 + $0xac8] sm:$0xf]  ;;  %v9633_v30 = vld [vmem:[#allocation3 + $0x9ec] sm:$0xf] }
 0x237   : > { %4168 = vmatpush.bf16.msrb.mxu0 %v7965_v6  ;;  %v7852_v6 = vld [vmem:[#allocation3 + $0x3c8] sm:$0xf] }
 0x238   : > { %v3813_v0 = vpop.f32.mrf.mxu3  ;;  %4197 = vmatpush.bf16.msrb.mxu1 %v8861_v54  ;;  %v7853_v24 = vor.u32 %v9451_v60, %v7852_v6  ;;  %v7742_v54 = vld [vmem:[#allocation3 + $0x358] sm:$0xf0]  ;;  %v9423_v60 = vld [vmem:[#allocation3 + $0x354] sm:$0xf0] }
 0x239   : > { %v3784_v28 = vpop.f32.mrf.mxu2  ;;  %v3728_v43 = vpop.f32.mrf.mxu0  ;;  %v7745_v16 = vor.u32 %v9409_v12, %v7742_v54  ;;  %v9605_v54 = vld [vmem:[#allocation3 + $0x90c] sm:$0xf] }
 0x23a   : > { %v10546_v32 = vadd.f32 %v3813_v0, %v3784_v28  ;;  %v3757_v41 = vpop.f32.mrf.mxu1  ;;  %4256 = vmatpush.bf16.msrb.mxu3 %v8753_v15  ;;  %v8641_v15 = vor.u32 %v9633_v30, %v8638_v21  ;;  %v8526_v30 = vld [vmem:[#allocation3 + $0x978] sm:$0xf0] }
 0x23b   : > { %v10548_v36 = vadd.f32 %v3757_v41, %v3728_v43  ;;  %v9675_v41 = vld [vmem:[#allocation3 + $0xb34] sm:$0xf0]  ;;  %4169 = vmatpush.bf16.msrb.mxu0 %v7853_v24  ;;  %4228 = vmatpush.bf16.msrb.mxu2 %v7745_v16  ;;  %v8529_v24 = vor.u32 %v9605_v54, %v8526_v30 }
 0x23c   : > { %12506 = vst [vmem:[#allocation75_spill] sm:$0xff] %v10546_v32  ;;  %v8749_v1 = vor.u32 %v9675_v41, %v8748_v29  ;;  %v8636_v41 = vld [vmem:[#allocation3 + $0x9e8] sm:$0xf] }
 0x23d   : > { %12507 = vst [vmem:[#allocation76_spill] sm:$0xff] %v10548_v36  ;;  %v7630_v36 = vld [vmem:[#allocation3 + $0x278] sm:$0xf0] }
 0x23e   : > { %4198 = vmatpush.bf16.msrb.mxu1 %v8749_v1  ;;  %4257 = vmatpush.bf16.msrb.mxu3 %v8641_v15  ;;  %v9647_v1 = vld [vmem:[#allocation3 + $0xa54] sm:$0xf0] }
 0x23f   : > { %v8637_v6 = vor.u32 %v9647_v1, %v8636_v41  ;;  %v9619_v41 = vld [vmem:[#allocation3 + $0x974] sm:$0xf0] }
 0x240   : > { %v3815_v28 = vpop.f32.mrf.mxu3 }
 0x241   : > { %v3786_v38 = vpop.f32.mrf.mxu2  ;;  %v3827_v26 = vpop.f32.mrf.mxu0 }
 0x242   : > { %v10550_v62 = vadd.f32 %v3815_v28, %v3786_v38  ;;  %v3856_v0 = vpop.f32.mrf.mxu1  ;;  %4199 = vmatpush.bf16.msrb.mxu1 %v8637_v6  ;;  %4258 = vmatpush.bf16.msrb.mxu3 %v8529_v24  ;;  %v7518_v6 = vld [vmem:[#allocation3 + $0x198] sm:$0xf0] }
 0x243   : > { %v10552_v43 = vadd.f32 %v3856_v0, %v3827_v26 }
 0x244   : > { %12508 = vst [vmem:[#allocation77_spill] sm:$0xff] %v10550_v62  ;;  %4058 = vmatmul.bf16.vlgmr.msra.gmra.mxu0 %v10204_v45  ;;  %4087 = vmatmul.bf16.vlgmr.msra.gmra.mxu1 %v10206_v50  ;;  %v9381_v62 = vld [vmem:[#allocation3 + $0x20c] sm:$0xf] }
 0x245   : > { %12509 = vst [vmem:[#allocation78_spill] sm:$0xff] %v10552_v43  ;;  %4145 = vmatmul.bf16.vlgmr.msra.gmra.mxu3 %v10206_v50  ;;  %v7740_v43 = vld [vmem:[#allocation3 + $0x2e8] sm:$0xf]  ;;  %v7633_v12 = vor.u32 %v9381_v62, %v7630_v36  ;;  %v9395_v62 = vld [vmem:[#allocation3 + $0x274] sm:$0xf0] }
 0x246   : > { %4116 = vmatmul.bf16.vlgmr.msra.gmra.mxu2 %v10204_v45  ;;  %v7741_v32 = vor.u32 %v9423_v60, %v7740_v43  ;;  %v9353_v43 = vld [vmem:[#allocation3 + $0x12c] sm:$0xf] }
 0x247   : > { %4229 = vmatpush.bf16.msrb.mxu2 %v7633_v12  ;;  %v9577_v60 = vld [vmem:[#allocation3 + $0x82c] sm:$0xf]  ;;  %v8414_v12 = vld [vmem:[#allocation3 + $0x898] sm:$0xf0]  ;;  %v7521_v30 = vor.u32 %v9353_v43, %v7518_v6 }
 0x248   : > { %v3914_v38 = vpop.f32.mrf.mxu3  ;;  %4170 = vmatpush.bf16.msrb.mxu0 %v7741_v32  ;;  %v7628_v32 = vld [vmem:[#allocation3 + $0x208] sm:$0xf]  ;;  %v8417_v24 = vor.u32 %v9577_v60, %v8414_v12  ;;  %v9549_v6 = vld [vmem:[#allocation3 + $0x74c] sm:$0xf]  ;;  %v8302_v60 = vld [vmem:[#allocation3 + $0x7b8] sm:$0xf0] }
 0x249   : > { %v3885_v3 = vpop.f32.mrf.mxu2  ;;  %v3829_v28 = vpop.f32.mrf.mxu0  ;;  %v7629_v1 = vor.u32 %v9395_v62, %v7628_v32  ;;  %v9367_v62 = vld [vmem:[#allocation3 + $0x194] sm:$0xf0] }
 0x24a   : > { %v10558_v26 = vadd.f32 %v3914_v38, %v3885_v3  ;;  %v3858_v0 = vpop.f32.mrf.mxu1  ;;  %4259 = vmatpush.bf16.msrb.mxu3 %v8417_v24  ;;  %v8300_v24 = vld [vmem:[#allocation3 + $0x748] sm:$0xf] }
 0x24b   : > { %v10560_v29 = vadd.f32 %v3858_v0, %v3829_v28  ;;  %v8524_v0 = vld [vmem:[#allocation3 + $0x908] sm:$0xf]  ;;  %4230 = vmatpush.bf16.msrb.mxu2 %v7521_v30  ;;  %v9339_v30 = vld [vmem:[#allocation3 + $0xb4] sm:$0xf0] }
 0x24c   : > { %12510 = vst [vmem:[#allocation79_spill] sm:$0xff] %v10558_v26  ;;  %v8525_v36 = vor.u32 %v9619_v41, %v8524_v0  ;;  %4171 = vmatpush.bf16.msrb.mxu0 %v7629_v1  ;;  %v8412_v41 = vld [vmem:[#allocation3 + $0x828] sm:$0xf]  ;;  %v8305_v1 = vor.u32 %v9549_v6, %v8302_v60  ;;  %v9746_v6 = vld [vmem:[#allocation3 + $0xd74] sm:$0xf] }
 0x24d   : > { %12511 = vst [vmem:[#allocation80_spill] sm:$0xff] %v10560_v29  ;;  %v7406_v29 = vld [vmem:[#allocation3 + $0xb8] sm:$0xf0] }
 0x24e   : > { %4200 = vmatpush.bf16.msrb.mxu1 %v8525_v36  ;;  %v9591_v36 = vld [vmem:[#allocation3 + $0x894] sm:$0xf0]  ;;  %4260 = vmatpush.bf16.msrb.mxu3 %v8305_v1 }
 0x24f   : > { %v8413_v32 = vor.u32 %v9591_v36, %v8412_v41  ;;  %v9563_v41 = vld [vmem:[#allocation3 + $0x7b4] sm:$0xf0] }
 0x250   : > { %v3916_v3 = vpop.f32.mrf.mxu3 }
 0x251   : > { %v3887_v21 = vpop.f32.mrf.mxu2  ;;  %v3832_v16 = vpop.f32.mrf.mxu0 }
 0x252   : > { %v10562_v15 = vadd.f32 %v3916_v3, %v3887_v21  ;;  %v3861_v38 = vpop.f32.mrf.mxu1  ;;  %4201 = vmatpush.bf16.msrb.mxu1 %v8413_v32 }
 0x253   : > { %v10564_v28 = vadd.f32 %v3861_v38, %v3832_v16 }
 0x254   : > { %12512 = vst [vmem:[#allocation81_spill] sm:$0xff] %v10562_v15  ;;  %4063 = vmatmul.bf16.gmra.mxu0 %v10216_v35  ;;  %4092 = vmatmul.bf16.gmra.mxu1 %v10218_v40  ;;  %v9325_v15 = vld [vmem:[#allocation3 + $0x4c] sm:$0xf] }
 0x255   : > { %12513 = vst [vmem:[#allocation82_spill] sm:$0xff] %v10564_v28  ;;  %4150 = vmatmul.bf16.gmra.mxu3 %v10218_v40  ;;  %v7516_v28 = vld [vmem:[#allocation3 + $0x128] sm:$0xf]  ;;  %v7409_v43 = vor.u32 %v9325_v15, %v7406_v29 }
 0x256   : > { %4121 = vmatmul.bf16.gmra.mxu2 %v10216_v35  ;;  %v7517_v26 = vor.u32 %v9367_v62, %v7516_v28  ;;  %v8301_v28 = vor.u32 %v9563_v41, %v8300_v24  ;;  %v9522_v62 = vld [vmem:[#allocation3 + $0x674] sm:$0xf] }
 0x257   : > { %4231 = vmatpush.bf16.msrb.mxu2 %v7409_v43  ;;  %v8198_v43 = vld [vmem:[#allocation3 + $0x6e0] sm:$0xf0] }
 0x258   : > { %v3919_v21 = vpop.f32.mrf.mxu3  ;;  %4172 = vmatpush.bf16.msrb.mxu0 %v7517_v26  ;;  %4202 = vmatpush.bf16.msrb.mxu1 %v8301_v28  ;;  %v8201_v1 = vor.u32 %v9522_v62, %v8198_v43  ;;  %v9536_v62 = vld [vmem:[#allocation3 + $0x6dc] sm:$0xf0]  ;;  %v9494_v43 = vld [vmem:[#allocation3 + $0x594] sm:$0xf] }
 0x259   : > { %v3890_v54 = vpop.f32.mrf.mxu2  ;;  %v3834_v3 = vpop.f32.mrf.mxu0 }
 0x25a   : > { %v10570_v16 = vadd.f32 %v3919_v21, %v3890_v54  ;;  %v3863_v38 = vpop.f32.mrf.mxu1  ;;  %v7404_v54 = vld [vmem:[#allocation3 + $0x48] sm:$0xf] }
 0x25b   : > { %v10572_v0 = vadd.f32 %v3863_v38, %v3834_v3  ;;  %v7405_v38 = vor.u32 %v9339_v30, %v7404_v54  ;;  %4340 = vmatpush.bf16.msra.mxu2 %v8201_v1 }
 0x25c   : > { %12514 = vst [vmem:[#allocation83_spill] sm:$0xff] %v10570_v16 }
 0x25d   : > { %12515 = vst [vmem:[#allocation84_spill] sm:$0xff] %v10572_v0  ;;  %4173 = vmatpush.bf16.msrb.mxu0 %v7405_v38 }
 0x260   : > { %v3921_v21 = vpop.f32.mrf.mxu3 }
 0x261   : > { %v3892_v12 = vpop.f32.mrf.mxu2  ;;  %v3837_v3 = vpop.f32.mrf.mxu0 }
 0x262   : > { %v10574_v36 = vadd.f32 %v3921_v21, %v3892_v12  ;;  %v3866_v0 = vpop.f32.mrf.mxu1  ;;  %v9094_v12 = vld [vmem:[#allocation3 + $0xde0] sm:$0xf0] }
 0x263   : > { %v10576_v29 = vadd.f32 %v3866_v0, %v3837_v3  ;;  %v9097_v30 = vor.u32 %v9746_v6, %v9094_v12  ;;  %v8086_v6 = vld [vmem:[#allocation3 + $0x600] sm:$0xf0]  ;;  %v9718_v12 = vld [vmem:[#allocation3 + $0xc94] sm:$0xf] }
 0x264   : > { %12516 = vst [vmem:[#allocation85_spill] sm:$0xff] %v10574_v36  ;;  %4068 = vmatmul.bf16.gmra.mxu0 %v10228_v19  ;;  %4097 = vmatmul.bf16.gmra.mxu1 %v10230_v20  ;;  %v8089_v1 = vor.u32 %v9494_v43, %v8086_v6  ;;  %v9466_v43 = vld [vmem:[#allocation3 + $0x4b4] sm:$0xf]  ;;  %v7974_v6 = vld [vmem:[#allocation3 + $0x520] sm:$0xf0] }
 0x265   : > { %12517 = vst [vmem:[#allocation86_spill] sm:$0xff] %v10576_v29  ;;  %4155 = vmatmul.bf16.gmra.mxu3 %v10230_v20  ;;  %v8084_v29 = vld [vmem:[#allocation3 + $0x590] sm:$0xf] }
 0x266   : > { %4126 = vmatmul.bf16.gmra.mxu2 %v10228_v19  ;;  %4369 = vmatpush.bf16.msra.mxu3 %v9097_v30  ;;  %v8982_v30 = vld [vmem:[#allocation3 + $0xd00] sm:$0xf0] }
 0x267   : > { %4341 = vmatpush.bf16.msra.mxu2 %v8089_v1 }
 0x268   : > { %v3924_v15 = vpop.f32.mrf.mxu3 }
 0x269   : > { %v3895_v26 = vpop.f32.mrf.mxu2  ;;  %v3839_v32 = vpop.f32.mrf.mxu0 }
 0x26a   : > { %v10582_v60 = vadd.f32 %v3924_v15, %v3895_v26  ;;  %v3868_v0 = vpop.f32.mrf.mxu1  ;;  %v9092_v26 = vld [vmem:[#allocation3 + $0xd70] sm:$0xf]  ;;  %v9760_v15 = vld [vmem:[#allocation3 + $0xddc] sm:$0xf0] }
 0x26b   : > { %v10584_v54 = vadd.f32 %v3868_v0, %v3839_v32  ;;  %v9093_v32 = vor.u32 %v9760_v15, %v9092_v26 }
 0x26c   : > { %12518 = vst [vmem:[#allocation87_spill] sm:$0xff] %v10582_v60  ;;  %v8196_v60 = vld [vmem:[#allocation3 + $0x670] sm:$0xf] }
 0x26d   : > { %12519 = vst [vmem:[#allocation88_spill] sm:$0xff] %v10584_v54  ;;  %v8197_v0 = vor.u32 %v9536_v62, %v8196_v60  ;;  %4311 = vmatpush.bf16.msra.mxu1 %v9093_v32  ;;  %v9732_v54 = vld [vmem:[#allocation3 + $0xcfc] sm:$0xf0] }
 0x26e   : > { %v9508_v62 = vld [vmem:[#allocation3 + $0x5fc] sm:$0xf0] }
 0x26f   : > { %4282 = vmatpush.bf16.msra.mxu0 %v8197_v0  ;;  %v8085_v32 = vor.u32 %v9508_v62, %v8084_v29  ;;  %v8870_v0 = vld [vmem:[#allocation3 + $0xc20] sm:$0xf0]  ;;  %v9480_v29 = vld [vmem:[#allocation3 + $0x51c] sm:$0xf0]  ;;  %v9438_v62 = vld [vmem:[#allocation3 + $0x3d4] sm:$0xf] }
 0x270   : > { %v3926_v21 = vpop.f32.mrf.mxu3 }
 0x271   : > { %v3897_v24 = vpop.f32.mrf.mxu2  ;;  %v3842_v3 = vpop.f32.mrf.mxu0 }
 0x272   : > { %v10586_v38 = vadd.f32 %v3926_v21, %v3897_v24  ;;  %v3871_v41 = vpop.f32.mrf.mxu1  ;;  %v8985_v24 = vor.u32 %v9718_v12, %v8982_v30  ;;  %v7977_v12 = vor.u32 %v9466_v43, %v7974_v6  ;;  %v9690_v30 = vld [vmem:[#allocation3 + $0xbb4] sm:$0xf]  ;;  %v7862_v43 = vld [vmem:[#allocation3 + $0x440] sm:$0xf0] }
 0x273   : > { %v10588_v28 = vadd.f32 %v3871_v41, %v3842_v3  ;;  %v8873_v1 = vor.u32 %v9690_v30, %v8870_v0  ;;  %4283 = vmatpush.bf16.msra.mxu0 %v8085_v32  ;;  %v7865_v6 = vor.u32 %v9438_v62, %v7862_v43  ;;  %v9662_v32 = vld [vmem:[#allocation3 + $0xad4] sm:$0xf]  ;;  %v10602_v0 = vld [vmem:[#allocation5] sm:$0xff]  ;;  %v7860_v62 = vld [vmem:[#allocation3 + $0x3d0] sm:$0xf] }
 0x274   : > { %12520 = vst [vmem:[#allocation89_spill] sm:$0xff] %v10586_v38  ;;  %4073 = vmatmul.bf16.gmra.mxu0 %v10240_v49  ;;  %4102 = vmatmul.bf16.gmra.mxu1 %v10242_v51  ;;  %v8980_v38 = vld [vmem:[#allocation3 + $0xc90] sm:$0xf]  ;;  %v9452_v43 = vld [vmem:[#allocation3 + $0x43c] sm:$0xf0] }
 0x275   : > { %12521 = vst [vmem:[#allocation90_spill] sm:$0xff] %v10588_v28  ;;  %4160 = vmatmul.bf16.gmra.mxu3 %v10242_v51  ;;  %v8981_v60 = vor.u32 %v9732_v54, %v8980_v38  ;;  %4342 = vmatpush.bf16.msra.mxu2 %v7977_v12  ;;  %v9704_v54 = vld [vmem:[#allocation3 + $0xc1c] sm:$0xf0]  ;;  %v7972_v38 = vld [vmem:[#allocation3 + $0x4b0] sm:$0xf] }
 0x276   : > { %4131 = vmatmul.bf16.gmra.mxu2 %v10240_v49  ;;  %4370 = vmatpush.bf16.msra.mxu3 %v8985_v24  ;;  %v8758_v12 = vld [vmem:[#allocation3 + $0xb40] sm:$0xf0] }
 0x277   : > { %4312 = vmatpush.bf16.msra.mxu1 %v8981_v60  ;;  %v7973_v60 = vor.u32 %v9480_v29, %v7972_v38 }
 0x278   : > { %v3929_v3 = vpop.f32.mrf.mxu3 }
 0x279   : > { %v3900_v21 = vpop.f32.mrf.mxu2  ;;  %v3844_v41 = vpop.f32.mrf.mxu0  ;;  %4284 = vmatpush.bf16.msra.mxu0 %v7973_v60  ;;  %4343 = vmatpush.bf16.msra.mxu2 %v7865_v6  ;;  %v7861_v6 = vor.u32 %v9452_v43, %v7860_v62 }
 0x27a   : > { %v10594_v28 = vadd.f32 %v3929_v3, %v3900_v21  ;;  %v3873_v26 = vpop.f32.mrf.mxu1  ;;  %4371 = vmatpush.bf16.msra.mxu3 %v8873_v1  ;;  %v10608_v1 = vperm.slane %v10602_v0, 0 }
 0x27b   : > { %v10596_v15 = vadd.f32 %v3873_v26, %v3844_v41  ;;  %v8868_v26 = vld [vmem:[#allocation3 + $0xbb0] sm:$0xf] }
 0x27c   : > { %12522 = vst [vmem:[#allocation91_spill] sm:$0xff] %v10594_v28  ;;  %v8869_v28 = vor.u32 %v9704_v54, %v8868_v26  ;;  %v9676_v26 = vld [vmem:[#allocation3 + $0xb3c] sm:$0xf0] }
 0x27d   : > { %12523 = vst [vmem:[#allocation92_spill] sm:$0xff] %v10596_v15  ;;  %4285 = vmatpush.bf16.msra.mxu0 %v7861_v6  ;;  %v7638_v6 = vld [vmem:[#allocation3 + $0x280] sm:$0xf0] }
 0x27e   : > { %4313 = vmatpush.bf16.msra.mxu1 %v8869_v28  ;;  %v9410_v28 = vld [vmem:[#allocation3 + $0x2f4] sm:$0xf] }
 0x280   : > { %v3931_v24 = vpop.f32.mrf.mxu3 }
 0x281   : > { %v3902_v36 = vpop.f32.mrf.mxu2  ;;  %v3943_v21 = vpop.f32.mrf.mxu0 }
 0x282   : > { %v10598_v3 = vadd.f32 %v3931_v24, %v3902_v36  ;;  %v3972_v41 = vpop.f32.mrf.mxu1  ;;  %v8761_v36 = vor.u32 %v9662_v32, %v8758_v12  ;;  %v7750_v32 = vld [vmem:[#allocation3 + $0x360] sm:$0xf0]  ;;  %v9634_v12 = vld [vmem:[#allocation3 + $0x9f4] sm:$0xf] }
 0x283   : > { %v3973_v15 = vadd.f32 %v3972_v41, %v3943_v21  ;;  %v8756_v41 = vld [vmem:[#allocation3 + $0xad0] sm:$0xf]  ;;  %v7753_v58 = vor.u32 %v9410_v28, %v7750_v32  ;;  %v9606_v32 = vld [vmem:[#allocation3 + $0x914] sm:$0xf] }
 0x284   : > { %12524 = vst [vmem:[#allocation93_spill] sm:$0xff] %v10598_v3  ;;  %4174 = vmatmul.bf16.vlgmr.msrb.gmra.mxu0 %v10204_v45  ;;  %4203 = vmatmul.bf16.vlgmr.msrb.gmra.mxu1 %v10206_v50  ;;  %v8757_v29 = vor.u32 %v9676_v26, %v8756_v41  ;;  %v8646_v3 = vld [vmem:[#allocation3 + $0xa60] sm:$0xf0] }
 0x285   : > { %v4746_v30 = vmax.f32 %v10264_v59, %v3973_v15  ;;  %4261 = vmatmul.bf16.vlgmr.msrb.gmra.mxu3 %v10206_v50  ;;  %v10611_v59 = vperm.slane %v10602_v0, 1  ;;  %v8649_v47 = vor.u32 %v9634_v12, %v8646_v3  ;;  %4344 = vmatpush.bf16.msra.mxu2 %v7753_v58  ;;  %v8534_v12 = vld [vmem:[#allocation3 + $0x980] sm:$0xf0] }
 0x286   : > { %4232 = vmatmul.bf16.vlgmr.msrb.gmra.mxu2 %v10204_v45  ;;  %4372 = vmatpush.bf16.msra.mxu3 %v8761_v36 }
 0x287   : > { %v4890_v36 = vadd.f32 %v10608_v1, %v4746_v30  ;;  %4314 = vmatpush.bf16.msra.mxu1 %v8757_v29  ;;  %v7748_v29 = vld [vmem:[#allocation3 + $0x2f0] sm:$0xf] }
 0x288   : > { %v4030_v21 = vpop.f32.mrf.mxu3 }
 0x289   : > { %v4001_v24 = vpop.f32.mrf.mxu2  ;;  %v3945_v15 = vpop.f32.mrf.mxu0 }
 0x28a   : > { %v4031_v54 = vadd.f32 %v4030_v21, %v4001_v24  ;;  %v3974_v38 = vpop.f32.mrf.mxu1  ;;  %4373 = vmatpush.bf16.msra.mxu3 %v8649_v47  ;;  %v5002_v21 = vmax.f32 %v4890_v36, 0.0 }
 0x28b   : > { %v3975_v60 = vadd.f32 %v3974_v38, %v3945_v15 }
 0x28c   : > { %v4747_v16 = vmax.f32 %v10270_v11, %v4031_v54  ;;  %v8644_v11 = vld [vmem:[#allocation3 + $0x9f0] sm:$0xf]  ;;  %v9648_v54 = vld [vmem:[#allocation3 + $0xa5c] sm:$0xf0] }
 0x28d   : > { %v4760_v4 = vmax.f32 %v10272_v13, %v3975_v60  ;;  %v8645_v28 = vor.u32 %v9648_v54, %v8644_v11  ;;  %v9424_v13 = vld [vmem:[#allocation3 + $0x35c] sm:$0xf0]  ;;  %v9382_v60 = vld [vmem:[#allocation3 + $0x214] sm:$0xf]  ;;  %v7636_v11 = vld [vmem:[#allocation3 + $0x210] sm:$0xf] }
 0x28e   : > { %v4891_v24 = vadd.f32 %v10611_v59, %v4747_v16  ;;  %v7749_v16 = vor.u32 %v9424_v13, %v7748_v29  ;;  %v9396_v54 = vld [vmem:[#allocation3 + $0x27c] sm:$0xf0] }
 0x28f   : > { %v4904_v58 = vadd.f32 %v10608_v1, %v4760_v4  ;;  %4315 = vmatpush.bf16.msra.mxu1 %v8645_v28  ;;  %v9354_v28 = vld [vmem:[#allocation3 + $0x134] sm:$0xf] }
 0x290   : > { %v5003_v15 = vmax.f32 %v4891_v24, 0.0  ;;  %v4032_v26 = vpop.f32.mrf.mxu3  ;;  %v7641_v24 = vor.u32 %v9382_v60, %v7638_v6  ;;  %4286 = vmatpush.bf16.msra.mxu0 %v7749_v16  ;;  %v7637_v6 = vor.u32 %v9396_v54, %v7636_v11  ;;  %v9578_v16 = vld [vmem:[#allocation3 + $0x834] sm:$0xf] }
 0x291   : > { %v4003_v41 = vpop.f32.mrf.mxu2  ;;  %v3948_v38 = vpop.f32.mrf.mxu0 }
 0x292   : > { %v10617_v62 = vpack.c.bf16 %v5003_v15, %v5002_v21  ;;  %v4033_v30 = vadd.f32 %v4032_v26, %v4003_v41  ;;  %v3977_v43 = vpop.f32.mrf.mxu1  ;;  %v8537_v21 = vor.u32 %v9606_v32, %v8534_v12  ;;  %4345 = vmatpush.bf16.msra.mxu2 %v7641_v24  ;;  %v8532_v26 = vld [vmem:[#allocation3 + $0x910] sm:$0xf] }
 0x293   : > { %v3978_v3 = vadd.f32 %v3977_v43, %v3948_v38  ;;  %v9620_v38 = vld [vmem:[#allocation3 + $0x97c] sm:$0xf0] }
 0x294   : > { %v4761_v47 = vmax.f32 %v10274_v31, %v4033_v30  ;;  %4179 = vmatmul.bf16.gmra.mxu0 %v10216_v35  ;;  %4208 = vmatmul.bf16.gmra.mxu1 %v10218_v40  ;;  %v5016_v31 = vmax.f32 %v4904_v58, 0.0  ;;  %v8533_v43 = vor.u32 %v9620_v38, %v8532_v26  ;;  %v5235_v29 = vunpack.c.l.b16 %v10617_v62 }
 0x295   : > { %v4774_v36 = vmax.f32 %v10276_v33, %v3978_v3  ;;  %4266 = vmatmul.bf16.gmra.mxu3 %v10218_v40  ;;  %v5236_v58 = vunpack.c.h.b16 %v10617_v62  ;;  %4287 = vmatpush.bf16.msra.mxu0 %v7637_v6  ;;  %v9368_v62 = vld [vmem:[#allocation3 + $0x19c] sm:$0xf0]  ;;  %v9326_v6 = vld [vmem:[#allocation3 + $0x54] sm:$0xf] }
 0x296   : > { %4237 = vmatmul.bf16.gmra.mxu2 %v10216_v35  ;;  %v4905_v15 = vadd.f32 %v10611_v59, %v4761_v47  ;;  %4374 = vmatpush.bf16.msra.mxu3 %v8537_v21  ;;  %v7526_v47 = vld [vmem:[#allocation3 + $0x1a0] sm:$0xf0] }
 0x297   : > { %v4918_v32 = vadd.f32 %v10608_v1, %v4774_v36  ;;  %4316 = vmatpush.bf16.msra.mxu1 %v8533_v43  ;;  %v7529_v24 = vor.u32 %v9354_v28, %v7526_v47  ;;  %v8422_v21 = vld [vmem:[#allocation3 + $0x8a0] sm:$0xf0] }
 0x298   : > { %v5017_v4 = vmax.f32 %v4905_v15, 0.0  ;;  %v4035_v33 = vpop.f32.mrf.mxu3  ;;  %v7414_v28 = vld [vmem:[#allocation3 + $0xc0] sm:$0xf0] }
 0x299   : > { %v4006_v41 = vpop.f32.mrf.mxu2  ;;  %v3950_v30 = vpop.f32.mrf.mxu0  ;;  %4346 = vmatpush.bf16.msra.mxu2 %v7529_v24  ;;  %v8310_v24 = vld [vmem:[#allocation3 + $0x7c0] sm:$0xf0] }
 0x29a   : > { %v5121_v3 = vpack.c.bf16 %v5017_v4, %v5016_v31  ;;  %v4036_v13 = vadd.f32 %v4035_v33, %v4006_v41  ;;  %v3979_v60 = vpop.f32.mrf.mxu1  ;;  %v8425_v31 = vor.u32 %v9578_v16, %v8422_v21  ;;  %v8420_v4 = vld [vmem:[#allocation3 + $0x830] sm:$0xf]  ;;  %v9592_v41 = vld [vmem:[#allocation3 + $0x89c] sm:$0xf0]  ;;  %v7417_v16 = vor.u32 %v9326_v6, %v7414_v28  ;;  %v9523_v6 = vld [vmem:[#allocation3 + $0x67c] sm:$0xf] }
 0x29b   : > { %v3980_v12 = vadd.f32 %v3979_v60, %v3950_v30  ;;  %v7524_v33 = vld [vmem:[#allocation3 + $0x130] sm:$0xf]  ;;  %v8421_v54 = vor.u32 %v9592_v41, %v8420_v4  ;;  %v9564_v41 = vld [vmem:[#allocation3 + $0x7bc] sm:$0xf0]  ;;  %v8206_v28 = vld [vmem:[#allocation3 + $0x6e8] sm:$0xf0] }
 0x29c   : > { %v5238_v15 = vunpack.c.l.b16 %v5121_v3  ;;  %v5239_v26 = vunpack.c.h.b16 %v5121_v3  ;;  %v4775_v38 = vmax.f32 %v10282_v55, %v4036_v13  ;;  %4375 = vmatpush.bf16.msra.mxu3 %v8425_v31  ;;  %v7525_v30 = vor.u32 %v9368_v62, %v7524_v33 }
 0x29d   : > { %v4788_v11 = vmax.f32 %v10284_v57, %v3980_v12  ;;  %4317 = vmatpush.bf16.msra.mxu1 %v8421_v54  ;;  %v5030_v55 = vmax.f32 %v4918_v32, 0.0  ;;  %v9550_v12 = vld [vmem:[#allocation3 + $0x754] sm:$0xf]  ;;  %4347 = vmatpush.bf16.msra.mxu2 %v7417_v16  ;;  %v9747_v16 = vld [vmem:[#allocation3 + $0xd7c] sm:$0xf] }
 0x29e   : > { %v4919_v36 = vadd.f32 %v10611_v59, %v4775_v38  ;;  %v10633_v43 = vpack.c.b16 %v5238_v15, %v5235_v29  ;;  %v10635_v60 = vpack.c.b16 %v5239_v26, %v5236_v58  ;;  %4288 = vmatpush.bf16.msra.mxu0 %v7525_v30  ;;  %v8313_v4 = vor.u32 %v9550_v12, %v8310_v24  ;;  %v7412_v29 = vld [vmem:[#allocation3 + $0x50] sm:$0xf]  ;;  %v9340_v15 = vld [vmem:[#allocation3 + $0xbc] sm:$0xf0]  ;;  %v9102_v12 = vld [vmem:[#allocation3 + $0xde8] sm:$0xf0] }
 0x29f   : > { %v8308_v58 = vld [vmem:[#allocation3 + $0x750] sm:$0xf]  ;;  %v7413_v32 = vor.u32 %v9340_v15, %v7412_v29  ;;  %v4932_v33 = vadd.f32 %v10608_v1, %v4788_v11 }
 0x2a0   : > { %v5031_v3 = vmax.f32 %v4919_v36, 0.0  ;;  %v4037_v47 = vpop.f32.mrf.mxu3  ;;  %4376 = vmatpush.bf16.msra.mxu3 %v8313_v4  ;;  %v8309_v62 = vor.u32 %v9564_v41, %v8308_v58 }
 0x2a1   : > { %v4008_v13 = vpop.f32.mrf.mxu2  ;;  %v3953_v57 = vpop.f32.mrf.mxu0 }
 0x2a2   : > { %v5128_v21 = vpack.c.bf16 %v5031_v3, %v5030_v55  ;;  %v4038_v38 = vadd.f32 %v4037_v47, %v4008_v13  ;;  %v3982_v31 = vpop.f32.mrf.mxu1  ;;  %4289 = vmatpush.bf16.msra.mxu0 %v7413_v32  ;;  %4318 = vmatpush.bf16.msra.mxu1 %v8309_v62  ;;  %v5044_v55 = vmax.f32 %v4932_v33, 0.0 }
 0x2a3   : > { %v3983_v26 = vadd.f32 %v3982_v31, %v3953_v57  ;;  %v9105_v31 = vor.u32 %v9747_v16, %v9102_v12  ;;  %v9537_v12 = vld [vmem:[#allocation3 + $0x6e4] sm:$0xf0] }
 0x2a4   : > { %v4789_v54 = vmax.f32 %v10286_v17, %v4038_v38  ;;  %4184 = vmatmul.bf16.gmra.mxu0 %v10228_v19  ;;  %4213 = vmatmul.bf16.gmra.mxu1 %v10230_v20  ;;  %v5241_v4 = vunpack.c.l.b16 %v5128_v21  ;;  %v5242_v29 = vunpack.c.h.b16 %v5128_v21 }
 0x2a5   : > { %v4802_v36 = vmax.f32 %v10288_v22, %v3983_v26  ;;  %4271 = vmatmul.bf16.gmra.mxu3 %v10230_v20  ;;  %v8209_v22 = vor.u32 %v9523_v6, %v8206_v28  ;;  %v9100_v28 = vld [vmem:[#allocation3 + $0xd78] sm:$0xf] }
 0x2a6   : > { %4242 = vmatmul.bf16.gmra.mxu2 %v10228_v19  ;;  %v4933_v30 = vadd.f32 %v10611_v59, %v4789_v54  ;;  %4485 = vmatpush.bf16.msrb.mxu3 %v9105_v31 }
 0x2a7   : > { %v4946_v15 = vadd.f32 %v10608_v1, %v4802_v36  ;;  %4456 = vmatpush.bf16.msrb.mxu2 %v8209_v22 }
 0x2a8   : > { %v5045_v11 = vmax.f32 %v4933_v30, 0.0  ;;  %v4040_v17 = vpop.f32.mrf.mxu3 }
 0x2a9   : > { %v4011_v3 = vpop.f32.mrf.mxu2  ;;  %v3955_v13 = vpop.f32.mrf.mxu0  ;;  %v5058_v30 = vmax.f32 %v4946_v15, 0.0  ;;  %v8990_v15 = vld [vmem:[#allocation3 + $0xd08] sm:$0xf0] }
 0x2aa   : > { %v4041_v47 = vadd.f32 %v4040_v17, %v4011_v3  ;;  %v3984_v57 = vpop.f32.mrf.mxu1  ;;  %v5135_v24 = vpack.c.bf16 %v5045_v11, %v5044_v55 }
 0x2ab   : > { %v3985_v38 = vadd.f32 %v3984_v57, %v3955_v13  ;;  %v8204_v57 = vld [vmem:[#allocation3 + $0x678] sm:$0xf] }
 0x2ac   : > { %v4803_v58 = vmax.f32 %v10294_v34, %v4041_v47  ;;  %v5244_v26 = vunpack.c.l.b16 %v5135_v24  ;;  %v5245_v32 = vunpack.c.h.b16 %v5135_v24  ;;  %v9761_v47 = vld [vmem:[#allocation3 + $0xde4] sm:$0xf0]  ;;  %v9495_v24 = vld [vmem:[#allocation3 + $0x59c] sm:$0xf] }
 0x2ad   : > { %v4816_v41 = vmax.f32 %v10296_v37, %v3985_v38  ;;  %v9101_v16 = vor.u32 %v9761_v47, %v9100_v28  ;;  %v8094_v38 = vld [vmem:[#allocation3 + $0x608] sm:$0xf0]  ;;  %v8092_v28 = vld [vmem:[#allocation3 + $0x598] sm:$0xf] }
 0x2ae   : > { %v4947_v33 = vadd.f32 %v10611_v59, %v4803_v58  ;;  %v10649_v54 = vpack.c.b16 %v5244_v26, %v5241_v4  ;;  %v10651_v62 = vpack.c.b16 %v5245_v32, %v5242_v29  ;;  %v8097_v4 = vor.u32 %v9495_v24, %v8094_v38  ;;  %v9719_v29 = vld [vmem:[#allocation3 + $0xc9c] sm:$0xf]  ;;  %v7982_v38 = vld [vmem:[#allocation3 + $0x528] sm:$0xf0] }
 0x2af   : > { %v4960_v6 = vadd.f32 %v10608_v1, %v4816_v41  ;;  %4427 = vmatpush.bf16.msrb.mxu1 %v9101_v16  ;;  %v8993_v58 = vor.u32 %v9719_v29, %v8990_v15  ;;  %v9467_v24 = vld [vmem:[#allocation3 + $0x4bc] sm:$0xf] }
 0x2b0   : > { %v5059_v55 = vmax.f32 %v4947_v33, 0.0  ;;  %v4042_v21 = vpop.f32.mrf.mxu3  ;;  %4457 = vmatpush.bf16.msrb.mxu2 %v8097_v4  ;;  %v7985_v29 = vor.u32 %v9467_v24, %v7982_v38  ;;  %v9691_v15 = vld [vmem:[#allocation3 + $0xbbc] sm:$0xf]  ;;  %v8766_v24 = vld [vmem:[#allocation3 + $0xb48] sm:$0xf0]  ;;  %v10680_v38 = vperm.slane %v10602_v0, 2 }
 0x2b1   : > { %v4013_v11 = vpop.f32.mrf.mxu2  ;;  %v3958_v3 = vpop.f32.mrf.mxu0  ;;  %v5072_v26 = vmax.f32 %v4960_v6, 0.0  ;;  %4486 = vmatpush.bf16.msrb.mxu3 %v8993_v58 }
 0x2b2   : > { %v5142_v36 = vpack.c.bf16 %v5059_v55, %v5058_v30  ;;  %v4043_v17 = vadd.f32 %v4042_v21, %v4013_v11  ;;  %v3987_v34 = vpop.f32.mrf.mxu1 }
 0x2b3   : > { %v3988_v13 = vadd.f32 %v3987_v34, %v3958_v3 }
 0x2b4   : > { %v4817_v37 = vmax.f32 %v10298_v61, %v4043_v17  ;;  %4189 = vmatmul.bf16.gmra.mxu0 %v10240_v49  ;;  %4218 = vmatmul.bf16.gmra.mxu1 %v10242_v51  ;;  %v8205_v61 = vor.u32 %v9537_v12, %v8204_v57  ;;  %v5247_v3 = vunpack.c.l.b16 %v5142_v36  ;;  %v9509_v12 = vld [vmem:[#allocation3 + $0x604] sm:$0xf0] }
 0x2b5   : > { %v4830_v22 = vmax.f32 %v10300_v63, %v3988_v13  ;;  %4276 = vmatmul.bf16.gmra.mxu3 %v10242_v51  ;;  %v8988_v13 = vld [vmem:[#allocation3 + $0xc98] sm:$0xf]  ;;  %v8093_v4 = vor.u32 %v9509_v12, %v8092_v28  ;;  %4458 = vmatpush.bf16.msrb.mxu2 %v7985_v29 }
 0x2b6   : > { %4247 = vmatmul.bf16.gmra.mxu2 %v10240_v49  ;;  %v4961_v31 = vadd.f32 %v10611_v59, %v4817_v37  ;;  %4398 = vmatpush.bf16.msrb.mxu0 %v8205_v61  ;;  %v9733_v37 = vld [vmem:[#allocation3 + $0xd04] sm:$0xf0] }
 0x2b7   : > { %v4974_v17 = vadd.f32 %v10608_v1, %v4830_v22  ;;  %v8989_v16 = vor.u32 %v9733_v37, %v8988_v13  ;;  %v8878_v22 = vld [vmem:[#allocation3 + $0xc28] sm:$0xf0]  ;;  %v7980_v13 = vld [vmem:[#allocation3 + $0x4b8] sm:$0xf] }
 0x2b8   : > { %v5073_v63 = vmax.f32 %v4961_v31, 0.0  ;;  %v4045_v41 = vpop.f32.mrf.mxu3  ;;  %v5248_v31 = vunpack.c.h.b16 %v5142_v36 }
 0x2b9   : > { %v4016_v32 = vpop.f32.mrf.mxu2  ;;  %v3960_v33 = vpop.f32.mrf.mxu0  ;;  %4428 = vmatpush.bf16.msrb.mxu1 %v8989_v16  ;;  %v7870_v16 = vld [vmem:[#allocation3 + $0x448] sm:$0xf0] }
 0x2ba   : > { %v4046_v30 = vadd.f32 %v4045_v41, %v4016_v32  ;;  %v3989_v55 = vpop.f32.mrf.mxu1  ;;  %v5149_v11 = vpack.c.bf16 %v5073_v63, %v5072_v26  ;;  %v5086_v63 = vmax.f32 %v4974_v17, 0.0  ;;  %4399 = vmatpush.bf16.msrb.mxu0 %v8093_v4  ;;  %v9705_v17 = vld [vmem:[#allocation3 + $0xc24] sm:$0xf0] }
 0x2bb   : > { %v3990_v21 = vadd.f32 %v3989_v55, %v3960_v33 }
 0x2bc   : > { %v4831_v34 = vmax.f32 %v10306_v18, %v4046_v30  ;;  %v5250_v6 = vunpack.c.l.b16 %v5149_v11  ;;  %v5251_v47 = vunpack.c.h.b16 %v5149_v11  ;;  %v8881_v18 = vor.u32 %v9691_v15, %v8878_v22 }
 0x2bd   : > { %v4844_v57 = vmax.f32 %v10308_v23, %v3990_v21  ;;  %v10683_v15 = vperm.slane %v10602_v0, 3 }
 0x2be   : > { %v4975_v61 = vadd.f32 %v10611_v59, %v4831_v34  ;;  %v10665_v58 = vpack.c.b16 %v5250_v6, %v5247_v3  ;;  %v10667_v26 = vpack.c.b16 %v5251_v47, %v5248_v31  ;;  %4487 = vmatpush.bf16.msrb.mxu3 %v8881_v18  ;;  %v8876_v34 = vld [vmem:[#allocation3 + $0xbb8] sm:$0xf]  ;;  %v9481_v6 = vld [vmem:[#allocation3 + $0x524] sm:$0xf0]  ;;  %v9439_v47 = vld [vmem:[#allocation3 + $0x3dc] sm:$0xf] }
 0x2bf   : > { %v4988_v21 = vadd.f32 %v10608_v1, %v4844_v57  ;;  %v8877_v28 = vor.u32 %v9705_v17, %v8876_v34  ;;  %v7873_v1 = vor.u32 %v9439_v47, %v7870_v16  ;;  %v9663_v57 = vld [vmem:[#allocation3 + $0xadc] sm:$0xf] }
 0x2c0   : > { %v5087_v32 = vmax.f32 %v4975_v61, 0.0  ;;  %v4047_v41 = vpop.f32.mrf.mxu3 }
 0x2c1   : > { %v4018_v23 = vpop.f32.mrf.mxu2  ;;  %v4059_v33 = vpop.f32.mrf.mxu0  ;;  %4429 = vmatpush.bf16.msrb.mxu1 %v8877_v28  ;;  %v5100_v31 = vmax.f32 %v4988_v21, 0.0  ;;  %4459 = vmatpush.bf16.msrb.mxu2 %v7873_v1  ;;  %v9411_v21 = vld [vmem:[#allocation3 + $0x2fc] sm:$0xf] }
 0x2c2   : > { %v10669_v36 = vpack.c.bf16 %v5087_v32, %v5086_v63  ;;  %v4048_v30 = vadd.f32 %v4047_v41, %v4018_v23  ;;  %v4088_v55 = vpop.f32.mrf.mxu1  ;;  %v8764_v63 = vld [vmem:[#allocation3 + $0xad8] sm:$0xf]  ;;  %v9677_v32 = vld [vmem:[#allocation3 + $0xb44] sm:$0xf0]  ;;  %v9635_v28 = vld [vmem:[#allocation3 + $0x9fc] sm:$0xf] }
 0x2c3   : > { %v4089_v11 = vadd.f32 %v4088_v55, %v4059_v33  ;;  %v7868_v23 = vld [vmem:[#allocation3 + $0x3d8] sm:$0xf]  ;;  %v8765_v55 = vor.u32 %v9677_v32, %v8764_v63  ;;  %v9649_v32 = vld [vmem:[#allocation3 + $0xa64] sm:$0xf0] }
 0x2c4   : > { %v4845_v3 = vmax.f32 %v10310_v46, %v4048_v30  ;;  %4290 = vmatmul.bf16.vlgmr.msra.gmra.mxu0 %v10204_v45  ;;  %4319 = vmatmul.bf16.vlgmr.msra.gmra.mxu1 %v10206_v50  ;;  %v7981_v46 = vor.u32 %v9481_v6, %v7980_v13  ;;  %v5253_v34 = vunpack.c.l.b16 %v10669_v36  ;;  %v8654_v6 = vld [vmem:[#allocation3 + $0xa68] sm:$0xf0]  ;;  %v8652_v63 = vld [vmem:[#allocation3 + $0x9f8] sm:$0xf] }
 0x2c5   : > { %v4748_v37 = vmax.f32 %v10312_v48, %v4089_v11  ;;  %4377 = vmatmul.bf16.vlgmr.msra.gmra.mxu3 %v10206_v50  ;;  %v8769_v48 = vor.u32 %v9663_v57, %v8766_v24  ;;  %v9453_v11 = vld [vmem:[#allocation3 + $0x444] sm:$0xf0]  ;;  %4430 = vmatpush.bf16.msrb.mxu1 %v8765_v55  ;;  %v9383_v55 = vld [vmem:[#allocation3 + $0x21c] sm:$0xf] }
 0x2c6   : > { %4348 = vmatmul.bf16.vlgmr.msra.gmra.mxu2 %v10204_v45  ;;  %v4989_v12 = vadd.f32 %v10611_v59, %v4845_v3  ;;  %4400 = vmatpush.bf16.msrb.mxu0 %v7981_v46  ;;  %v7758_v3 = vld [vmem:[#allocation3 + $0x368] sm:$0xf0]  ;;  %v7869_v17 = vor.u32 %v9453_v11, %v7868_v23  ;;  %v7756_v23 = vld [vmem:[#allocation3 + $0x2f8] sm:$0xf] }
 0x2c7   : > { %4488 = vmatpush.bf16.msrb.mxu3 %v8769_v48  ;;  %v4892_v33 = vadd.f32 %v10680_v38, %v4748_v37  ;;  %v7761_v13 = vor.u32 %v9411_v21, %v7758_v3  ;;  %v5254_v37 = vunpack.c.h.b16 %v10669_v36  ;;  %v7646_v11 = vld [vmem:[#allocation3 + $0x288] sm:$0xf0] }
 0x2c8   : > { %v5101_v61 = vmax.f32 %v4989_v12, 0.0  ;;  %v4146_v29 = vpop.f32.mrf.mxu3  ;;  %v8657_v12 = vor.u32 %v9635_v28, %v8654_v6  ;;  %v7649_v3 = vor.u32 %v9383_v55, %v7646_v11  ;;  %v8540_v6 = vld [vmem:[#allocation3 + $0x918] sm:$0xf] }
 0x2c9   : > { %v4117_v4 = vpop.f32.mrf.mxu2  ;;  %v4061_v59 = vpop.f32.mrf.mxu0  ;;  %4460 = vmatpush.bf16.msrb.mxu2 %v7761_v13  ;;  %v5004_v24 = vmax.f32 %v4892_v33, 0.0  ;;  %v8653_v33 = vor.u32 %v9649_v32, %v8652_v63 }
 0x2ca   : > { %v4147_v22 = vadd.f32 %v4146_v29, %v4117_v4  ;;  %v4090_v18 = vpop.f32.mrf.mxu1  ;;  %v5163_v41 = vpack.c.bf16 %v5101_v61, %v5100_v31  ;;  %4401 = vmatpush.bf16.msrb.mxu0 %v7869_v17 }
 0x2cb   : > { %v4091_v30 = vadd.f32 %v4090_v18, %v4061_v59  ;;  %4489 = vmatpush.bf16.msrb.mxu3 %v8657_v12  ;;  %4431 = vmatpush.bf16.msrb.mxu1 %v8653_v33 }
 0x2cc   : > { %v4749_v0 = vmax.f32 %v10318_v8, %v4147_v22  ;;  %v5256_v47 = vunpack.c.l.b16 %v5163_v41  ;;  %v5257_v46 = vunpack.c.h.b16 %v5163_v41 }
 0x2cd   : > { %v4762_v16 = vmax.f32 %v10320_v10, %v4091_v30  ;;  %v9425_v30 = vld [vmem:[#allocation3 + $0x364] sm:$0xf0]  ;;  %4461 = vmatpush.bf16.msrb.mxu2 %v7649_v3  ;;  %v7532_v3 = vld [vmem:[#allocation3 + $0x138] sm:$0xf] }
 0x2ce   : > { %v4893_v1 = vadd.f32 %v10683_v15, %v4749_v0  ;;  %v10691_v57 = vpack.c.b16 %v5256_v47, %v5253_v34  ;;  %v10693_v8 = vpack.c.b16 %v5257_v46, %v5254_v37  ;;  %v9607_v34 = vld [vmem:[#allocation3 + $0x91c] sm:$0xf]  ;;  %v8542_v0 = vld [vmem:[#allocation3 + $0x988] sm:$0xf0]  ;;  %v9621_v47 = vld [vmem:[#allocation3 + $0x984] sm:$0xf0] }
 0x2cf   : > { %v4906_v22 = vadd.f32 %v10680_v38, %v4762_v16  ;;  %v8545_v17 = vor.u32 %v9607_v34, %v8542_v0  ;;  %v8541_v37 = vor.u32 %v9621_v47, %v8540_v6  ;;  %v7644_v46 = vld [vmem:[#allocation3 + $0x218] sm:$0xf]  ;;  %v9327_v47 = vld [vmem:[#allocation3 + $0x5c] sm:$0xf] }
 0x2d0   : > { %v5005_v48 = vmax.f32 %v4893_v1, 0.0  ;;  %v4148_v61 = vpop.f32.mrf.mxu3  ;;  %v9397_v1 = vld [vmem:[#allocation3 + $0x284] sm:$0xf0] }
 0x2d1   : > { %v4119_v31 = vpop.f32.mrf.mxu2  ;;  %v4064_v4 = vpop.f32.mrf.mxu0  ;;  %v5018_v13 = vmax.f32 %v4906_v22, 0.0  ;;  %4490 = vmatpush.bf16.msrb.mxu3 %v8545_v17  ;;  %4432 = vmatpush.bf16.msrb.mxu1 %v8541_v37 }
 0x2d2   : > { %v10695_v10 = vpack.c.bf16 %v5005_v48, %v5004_v24  ;;  %v4149_v29 = vadd.f32 %v4148_v61, %v4119_v31  ;;  %v4093_v59 = vpop.f32.mrf.mxu1 }
 0x2d3   : > { %v4094_v36 = vadd.f32 %v4093_v59, %v4064_v4  ;;  %v7645_v4 = vor.u32 %v9397_v1, %v7644_v46  ;;  %v7534_v59 = vld [vmem:[#allocation3 + $0x1a8] sm:$0xf0]  ;;  %v9551_v46 = vld [vmem:[#allocation3 + $0x75c] sm:$0xf] }
 0x2d4   : > { %v4763_v18 = vmax.f32 %v10322_v39, %v4149_v29  ;;  %4295 = vmatmul.bf16.gmra.mxu0 %v10216_v35  ;;  %4324 = vmatmul.bf16.gmra.mxu1 %v10218_v40  ;;  %v7757_v39 = vor.u32 %v9425_v30, %v7756_v23  ;;  %v5237_v24 = vunpack.c.l.b16 %v10695_v10  ;;  %v9355_v29 = vld [vmem:[#allocation3 + $0x13c] sm:$0xf]  ;;  %v5768_v22 = vunpack.c.h.b16 %v10695_v10  ;;  %v8430_v23 = vld [vmem:[#allocation3 + $0x8a8] sm:$0xf0]  ;;  %v9369_v10 = vld [vmem:[#allocation3 + $0x1a4] sm:$0xf0] }
 0x2d5   : > { %v4776_v41 = vmax.f32 %v10324_v42, %v4094_v36  ;;  %4382 = vmatmul.bf16.gmra.mxu3 %v10218_v40  ;;  %v9579_v36 = vld [vmem:[#allocation3 + $0x83c] sm:$0xf]  ;;  %v7537_v32 = vor.u32 %v9355_v29, %v7534_v59  ;;  %v7533_v17 = vor.u32 %v9369_v10, %v7532_v3  ;;  %v8318_v1 = vld [vmem:[#allocation3 + $0x7c8] sm:$0xf0]  ;;  %v9341_v29 = vld [vmem:[#allocation3 + $0xc4] sm:$0xf0] }
 0x2d6   : > { %4353 = vmatmul.bf16.gmra.mxu2 %v10216_v35  ;;  %v4907_v21 = vadd.f32 %v10683_v15, %v4763_v18  ;;  %4402 = vmatpush.bf16.msrb.mxu0 %v7757_v39  ;;  %v8433_v11 = vor.u32 %v9579_v36, %v8430_v23  ;;  %v9593_v39 = vld [vmem:[#allocation3 + $0x8a4] sm:$0xf0]  ;;  %v8316_v59 = vld [vmem:[#allocation3 + $0x758] sm:$0xf]  ;;  %v9524_v10 = vld [vmem:[#allocation3 + $0x684] sm:$0xf] }
 0x2d7   : > { %v4920_v18 = vadd.f32 %v10680_v38, %v4776_v41  ;;  %4462 = vmatpush.bf16.msrb.mxu2 %v7537_v32 }
 0x2d8   : > { %v5019_v42 = vmax.f32 %v4907_v21, 0.0  ;;  %v4151_v16 = vpop.f32.mrf.mxu3  ;;  %v8428_v21 = vld [vmem:[#allocation3 + $0x838] sm:$0xf]  ;;  %4491 = vmatpush.bf16.msrb.mxu3 %v8433_v11 }
 0x2d9   : > { %v4122_v28 = vpop.f32.mrf.mxu2  ;;  %v4066_v12 = vpop.f32.mrf.mxu0  ;;  %v8429_v0 = vor.u32 %v9593_v39, %v8428_v21 }
 0x2da   : > { %v5122_v48 = vpack.c.bf16 %v5019_v42, %v5018_v13  ;;  %v4152_v31 = vadd.f32 %v4151_v16, %v4122_v28  ;;  %v4095_v61 = vpop.f32.mrf.mxu1  ;;  %4403 = vmatpush.bf16.msrb.mxu0 %v7645_v4  ;;  %v7422_v16 = vld [vmem:[#allocation3 + $0xc8] sm:$0xf0]  ;;  %v8321_v4 = vor.u32 %v9551_v46, %v8318_v1 }
 0x2db   : > { %v4096_v63 = vadd.f32 %v4095_v61, %v4066_v12  ;;  %4433 = vmatpush.bf16.msrb.mxu1 %v8429_v0  ;;  %v7425_v37 = vor.u32 %v9327_v47, %v7422_v16 }
 0x2dc   : > { %v5240_v33 = vunpack.c.l.b16 %v5122_v48  ;;  %v5770_v30 = vunpack.c.h.b16 %v5122_v48  ;;  %v4777_v55 = vmax.f32 %v10330_v5, %v4152_v31  ;;  %v5032_v5 = vmax.f32 %v4920_v18, 0.0  ;;  %v9565_v18 = vld [vmem:[#allocation3 + $0x7c4] sm:$0xf0]  ;;  %4492 = vmatpush.bf16.msrb.mxu3 %v8321_v4 }
 0x2dd   : > { %v4790_v34 = vmax.f32 %v10332_v7, %v4096_v63  ;;  %4463 = vmatpush.bf16.msrb.mxu2 %v7425_v37  ;;  %v8317_v23 = vor.u32 %v9565_v18, %v8316_v59 }
 0x2de   : > { %v4921_v41 = vadd.f32 %v10683_v15, %v4777_v55  ;;  %v10711_v13 = vpack.c.b16 %v5240_v33, %v5237_v24  ;;  %v10713_v42 = vpack.c.b16 %v5770_v30, %v5768_v22  ;;  %4404 = vmatpush.bf16.msrb.mxu0 %v7533_v17  ;;  %v7420_v24 = vld [vmem:[#allocation3 + $0x58] sm:$0xf] }
 0x2df   : > { %v7421_v22 = vor.u32 %v9341_v29, %v7420_v24  ;;  %v4934_v63 = vadd.f32 %v10680_v38, %v4790_v34  ;;  %4434 = vmatpush.bf16.msrb.mxu1 %v8317_v23  ;;  %v9108_v23 = vld [vmem:[#allocation3 + $0xd80] sm:$0xf] }
 0x2e0   : > { %12525 = vst [vmem:[#allocation94_spill] sm:$0xff] %v10713_v42  ;;  %v5033_v28 = vmax.f32 %v4921_v41, 0.0  ;;  %v4153_v12 = vpop.f32.mrf.mxu3  ;;  %v9748_v41 = vld [vmem:[#allocation3 + $0xd84] sm:$0xf] }
 0x2e1   : > { %v4124_v6 = vpop.f32.mrf.mxu2  ;;  %v4069_v7 = vpop.f32.mrf.mxu0  ;;  %v5046_v55 = vmax.f32 %v4934_v63, 0.0 }
 0x2e2   : > { %v5129_v48 = vpack.c.bf16 %v5033_v28, %v5032_v5  ;;  %v4154_v31 = vadd.f32 %v4153_v12, %v4124_v6  ;;  %v4098_v61 = vpop.f32.mrf.mxu1  ;;  %4405 = vmatpush.bf16.msrb.mxu0 %v7421_v22  ;;  %v9110_v6 = vld [vmem:[#allocation3 + $0xdf0] sm:$0xf0] }
 0x2e3   : > { %v4099_v36 = vadd.f32 %v4098_v61, %v4069_v7  ;;  %v9113_v12 = vor.u32 %v9748_v41, %v9110_v6 }
 0x2e4   : > { %v4791_v32 = vmax.f32 %v10334_v52, %v4154_v31  ;;  %4300 = vmatmul.bf16.gmra.mxu0 %v10228_v19  ;;  %4329 = vmatmul.bf16.gmra.mxu1 %v10230_v20  ;;  %v5243_v17 = vunpack.c.l.b16 %v5129_v48  ;;  %v5772_v46 = vunpack.c.h.b16 %v5129_v48 }
 0x2e5   : > { %v4804_v33 = vmax.f32 %v10336_v56, %v4099_v36  ;;  %4387 = vmatmul.bf16.gmra.mxu3 %v10230_v20  ;;  %v8214_v56 = vld [vmem:[#allocation3 + $0x6f0] sm:$0xf0] }
 0x2e6   : > { %4358 = vmatmul.bf16.gmra.mxu2 %v10228_v19  ;;  %v4935_v30 = vadd.f32 %v10683_v15, %v4791_v32  ;;  %v8217_v28 = vor.u32 %v9524_v10, %v8214_v56  ;;  %4601 = vmatpush.bf16.msra.mxu3 %v9113_v12  ;;  %v8998_v10 = vld [vmem:[#allocation3 + $0xd10] sm:$0xf0] }
 0x2e7   : > { %v4948_v47 = vadd.f32 %v10680_v38, %v4804_v33  ;;  %v9762_v33 = vld [vmem:[#allocation3 + $0xdec] sm:$0xf0] }
 0x2e8   : > { %v5047_v11 = vmax.f32 %v4935_v30, 0.0  ;;  %v4156_v52 = vpop.f32.mrf.mxu3  ;;  %4572 = vmatpush.bf16.msra.mxu2 %v8217_v28  ;;  %v8212_v30 = vld [vmem:[#allocation3 + $0x680] sm:$0xf] }
 0x2e9   : > { %v4127_v21 = vpop.f32.mrf.mxu2  ;;  %v4071_v39 = vpop.f32.mrf.mxu0  ;;  %v5060_v24 = vmax.f32 %v4948_v47, 0.0 }
 0x2ea   : > { %v5136_v3 = vpack.c.bf16 %v5047_v11, %v5046_v55  ;;  %v4157_v34 = vadd.f32 %v4156_v52, %v4127_v21  ;;  %v4100_v0 = vpop.f32.mrf.mxu1  ;;  %v9109_v11 = vor.u32 %v9762_v33, %v9108_v23  ;;  %v9538_v21 = vld [vmem:[#allocation3 + $0x6ec] sm:$0xf0]  ;;  %v9496_v52 = vld [vmem:[#allocation3 + $0x5a4] sm:$0xf] }
 0x2eb   : > { %v4101_v5 = vadd.f32 %v4100_v0, %v4071_v39  ;;  %v8102_v39 = vld [vmem:[#allocation3 + $0x610] sm:$0xf0]  ;;  %v9720_v0 = vld [vmem:[#allocation3 + $0xca4] sm:$0xf] }
 0x2ec   : > { %v4805_v16 = vmax.f32 %v10342_v9, %v4157_v34  ;;  %v5246_v7 = vunpack.c.l.b16 %v5136_v3  ;;  %v5774_v1 = vunpack.c.h.b16 %v5136_v3  ;;  %v8105_v34 = vor.u32 %v9496_v52, %v8102_v39  ;;  %4543 = vmatpush.bf16.msra.mxu1 %v9109_v11 }
 0x2ed   : > { %v4818_v37 = vmax.f32 %v10344_v14, %v4101_v5  ;;  %v9001_v56 = vor.u32 %v9720_v0, %v8998_v10 }
 0x2ee   : > { %v4949_v31 = vadd.f32 %v10683_v15, %v4805_v16  ;;  %v10727_v61 = vpack.c.b16 %v5246_v7, %v5243_v17  ;;  %v10729_v4 = vpack.c.b16 %v5774_v1, %v5772_v46  ;;  %4573 = vmatpush.bf16.msra.mxu2 %v8105_v34  ;;  %v8996_v1 = vld [vmem:[#allocation3 + $0xca0] sm:$0xf] }
 0x2ef   : > { %v4962_v14 = vadd.f32 %v10680_v38, %v4818_v37  ;;  %4602 = vmatpush.bf16.msra.mxu3 %v9001_v56 }
 0x2f0   : > { %12526 = vst [vmem:[#allocation95_spill] sm:$0xff] %v10729_v4  ;;  %v5061_v29 = vmax.f32 %v4949_v31, 0.0  ;;  %v4158_v36 = vpop.f32.mrf.mxu3  ;;  %v9734_v31 = vld [vmem:[#allocation3 + $0xd0c] sm:$0xf0] }
 0x2f1   : > { %v4129_v59 = vpop.f32.mrf.mxu2  ;;  %v4074_v22 = vpop.f32.mrf.mxu0  ;;  %v5074_v41 = vmax.f32 %v4962_v14, 0.0 }
 0x2f2   : > { %v5143_v9 = vpack.c.bf16 %v5061_v29, %v5060_v24  ;;  %v4159_v18 = vadd.f32 %v4158_v36, %v4129_v59  ;;  %v4103_v63 = vpop.f32.mrf.mxu1  ;;  %v8100_v24 = vld [vmem:[#allocation3 + $0x5a0] sm:$0xf] }
 0x2f3   : > { %v4104_v32 = vadd.f32 %v4103_v63, %v4074_v22  ;;  %v8997_v22 = vor.u32 %v9734_v31, %v8996_v1  ;;  %v9468_v63 = vld [vmem:[#allocation3 + $0x4c4] sm:$0xf]  ;;  %v8774_v1 = vld [vmem:[#allocation3 + $0xb50] sm:$0xf0] }
 0x2f4   : > { %v4819_v48 = vmax.f32 %v10346_v44, %v4159_v18  ;;  %4305 = vmatmul.bf16.gmra.mxu0 %v10240_v49  ;;  %4334 = vmatmul.bf16.gmra.mxu1 %v10242_v51  ;;  %v8213_v44 = vor.u32 %v9538_v21, %v8212_v30  ;;  %v5249_v12 = vunpack.c.l.b16 %v5143_v9  ;;  %v9510_v18 = vld [vmem:[#allocation3 + $0x60c] sm:$0xf0]  ;;  %v5776_v14 = vunpack.c.h.b16 %v5143_v9  ;;  %v9692_v30 = vld [vmem:[#allocation3 + $0xbc4] sm:$0xf] }
 0x2f5   : > { %v4832_v55 = vmax.f32 %v10348_v53, %v4104_v32  ;;  %4392 = vmatmul.bf16.gmra.mxu3 %v10242_v51  ;;  %v7990_v32 = vld [vmem:[#allocation3 + $0x530] sm:$0xf0]  ;;  %v8101_v23 = vor.u32 %v9510_v18, %v8100_v24  ;;  %4544 = vmatpush.bf16.msra.mxu1 %v8997_v22  ;;  %v10757_v31 = vld [vmem:[#allocation5] sm:$0xff] }
 0x2f6   : > { %4363 = vmatmul.bf16.gmra.mxu2 %v10240_v49  ;;  %v4963_v3 = vadd.f32 %v10683_v15, %v4819_v48  ;;  %4514 = vmatpush.bf16.msra.mxu0 %v8213_v44  ;;  %v7993_v33 = vor.u32 %v9468_v63, %v7990_v32  ;;  %v10760_v24 = vperm.slane %v10757_v31, 4 }
 0x2f7   : > { %v4976_v37 = vadd.f32 %v10680_v38, %v4832_v55  ;;  %v8886_v55 = vld [vmem:[#allocation3 + $0xc30] sm:$0xf0] }
 0x2f8   : > { %v5075_v53 = vmax.f32 %v4963_v3, 0.0  ;;  %v4161_v5 = vpop.f32.mrf.mxu3  ;;  %4574 = vmatpush.bf16.msra.mxu2 %v7993_v33  ;;  %v9678_v33 = vld [vmem:[#allocation3 + $0xb4c] sm:$0xf0] }
 0x2f9   : > { %v4132_v17 = vpop.f32.mrf.mxu2  ;;  %v4076_v28 = vpop.f32.mrf.mxu0  ;;  %v5088_v52 = vmax.f32 %v4976_v37, 0.0 }
 0x2fa   : > { %v5150_v6 = vpack.c.bf16 %v5075_v53, %v5074_v41  ;;  %v4162_v47 = vadd.f32 %v4161_v5, %v4132_v17  ;;  %v4105_v16 = vpop.f32.mrf.mxu1  ;;  %4515 = vmatpush.bf16.msra.mxu0 %v8101_v23  ;;  %v8884_v53 = vld [vmem:[#allocation3 + $0xbc0] sm:$0xf]  ;;  %v9706_v17 = vld [vmem:[#allocation3 + $0xc2c] sm:$0xf0] }
 0x2fb   : > { %v4106_v7 = vadd.f32 %v4105_v16, %v4076_v28  ;;  %v7988_v5 = vld [vmem:[#allocation3 + $0x4c0] sm:$0xf]  ;;  %v12528_v28 = vld [vmem:[#allocation14_spill] sm:$0xff]  ;;  %v9482_v16 = vld [vmem:[#allocation3 + $0x52c] sm:$0xf0] }
 0x2fc   : > { %v4833_v46 = vmax.f32 %v10354_v25, %v4162_v47  ;;  %v5252_v29 = vunpack.c.l.b16 %v5150_v6  ;;  %v5778_v59 = vunpack.c.h.b16 %v5150_v6  ;;  %v8889_v25 = vor.u32 %v9692_v30, %v8886_v55  ;;  %v8772_v23 = vld [vmem:[#allocation3 + $0xae0] sm:$0xf] }
 0x2fd   : > { %v4846_v36 = vmax.f32 %v10356_v27, %v4106_v7  ;;  %v8885_v47 = vor.u32 %v9706_v17, %v8884_v53  ;;  %v7878_v7 = vld [vmem:[#allocation3 + $0x450] sm:$0xf0]  ;;  %v7876_v30 = vld [vmem:[#allocation3 + $0x3e0] sm:$0xf] }
 0x2fe   : > { %v4977_v48 = vadd.f32 %v10683_v15, %v4833_v46  ;;  %v10743_v11 = vpack.c.b16 %v5252_v29, %v5249_v12  ;;  %v10745_v21 = vpack.c.b16 %v5778_v59, %v5776_v14  ;;  %4603 = vmatpush.bf16.msra.mxu3 %v8889_v25  ;;  %v9440_v12 = vld [vmem:[#allocation3 + $0x3e4] sm:$0xf]  ;;  %v8662_v53 = vld [vmem:[#allocation3 + $0xa70] sm:$0xf0] }
 0x2ff   : > { %v4990_v56 = vadd.f32 %v10680_v38, %v4846_v36  ;;  %v7881_v38 = vor.u32 %v9440_v12, %v7878_v7  ;;  %v9664_v46 = vld [vmem:[#allocation3 + $0xae4] sm:$0xf]  ;;  %4545 = vmatpush.bf16.msra.mxu1 %v8885_v47 }
 0x300   : > { %12527 = vst [vmem:[#allocation96_spill] sm:$0xff] %v10745_v21  ;;  %v5089_v39 = vmax.f32 %v4977_v48, 0.0  ;;  %v4163_v3 = vpop.f32.mrf.mxu3  ;;  %v8777_v29 = vor.u32 %v9664_v46, %v8774_v1 }
 0x301   : > { %v4134_v27 = vpop.f32.mrf.mxu2  ;;  %v4175_v44 = vpop.f32.mrf.mxu0  ;;  %v5102_v59 = vmax.f32 %v4990_v56, 0.0  ;;  %4575 = vmatpush.bf16.msra.mxu2 %v7881_v38 }
 0x302   : > { %v10747_v9 = vpack.c.bf16 %v5089_v39, %v5088_v52  ;;  %v4164_v34 = vadd.f32 %v4163_v3, %v4134_v27  ;;  %v4204_v0 = vpop.f32.mrf.mxu1  ;;  %4604 = vmatpush.bf16.msra.mxu3 %v8777_v29  ;;  %v8773_v39 = vor.u32 %v9678_v33, %v8772_v23  ;;  %v9454_v27 = vld [vmem:[#allocation3 + $0x44c] sm:$0xf0]  ;;  %v9412_v3 = vld [vmem:[#allocation3 + $0x304] sm:$0xf]  ;;  %v7764_v23 = vld [vmem:[#allocation3 + $0x300] sm:$0xf] }
 0x303   : > { %v4205_v10 = vadd.f32 %v4204_v0, %v4175_v44  ;;  %v7766_v44 = vld [vmem:[#allocation3 + $0x370] sm:$0xf0] }
 0x304   : > { %v4847_v41 = vmax.f32 %v10358_v2, %v4164_v34  ;;  %4406 = vmatmul.bf16.vlgmr.msrb.gmra.mxu0 %v10204_v45  ;;  %4435 = vmatmul.bf16.vlgmr.msrb.gmra.mxu1 %v10206_v50  ;;  %v7989_v2 = vor.u32 %v9482_v16, %v7988_v5  ;;  %v5255_v55 = vunpack.c.l.b16 %v10747_v9  ;;  %v12529_v34 = vld [vmem:[#allocation15_spill] sm:$0xff]  ;;  %v7769_v56 = vor.u32 %v9412_v3, %v7766_v44  ;;  %v12530_v5 = vld [vmem:[#allocation16_spill] sm:$0xff]  ;;  %v12533_v33 = vld [vmem:[#allocation18_spill] sm:$0xff] }
 0x305   : > { %v4750_v6 = vmax.f32 %v12528_v28, %v4205_v10  ;;  %4493 = vmatmul.bf16.vlgmr.msrb.gmra.mxu3 %v10206_v50  ;;  %v7877_v10 = vor.u32 %v9454_v27, %v7876_v30  ;;  %4546 = vmatpush.bf16.msra.mxu1 %v8773_v39  ;;  %v5780_v16 = vunpack.c.h.b16 %v10747_v9  ;;  %v7654_v39 = vld [vmem:[#allocation3 + $0x290] sm:$0xf0] }
 0x306   : > { %4464 = vmatmul.bf16.vlgmr.msrb.gmra.mxu2 %v10204_v45  ;;  %v4991_v37 = vadd.f32 %v10683_v15, %v4847_v41  ;;  %4516 = vmatpush.bf16.msra.mxu0 %v7989_v2  ;;  %v10763_v15 = vperm.slane %v10757_v31, 5  ;;  %v9636_v41 = vld [vmem:[#allocation3 + $0xa04] sm:$0xf] }
 0x307   : > { %v4894_v25 = vadd.f32 %v10760_v24, %v4750_v6  ;;  %v8665_v47 = vor.u32 %v9636_v41, %v8662_v53  ;;  %4576 = vmatpush.bf16.msra.mxu2 %v7769_v56 }
 0x308   : > { %v5103_v36 = vmax.f32 %v4991_v37, 0.0  ;;  %v4262_v18 = vpop.f32.mrf.mxu3 }
 0x309   : > { %v4233_v22 = vpop.f32.mrf.mxu2  ;;  %v4177_v63 = vpop.f32.mrf.mxu0  ;;  %4605 = vmatpush.bf16.msra.mxu3 %v8665_v47  ;;  %v5006_v2 = vmax.f32 %v4894_v25, 0.0  ;;  %v9426_v25 = vld [vmem:[#allocation3 + $0x36c] sm:$0xf0] }
 0x30a   : > { %v5164_v32 = vpack.c.bf16 %v5103_v36, %v5102_v59  ;;  %v4263_v14 = vadd.f32 %v4262_v18, %v4233_v22  ;;  %v4206_v48 = vpop.f32.mrf.mxu1  ;;  %4517 = vmatpush.bf16.msra.mxu0 %v7877_v10  ;;  %v7765_v3 = vor.u32 %v9426_v25, %v7764_v23 }
 0x30b   : > { %v4207_v52 = vadd.f32 %v4206_v48, %v4177_v63  ;;  %v12532_v63 = vld [vmem:[#allocation17_spill] sm:$0xff] }
 0x30c   : > { %v4751_v0 = vmax.f32 %v12529_v34, %v4263_v14  ;;  %v5258_v17 = vunpack.c.l.b16 %v5164_v32  ;;  %v5782_v12 = vunpack.c.h.b16 %v5164_v32  ;;  %v8660_v14 = vld [vmem:[#allocation3 + $0xa00] sm:$0xf]  ;;  %v9650_v48 = vld [vmem:[#allocation3 + $0xa6c] sm:$0xf0]  ;;  %v9608_v34 = vld [vmem:[#allocation3 + $0x924] sm:$0xf] }
 0x30d   : > { %v4764_v28 = vmax.f32 %v12530_v5, %v4207_v52  ;;  %v9384_v52 = vld [vmem:[#allocation3 + $0x224] sm:$0xf]  ;;  %v9622_v5 = vld [vmem:[#allocation3 + $0x98c] sm:$0xf0] }
 0x30e   : > { %v4895_v6 = vadd.f32 %v10763_v15, %v4751_v0  ;;  %v10771_v7 = vpack.c.b16 %v5258_v17, %v5255_v55  ;;  %v10773_v37 = vpack.c.b16 %v5782_v12, %v5780_v16  ;;  %v8661_v55 = vor.u32 %v9650_v48, %v8660_v14  ;;  %v8550_v0 = vld [vmem:[#allocation3 + $0x990] sm:$0xf0]  ;;  %4518 = vmatpush.bf16.msra.mxu0 %v7765_v3  ;;  %v8548_v17 = vld [vmem:[#allocation3 + $0x920] sm:$0xf] }
 0x30f   : > { %v4908_v18 = vadd.f32 %v10760_v24, %v4764_v28  ;;  %v7657_v44 = vor.u32 %v9384_v52, %v7654_v39  ;;  %v8553_v10 = vor.u32 %v9608_v34, %v8550_v0  ;;  %v8549_v16 = vor.u32 %v9622_v5, %v8548_v17  ;;  %v7652_v12 = vld [vmem:[#allocation3 + $0x220] sm:$0xf]  ;;  %v8438_v48 = vld [vmem:[#allocation3 + $0x8b0] sm:$0xf0] }
 0x310   : > { %12531 = vst [vmem:[#allocation14_spill] sm:$0xff] %v10773_v37  ;;  %v5007_v38 = vmax.f32 %v4895_v6, 0.0  ;;  %v4264_v1 = vpop.f32.mrf.mxu3  ;;  %4547 = vmatpush.bf16.msra.mxu1 %v8661_v55  ;;  %v9398_v6 = vld [vmem:[#allocation3 + $0x28c] sm:$0xf0]  ;;  %v12534_v55 = vld [vmem:[#allocation19_spill] sm:$0xff] }
 0x311   : > { %v4235_v46 = vpop.f32.mrf.mxu2  ;;  %v4180_v29 = vpop.f32.mrf.mxu0  ;;  %v5020_v56 = vmax.f32 %v4908_v18, 0.0  ;;  %4577 = vmatpush.bf16.msra.mxu2 %v7657_v44  ;;  %4606 = vmatpush.bf16.msra.mxu3 %v8553_v10  ;;  %v8436_v39 = vld [vmem:[#allocation3 + $0x840] sm:$0xf]  ;;  %v12535_v44 = vld [vmem:[#allocation20_spill] sm:$0xff] }
 0x312   : > { %v10775_v59 = vpack.c.bf16 %v5007_v38, %v5006_v2  ;;  %v4265_v36 = vadd.f32 %v4264_v1, %v4235_v46  ;;  %v4209_v22 = vpop.f32.mrf.mxu1  ;;  %v7540_v3 = vld [vmem:[#allocation3 + $0x140] sm:$0xf] }
 0x313   : > { %v4210_v9 = vadd.f32 %v4209_v22, %v4180_v29  ;;  %v7653_v29 = vor.u32 %v9398_v6, %v7652_v12  ;;  %v7542_v22 = vld [vmem:[#allocation3 + $0x1b0] sm:$0xf0]  ;;  %v9766_v37 = vld [vmem:[#allocation7 + $0x14] sm:$0xf] }
 0x314   : > { %v4765_v32 = vmax.f32 %v12532_v63, %v4265_v36  ;;  %4411 = vmatmul.bf16.gmra.mxu0 %v10216_v35  ;;  %4440 = vmatmul.bf16.gmra.mxu1 %v10218_v40  ;;  %v5769_v2 = vunpack.c.l.b16 %v10775_v59  ;;  %v9356_v36 = vld [vmem:[#allocation3 + $0x144] sm:$0xf]  ;;  %v6050_v18 = vunpack.c.h.b16 %v10775_v59  ;;  %v9370_v59 = vld [vmem:[#allocation3 + $0x1ac] sm:$0xf0] }
 0x315   : > { %v4778_v30 = vmax.f32 %v12533_v33, %v4210_v9  ;;  %4498 = vmatmul.bf16.gmra.mxu3 %v10218_v40  ;;  %v9580_v9 = vld [vmem:[#allocation3 + $0x844] sm:$0xf]  ;;  %4548 = vmatpush.bf16.msra.mxu1 %v8549_v16  ;;  %v7545_v14 = vor.u32 %v9356_v36, %v7542_v22  ;;  %v7541_v10 = vor.u32 %v9370_v59, %v7540_v3 }
 0x316   : > { %4469 = vmatmul.bf16.gmra.mxu2 %v10216_v35  ;;  %v4909_v27 = vadd.f32 %v10763_v15, %v4765_v32  ;;  %4519 = vmatpush.bf16.msra.mxu0 %v7653_v29  ;;  %v8441_v52 = vor.u32 %v9580_v9, %v8438_v48  ;;  %v9342_v9 = vld [vmem:[#allocation3 + $0xcc] sm:$0xf0] }
 0x317   : > { %v4922_v63 = vadd.f32 %v10760_v24, %v4778_v30  ;;  %4578 = vmatpush.bf16.msra.mxu2 %v7545_v14  ;;  %v9566_v14 = vld [vmem:[#allocation3 + $0x7cc] sm:$0xf0] }
 0x318   : > { %v5021_v41 = vmax.f32 %v4909_v27, 0.0  ;;  %v4267_v28 = vpop.f32.mrf.mxu3  ;;  %v9594_v27 = vld [vmem:[#allocation3 + $0x8ac] sm:$0xf0]  ;;  %4607 = vmatpush.bf16.msra.mxu3 %v8441_v52 }
 0x319   : > { %v4238_v53 = vpop.f32.mrf.mxu2  ;;  %v4182_v47 = vpop.f32.mrf.mxu0  ;;  %v8437_v0 = vor.u32 %v9594_v27, %v8436_v39 }
 0x31a   : > { %v5123_v38 = vpack.c.bf16 %v5021_v41, %v5020_v56  ;;  %v4268_v46 = vadd.f32 %v4267_v28, %v4238_v53  ;;  %v4211_v1 = vpop.f32.mrf.mxu1  ;;  %v5034_v53 = vmax.f32 %v4922_v63, 0.0  ;;  %4520 = vmatpush.bf16.msra.mxu0 %v7541_v10  ;;  %v9328_v28 = vld [vmem:[#allocation3 + $0x64] sm:$0xf] }
 0x31b   : > { %v4212_v32 = vadd.f32 %v4211_v1, %v4182_v47  ;;  %4549 = vmatpush.bf16.msra.mxu1 %v8437_v0  ;;  %v7430_v47 = vld [vmem:[#allocation3 + $0xd0] sm:$0xf0] }
 0x31c   : > { %v5771_v23 = vunpack.c.l.b16 %v5123_v38  ;;  %v6052_v33 = vunpack.c.h.b16 %v5123_v38  ;;  %v4779_v25 = vmax.f32 %v12534_v55, %v4268_v46  ;;  %v7433_v6 = vor.u32 %v9328_v28, %v7430_v47  ;;  %v9552_v38 = vld [vmem:[#allocation3 + $0x764] sm:$0xf]  ;;  %v8326_v46 = vld [vmem:[#allocation3 + $0x7d0] sm:$0xf0] }
 0x31d   : > { %v4792_v34 = vmax.f32 %v12535_v44, %v4212_v32  ;;  %v8329_v22 = vor.u32 %v9552_v38, %v8326_v46  ;;  %v12540_v38 = vld [vmem:[#allocation23_spill] sm:$0xff] }
 0x31e   : > { %v4923_v30 = vadd.f32 %v10763_v15, %v4779_v25  ;;  %v10791_v56 = vpack.c.b16 %v5771_v23, %v5769_v2  ;;  %v10793_v41 = vpack.c.b16 %v6052_v33, %v6050_v18  ;;  %v7428_v2 = vld [vmem:[#allocation3 + $0x60] sm:$0xf]  ;;  %4579 = vmatpush.bf16.msra.mxu2 %v7433_v6  ;;  %v12538_v23 = vld [vmem:[#allocation21_spill] sm:$0xff]  ;;  %v12539_v25 = vld [vmem:[#allocation22_spill] sm:$0xff] }
 0x31f   : > { %v8324_v18 = vld [vmem:[#allocation3 + $0x760] sm:$0xf]  ;;  %v7429_v63 = vor.u32 %v9342_v9, %v7428_v2  ;;  %v4936_v48 = vadd.f32 %v10760_v24, %v4792_v34  ;;  %4608 = vmatpush.bf16.msra.mxu3 %v8329_v22  ;;  %v12541_v22 = vld [vmem:[#allocation24_spill] sm:$0xff] }
 0x320   : > { %12536 = vst [vmem:[#allocation15_spill] sm:$0xff] %v10791_v56  ;;  %v5035_v17 = vmax.f32 %v4923_v30, 0.0  ;;  %v4269_v16 = vpop.f32.mrf.mxu3  ;;  %v8325_v55 = vor.u32 %v9566_v14, %v8324_v18 }
 0x321   : > { %12537 = vst [vmem:[#allocation16_spill] sm:$0xff] %v10793_v41  ;;  %v4240_v5 = vpop.f32.mrf.mxu2  ;;  %v4185_v12 = vpop.f32.mrf.mxu0  ;;  %4521 = vmatpush.bf16.msra.mxu0 %v7429_v63  ;;  %v5048_v27 = vmax.f32 %v4936_v48, 0.0  ;;  %v12587_v41 = vld [vmem:[#allocation47_spill] sm:$0xff] }
 0x322   : > { %v5130_v1 = vpack.c.bf16 %v5035_v17, %v5034_v53  ;;  %v4270_v29 = vadd.f32 %v4269_v16, %v4240_v5  ;;  %v4214_v36 = vpop.f32.mrf.mxu1  ;;  %4550 = vmatpush.bf16.msra.mxu1 %v8325_v55  ;;  %v9525_v53 = vld [vmem:[#allocation3 + $0x68c] sm:$0xf]  ;;  %v8222_v17 = vld [vmem:[#allocation3 + $0x6f8] sm:$0xf0] }
 0x323   : > { %v4215_v32 = vadd.f32 %v4214_v36, %v4185_v12  ;;  %v9749_v5 = vld [vmem:[#allocation3 + $0xd8c] sm:$0xf]  ;;  %v8225_v16 = vor.u32 %v9525_v53, %v8222_v17  ;;  %v9118_v12 = vld [vmem:[#allocation3 + $0xdf8] sm:$0xf0] }
 0x324   : > { %v4793_v33 = vmax.f32 %v12538_v23, %v4270_v29  ;;  %4416 = vmatmul.bf16.gmra.mxu0 %v10228_v19  ;;  %4445 = vmatmul.bf16.gmra.mxu1 %v10230_v20  ;;  %v5773_v28 = vunpack.c.l.b16 %v5130_v1  ;;  %v9121_v29 = vor.u32 %v9749_v5, %v9118_v12  ;;  %v6054_v9 = vunpack.c.h.b16 %v5130_v1  ;;  %v12544_v1 = vld [vmem:[#allocation25_spill] sm:$0xff]  ;;  %v9539_v5 = vld [vmem:[#allocation3 + $0x6f4] sm:$0xf0] }
 0x325   : > { %v4806_v52 = vmax.f32 %v12539_v25, %v4215_v32  ;;  %4503 = vmatmul.bf16.gmra.mxu3 %v10230_v20  ;;  %4688 = vmatpush.bf16.msrb.mxu2 %v8225_v16 }
 0x326   : > { %4474 = vmatmul.bf16.gmra.mxu2 %v10228_v19  ;;  %v4937_v39 = vadd.f32 %v10763_v15, %v4793_v33  ;;  %4717 = vmatpush.bf16.msrb.mxu3 %v9121_v29 }
 0x327   : > { %v4950_v6 = vadd.f32 %v10760_v24, %v4806_v52 }
 0x328   : > { %v5049_v3 = vmax.f32 %v4937_v39, 0.0  ;;  %v4272_v34 = vpop.f32.mrf.mxu3 }
 0x329   : > { %v4243_v44 = vpop.f32.mrf.mxu2  ;;  %v4187_v0 = vpop.f32.mrf.mxu0  ;;  %v5062_v48 = vmax.f32 %v4950_v6, 0.0 }
 0x32a   : > { %v5137_v59 = vpack.c.bf16 %v5049_v3, %v5048_v27  ;;  %v4273_v30 = vadd.f32 %v4272_v34, %v4243_v44  ;;  %v4216_v10 = vpop.f32.mrf.mxu1 }
 0x32b   : > { %v4217_v47 = vadd.f32 %v4216_v10, %v4187_v0  ;;  %v9116_v0 = vld [vmem:[#allocation3 + $0xd88] sm:$0xf]  ;;  %v12545_v10 = vld [vmem:[#allocation26_spill] sm:$0xff] }
 0x32c   : > { %v4807_v46 = vmax.f32 %v12540_v38, %v4273_v30  ;;  %v5775_v36 = vunpack.c.l.b16 %v5137_v59  ;;  %v6056_v18 = vunpack.c.h.b16 %v5137_v59  ;;  %v9763_v59 = vld [vmem:[#allocation3 + $0xdf4] sm:$0xf0]  ;;  %v8220_v30 = vld [vmem:[#allocation3 + $0x688] sm:$0xf]  ;;  %v9721_v38 = vld [vmem:[#allocation3 + $0xcac] sm:$0xf] }
 0x32d   : > { %v4820_v2 = vmax.f32 %v12541_v22, %v4217_v47  ;;  %v9117_v17 = vor.u32 %v9763_v59, %v9116_v0  ;;  %v8110_v47 = vld [vmem:[#allocation3 + $0x618] sm:$0xf0]  ;;  %v8221_v12 = vor.u32 %v9539_v5, %v8220_v30  ;;  %v12547_v59 = vld [vmem:[#allocation28_spill] sm:$0xff] }
 0x32e   : > { %v4951_v32 = vadd.f32 %v10763_v15, %v4807_v46  ;;  %v10807_v63 = vpack.c.b16 %v5775_v36, %v5773_v28  ;;  %v10809_v14 = vpack.c.b16 %v6056_v18, %v6054_v9  ;;  %v9497_v28 = vld [vmem:[#allocation3 + $0x5ac] sm:$0xf]  ;;  %v9006_v46 = vld [vmem:[#allocation3 + $0xd18] sm:$0xf0] }
 0x32f   : > { %v4964_v44 = vadd.f32 %v10760_v24, %v4820_v2  ;;  %v8113_v6 = vor.u32 %v9497_v28, %v8110_v47  ;;  %4659 = vmatpush.bf16.msrb.mxu1 %v9117_v17  ;;  %v9009_v29 = vor.u32 %v9721_v38, %v9006_v46  ;;  %4630 = vmatpush.bf16.msrb.mxu0 %v8221_v12  ;;  %v9511_v17 = vld [vmem:[#allocation3 + $0x614] sm:$0xf0]  ;;  %v9469_v5 = vld [vmem:[#allocation3 + $0x4cc] sm:$0xf]  ;;  %v7998_v28 = vld [vmem:[#allocation3 + $0x538] sm:$0xf0] }
 0x330   : > { %12542 = vst [vmem:[#allocation17_spill] sm:$0xff] %v10807_v63  ;;  %v5063_v23 = vmax.f32 %v4951_v32, 0.0  ;;  %v4274_v55 = vpop.f32.mrf.mxu3  ;;  %v9693_v38 = vld [vmem:[#allocation3 + $0xbcc] sm:$0xf] }
 0x331   : > { %12543 = vst [vmem:[#allocation18_spill] sm:$0xff] %v10809_v14  ;;  %v4245_v33 = vpop.f32.mrf.mxu2  ;;  %v4190_v25 = vpop.f32.mrf.mxu0  ;;  %v5076_v36 = vmax.f32 %v4964_v44, 0.0  ;;  %4689 = vmatpush.bf16.msrb.mxu2 %v8113_v6  ;;  %4718 = vmatpush.bf16.msrb.mxu3 %v9009_v29  ;;  %v8001_v6 = vor.u32 %v9469_v5, %v7998_v28  ;;  %v9665_v28 = vld [vmem:[#allocation3 + $0xaec] sm:$0xf]  ;;  %v9276_v14 = vld [vmem:[#allocation7 + $0x130] sm:$0xf] }
 0x332   : > { %v5144_v52 = vpack.c.bf16 %v5063_v23, %v5062_v48  ;;  %v4275_v39 = vadd.f32 %v4274_v55, %v4245_v33  ;;  %v4219_v27 = vpop.f32.mrf.mxu1  ;;  %v12589_v63 = vld [vmem:[#allocation48_spill] sm:$0xff] }
 0x333   : > { %v4220_v3 = vadd.f32 %v4219_v27, %v4190_v25 }
 0x334   : > { %v4821_v34 = vmax.f32 %v12544_v1, %v4275_v39  ;;  %4421 = vmatmul.bf16.gmra.mxu0 %v10240_v49  ;;  %4450 = vmatmul.bf16.gmra.mxu1 %v10242_v51  ;;  %v5777_v33 = vunpack.c.l.b16 %v5144_v52  ;;  %v12546_v39 = vld [vmem:[#allocation27_spill] sm:$0xff]  ;;  %v9735_v1 = vld [vmem:[#allocation3 + $0xd14] sm:$0xf0]  ;;  %v6058_v47 = vunpack.c.h.b16 %v5144_v52 }
 0x335   : > { %v4834_v53 = vmax.f32 %v12545_v10, %v4220_v3  ;;  %4508 = vmatmul.bf16.gmra.mxu3 %v10242_v51  ;;  %v9004_v3 = vld [vmem:[#allocation3 + $0xca8] sm:$0xf]  ;;  %4690 = vmatpush.bf16.msrb.mxu2 %v8001_v6 }
 0x336   : > { %4479 = vmatmul.bf16.gmra.mxu2 %v10240_v49  ;;  %v4965_v16 = vadd.f32 %v10763_v15, %v4821_v34  ;;  %v8108_v34 = vld [vmem:[#allocation3 + $0x5a8] sm:$0xf]  ;;  %v9005_v10 = vor.u32 %v9735_v1, %v9004_v3 }
 0x337   : > { %v4978_v25 = vadd.f32 %v10760_v24, %v4834_v53  ;;  %v8109_v12 = vor.u32 %v9511_v17, %v8108_v34  ;;  %v8894_v53 = vld [vmem:[#allocation3 + $0xc38] sm:$0xf0]  ;;  %v8892_v3 = vld [vmem:[#allocation3 + $0xbc8] sm:$0xf] }
 0x338   : > { %v5077_v22 = vmax.f32 %v4965_v16, 0.0  ;;  %v4277_v9 = vpop.f32.mrf.mxu3  ;;  %4660 = vmatpush.bf16.msrb.mxu1 %v9005_v10  ;;  %v8897_v29 = vor.u32 %v9693_v38, %v8894_v53  ;;  %v7996_v1 = vld [vmem:[#allocation3 + $0x4c8] sm:$0xf]  ;;  %v12551_v34 = vld [vmem:[#allocation30_spill] sm:$0xff]  ;;  %v9441_v10 = vld [vmem:[#allocation3 + $0x3ec] sm:$0xf] }
 0x339   : > { %v4248_v2 = vpop.f32.mrf.mxu2  ;;  %v4192_v18 = vpop.f32.mrf.mxu0  ;;  %4631 = vmatpush.bf16.msrb.mxu0 %v8109_v12  ;;  %v7886_v17 = vld [vmem:[#allocation3 + $0x458] sm:$0xf0] }
 0x33a   : > { %v5151_v32 = vpack.c.bf16 %v5077_v22, %v5076_v36  ;;  %v4278_v48 = vadd.f32 %v4277_v9, %v4248_v2  ;;  %v4221_v23 = vpop.f32.mrf.mxu1  ;;  %v5090_v22 = vmax.f32 %v4978_v25, 0.0  ;;  %4719 = vmatpush.bf16.msrb.mxu3 %v8897_v29  ;;  %v9707_v25 = vld [vmem:[#allocation3 + $0xc34] sm:$0xf0] }
 0x33b   : > { %v4222_v55 = vadd.f32 %v4221_v23, %v4192_v18 }
 0x33c   : > { %v4835_v27 = vmax.f32 %v12546_v39, %v4278_v48  ;;  %v5779_v44 = vunpack.c.l.b16 %v5151_v32  ;;  %v6060_v0 = vunpack.c.h.b16 %v5151_v32  ;;  %v12550_v39 = vld [vmem:[#allocation29_spill] sm:$0xff] }
 0x33d   : > { %v4848_v30 = vmax.f32 %v12547_v59, %v4222_v55  ;;  %v9483_v59 = vld [vmem:[#allocation3 + $0x534] sm:$0xf0] }
 0x33e   : > { %v4979_v16 = vadd.f32 %v10763_v15, %v4835_v27  ;;  %v10823_v46 = vpack.c.b16 %v5779_v44, %v5777_v33  ;;  %v10825_v36 = vpack.c.b16 %v6060_v0, %v6058_v47  ;;  %v8893_v0 = vor.u32 %v9707_v25, %v8892_v3  ;;  %v8782_v47 = vld [vmem:[#allocation3 + $0xb58] sm:$0xf0]  ;;  %v9455_v3 = vld [vmem:[#allocation3 + $0x454] sm:$0xf0]  ;;  %v9413_v25 = vld [vmem:[#allocation3 + $0x30c] sm:$0xf] }
 0x33f   : > { %v4992_v33 = vadd.f32 %v10760_v24, %v4848_v30  ;;  %v7997_v24 = vor.u32 %v9483_v59, %v7996_v1  ;;  %v7889_v30 = vor.u32 %v9441_v10, %v7886_v17  ;;  %v8785_v12 = vor.u32 %v9665_v28, %v8782_v47  ;;  %v7774_v1 = vld [vmem:[#allocation3 + $0x378] sm:$0xf0]  ;;  %v9637_v10 = vld [vmem:[#allocation3 + $0xa0c] sm:$0xf] }
 0x340   : > { %12548 = vst [vmem:[#allocation19_spill] sm:$0xff] %v10823_v46  ;;  %v5091_v2 = vmax.f32 %v4979_v16, 0.0  ;;  %v4279_v18 = vpop.f32.mrf.mxu3  ;;  %v10838_v16 = vperm.slane %v10757_v31, 6  ;;  %4661 = vmatpush.bf16.msrb.mxu1 %v8893_v0  ;;  %v7777_v59 = vor.u32 %v9413_v25, %v7774_v1  ;;  %v8670_v17 = vld [vmem:[#allocation3 + $0xa78] sm:$0xf0] }
 0x341   : > { %12549 = vst [vmem:[#allocation20_spill] sm:$0xff] %v10825_v36  ;;  %v4250_v9 = vpop.f32.mrf.mxu2  ;;  %v4291_v32 = vpop.f32.mrf.mxu0  ;;  %v5104_v6 = vmax.f32 %v4992_v33, 0.0  ;;  %4632 = vmatpush.bf16.msrb.mxu0 %v7997_v24  ;;  %4691 = vmatpush.bf16.msrb.mxu2 %v7889_v30  ;;  %v12553_v24 = vld [vmem:[#allocation32_spill] sm:$0xff]  ;;  %v8673_v28 = vor.u32 %v9637_v10, %v8670_v17  ;;  %v12557_v1 = vld [vmem:[#allocation34_spill] sm:$0xff] }
 0x342   : > { %v10827_v52 = vpack.c.bf16 %v5091_v2, %v5090_v22  ;;  %v4280_v48 = vadd.f32 %v4279_v18, %v4250_v9  ;;  %v4320_v23 = vpop.f32.mrf.mxu1  ;;  %v10841_v22 = vperm.slane %v10757_v31, 7  ;;  %4720 = vmatpush.bf16.msrb.mxu3 %v8785_v12  ;;  %v7772_v25 = vld [vmem:[#allocation3 + $0x308] sm:$0xf]  ;;  %v9777_v36 = vld [vmem:[#allocation7 + $0x64] sm:$0xf0] }
 0x343   : > { %v4321_v55 = vadd.f32 %v4320_v23, %v4291_v32  ;;  %v8780_v32 = vld [vmem:[#allocation3 + $0xae8] sm:$0xf] }
 0x344   : > { %v4849_v27 = vmax.f32 %v12550_v39, %v4280_v48  ;;  %4522 = vmatmul.bf16.vlgmr.msra.gmra.mxu0 %v10204_v45  ;;  %4551 = vmatmul.bf16.vlgmr.msra.gmra.mxu1 %v10206_v50  ;;  %v9679_v48 = vld [vmem:[#allocation3 + $0xb54] sm:$0xf0]  ;;  %v7884_v23 = vld [vmem:[#allocation3 + $0x3e8] sm:$0xf]  ;;  %v6062_v47 = vunpack.c.h.b16 %v10827_v52 }
 0x345   : > { %v4752_v44 = vmax.f32 %v12551_v34, %v4321_v55  ;;  %4609 = vmatmul.bf16.vlgmr.msra.gmra.mxu3 %v10206_v50  ;;  %v5781_v55 = vunpack.c.l.b16 %v10827_v52  ;;  %v12552_v34 = vld [vmem:[#allocation31_spill] sm:$0xff]  ;;  %v7885_v0 = vor.u32 %v9455_v3, %v7884_v23  ;;  %4692 = vmatpush.bf16.msrb.mxu2 %v7777_v59  ;;  %v9651_v3 = vld [vmem:[#allocation3 + $0xa74] sm:$0xf0] }
 0x346   : > { %4580 = vmatmul.bf16.vlgmr.msra.gmra.mxu2 %v10204_v45  ;;  %v4993_v5 = vadd.f32 %v10763_v15, %v4849_v27  ;;  %v8781_v27 = vor.u32 %v9679_v48, %v8780_v32  ;;  %4721 = vmatpush.bf16.msrb.mxu3 %v8673_v28  ;;  %v7662_v59 = vld [vmem:[#allocation3 + $0x298] sm:$0xf0] }
 0x347   : > { %v4896_v33 = vadd.f32 %v10838_v16, %v4752_v44  ;;  %4633 = vmatpush.bf16.msrb.mxu0 %v7885_v0  ;;  %v9385_v0 = vld [vmem:[#allocation3 + $0x22c] sm:$0xf] }
 0x348   : > { %v5105_v38 = vmax.f32 %v4993_v5, 0.0  ;;  %v4378_v29 = vpop.f32.mrf.mxu3  ;;  %4662 = vmatpush.bf16.msrb.mxu1 %v8781_v27 }
 0x349   : > { %v4349_v53 = vpop.f32.mrf.mxu2  ;;  %v4293_v15 = vpop.f32.mrf.mxu0 }
 0x34a   : > { %v5165_v2 = vpack.c.bf16 %v5105_v38, %v5104_v6  ;;  %v4379_v9 = vadd.f32 %v4378_v29, %v4349_v53  ;;  %v4322_v18 = vpop.f32.mrf.mxu1  ;;  %v5008_v53 = vmax.f32 %v4896_v33, 0.0 }
 0x34b   : > { %v4323_v39 = vadd.f32 %v4322_v18, %v4293_v15 }
 0x34c   : > { %v4753_v31 = vmax.f32 %v12552_v34, %v4379_v9  ;;  %v5783_v5 = vunpack.c.l.b16 %v5165_v2  ;;  %v6064_v12 = vunpack.c.h.b16 %v5165_v2 }
 0x34d   : > { %v4766_v30 = vmax.f32 %v12553_v24, %v4323_v39  ;;  %v12556_v39 = vld [vmem:[#allocation33_spill] sm:$0xff] }
 0x34e   : > { %v4897_v44 = vadd.f32 %v10841_v22, %v4753_v31  ;;  %v10849_v6 = vpack.c.b16 %v5783_v5, %v5781_v55  ;;  %v10851_v38 = vpack.c.b16 %v6064_v12, %v6062_v47  ;;  %v8668_v55 = vld [vmem:[#allocation3 + $0xa08] sm:$0xf]  ;;  %v9427_v31 = vld [vmem:[#allocation3 + $0x374] sm:$0xf0]  ;;  %v7665_v5 = vor.u32 %v9385_v0, %v7662_v59  ;;  %v9609_v24 = vld [vmem:[#allocation3 + $0x92c] sm:$0xf] }
 0x34f   : > { %v4910_v2 = vadd.f32 %v10838_v16, %v4766_v30  ;;  %v8669_v34 = vor.u32 %v9651_v3, %v8668_v55  ;;  %v7773_v17 = vor.u32 %v9427_v31, %v7772_v25  ;;  %v8558_v30 = vld [vmem:[#allocation3 + $0x998] sm:$0xf0]  ;;  %v9357_v25 = vld [vmem:[#allocation3 + $0x14c] sm:$0xf] }
 0x350   : > { %12554 = vst [vmem:[#allocation21_spill] sm:$0xff] %v10849_v6  ;;  %v5009_v29 = vmax.f32 %v4897_v44, 0.0  ;;  %v4380_v9 = vpop.f32.mrf.mxu3  ;;  %v8561_v28 = vor.u32 %v9609_v24, %v8558_v30  ;;  %4693 = vmatpush.bf16.msrb.mxu2 %v7665_v5  ;;  %v12558_v24 = vld [vmem:[#allocation35_spill] sm:$0xff] }
 0x351   : > { %12555 = vst [vmem:[#allocation22_spill] sm:$0xff] %v10851_v38  ;;  %v4351_v15 = vpop.f32.mrf.mxu2  ;;  %v4296_v18 = vpop.f32.mrf.mxu0  ;;  %4663 = vmatpush.bf16.msrb.mxu1 %v8669_v34  ;;  %v5022_v47 = vmax.f32 %v4910_v2, 0.0  ;;  %4634 = vmatpush.bf16.msrb.mxu0 %v7773_v17  ;;  %v7550_v2 = vld [vmem:[#allocation3 + $0x1b8] sm:$0xf0] }
 0x352   : > { %v10853_v32 = vpack.c.bf16 %v5009_v29, %v5008_v53  ;;  %v4381_v48 = vadd.f32 %v4380_v9, %v4351_v15  ;;  %v4325_v23 = vpop.f32.mrf.mxu1  ;;  %v8556_v53 = vld [vmem:[#allocation3 + $0x928] sm:$0xf]  ;;  %v9623_v29 = vld [vmem:[#allocation3 + $0x994] sm:$0xf0]  ;;  %4722 = vmatpush.bf16.msrb.mxu3 %v8561_v28  ;;  %v7553_v59 = vor.u32 %v9357_v25, %v7550_v2 }
 0x353   : > { %v4326_v52 = vadd.f32 %v4325_v23, %v4296_v18  ;;  %v8557_v18 = vor.u32 %v9623_v29, %v8556_v53  ;;  %v9399_v23 = vld [vmem:[#allocation3 + $0x294] sm:$0xf0]  ;;  %v12559_v53 = vld [vmem:[#allocation36_spill] sm:$0xff] }
 0x354   : > { %v4767_v27 = vmax.f32 %v12556_v39, %v4381_v48  ;;  %4527 = vmatmul.bf16.gmra.mxu0 %v10216_v35  ;;  %4556 = vmatmul.bf16.gmra.mxu1 %v10218_v40  ;;  %v7660_v48 = vld [vmem:[#allocation3 + $0x228] sm:$0xf]  ;;  %v6332_v34 = vunpack.c.h.b16 %v10853_v32 }
 0x355   : > { %v4780_v33 = vmax.f32 %v12557_v1, %v4326_v52  ;;  %4614 = vmatmul.bf16.gmra.mxu3 %v10218_v40  ;;  %v6051_v52 = vunpack.c.l.b16 %v10853_v32  ;;  %v7661_v3 = vor.u32 %v9399_v23, %v7660_v48  ;;  %v9581_v1 = vld [vmem:[#allocation3 + $0x84c] sm:$0xf]  ;;  %4664 = vmatpush.bf16.msrb.mxu1 %v8557_v18  ;;  %v9371_v32 = vld [vmem:[#allocation3 + $0x1b4] sm:$0xf0] }
 0x356   : > { %4585 = vmatmul.bf16.gmra.mxu2 %v10216_v35  ;;  %v4911_v10 = vadd.f32 %v10841_v22, %v4767_v27 }
 0x357   : > { %v4924_v31 = vadd.f32 %v10838_v16, %v4780_v33  ;;  %4635 = vmatpush.bf16.msrb.mxu0 %v7661_v3  ;;  %4694 = vmatpush.bf16.msrb.mxu2 %v7553_v59  ;;  %v7438_v3 = vld [vmem:[#allocation3 + $0xd8] sm:$0xf0] }
 0x358   : > { %v5023_v12 = vmax.f32 %v4911_v10, 0.0  ;;  %v4383_v15 = vpop.f32.mrf.mxu3  ;;  %v8446_v10 = vld [vmem:[#allocation3 + $0x8b8] sm:$0xf0] }
 0x359   : > { %v4354_v44 = vpop.f32.mrf.mxu2  ;;  %v4298_v9 = vpop.f32.mrf.mxu0  ;;  %v8449_v28 = vor.u32 %v9581_v1, %v8446_v10  ;;  %v5036_v23 = vmax.f32 %v4924_v31, 0.0  ;;  %v8334_v59 = vld [vmem:[#allocation3 + $0x7d8] sm:$0xf0] }
 0x35a   : > { %v5124_v39 = vpack.c.bf16 %v5023_v12, %v5022_v47  ;;  %v4384_v27 = vadd.f32 %v4383_v15, %v4354_v44  ;;  %v4327_v55 = vpop.f32.mrf.mxu1  ;;  %v8444_v47 = vld [vmem:[#allocation3 + $0x848] sm:$0xf]  ;;  %v9595_v12 = vld [vmem:[#allocation3 + $0x8b4] sm:$0xf0] }
 0x35b   : > { %v4328_v0 = vadd.f32 %v4327_v55, %v4298_v9  ;;  %v7548_v44 = vld [vmem:[#allocation3 + $0x148] sm:$0xf]  ;;  %v8445_v15 = vor.u32 %v9595_v12, %v8444_v47  ;;  %4723 = vmatpush.bf16.msrb.mxu3 %v8449_v28  ;;  %v9329_v55 = vld [vmem:[#allocation3 + $0x6c] sm:$0xf]  ;;  %v9567_v47 = vld [vmem:[#allocation3 + $0x7d4] sm:$0xf0] }
 0x35c   : > { %v6053_v17 = vunpack.c.l.b16 %v5124_v39  ;;  %v6334_v5 = vunpack.c.h.b16 %v5124_v39  ;;  %v4781_v30 = vmax.f32 %v12558_v24, %v4384_v27  ;;  %v7549_v9 = vor.u32 %v9371_v32, %v7548_v44  ;;  %v12562_v44 = vld [vmem:[#allocation37_spill] sm:$0xff]  ;;  %v12563_v32 = vld [vmem:[#allocation38_spill] sm:$0xff] }
 0x35d   : > { %v4794_v29 = vmax.f32 %v12559_v53, %v4328_v0  ;;  %4665 = vmatpush.bf16.msrb.mxu1 %v8445_v15  ;;  %v7441_v1 = vor.u32 %v9329_v55, %v7438_v3  ;;  %v9553_v0 = vld [vmem:[#allocation3 + $0x76c] sm:$0xf] }
 0x35e   : > { %v4925_v33 = vadd.f32 %v10841_v22, %v4781_v30  ;;  %v10869_v18 = vpack.c.b16 %v6053_v17, %v6051_v52  ;;  %v10871_v48 = vpack.c.b16 %v6334_v5, %v6332_v34  ;;  %4636 = vmatpush.bf16.msrb.mxu0 %v7549_v9  ;;  %v8337_v28 = vor.u32 %v9553_v0, %v8334_v59  ;;  %v7436_v52 = vld [vmem:[#allocation3 + $0x68] sm:$0xf]  ;;  %v9343_v17 = vld [vmem:[#allocation3 + $0xd4] sm:$0xf0]  ;;  %v9778_v59 = vld [vmem:[#allocation7 + $0x74] sm:$0xf] }
 0x35f   : > { %v8332_v34 = vld [vmem:[#allocation3 + $0x768] sm:$0xf]  ;;  %4695 = vmatpush.bf16.msrb.mxu2 %v7441_v1  ;;  %v7437_v31 = vor.u32 %v9343_v17, %v7436_v52  ;;  %v4938_v12 = vadd.f32 %v10838_v16, %v4794_v29  ;;  %v9308_v1 = vld [vmem:[#allocation7 + $0x170] sm:$0xf] }
 0x360   : > { %12560 = vst [vmem:[#allocation23_spill] sm:$0xff] %v10869_v18  ;;  %v5037_v39 = vmax.f32 %v4925_v33, 0.0  ;;  %v4385_v25 = vpop.f32.mrf.mxu3  ;;  %4724 = vmatpush.bf16.msrb.mxu3 %v8337_v28  ;;  %v8333_v15 = vor.u32 %v9567_v47, %v8332_v34  ;;  %v9811_v0 = vld [vmem:[#allocation7 + $0x174] sm:$0xf0]  ;;  %v9182_v52 = vld [vmem:[#allocation7 + $0x78] sm:$0xf0] }
 0x361   : > { %12561 = vst [vmem:[#allocation24_spill] sm:$0xff] %v10871_v48  ;;  %v4356_v27 = vpop.f32.mrf.mxu2  ;;  %v4301_v2 = vpop.f32.mrf.mxu0  ;;  %v10881_v28 = vor.u32 %v9811_v0, %v9308_v1  ;;  %v12564_v34 = vld [vmem:[#allocation39_spill] sm:$0xff]  ;;  %v9803_v18 = vld [vmem:[#allocation7 + $0x134] sm:$0xf0] }
 0x362   : > { %v5131_v10 = vpack.c.bf16 %v5037_v39, %v5036_v23  ;;  %v4386_v24 = vadd.f32 %v4385_v25, %v4356_v27  ;;  %v4330_v30 = vpop.f32.mrf.mxu1  ;;  %4637 = vmatpush.bf16.msrb.mxu0 %v7437_v31  ;;  %4666 = vmatpush.bf16.msrb.mxu1 %v8333_v15  ;;  %v5050_v23 = vmax.f32 %v4938_v12, 0.0  ;;  %v10885_v31 = vor.u32 %v9778_v59, %v9182_v52  ;;  %v12565_v12 = vld [vmem:[#allocation40_spill] sm:$0xff]  ;;  %v9180_v52 = vld [vmem:[#allocation7 + $0x70] sm:$0xf] }
 0x363   : > { %v4331_v5 = vadd.f32 %v4330_v30, %v4301_v2  ;;  %5581 = vmatpush.bf16.msra.mxu2 %v10881_v28 }
 0x364   : > { %v4795_v53 = vmax.f32 %v12562_v44, %v4386_v24  ;;  %4532 = vmatmul.bf16.gmra.mxu0 %v10228_v19  ;;  %4561 = vmatmul.bf16.gmra.mxu1 %v10230_v20  ;;  %v6055_v24 = vunpack.c.l.b16 %v5131_v10 }
 0x365   : > { %v4808_v33 = vmax.f32 %v12563_v32, %v4331_v5  ;;  %4619 = vmatmul.bf16.gmra.mxu3 %v10230_v20 }
 0x366   : > { %4590 = vmatmul.bf16.gmra.mxu2 %v10228_v19  ;;  %v4939_v9 = vadd.f32 %v10841_v22, %v4795_v53  ;;  %v6336_v53 = vunpack.c.h.b16 %v5131_v10  ;;  %5610 = vmatpush.bf16.msra.mxu3 %v10885_v31 }
 0x367   : > { %v4952_v17 = vadd.f32 %v10838_v16, %v4808_v33 }
 0x368   : > { %v5051_v29 = vmax.f32 %v4939_v9, 0.0  ;;  %v4388_v27 = vpop.f32.mrf.mxu3 }
 0x369   : > { %v4359_v39 = vpop.f32.mrf.mxu2  ;;  %v4303_v55 = vpop.f32.mrf.mxu0  ;;  %v5064_v33 = vmax.f32 %v4952_v17, 0.0 }
 0x36a   : > { %v5138_v3 = vpack.c.bf16 %v5051_v29, %v5050_v23  ;;  %v4389_v25 = vadd.f32 %v4388_v27, %v4359_v39  ;;  %v4332_v2 = vpop.f32.mrf.mxu1 }
 0x36b   : > { %v4333_v30 = vadd.f32 %v4332_v2, %v4303_v55 }
 0x36c   : > { %v4809_v5 = vmax.f32 %v12564_v34, %v4389_v25  ;;  %v6057_v47 = vunpack.c.l.b16 %v5138_v3  ;;  %v6338_v15 = vunpack.c.h.b16 %v5138_v3  ;;  %v12568_v3 = vld [vmem:[#allocation41_spill] sm:$0xff]  ;;  %v12569_v34 = vld [vmem:[#allocation42_spill] sm:$0xff] }
 0x36d   : > { %v4822_v44 = vmax.f32 %v12565_v12, %v4333_v30  ;;  %v9244_v30 = vld [vmem:[#allocation7 + $0xf0] sm:$0xf]  ;;  %v9300_v12 = vld [vmem:[#allocation7 + $0x160] sm:$0xf] }
 0x36e   : > { %v4953_v32 = vadd.f32 %v10841_v22, %v4809_v5  ;;  %v10891_v9 = vpack.c.b16 %v6057_v47, %v6055_v24  ;;  %v10893_v23 = vpack.c.b16 %v6338_v15, %v6336_v53  ;;  %v9795_v24 = vld [vmem:[#allocation7 + $0xf4] sm:$0xf0]  ;;  %v9809_v53 = vld [vmem:[#allocation7 + $0x164] sm:$0xf0] }
 0x36f   : > { %v4966_v10 = vadd.f32 %v10838_v16, %v4822_v44  ;;  %v10901_v17 = vor.u32 %v9795_v24, %v9244_v30  ;;  %v9779_v47 = vld [vmem:[#allocation7 + $0x74] sm:$0xf0] }
 0x370   : > { %12566 = vst [vmem:[#allocation25_spill] sm:$0xff] %v10891_v9  ;;  %v5065_v29 = vmax.f32 %v4953_v32, 0.0  ;;  %v4390_v27 = vpop.f32.mrf.mxu3  ;;  %v10905_v15 = vor.u32 %v9779_v47, %v9180_v52  ;;  %v10907_v32 = vor.u32 %v9809_v53, %v9300_v12  ;;  %v12574_v47 = vld [vmem:[#allocation43_spill] sm:$0xff]  ;;  %v9793_v53 = vld [vmem:[#allocation7 + $0xe4] sm:$0xf0] }
 0x371   : > { %12567 = vst [vmem:[#allocation26_spill] sm:$0xff] %v10893_v23  ;;  %v4361_v39 = vpop.f32.mrf.mxu2  ;;  %v4306_v55 = vpop.f32.mrf.mxu0  ;;  %5552 = vmatpush.bf16.msra.mxu1 %v10901_v17  ;;  %v12575_v23 = vld [vmem:[#allocation44_spill] sm:$0xff]  ;;  %v9292_v9 = vld [vmem:[#allocation7 + $0x150] sm:$0xf] }
 0x372   : > { %v5145_v25 = vpack.c.bf16 %v5065_v29, %v5064_v33  ;;  %v4391_v2 = vadd.f32 %v4390_v27, %v4361_v39  ;;  %v4335_v1 = vpop.f32.mrf.mxu1  ;;  %12570 = vst [vmem:[#allocation27_spill] sm:$0xff] %v10901_v17  ;;  %v9776_v33 = vld [vmem:[#allocation7 + $0x64] sm:$0xf]  ;;  %v9174_v29 = vld [vmem:[#allocation7 + $0x68] sm:$0xf0]  ;;  %v5078_v27 = vmax.f32 %v4966_v10, 0.0  ;;  %5523 = vmatpush.bf16.msra.mxu0 %v10905_v15  ;;  %5582 = vmatpush.bf16.msra.mxu2 %v10907_v32 }
 0x373   : > { %v4336_v0 = vadd.f32 %v4335_v1, %v4306_v55  ;;  %12571 = vst [vmem:[#allocation28_spill] sm:$0xff] %v10905_v15  ;;  %v10910_v39 = vor.u32 %v9776_v33, %v9174_v29  ;;  %v9236_v10 = vld [vmem:[#allocation7 + $0xe0] sm:$0xf] }
 0x374   : > { %v4823_v59 = vmax.f32 %v12568_v3, %v4391_v2  ;;  %4537 = vmatmul.bf16.gmra.mxu0 %v10240_v49  ;;  %4566 = vmatmul.bf16.gmra.mxu1 %v10242_v51  ;;  %12572 = vst [vmem:[#allocation29_spill] sm:$0xff] %v10907_v32  ;;  %v6059_v24 = vunpack.c.l.b16 %v5145_v25  ;;  %v10918_v38 = vor.u32 %v9793_v53, %v9236_v10 }
 0x375   : > { %v4836_v5 = vmax.f32 %v12569_v34, %v4336_v0  ;;  %4624 = vmatmul.bf16.gmra.mxu3 %v10242_v51  ;;  %12573 = vst [vmem:[#allocation30_spill] sm:$0xff] %v10910_v39 }
 0x376   : > { %4595 = vmatmul.bf16.gmra.mxu2 %v10240_v49  ;;  %v4967_v44 = vadd.f32 %v10841_v22, %v4823_v59  ;;  %5611 = vmatpush.bf16.msra.mxu3 %v10910_v39  ;;  %12576 = vst [vmem:[#allocation31_spill] sm:$0xff] %v10918_v38 }
 0x377   : > { %v4980_v34 = vadd.f32 %v10838_v16, %v4836_v5  ;;  %5553 = vmatpush.bf16.msra.mxu1 %v10918_v38 }
 0x378   : > { %v5079_v55 = vmax.f32 %v4967_v44, 0.0  ;;  %v4393_v1 = vpop.f32.mrf.mxu3  ;;  %v9172_v44 = vld [vmem:[#allocation7 + $0x60] sm:$0xf] }
 0x379   : > { %v4364_v2 = vpop.f32.mrf.mxu2  ;;  %v4308_v0 = vpop.f32.mrf.mxu0 }
 0x37a   : > { %v5152_v3 = vpack.c.bf16 %v5079_v55, %v5078_v27  ;;  %v4394_v59 = vadd.f32 %v4393_v1, %v4364_v2  ;;  %v4337_v30 = vpop.f32.mrf.mxu1  ;;  %v9807_v27 = vld [vmem:[#allocation7 + $0x154] sm:$0xf0]  ;;  %v6340_v55 = vunpack.c.h.b16 %v5145_v25  ;;  %v10921_v1 = vor.u32 %v9777_v36, %v9172_v44 }
 0x37b   : > { %v4338_v52 = vadd.f32 %v4337_v30, %v4308_v0  ;;  %v10923_v5 = vor.u32 %v9807_v27, %v9292_v9  ;;  %v9774_v0 = vld [vmem:[#allocation7 + $0x54] sm:$0xf]  ;;  %v10937_v44 = vld [vmem:[#allocation5 + $0x8] sm:$0x3f]  ;;  %v9228_v27 = vld [vmem:[#allocation7 + $0xd0] sm:$0xf] }
 0x37c   : > { %v4837_v12 = vmax.f32 %v12574_v47, %v4394_v59  ;;  %v6061_v33 = vunpack.c.l.b16 %v5152_v3  ;;  %v6342_v29 = vunpack.c.h.b16 %v5152_v3  ;;  %12577 = vst [vmem:[#allocation32_spill] sm:$0xff] %v10921_v1  ;;  %v9166_v59 = vld [vmem:[#allocation7 + $0x58] sm:$0xf0]  ;;  %5524 = vmatpush.bf16.msra.mxu0 %v10921_v1 }
 0x37d   : > { %v4850_v48 = vmax.f32 %v12575_v23, %v4338_v52  ;;  %v10928_v3 = vor.u32 %v9774_v0, %v9166_v59  ;;  %v5092_v52 = vmax.f32 %v4980_v34, 0.0  ;;  %5583 = vmatpush.bf16.msra.mxu2 %v10923_v5  ;;  %v12580_v34 = vld [vmem:[#allocation45_spill] sm:$0xff]  ;;  %v12581_v0 = vld [vmem:[#allocation46_spill] sm:$0xff] }
 0x37e   : > { %v4981_v2 = vadd.f32 %v10841_v22, %v4837_v12  ;;  %v10925_v30 = vpack.c.b16 %v6061_v33, %v6059_v24  ;;  %v10930_v23 = vpack.c.b16 %v6342_v29, %v6340_v55  ;;  %v9791_v55 = vld [vmem:[#allocation7 + $0xd4] sm:$0xf0] }
 0x37f   : > { %5612 = vmatpush.bf16.msra.mxu3 %v10928_v3  ;;  %v4994_v33 = vadd.f32 %v10838_v16, %v4850_v48 }
 0x380   : > { %12578 = vst [vmem:[#allocation33_spill] sm:$0xff] %v10925_v30  ;;  %v5093_v47 = vmax.f32 %v4981_v2, 0.0  ;;  %v4395_v36 = vpop.f32.mrf.mxu3  ;;  %v9164_v2 = vld [vmem:[#allocation7 + $0x50] sm:$0xf]  ;;  %v9773_v30 = vld [vmem:[#allocation7 + $0x44] sm:$0xf0] }
 0x381   : > { %12579 = vst [vmem:[#allocation34_spill] sm:$0xff] %v10930_v23  ;;  %v4366_v10 = vpop.f32.mrf.mxu2  ;;  %v4407_v9 = vpop.f32.mrf.mxu0 }
 0x382   : > { %v10935_v25 = vpack.c.bf16 %v5093_v47, %v5092_v52  ;;  %v4396_v24 = vadd.f32 %v4395_v36, %v4366_v10  ;;  %v4436_v12 = vpop.f32.mrf.mxu1  ;;  %v10945_v52 = vor.u32 %v9791_v55, %v9228_v27  ;;  %v9775_v47 = vld [vmem:[#allocation7 + $0x54] sm:$0xf0]  ;;  %v9284_v10 = vld [vmem:[#allocation7 + $0x140] sm:$0xf]  ;;  %v9805_v36 = vld [vmem:[#allocation7 + $0x144] sm:$0xf0] }
 0x383   : > { %v4437_v53 = vadd.f32 %v4436_v12, %v4407_v9  ;;  %v10949_v48 = vor.u32 %v9775_v47, %v9164_v2  ;;  %v10951_v9 = vor.u32 %v9805_v36, %v9284_v10  ;;  %v9158_v12 = vld [vmem:[#allocation7 + $0x48] sm:$0xf0]  ;;  %v9220_v10 = vld [vmem:[#allocation7 + $0xc0] sm:$0xf]  ;;  %v9789_v36 = vld [vmem:[#allocation7 + $0xc4] sm:$0xf0] }
 0x384   : > { %v4851_v29 = vmax.f32 %v12580_v34, %v4396_v24  ;;  %4638 = vmatmul.bf16.vlgmr.msrb.gmra.mxu0 %v10204_v45  ;;  %4667 = vmatmul.bf16.vlgmr.msrb.gmra.mxu1 %v10206_v50  ;;  %12582 = vst [vmem:[#allocation35_spill] sm:$0xff] %v10945_v52  ;;  %v9772_v24 = vld [vmem:[#allocation7 + $0x44] sm:$0xf]  ;;  %v5106_v34 = vmax.f32 %v4994_v33, 0.0  ;;  %v6063_v33 = vunpack.c.l.b16 %v10935_v25  ;;  %v10967_v23 = vor.u32 %v9789_v36, %v9220_v10 }
 0x385   : > { %v4754_v59 = vmax.f32 %v12581_v0, %v4437_v53  ;;  %4725 = vmatmul.bf16.vlgmr.msrb.gmra.mxu3 %v10206_v50  ;;  %12583 = vst [vmem:[#allocation36_spill] sm:$0xff] %v10949_v48  ;;  %v10954_v53 = vperm.slane %v10937_v44, 0  ;;  %5554 = vmatpush.bf16.msra.mxu1 %v10945_v52 }
 0x386   : > { %4696 = vmatmul.bf16.vlgmr.msrb.gmra.mxu2 %v10204_v45  ;;  %v4995_v16 = vadd.f32 %v10841_v22, %v4851_v29  ;;  %12584 = vst [vmem:[#allocation37_spill] sm:$0xff] %v10951_v9  ;;  %v10957_v45 = vor.u32 %v9772_v24, %v9158_v12  ;;  %5525 = vmatpush.bf16.msra.mxu0 %v10949_v48  ;;  %v10962_v22 = vperm.slane %v10937_v44, 1  ;;  %v9156_v24 = vld [vmem:[#allocation7 + $0x40] sm:$0xf] }
 0x387   : > { %5584 = vmatpush.bf16.msra.mxu2 %v10951_v9  ;;  %12586 = vst [vmem:[#allocation39_spill] sm:$0xff] %v10967_v23  ;;  %v10970_v46 = vor.u32 %v9773_v30, %v9156_v24 }
 0x388   : > { %12585 = vst [vmem:[#allocation38_spill] sm:$0xff] %v10957_v45  ;;  %v5107_v27 = vmax.f32 %v4995_v16, 0.0  ;;  %v4494_v50 = vpop.f32.mrf.mxu3  ;;  %5613 = vmatpush.bf16.msra.mxu3 %v10957_v45  ;;  %v4898_v16 = vadd.f32 %v10954_v53, %v4754_v59 }
 0x389   : > { %v4465_v55 = vpop.f32.mrf.mxu2  ;;  %v4409_v29 = vpop.f32.mrf.mxu0  ;;  %12588 = vst [vmem:[#allocation40_spill] sm:$0xff] %v10970_v46  ;;  %5555 = vmatpush.bf16.msra.mxu1 %v10967_v23 }
 0x38a   : > { %v5166_v2 = vpack.c.bf16 %v5107_v27, %v5106_v34  ;;  %v4495_v0 = vadd.f32 %v4494_v50, %v4465_v55  ;;  %v4438_v47 = vpop.f32.mrf.mxu1  ;;  %v10972_v34 = vor.u32 %v9803_v18, %v9276_v14  ;;  %v9770_v27 = vld [vmem:[#allocation7 + $0x34] sm:$0xf]  ;;  %v9150_v55 = vld [vmem:[#allocation7 + $0x38] sm:$0xf0]  ;;  %5526 = vmatpush.bf16.msra.mxu0 %v10970_v46 }
 0x38b   : > { %v4439_v12 = vadd.f32 %v4438_v47, %v4409_v29  ;;  %v10976_v59 = vor.u32 %v9770_v27, %v9150_v55  ;;  %v6344_v29 = vunpack.c.h.b16 %v10935_v25  ;;  %v12593_v27 = vld [vmem:[#allocation49_spill] sm:$0xff] }
 0x38c   : > { %v4755_v6 = vmax.f32 %v12587_v41, %v4495_v0  ;;  %v6065_v50 = vunpack.c.l.b16 %v5166_v2  ;;  %v6346_v47 = vunpack.c.h.b16 %v5166_v2  ;;  %5585 = vmatpush.bf16.msra.mxu2 %v10972_v34 }
 0x38d   : > { %v4768_v56 = vmax.f32 %v12589_v63, %v4439_v12  ;;  %12590 = vst [vmem:[#allocation41_spill] sm:$0xff] %v10976_v59  ;;  %5614 = vmatpush.bf16.msra.mxu3 %v10976_v59  ;;  %v5010_v63 = vmax.f32 %v4898_v16, 0.0 }
 0x38e   : > { %v4899_v10 = vadd.f32 %v10962_v22, %v4755_v6  ;;  %v10982_v41 = vpack.c.b16 %v6065_v50, %v6063_v33  ;;  %v10985_v14 = vpack.c.b16 %v6346_v47, %v6344_v29  ;;  %v9212_v33 = vld [vmem:[#allocation7 + $0xb0] sm:$0xf]  ;;  %v9787_v50 = vld [vmem:[#allocation7 + $0xb4] sm:$0xf0]  ;;  %v12594_v47 = vld [vmem:[#allocation50_spill] sm:$0xff] }
 0x38f   : > { %v4912_v12 = vadd.f32 %v10954_v53, %v4768_v56  ;;  %v9148_v29 = vld [vmem:[#allocation7 + $0x30] sm:$0xf] }
 0x390   : > { %12591 = vst [vmem:[#allocation42_spill] sm:$0xff] %v10982_v41  ;;  %v5011_v18 = vmax.f32 %v4899_v10, 0.0  ;;  %v4496_v0 = vpop.f32.mrf.mxu3  ;;  %v10995_v10 = vor.u32 %v9787_v50, %v9212_v33  ;;  %v9785_v50 = vld [vmem:[#allocation7 + $0xa4] sm:$0xf0]  ;;  %v9799_v41 = vld [vmem:[#allocation7 + $0x114] sm:$0xf0] }
 0x391   : > { %12592 = vst [vmem:[#allocation43_spill] sm:$0xff] %v10985_v14  ;;  %v4467_v30 = vpop.f32.mrf.mxu2  ;;  %v4412_v36 = vpop.f32.mrf.mxu0  ;;  %v9260_v14 = vld [vmem:[#allocation7 + $0x110] sm:$0xf] }
 0x392   : > { %v10987_v24 = vpack.c.bf16 %v5011_v18, %v5010_v63  ;;  %v4497_v25 = vadd.f32 %v4496_v0, %v4467_v30  ;;  %v4441_v2 = vpop.f32.mrf.mxu1  ;;  %12595 = vst [vmem:[#allocation44_spill] sm:$0xff] %v10995_v10  ;;  %v9771_v63 = vld [vmem:[#allocation7 + $0x34] sm:$0xf0]  ;;  %v9268_v18 = vld [vmem:[#allocation7 + $0x120] sm:$0xf]  ;;  %5556 = vmatpush.bf16.msra.mxu1 %v10995_v10 }
 0x393   : > { %v4442_v6 = vadd.f32 %v4441_v2, %v4412_v36  ;;  %v9801_v30 = vld [vmem:[#allocation7 + $0x124] sm:$0xf0]  ;;  %v10999_v0 = vor.u32 %v9771_v63, %v9148_v29  ;;  %v9142_v2 = vld [vmem:[#allocation7 + $0x28] sm:$0xf0]  ;;  %v9140_v63 = vld [vmem:[#allocation7 + $0x20] sm:$0xf] }
 0x394   : > { %v4769_v55 = vmax.f32 %v12593_v27, %v4497_v25  ;;  %4643 = vmatmul.bf16.gmra.mxu0 %v10216_v35  ;;  %4672 = vmatmul.bf16.gmra.mxu1 %v10218_v40  ;;  %v11001_v36 = vor.u32 %v9801_v30, %v9268_v18  ;;  %v9768_v25 = vld [vmem:[#allocation7 + $0x24] sm:$0xf]  ;;  %v9769_v18 = vld [vmem:[#allocation7 + $0x24] sm:$0xf0]  ;;  %v6333_v30 = vunpack.c.l.b16 %v10987_v24  ;;  %v6614_v21 = vunpack.c.h.b16 %v10987_v24  ;;  %v12604_v24 = vld [vmem:[#allocation52_spill] sm:$0xff] }
 0x395   : > { %v4782_v16 = vmax.f32 %v12594_v47, %v4442_v6  ;;  %4730 = vmatmul.bf16.gmra.mxu3 %v10218_v40  ;;  %12596 = vst [vmem:[#allocation45_spill] sm:$0xff] %v10999_v0  ;;  %v11004_v6 = vor.u32 %v9768_v25, %v9142_v2  ;;  %5527 = vmatpush.bf16.msra.mxu0 %v10999_v0 }
 0x396   : > { %4701 = vmatmul.bf16.gmra.mxu2 %v10216_v35  ;;  %v4913_v56 = vadd.f32 %v10962_v22, %v4769_v55  ;;  %12597 = vst [vmem:[#allocation46_spill] sm:$0xff] %v11001_v36  ;;  %v5024_v35 = vmax.f32 %v4912_v12, 0.0  ;;  %v9204_v55 = vld [vmem:[#allocation7 + $0xa0] sm:$0xf]  ;;  %v11012_v2 = vor.u32 %v9769_v18, %v9140_v63  ;;  %v9783_v63 = vld [vmem:[#allocation7 + $0x94] sm:$0xf0] }
 0x397   : > { %12598 = vst [vmem:[#allocation47_spill] sm:$0xff] %v11004_v6  ;;  %5586 = vmatpush.bf16.msra.mxu2 %v11001_v36  ;;  %5615 = vmatpush.bf16.msra.mxu3 %v11004_v6  ;;  %v11009_v47 = vor.u32 %v9785_v50, %v9204_v55  ;;  %v4926_v4 = vadd.f32 %v10954_v53, %v4782_v16  ;;  %v9134_v50 = vld [vmem:[#allocation7 + $0x18] sm:$0xf0]  ;;  %v9132_v18 = vld [vmem:[#allocation7 + $0x10] sm:$0xf] }
 0x398   : > { %v5025_v27 = vmax.f32 %v4913_v56, 0.0  ;;  %v4499_v40 = vpop.f32.mrf.mxu3  ;;  %12600 = vst [vmem:[#allocation49_spill] sm:$0xff] %v11012_v2  ;;  %v11017_v55 = vor.u32 %v9799_v41, %v9260_v14  ;;  %v9767_v41 = vld [vmem:[#allocation7 + $0x14] sm:$0xf0] }
 0x399   : > { %v4470_v33 = vpop.f32.mrf.mxu2  ;;  %v4414_v29 = vpop.f32.mrf.mxu0  ;;  %12599 = vst [vmem:[#allocation48_spill] sm:$0xff] %v11009_v47  ;;  %5557 = vmatpush.bf16.msra.mxu1 %v11009_v47  ;;  %5528 = vmatpush.bf16.msra.mxu0 %v11012_v2 }
 0x39a   : > { %v5125_v25 = vpack.c.bf16 %v5025_v27, %v5024_v35  ;;  %v4500_v12 = vadd.f32 %v4499_v40, %v4470_v33  ;;  %v4443_v56 = vpop.f32.mrf.mxu1  ;;  %12601 = vst [vmem:[#allocation50_spill] sm:$0xff] %v11017_v55  ;;  %v12602_v35 = vld [vmem:[#allocation51_spill] sm:$0xff]  ;;  %v11021_v33 = vor.u32 %v9766_v37, %v9134_v50  ;;  %v9252_v50 = vld [vmem:[#allocation7 + $0x100] sm:$0xf] }
 0x39b   : > { %v4444_v42 = vadd.f32 %v4443_v56, %v4414_v29  ;;  %v9196_v40 = vld [vmem:[#allocation7 + $0x90] sm:$0xf]  ;;  %5587 = vmatpush.bf16.msra.mxu2 %v11017_v55  ;;  %v11029_v29 = vor.u32 %v9767_v41, %v9132_v18  ;;  %v9126_v18 = vld [vmem:[#allocation7 + $0x8] sm:$0xf0] }
 0x39c   : > { %v6335_v6 = vunpack.c.l.b16 %v5125_v25  ;;  %v6616_v36 = vunpack.c.h.b16 %v5125_v25  ;;  %v4783_v27 = vmax.f32 %v12602_v35, %v4500_v12  ;;  %12603 = vst [vmem:[#allocation51_spill] sm:$0xff] %v11021_v33  ;;  %v11025_v16 = vor.u32 %v9783_v63, %v9196_v40  ;;  %5616 = vmatpush.bf16.msra.mxu3 %v11021_v33  ;;  %v9797_v35 = vld [vmem:[#allocation7 + $0x104] sm:$0xf0] }
 0x39d   : > { %v4796_v59 = vmax.f32 %v12604_v24, %v4444_v42  ;;  %12606 = vst [vmem:[#allocation97_spill] sm:$0xff] %v11029_v29  ;;  %v5038_v12 = vmax.f32 %v4926_v4, 0.0  ;;  %5529 = vmatpush.bf16.msra.mxu0 %v11029_v29  ;;  %v9764_v24 = vld [vmem:[#allocation7 + $0x4] sm:$0xf]  ;;  %v9188_v4 = vld [vmem:[#allocation7 + $0x80] sm:$0xf] }
 0x39e   : > { %12605 = vst [vmem:[#allocation52_spill] sm:$0xff] %v11025_v16  ;;  %v4927_v14 = vadd.f32 %v10962_v22, %v4783_v27  ;;  %v11031_v25 = vpack.c.b16 %v6335_v6, %v6333_v30  ;;  %v11033_v37 = vpack.c.b16 %v6616_v36, %v6614_v21  ;;  %5558 = vmatpush.bf16.msra.mxu1 %v11025_v16  ;;  %v9124_v36 = vld [vmem:[#allocation7] sm:$0xf]  ;;  %v9781_v33 = vld [vmem:[#allocation7 + $0x84] sm:$0xf0] }
 0x39f   : > { %v11037_v27 = vor.u32 %v9797_v35, %v9252_v50  ;;  %v11039_v21 = vor.u32 %v9764_v24, %v9126_v18  ;;  %v4940_v55 = vadd.f32 %v10954_v53, %v4796_v59  ;;  %v12612_v50 = vld [vmem:[#allocation53_spill] sm:$0xff] }
 0x3a0   : > { %12607 = vst [vmem:[#allocation98_spill] sm:$0xff] %v11031_v25  ;;  %v5039_v56 = vmax.f32 %v4927_v14, 0.0  ;;  %v4501_v40 = vpop.f32.mrf.mxu3 }
 0x3a1   : > { %12608 = vst [vmem:[#allocation99_spill] sm:$0xff] %v11033_v37  ;;  %v4472_v42 = vpop.f32.mrf.mxu2  ;;  %v4417_v63 = vpop.f32.mrf.mxu0  ;;  %v9765_v37 = vld [vmem:[#allocation7 + $0x4] sm:$0xf0]  ;;  %5588 = vmatpush.bf16.msra.mxu2 %v11037_v27  ;;  %5617 = vmatpush.bf16.msra.mxu3 %v11039_v21  ;;  %v5052_v59 = vmax.f32 %v4940_v55, 0.0 }
 0x3a2   : > { %12609 = vst [vmem:[#allocation100_spill] sm:$0xff] %v11037_v27  ;;  %v5132_v41 = vpack.c.bf16 %v5039_v56, %v5038_v12  ;;  %v4502_v6 = vadd.f32 %v4501_v40, %v4472_v42  ;;  %v4446_v30 = vpop.f32.mrf.mxu1  ;;  %v11042_v25 = vor.u32 %v9765_v37, %v9124_v36  ;;  %v11048_v12 = vor.u32 %v9781_v33, %v9188_v4  ;;  %v12614_v56 = vld [vmem:[#allocation54_spill] sm:$0xff] }
 0x3a3   : > { %12610 = vst [vmem:[#allocation101_spill] sm:$0xff] %v11039_v21  ;;  %v4447_v14 = vadd.f32 %v4446_v30, %v4417_v63 }
 0x3a4   : > { %12611 = vst [vmem:[#allocation102_spill] sm:$0xff] %v11042_v25  ;;  %v4797_v35 = vmax.f32 %v12612_v50, %v4502_v6  ;;  %4648 = vmatmul.bf16.gmra.mxu0 %v10228_v19  ;;  %4677 = vmatmul.bf16.gmra.mxu1 %v10230_v20  ;;  %v6337_v30 = vunpack.c.l.b16 %v5132_v41 }
 0x3a5   : > { %12613 = vst [vmem:[#allocation53_spill] sm:$0xff] %v11048_v12  ;;  %v4810_v42 = vmax.f32 %v12614_v56, %v4447_v14  ;;  %4735 = vmatmul.bf16.gmra.mxu3 %v10230_v20  ;;  %5530 = vmatpush.bf16.msra.mxu0 %v11042_v25  ;;  %v6618_v20 = vunpack.c.h.b16 %v5132_v41  ;;  %v12615_v14 = vld [vmem:[#allocation55_spill] sm:$0xff]  ;;  %v12616_v56 = vld [vmem:[#allocation56_spill] sm:$0xff] }
 0x3a6   : > { %4706 = vmatmul.bf16.gmra.mxu2 %v10228_v19  ;;  %v4941_v37 = vadd.f32 %v10962_v22, %v4797_v35  ;;  %5559 = vmatpush.bf16.msra.mxu1 %v11048_v12 }
 0x3a7   : > { %5800 = vmatpush.bf16.msrb.mxu2 %v10905_v15  ;;  %5829 = vmatpush.bf16.msrb.mxu3 %v10901_v17  ;;  %v4954_v4 = vadd.f32 %v10954_v53, %v4810_v42 }
 0x3a8   : > { %v5053_v40 = vmax.f32 %v4941_v37, 0.0  ;;  %v4504_v63 = vpop.f32.mrf.mxu3 }
 0x3a9   : > { %v4475_v33 = vpop.f32.mrf.mxu2  ;;  %v4419_v24 = vpop.f32.mrf.mxu0 }
 0x3aa   : > { %v5139_v18 = vpack.c.bf16 %v5053_v40, %v5052_v59  ;;  %v4505_v6 = vadd.f32 %v4504_v63, %v4475_v33  ;;  %v4448_v19 = vpop.f32.mrf.mxu1  ;;  %v5066_v33 = vmax.f32 %v4954_v4, 0.0  ;;  %v9310_v4 = vld [vmem:[#allocation7 + $0x178] sm:$0xf0] }
 0x3ab   : > { %v4449_v36 = vadd.f32 %v4448_v19, %v4419_v24  ;;  %5801 = vmatpush.bf16.msrb.mxu2 %v10921_v1  ;;  %5830 = vmatpush.bf16.msrb.mxu3 %v10918_v38 }
 0x3ac   : > { %v4811_v50 = vmax.f32 %v12615_v14, %v4505_v6  ;;  %v6339_v55 = vunpack.c.l.b16 %v5139_v18  ;;  %v6620_v35 = vunpack.c.h.b16 %v5139_v18 }
 0x3ad   : > { %v4824_v37 = vmax.f32 %v12616_v56, %v4449_v36  ;;  %v12619_v36 = vld [vmem:[#allocation57_spill] sm:$0xff] }
 0x3ae   : > { %v4955_v15 = vadd.f32 %v10962_v22, %v4811_v50  ;;  %v11065_v59 = vpack.c.b16 %v6339_v55, %v6337_v30  ;;  %v11067_v40 = vpack.c.b16 %v6620_v35, %v6618_v20  ;;  %v9810_v50 = vld [vmem:[#allocation7 + $0x174] sm:$0xf]  ;;  %v12620_v55 = vld [vmem:[#allocation58_spill] sm:$0xff] }
 0x3af   : > { %5802 = vmatpush.bf16.msrb.mxu2 %v10949_v48  ;;  %5831 = vmatpush.bf16.msrb.mxu3 %v10945_v52  ;;  %v4968_v30 = vadd.f32 %v10954_v53, %v4824_v37  ;;  %v11079_v56 = vor.u32 %v9810_v50, %v9310_v4 }
 0x3b0   : > { %12617 = vst [vmem:[#allocation54_spill] sm:$0xff] %v11065_v59  ;;  %v5067_v41 = vmax.f32 %v4955_v15, 0.0  ;;  %v4506_v42 = vpop.f32.mrf.mxu3  ;;  %v9794_v15 = vld [vmem:[#allocation7 + $0xf4] sm:$0xf] }
 0x3b1   : > { %12618 = vst [vmem:[#allocation55_spill] sm:$0xff] %v11067_v40  ;;  %v4477_v63 = vpop.f32.mrf.mxu2  ;;  %v4422_v24 = vpop.f32.mrf.mxu0  ;;  %5668 = vmatpush.bf16.msrb.mxu1 %v11079_v56 }
 0x3b2   : > { %v5146_v6 = vpack.c.bf16 %v5067_v41, %v5066_v33  ;;  %v4507_v19 = vadd.f32 %v4506_v42, %v4477_v63  ;;  %v4451_v18 = vpop.f32.mrf.mxu1  ;;  %12621 = vst [vmem:[#allocation56_spill] sm:$0xff] %v11079_v56  ;;  %v9246_v33 = vld [vmem:[#allocation7 + $0xf8] sm:$0xf0]  ;;  %v5080_v63 = vmax.f32 %v4968_v30, 0.0 }
 0x3b3   : > { %v4452_v14 = vadd.f32 %v4451_v18, %v4422_v24  ;;  %5803 = vmatpush.bf16.msrb.mxu2 %v10970_v46  ;;  %5832 = vmatpush.bf16.msrb.mxu3 %v10967_v23  ;;  %v11083_v41 = vor.u32 %v9794_v15, %v9246_v33  ;;  %v12623_v15 = vld [vmem:[#allocation59_spill] sm:$0xff]  ;;  %v9302_v33 = vld [vmem:[#allocation7 + $0x168] sm:$0xf0] }
 0x3b4   : > { %v4825_v20 = vmax.f32 %v12619_v36, %v4507_v19  ;;  %4653 = vmatmul.bf16.gmra.mxu0 %v10240_v49  ;;  %4682 = vmatmul.bf16.gmra.mxu1 %v10242_v51  ;;  %v6622_v50 = vunpack.c.h.b16 %v5146_v6 }
 0x3b5   : > { %v4838_v35 = vmax.f32 %v12620_v55, %v4452_v14  ;;  %4740 = vmatmul.bf16.gmra.mxu3 %v10242_v51  ;;  %12622 = vst [vmem:[#allocation57_spill] sm:$0xff] %v11083_v41  ;;  %5639 = vmatpush.bf16.msrb.mxu0 %v11083_v41  ;;  %v9808_v55 = vld [vmem:[#allocation7 + $0x164] sm:$0xf] }
 0x3b6   : > { %4711 = vmatmul.bf16.gmra.mxu2 %v10240_v49  ;;  %v4969_v37 = vadd.f32 %v10962_v22, %v4825_v20  ;;  %v6341_v20 = vunpack.c.l.b16 %v5146_v6 }
 0x3b7   : > { %5804 = vmatpush.bf16.msrb.mxu2 %v10999_v0  ;;  %5833 = vmatpush.bf16.msrb.mxu3 %v10995_v10  ;;  %v4982_v4 = vadd.f32 %v10954_v53, %v4838_v35  ;;  %v12624_v0 = vld [vmem:[#allocation60_spill] sm:$0xff] }
 0x3b8   : > { %v5081_v42 = vmax.f32 %v4969_v37, 0.0  ;;  %v4509_v49 = vpop.f32.mrf.mxu3  ;;  %v9792_v37 = vld [vmem:[#allocation7 + $0xe4] sm:$0xf] }
 0x3b9   : > { %v4480_v24 = vpop.f32.mrf.mxu2  ;;  %v4424_v19 = vpop.f32.mrf.mxu0 }
 0x3ba   : > { %v5153_v18 = vpack.c.bf16 %v5081_v42, %v5080_v63  ;;  %v4510_v14 = vadd.f32 %v4509_v49, %v4480_v24  ;;  %v4453_v36 = vpop.f32.mrf.mxu1  ;;  %v11094_v42 = vor.u32 %v9808_v55, %v9302_v33  ;;  %v9238_v24 = vld [vmem:[#allocation7 + $0xe8] sm:$0xf0]  ;;  %v9294_v33 = vld [vmem:[#allocation7 + $0x158] sm:$0xf0] }
 0x3bb   : > { %v4454_v51 = vadd.f32 %v4453_v36, %v4424_v19  ;;  %5805 = vmatpush.bf16.msrb.mxu2 %v11012_v2  ;;  %5834 = vmatpush.bf16.msrb.mxu3 %v11009_v47  ;;  %v11097_v19 = vor.u32 %v9792_v37, %v9238_v24  ;;  %v9790_v37 = vld [vmem:[#allocation7 + $0xd4] sm:$0xf]  ;;  %v12629_v24 = vld [vmem:[#allocation62_spill] sm:$0xff] }
 0x3bc   : > { %v4839_v30 = vmax.f32 %v12623_v15, %v4510_v14  ;;  %v6343_v40 = vunpack.c.l.b16 %v5153_v18  ;;  %v6624_v59 = vunpack.c.h.b16 %v5153_v18  ;;  %5669 = vmatpush.bf16.msrb.mxu1 %v11094_v42  ;;  %v5094_v14 = vmax.f32 %v4982_v4, 0.0  ;;  %v9806_v4 = vld [vmem:[#allocation7 + $0x154] sm:$0xf] }
 0x3bd   : > { %v4852_v63 = vmax.f32 %v12624_v0, %v4454_v51  ;;  %12625 = vst [vmem:[#allocation58_spill] sm:$0xff] %v11097_v19  ;;  %5640 = vmatpush.bf16.msrb.mxu0 %v11097_v19 }
 0x3be   : > { %v4983_v49 = vadd.f32 %v10962_v22, %v4839_v30  ;;  %v11099_v6 = vpack.c.b16 %v6343_v40, %v6341_v20  ;;  %v11101_v35 = vpack.c.b16 %v6624_v59, %v6622_v50  ;;  %v12628_v20 = vld [vmem:[#allocation61_spill] sm:$0xff] }
 0x3bf   : > { %5806 = vmatpush.bf16.msrb.mxu2 %v11029_v29  ;;  %5835 = vmatpush.bf16.msrb.mxu3 %v11025_v16  ;;  %v4996_v59 = vadd.f32 %v10954_v53, %v4852_v63 }
 0x3c0   : > { %12626 = vst [vmem:[#allocation59_spill] sm:$0xff] %v11099_v6  ;;  %v5095_v36 = vmax.f32 %v4983_v49, 0.0  ;;  %v4511_v0 = vpop.f32.mrf.mxu3 }
 0x3c1   : > { %12627 = vst [vmem:[#allocation60_spill] sm:$0xff] %v11101_v35  ;;  %v4482_v18 = vpop.f32.mrf.mxu2  ;;  %v4523_v51 = vpop.f32.mrf.mxu0  ;;  %v9222_v35 = vld [vmem:[#allocation7 + $0xc8] sm:$0xf0] }
 0x3c2   : > { %v5160_v15 = vpack.c.bf16 %v5095_v36, %v5094_v14  ;;  %v4512_v30 = vadd.f32 %v4511_v0, %v4482_v18  ;;  %v4552_v55 = vpop.f32.mrf.mxu1  ;;  %v11115_v14 = vor.u32 %v9806_v4, %v9294_v33  ;;  %v9230_v36 = vld [vmem:[#allocation7 + $0xd8] sm:$0xf0]  ;;  %v11123_v18 = vperm.slane %v10937_v44, 2  ;;  %v9804_v33 = vld [vmem:[#allocation7 + $0x144] sm:$0xf] }
 0x3c3   : > { %v4553_v40 = vadd.f32 %v4552_v55, %v4523_v51  ;;  %5807 = vmatpush.bf16.msrb.mxu2 %v11042_v25  ;;  %5836 = vmatpush.bf16.msrb.mxu3 %v11048_v12  ;;  %v11119_v63 = vor.u32 %v9790_v37, %v9230_v36  ;;  %v5108_v0 = vmax.f32 %v4996_v59, 0.0  ;;  %v9286_v37 = vld [vmem:[#allocation7 + $0x148] sm:$0xf0] }
 0x3c4   : > { %v4853_v50 = vmax.f32 %v12628_v20, %v4512_v30  ;;  %5531 = vmatmul.bf16.vlgmr.msra.gmra.mxu0 %v10633_v43  ;;  %5560 = vmatmul.bf16.vlgmr.msra.gmra.mxu1 %v10635_v60  ;;  %v6626_v6 = vunpack.c.h.b16 %v5160_v15 }
 0x3c5   : > { %v4756_v49 = vmax.f32 %v12629_v24, %v4553_v40  ;;  %5618 = vmatmul.bf16.vlgmr.msra.gmra.mxu3 %v10633_v43  ;;  %5670 = vmatpush.bf16.msrb.mxu1 %v11115_v14  ;;  %v6345_v40 = vunpack.c.l.b16 %v5160_v15  ;;  %v9788_v24 = vld [vmem:[#allocation7 + $0xc4] sm:$0xf] }
 0x3c6   : > { %5589 = vmatmul.bf16.vlgmr.msra.gmra.mxu2 %v10711_v13  ;;  %v4997_v53 = vadd.f32 %v10962_v22, %v4853_v50  ;;  %5641 = vmatpush.bf16.msrb.mxu0 %v11119_v63  ;;  %v11129_v22 = vperm.slane %v10937_v44, 3  ;;  %v11137_v25 = vor.u32 %v9788_v24, %v9222_v35  ;;  %v12636_v24 = vld [vmem:[#allocation65_spill] sm:$0xff] }
 0x3c7   : > { %5916 = vmatpush.bf16.msra.mxu2 %v11083_v41  ;;  %5945 = vmatpush.bf16.msra.mxu3 %v11079_v56  ;;  %v4900_v59 = vadd.f32 %v11123_v18, %v4756_v49  ;;  %v12631_v41 = vld [vmem:[#allocation63_spill] sm:$0xff] }
 0x3c8   : > { %v5109_v51 = vmax.f32 %v4997_v53, 0.0  ;;  %v4610_v55 = vpop.f32.mrf.mxu3  ;;  %v11133_v53 = vor.u32 %v9804_v33, %v9286_v37  ;;  %12632 = vst [vmem:[#allocation62_spill] sm:$0xff] %v11137_v25 }
 0x3c9   : > { %v4581_v30 = vpop.f32.mrf.mxu2  ;;  %v4525_v43 = vpop.f32.mrf.mxu0 }
 0x3ca   : > { %v5167_v20 = vpack.c.bf16 %v5109_v51, %v5108_v0  ;;  %v4611_v50 = vadd.f32 %v4610_v55, %v4581_v30  ;;  %v4554_v4 = vpop.f32.mrf.mxu1  ;;  %12630 = vst [vmem:[#allocation61_spill] sm:$0xff] %v11133_v53  ;;  %v12633_v30 = vld [vmem:[#allocation64_spill] sm:$0xff]  ;;  %5671 = vmatpush.bf16.msrb.mxu1 %v11133_v53  ;;  %5642 = vmatpush.bf16.msrb.mxu0 %v11137_v25 }
 0x3cb   : > { %5917 = vmatpush.bf16.msra.mxu2 %v11097_v19  ;;  %v4555_v36 = vadd.f32 %v4554_v4, %v4525_v43  ;;  %5946 = vmatpush.bf16.msra.mxu3 %v11094_v42 }
 0x3cc   : > { %v4757_v56 = vmax.f32 %v12631_v41, %v4611_v50  ;;  %v6347_v0 = vunpack.c.l.b16 %v5167_v20  ;;  %v6628_v51 = vunpack.c.h.b16 %v5167_v20  ;;  %v5012_v41 = vmax.f32 %v4900_v59, 0.0  ;;  %v9278_v59 = vld [vmem:[#allocation7 + $0x138] sm:$0xf0] }
 0x3cd   : > { %v4770_v55 = vmax.f32 %v12633_v30, %v4555_v36  ;;  %v9802_v36 = vld [vmem:[#allocation7 + $0x134] sm:$0xf] }
 0x3ce   : > { %v4901_v19 = vadd.f32 %v11129_v22, %v4757_v56  ;;  %v11144_v49 = vpack.c.b16 %v6347_v0, %v6345_v40  ;;  %v11146_v43 = vpack.c.b16 %v6628_v51, %v6626_v6  ;;  %v12637_v0 = vld [vmem:[#allocation66_spill] sm:$0xff]  ;;  %v11157_v30 = vor.u32 %v9802_v36, %v9278_v59 }
 0x3cf   : > { %5918 = vmatpush.bf16.msra.mxu2 %v11119_v63  ;;  %5947 = vmatpush.bf16.msra.mxu3 %v11115_v14  ;;  %v4914_v40 = vadd.f32 %v11123_v18, %v4770_v55 }
 0x3d0   : > { %12634 = vst [vmem:[#allocation63_spill] sm:$0xff] %v11144_v49  ;;  %v5013_v35 = vmax.f32 %v4901_v19, 0.0  ;;  %v4612_v20 = vpop.f32.mrf.mxu3  ;;  %v9786_v19 = vld [vmem:[#allocation7 + $0xb4] sm:$0xf]  ;;  %5672 = vmatpush.bf16.msrb.mxu1 %v11157_v30 }
 0x3d1   : > { %12635 = vst [vmem:[#allocation64_spill] sm:$0xff] %v11146_v43  ;;  %v4583_v15 = vpop.f32.mrf.mxu2  ;;  %v4528_v50 = vpop.f32.mrf.mxu0 }
 0x3d2   : > { %v5119_v4 = vpack.c.bf16 %v5013_v35, %v5012_v41  ;;  %v4613_v33 = vadd.f32 %v4612_v20, %v4583_v15  ;;  %v4557_v37 = vpop.f32.mrf.mxu1  ;;  %12638 = vst [vmem:[#allocation65_spill] sm:$0xff] %v11157_v30  ;;  %v9214_v41 = vld [vmem:[#allocation7 + $0xb8] sm:$0xf0]  ;;  %v5026_v15 = vmax.f32 %v4914_v40, 0.0 }
 0x3d3   : > { %5919 = vmatpush.bf16.msra.mxu2 %v11137_v25  ;;  %v4558_v56 = vadd.f32 %v4557_v37, %v4528_v50  ;;  %5948 = vmatpush.bf16.msra.mxu3 %v11133_v53  ;;  %v11161_v55 = vor.u32 %v9786_v19, %v9214_v41  ;;  %v9784_v19 = vld [vmem:[#allocation7 + $0xa4] sm:$0xf]  ;;  %v12642_v25 = vld [vmem:[#allocation67_spill] sm:$0xff] }
 0x3d4   : > { %v4771_v6 = vmax.f32 %v12636_v24, %v4613_v33  ;;  %5536 = vmatmul.bf16.gmra.mxu0 %v10649_v54  ;;  %5565 = vmatmul.bf16.gmra.mxu1 %v10651_v62  ;;  %v9270_v24 = vld [vmem:[#allocation7 + $0x128] sm:$0xf0]  ;;  %v6615_v41 = vunpack.c.l.b16 %v5119_v4  ;;  %v6896_v43 = vunpack.c.h.b16 %v5119_v4  ;;  %v9782_v4 = vld [vmem:[#allocation7 + $0x94] sm:$0xf] }
 0x3d5   : > { %v4784_v51 = vmax.f32 %v12637_v0, %v4558_v56  ;;  %5623 = vmatmul.bf16.gmra.mxu3 %v10649_v54  ;;  %12639 = vst [vmem:[#allocation66_spill] sm:$0xff] %v11161_v55  ;;  %5643 = vmatpush.bf16.msrb.mxu0 %v11161_v55  ;;  %v9800_v56 = vld [vmem:[#allocation7 + $0x124] sm:$0xf]  ;;  %v9206_v0 = vld [vmem:[#allocation7 + $0xa8] sm:$0xf0] }
 0x3d6   : > { %5594 = vmatmul.bf16.gmra.mxu2 %v10727_v61  ;;  %v4915_v35 = vadd.f32 %v11129_v22, %v4771_v6  ;;  %v11167_v59 = vor.u32 %v9800_v56, %v9270_v24 }
 0x3d7   : > { %5949 = vmatpush.bf16.msra.mxu3 %v11157_v30  ;;  %5920 = vmatpush.bf16.msra.mxu2 %v11161_v55  ;;  %v4928_v55 = vadd.f32 %v11123_v18, %v4784_v51  ;;  %v9198_v51 = vld [vmem:[#allocation7 + $0x98] sm:$0xf0] }
 0x3d8   : > { %v5027_v20 = vmax.f32 %v4915_v35, 0.0  ;;  %v4615_v33 = vpop.f32.mrf.mxu3  ;;  %12640 = vst [vmem:[#allocation103_spill] sm:$0xff] %v11167_v59  ;;  %v11169_v35 = vor.u32 %v9784_v19, %v9206_v0  ;;  %5673 = vmatpush.bf16.msrb.mxu1 %v11167_v59 }
 0x3d9   : > { %v4586_v50 = vpop.f32.mrf.mxu2  ;;  %v4530_v37 = vpop.f32.mrf.mxu0 }
 0x3da   : > { %v5126_v6 = vpack.c.bf16 %v5027_v20, %v5026_v15  ;;  %v4616_v36 = vadd.f32 %v4615_v33, %v4586_v50  ;;  %v4559_v54 = vpop.f32.mrf.mxu1  ;;  %12641 = vst [vmem:[#allocation104_spill] sm:$0xff] %v11169_v35  ;;  %v12643_v15 = vld [vmem:[#allocation68_spill] sm:$0xff]  ;;  %5644 = vmatpush.bf16.msrb.mxu0 %v11169_v35  ;;  %v9798_v50 = vld [vmem:[#allocation7 + $0x114] sm:$0xf] }
 0x3db   : > { %v4560_v40 = vadd.f32 %v4559_v54, %v4530_v37  ;;  %5950 = vmatpush.bf16.msra.mxu3 %v11167_v59  ;;  %v9262_v33 = vld [vmem:[#allocation7 + $0x118] sm:$0xf0]  ;;  %5921 = vmatpush.bf16.msra.mxu2 %v11169_v35 }
 0x3dc   : > { %v6617_v49 = vunpack.c.l.b16 %v5126_v6  ;;  %v6898_v30 = vunpack.c.h.b16 %v5126_v6  ;;  %v4785_v53 = vmax.f32 %v12642_v25, %v4616_v36  ;;  %v11179_v56 = vor.u32 %v9798_v50, %v9262_v33  ;;  %v9254_v50 = vld [vmem:[#allocation7 + $0x108] sm:$0xf0] }
 0x3dd   : > { %v4798_v20 = vmax.f32 %v12643_v15, %v4560_v40  ;;  %v11185_v6 = vor.u32 %v9782_v4, %v9198_v51  ;;  %v5040_v36 = vmax.f32 %v4928_v55, 0.0  ;;  %v9190_v15 = vld [vmem:[#allocation7 + $0x88] sm:$0xf0]  ;;  %v9796_v55 = vld [vmem:[#allocation7 + $0x104] sm:$0xf] }
 0x3de   : > { %v4929_v37 = vadd.f32 %v11129_v22, %v4785_v53  ;;  %12644 = vst [vmem:[#allocation67_spill] sm:$0xff] %v11179_v56  ;;  %v11181_v24 = vpack.c.b16 %v6617_v49, %v6615_v41  ;;  %v11183_v25 = vpack.c.b16 %v6898_v30, %v6896_v43  ;;  %5674 = vmatpush.bf16.msrb.mxu1 %v11179_v56  ;;  %v9780_v53 = vld [vmem:[#allocation7 + $0x84] sm:$0xf] }
 0x3df   : > { %12647 = vst [vmem:[#allocation106_spill] sm:$0xff] %v11185_v6  ;;  %5951 = vmatpush.bf16.msra.mxu3 %v11179_v56  ;;  %5645 = vmatpush.bf16.msrb.mxu0 %v11185_v6  ;;  %v11191_v41 = vor.u32 %v9780_v53, %v9190_v15  ;;  %v11193_v4 = vor.u32 %v9796_v55, %v9254_v50  ;;  %v12650_v51 = vld [vmem:[#allocation69_spill] sm:$0xff]  ;;  %v12652_v55 = vld [vmem:[#allocation71_spill] sm:$0xff] }
 0x3e0   : > { %12645 = vst [vmem:[#allocation68_spill] sm:$0xff] %v11181_v24  ;;  %v5041_v54 = vmax.f32 %v4929_v37, 0.0  ;;  %v4617_v0 = vpop.f32.mrf.mxu3  ;;  %5922 = vmatpush.bf16.msra.mxu2 %v11185_v6  ;;  %v4942_v37 = vadd.f32 %v11123_v18, %v4798_v20  ;;  %v12651_v24 = vld [vmem:[#allocation70_spill] sm:$0xff] }
 0x3e1   : > { %12646 = vst [vmem:[#allocation105_spill] sm:$0xff] %v11183_v25  ;;  %v4588_v19 = vpop.f32.mrf.mxu2  ;;  %v4533_v40 = vpop.f32.mrf.mxu0 }
 0x3e2   : > { %v5133_v49 = vpack.c.bf16 %v5041_v54, %v5040_v36  ;;  %v4618_v43 = vadd.f32 %v4617_v0, %v4588_v19  ;;  %v4562_v30 = vpop.f32.mrf.mxu1  ;;  %12648 = vst [vmem:[#allocation107_spill] sm:$0xff] %v11191_v41  ;;  %5675 = vmatpush.bf16.msrb.mxu1 %v11193_v4  ;;  %v5054_v20 = vmax.f32 %v4942_v37, 0.0 }
 0x3e3   : > { %v4563_v33 = vadd.f32 %v4562_v30, %v4533_v40  ;;  %12649 = vst [vmem:[#allocation108_spill] sm:$0xff] %v11193_v4  ;;  %5646 = vmatpush.bf16.msrb.mxu0 %v11191_v41  ;;  %5952 = vmatpush.bf16.msra.mxu3 %v11193_v4 }
 0x3e4   : > { %v4799_v25 = vmax.f32 %v12650_v51, %v4618_v43  ;;  %5541 = vmatmul.bf16.gmra.mxu0 %v10665_v58  ;;  %5570 = vmatmul.bf16.gmra.mxu1 %v10667_v26  ;;  %v6619_v53 = vunpack.c.l.b16 %v5133_v49  ;;  %v6900_v43 = vunpack.c.h.b16 %v5133_v49  ;;  %v12653_v51 = vld [vmem:[#allocation72_spill] sm:$0xff] }
 0x3e5   : > { %v4812_v56 = vmax.f32 %v12651_v24, %v4563_v33  ;;  %5628 = vmatmul.bf16.gmra.mxu3 %v10665_v58  ;;  %5923 = vmatpush.bf16.msra.mxu2 %v11191_v41 }
 0x3e6   : > { %5599 = vmatmul.bf16.gmra.mxu2 %v10743_v11  ;;  %v4943_v36 = vadd.f32 %v11129_v22, %v4799_v25  ;;  %5887 = vmatpush.bf16.msra.mxu1 %v10885_v31 }
 0x3e7   : > { %5858 = vmatpush.bf16.msra.mxu0 %v10881_v28  ;;  %v4956_v30 = vadd.f32 %v11123_v18, %v4812_v56 }
 0x3e8   : > { %v5055_v54 = vmax.f32 %v4943_v36, 0.0  ;;  %v4620_v24 = vpop.f32.mrf.mxu3 }
 0x3e9   : > { %v4591_v19 = vpop.f32.mrf.mxu2  ;;  %v4535_v0 = vpop.f32.mrf.mxu0 }
 0x3ea   : > { %v5140_v25 = vpack.c.bf16 %v5055_v54, %v5054_v20  ;;  %v4621_v40 = vadd.f32 %v4620_v24, %v4591_v19  ;;  %v4564_v58 = vpop.f32.mrf.mxu1  ;;  %5888 = vmatpush.bf16.msra.mxu1 %v10910_v39  ;;  %v5068_v19 = vmax.f32 %v4956_v30, 0.0 }
 0x3eb   : > { %v4565_v15 = vadd.f32 %v4564_v58, %v4535_v0  ;;  %5859 = vmatpush.bf16.msra.mxu0 %v10907_v32 }
 0x3ec   : > { %v4813_v50 = vmax.f32 %v12652_v55, %v4621_v40  ;;  %v6621_v33 = vunpack.c.l.b16 %v5140_v25  ;;  %v6902_v37 = vunpack.c.h.b16 %v5140_v25 }
 0x3ed   : > { %v4826_v36 = vmax.f32 %v12653_v51, %v4565_v15  ;;  %v12656_v15 = vld [vmem:[#allocation73_spill] sm:$0xff] }
 0x3ee   : > { %v4957_v41 = vadd.f32 %v11129_v22, %v4813_v50  ;;  %v11215_v20 = vpack.c.b16 %v6621_v33, %v6619_v53  ;;  %v11217_v54 = vpack.c.b16 %v6902_v37, %v6900_v43  ;;  %5889 = vmatpush.bf16.msra.mxu1 %v10928_v3 }
 0x3ef   : > { %5860 = vmatpush.bf16.msra.mxu0 %v10923_v5  ;;  %v4970_v53 = vadd.f32 %v11123_v18, %v4826_v36  ;;  %v12658_v36 = vld [vmem:[#allocation41_spill] sm:$0xff] }
 0x3f0   : > { %12654 = vst [vmem:[#allocation69_spill] sm:$0xff] %v11215_v20  ;;  %v5069_v49 = vmax.f32 %v4957_v41, 0.0  ;;  %v4622_v56 = vpop.f32.mrf.mxu3  ;;  %v12657_v41 = vld [vmem:[#allocation74_spill] sm:$0xff]  ;;  %v12662_v20 = vld [vmem:[#allocation76_spill] sm:$0xff] }
 0x3f1   : > { %12655 = vst [vmem:[#allocation70_spill] sm:$0xff] %v11217_v54  ;;  %v4593_v24 = vpop.f32.mrf.mxu2  ;;  %v4538_v0 = vpop.f32.mrf.mxu0  ;;  %v5082_v33 = vmax.f32 %v4970_v53, 0.0  ;;  %v12661_v54 = vld [vmem:[#allocation47_spill] sm:$0xff] }
 0x3f2   : > { %v5147_v40 = vpack.c.bf16 %v5069_v49, %v5068_v19  ;;  %v4623_v58 = vadd.f32 %v4622_v56, %v4593_v24  ;;  %v4567_v25 = vpop.f32.mrf.mxu1  ;;  %5890 = vmatpush.bf16.msra.mxu1 %v10957_v45 }
 0x3f3   : > { %v4568_v55 = vadd.f32 %v4567_v25, %v4538_v0  ;;  %5861 = vmatpush.bf16.msra.mxu0 %v10951_v9 }
 0x3f4   : > { %v4827_v43 = vmax.f32 %v12656_v15, %v4623_v58  ;;  %5546 = vmatmul.bf16.gmra.mxu0 %v10691_v57  ;;  %5575 = vmatmul.bf16.gmra.mxu1 %v10693_v8  ;;  %v6623_v58 = vunpack.c.l.b16 %v5147_v40  ;;  %v6904_v15 = vunpack.c.h.b16 %v5147_v40 }
 0x3f5   : > { %v4840_v30 = vmax.f32 %v12657_v41, %v4568_v55  ;;  %5633 = vmatmul.bf16.gmra.mxu3 %v10691_v57  ;;  %v12659_v55 = vld [vmem:[#allocation46_spill] sm:$0xff]  ;;  %v12660_v57 = vld [vmem:[#allocation75_spill] sm:$0xff] }
 0x3f6   : > { %5604 = vmatmul.bf16.gmra.mxu2 %v10771_v7  ;;  %v4971_v50 = vadd.f32 %v11129_v22, %v4827_v43  ;;  %5891 = vmatpush.bf16.msra.mxu1 %v12658_v36 }
 0x3f7   : > { %5862 = vmatpush.bf16.msra.mxu0 %v10972_v34  ;;  %v4984_v43 = vadd.f32 %v11123_v18, %v4840_v30  ;;  %v12666_v30 = vld [vmem:[#allocation51_spill] sm:$0xff] }
 0x3f8   : > { %v5083_v37 = vmax.f32 %v4971_v50, 0.0  ;;  %v4625_v19 = vpop.f32.mrf.mxu3 }
 0x3f9   : > { %v4596_v51 = vpop.f32.mrf.mxu2  ;;  %v4540_v49 = vpop.f32.mrf.mxu0 }
 0x3fa   : > { %v5154_v24 = vpack.c.bf16 %v5083_v37, %v5082_v33  ;;  %v4626_v56 = vadd.f32 %v4625_v19, %v4596_v51  ;;  %v4569_v0 = vpop.f32.mrf.mxu1  ;;  %5892 = vmatpush.bf16.msra.mxu1 %v12661_v54  ;;  %v12665_v51 = vld [vmem:[#allocation50_spill] sm:$0xff]  ;;  %v5096_v19 = vmax.f32 %v4984_v43, 0.0 }
 0x3fb   : > { %v4570_v25 = vadd.f32 %v4569_v0, %v4540_v49  ;;  %5863 = vmatpush.bf16.msra.mxu0 %v12659_v55 }
 0x3fc   : > { %v4841_v41 = vmax.f32 %v12660_v57, %v4626_v56  ;;  %v6625_v53 = vunpack.c.l.b16 %v5154_v24  ;;  %v6906_v50 = vunpack.c.h.b16 %v5154_v24 }
 0x3fd   : > { %v4854_v4 = vmax.f32 %v12662_v20, %v4570_v25 }
 0x3fe   : > { %v4985_v6 = vadd.f32 %v11129_v22, %v4841_v41  ;;  %v11239_v33 = vpack.c.b16 %v6625_v53, %v6623_v58  ;;  %v11241_v37 = vpack.c.b16 %v6906_v50, %v6904_v15  ;;  %5893 = vmatpush.bf16.msra.mxu1 %v12666_v30  ;;  %v12667_v58 = vld [vmem:[#allocation77_spill] sm:$0xff]  ;;  %v12669_v41 = vld [vmem:[#allocation94_spill] sm:$0xff] }
 0x3ff   : > { %5864 = vmatpush.bf16.msra.mxu0 %v12665_v51  ;;  %v4998_v20 = vadd.f32 %v11123_v18, %v4854_v4  ;;  %v12670_v4 = vld [vmem:[#allocation28_spill] sm:$0xff] }
 0x400   : > { %12663 = vst [vmem:[#allocation71_spill] sm:$0xff] %v11239_v33  ;;  %v5097_v40 = vmax.f32 %v4985_v6, 0.0  ;;  %v4627_v56 = vpop.f32.mrf.mxu3  ;;  %v12668_v6 = vld [vmem:[#allocation78_spill] sm:$0xff] }
 0x401   : > { %12664 = vst [vmem:[#allocation72_spill] sm:$0xff] %v11241_v37  ;;  %v4598_v49 = vpop.f32.mrf.mxu2  ;;  %v4639_v0 = vpop.f32.mrf.mxu0  ;;  %v5110_v18 = vmax.f32 %v4998_v20, 0.0 }
 0x402   : > { %v5161_v57 = vpack.c.bf16 %v5097_v40, %v5096_v19  ;;  %v4628_v35 = vadd.f32 %v4627_v56, %v4598_v49  ;;  %v4668_v24 = vpop.f32.mrf.mxu1  ;;  %5894 = vmatpush.bf16.msra.mxu1 %v11039_v21  ;;  %v9884_v40 = vld [vmem:[#allocation5 + $0x8] sm:$0x3f] }
 0x403   : > { %v4669_v59 = vadd.f32 %v4668_v24, %v4639_v0  ;;  %5865 = vmatpush.bf16.msra.mxu0 %v11037_v27  ;;  %v11262_v49 = vperm.slane %v9884_v40, 5 }
 0x404   : > { %v4855_v25 = vmax.f32 %v12667_v58, %v4628_v35  ;;  %5647 = vmatmul.bf16.vlgmr.msrb.gmra.mxu0 %v10635_v60  ;;  %5676 = vmatmul.bf16.vlgmr.msrb.gmra.mxu1 %v10711_v13  ;;  %v11259_v35 = vperm.slane %v10937_v44, 4  ;;  %v6627_v0 = vunpack.c.l.b16 %v5161_v57  ;;  %v6908_v44 = vunpack.c.h.b16 %v5161_v57  ;;  %v12671_v58 = vld [vmem:[#allocation79_spill] sm:$0xff] }
 0x405   : > { %v4758_v15 = vmax.f32 %v12668_v6, %v4669_v59  ;;  %5837 = vmatmul.bf16.vlgmr.msrb.gmra.mxu3 %v12669_v41 }
 0x406   : > { %5808 = vmatmul.bf16.vlgmr.msrb.gmra.mxu2 %v10711_v13  ;;  %v4999_v43 = vadd.f32 %v11129_v22, %v4855_v25  ;;  %6169 = vmatpush.bf16.msrb.mxu3 %v10885_v31 }
 0x407   : > { %6140 = vmatpush.bf16.msrb.mxu2 %v10881_v28  ;;  %6111 = vmatpush.bf16.msrb.mxu1 %v10901_v17  ;;  %v4902_v20 = vadd.f32 %v11259_v35, %v4758_v15 }
 0x408   : > { %v5111_v60 = vmax.f32 %v4999_v43, 0.0  ;;  %6082 = vmatpush.bf16.msrb.mxu0 %v12670_v4  ;;  %v4726_v53 = vpop.f32.mrf.mxu3 }
 0x409   : > { %v4697_v59 = vpop.f32.mrf.mxu2  ;;  %v4641_v50 = vpop.f32.mrf.mxu0  ;;  %v5014_v57 = vmax.f32 %v4902_v20, 0.0 }
 0x40a   : > { %v5168_v19 = vpack.c.bf16 %v5111_v60, %v5110_v18  ;;  %v4727_v22 = vadd.f32 %v4726_v53, %v4697_v59  ;;  %v4670_v56 = vpop.f32.mrf.mxu1  ;;  %6170 = vmatpush.bf16.msrb.mxu3 %v10910_v39  ;;  %v12672_v18 = vld [vmem:[#allocation80_spill] sm:$0xff] }
 0x40b   : > { %6141 = vmatpush.bf16.msrb.mxu2 %v10907_v32  ;;  %v4671_v24 = vadd.f32 %v4670_v56, %v4641_v50  ;;  %6112 = vmatpush.bf16.msrb.mxu1 %v10918_v38 }
 0x40c   : > { %v4759_v25 = vmax.f32 %v12671_v58, %v4727_v22  ;;  %6083 = vmatpush.bf16.msrb.mxu0 %v10921_v1  ;;  %v6629_v6 = vunpack.c.l.b16 %v5168_v19  ;;  %v6910_v43 = vunpack.c.h.b16 %v5168_v19 }
 0x40d   : > { %v4772_v60 = vmax.f32 %v12672_v18, %v4671_v24 }
 0x40e   : > { %v4903_v59 = vadd.f32 %v11262_v49, %v4759_v25  ;;  %v11273_v53 = vpack.c.b16 %v6629_v6, %v6627_v0  ;;  %v11275_v50 = vpack.c.b16 %v6910_v43, %v6908_v44  ;;  %6171 = vmatpush.bf16.msrb.mxu3 %v10928_v3  ;;  %v12675_v25 = vld [vmem:[#allocation81_spill] sm:$0xff]  ;;  %v12676_v6 = vld [vmem:[#allocation82_spill] sm:$0xff] }
 0x40f   : > { %6142 = vmatpush.bf16.msrb.mxu2 %v10923_v5  ;;  %6113 = vmatpush.bf16.msrb.mxu1 %v10945_v52  ;;  %v4916_v44 = vadd.f32 %v11259_v35, %v4772_v60 }
 0x410   : > { %12673 = vst [vmem:[#allocation73_spill] sm:$0xff] %v11273_v53  ;;  %v5015_v15 = vmax.f32 %v4903_v59, 0.0  ;;  %6084 = vmatpush.bf16.msrb.mxu0 %v10949_v48  ;;  %v4728_v19 = vpop.f32.mrf.mxu3  ;;  %v12677_v59 = vld [vmem:[#allocation95_spill] sm:$0xff] }
 0x411   : > { %12674 = vst [vmem:[#allocation74_spill] sm:$0xff] %v11275_v50  ;;  %v4699_v22 = vpop.f32.mrf.mxu2  ;;  %v4644_v40 = vpop.f32.mrf.mxu0  ;;  %v5028_v60 = vmax.f32 %v4916_v44, 0.0  ;;  %v12680_v50 = vld [vmem:[#allocation84_spill] sm:$0xff] }
 0x412   : > { %v5120_v56 = vpack.c.bf16 %v5015_v15, %v5014_v57  ;;  %v4729_v24 = vadd.f32 %v4728_v19, %v4699_v22  ;;  %v4673_v58 = vpop.f32.mrf.mxu1  ;;  %6172 = vmatpush.bf16.msrb.mxu3 %v10957_v45 }
 0x413   : > { %6143 = vmatpush.bf16.msrb.mxu2 %v10951_v9  ;;  %v4674_v0 = vadd.f32 %v4673_v58, %v4644_v40  ;;  %6114 = vmatpush.bf16.msrb.mxu1 %v10967_v23  ;;  %v12678_v58 = vld [vmem:[#allocation45_spill] sm:$0xff] }
 0x414   : > { %v4773_v20 = vmax.f32 %v12675_v25, %v4729_v24  ;;  %5652 = vmatmul.bf16.gmra.mxu0 %v10651_v62  ;;  %5681 = vmatmul.bf16.gmra.mxu1 %v10727_v61  ;;  %v6897_v25 = vunpack.c.l.b16 %v5120_v56 }
 0x415   : > { %v4786_v43 = vmax.f32 %v12676_v6, %v4674_v0  ;;  %5842 = vmatmul.bf16.gmra.mxu3 %v12677_v59  ;;  %6085 = vmatpush.bf16.msrb.mxu0 %v10970_v46  ;;  %v12679_v6 = vld [vmem:[#allocation83_spill] sm:$0xff] }
 0x416   : > { %5813 = vmatmul.bf16.gmra.mxu2 %v10727_v61  ;;  %v4917_v18 = vadd.f32 %v11262_v49, %v4773_v20  ;;  %6173 = vmatpush.bf16.msrb.mxu3 %v12658_v36 }
 0x417   : > { %6144 = vmatpush.bf16.msrb.mxu2 %v10972_v34  ;;  %6115 = vmatpush.bf16.msrb.mxu1 %v10995_v10  ;;  %v4930_v44 = vadd.f32 %v11259_v35, %v4786_v43 }
 0x418   : > { %v5029_v57 = vmax.f32 %v4917_v18, 0.0  ;;  %v4731_v62 = vpop.f32.mrf.mxu3 }
 0x419   : > { %v4702_v15 = vpop.f32.mrf.mxu2  ;;  %v4646_v22 = vpop.f32.mrf.mxu0  ;;  %6086 = vmatpush.bf16.msrb.mxu0 %v12678_v58  ;;  %v5042_v56 = vmax.f32 %v4930_v44, 0.0  ;;  %v12683_v44 = vld [vmem:[#allocation86_spill] sm:$0xff] }
 0x41a   : > { %v5127_v19 = vpack.c.bf16 %v5029_v57, %v5028_v60  ;;  %v4732_v40 = vadd.f32 %v4731_v62, %v4702_v15  ;;  %v4675_v24 = vpop.f32.mrf.mxu1  ;;  %6174 = vmatpush.bf16.msrb.mxu3 %v12661_v54 }
 0x41b   : > { %v4676_v0 = vadd.f32 %v4675_v24, %v4646_v22  ;;  %6145 = vmatpush.bf16.msrb.mxu2 %v12659_v55  ;;  %6116 = vmatpush.bf16.msrb.mxu1 %v11009_v47 }
 0x41c   : > { %v6899_v20 = vunpack.c.l.b16 %v5127_v19  ;;  %v4787_v18 = vmax.f32 %v12679_v6, %v4732_v40 }
 0x41d   : > { %v4800_v37 = vmax.f32 %v12680_v50, %v4676_v0  ;;  %6087 = vmatpush.bf16.msrb.mxu0 %v11012_v2 }
 0x41e   : > { %v11302_v60 = vpack.c.b16 %v6899_v20, %v6897_v25  ;;  %v4931_v57 = vadd.f32 %v11262_v49, %v4787_v18  ;;  %6175 = vmatpush.bf16.msrb.mxu3 %v12666_v30  ;;  %v12682_v25 = vld [vmem:[#allocation85_spill] sm:$0xff] }
 0x41f   : > { %6146 = vmatpush.bf16.msrb.mxu2 %v12665_v51  ;;  %6117 = vmatpush.bf16.msrb.mxu1 %v11025_v16  ;;  %v4944_v0 = vadd.f32 %v11259_v35, %v4800_v37 }
 0x420   : > { %12681 = vst [vmem:[#allocation41_spill] sm:$0xff] %v11302_v60  ;;  %v5043_v15 = vmax.f32 %v4931_v57, 0.0  ;;  %v4733_v43 = vpop.f32.mrf.mxu3  ;;  %v12684_v57 = vld [vmem:[#allocation96_spill] sm:$0xff] }
 0x421   : > { %v4704_v62 = vpop.f32.mrf.mxu2  ;;  %v4649_v22 = vpop.f32.mrf.mxu0  ;;  %6088 = vmatpush.bf16.msrb.mxu0 %v11029_v29 }
 0x422   : > { %v4734_v19 = vadd.f32 %v4733_v43, %v4704_v62  ;;  %v4678_v40 = vpop.f32.mrf.mxu1  ;;  %v5134_v50 = vpack.c.bf16 %v5043_v15, %v5042_v56  ;;  %6176 = vmatpush.bf16.msrb.mxu3 %v11039_v21  ;;  %v12685_v56 = vld [vmem:[#allocation102_spill] sm:$0xff]  ;;  %v5056_v15 = vmax.f32 %v4944_v0, 0.0 }
 0x423   : > { %v4679_v24 = vadd.f32 %v4678_v40, %v4649_v22  ;;  %6147 = vmatpush.bf16.msrb.mxu2 %v11037_v27  ;;  %6118 = vmatpush.bf16.msrb.mxu1 %v11048_v12 }
 0x424   : > { %v4801_v20 = vmax.f32 %v12682_v25, %v4734_v19  ;;  %5657 = vmatmul.bf16.gmra.mxu0 %v10667_v26  ;;  %5686 = vmatmul.bf16.gmra.mxu1 %v10743_v11  ;;  %v6901_v53 = vunpack.c.l.b16 %v5134_v50 }
 0x425   : > { %v4814_v6 = vmax.f32 %v12683_v44, %v4679_v24  ;;  %5847 = vmatmul.bf16.gmra.mxu3 %v12684_v57  ;;  %6089 = vmatpush.bf16.msrb.mxu0 %v12685_v56  ;;  %v12686_v44 = vld [vmem:[#allocation87_spill] sm:$0xff] }
 0x426   : > { %5818 = vmatmul.bf16.gmra.mxu2 %v10743_v11  ;;  %v4945_v18 = vadd.f32 %v11262_v49, %v4801_v20  ;;  %v12687_v20 = vld [vmem:[#allocation88_spill] sm:$0xff] }
 0x427   : > { %v4958_v24 = vadd.f32 %v11259_v35, %v4814_v6 }
 0x428   : > { %v5057_v37 = vmax.f32 %v4945_v18, 0.0  ;;  %v4736_v43 = vpop.f32.mrf.mxu3 }
 0x429   : > { %v4707_v62 = vpop.f32.mrf.mxu2  ;;  %v4651_v22 = vpop.f32.mrf.mxu0  ;;  %v5070_v0 = vmax.f32 %v4958_v24, 0.0 }
 0x42a   : > { %v4737_v26 = vadd.f32 %v4736_v43, %v4707_v62  ;;  %v4680_v19 = vpop.f32.mrf.mxu1  ;;  %v5141_v40 = vpack.c.bf16 %v5057_v37, %v5056_v15 }
 0x42b   : > { %v4681_v25 = vadd.f32 %v4680_v19, %v4651_v22  ;;  %v12690_v19 = vld [vmem:[#allocation90_spill] sm:$0xff] }
 0x42c   : > { %v4815_v60 = vmax.f32 %v12686_v44, %v4737_v26  ;;  %v6903_v33 = vunpack.c.l.b16 %v5141_v40  ;;  %v12689_v26 = vld [vmem:[#allocation89_spill] sm:$0xff] }
 0x42d   : > { %v4828_v21 = vmax.f32 %v12687_v20, %v4681_v25 }
 0x42e   : > { %v4959_v27 = vadd.f32 %v11262_v49, %v4815_v60  ;;  %v11326_v51 = vpack.c.b16 %v6903_v33, %v6901_v53  ;;  %v12691_v33 = vld [vmem:[#allocation14_spill] sm:$0xff] }
 0x42f   : > { %v4972_v6 = vadd.f32 %v11259_v35, %v4828_v21 }
 0x430   : > { %12688 = vst [vmem:[#allocation75_spill] sm:$0xff] %v11326_v51  ;;  %v5071_v18 = vmax.f32 %v4959_v27, 0.0  ;;  %v4738_v55 = vpop.f32.mrf.mxu3 }
 0x431   : > { %v4709_v30 = vpop.f32.mrf.mxu2  ;;  %v4654_v62 = vpop.f32.mrf.mxu0 }
 0x432   : > { %v4739_v43 = vadd.f32 %v4738_v55, %v4709_v30  ;;  %v4683_v15 = vpop.f32.mrf.mxu1  ;;  %v5148_v37 = vpack.c.bf16 %v5071_v18, %v5070_v0  ;;  %v5084_v55 = vmax.f32 %v4972_v6, 0.0  ;;  %v12692_v0 = vld [vmem:[#allocation91_spill] sm:$0xff] }
 0x433   : > { %v4684_v22 = vadd.f32 %v4683_v15, %v4654_v62  ;;  %v12693_v15 = vld [vmem:[#allocation92_spill] sm:$0xff] }
 0x434   : > { %v4829_v50 = vmax.f32 %v12689_v26, %v4739_v43  ;;  %5662 = vmatmul.bf16.gmra.mxu0 %v10693_v8  ;;  %5691 = vmatmul.bf16.gmra.mxu1 %v10771_v7  ;;  %v6905_v62 = vunpack.c.l.b16 %v5148_v37  ;;  %v12695_v37 = vld [vmem:[#allocation93_spill] sm:$0xff] }
 0x435   : > { %v4842_v40 = vmax.f32 %v12690_v19, %v4684_v22  ;;  %5852 = vmatmul.bf16.gmra.mxu3 %v12691_v33 }
 0x436   : > { %5823 = vmatmul.bf16.gmra.mxu2 %v10771_v7  ;;  %v4973_v27 = vadd.f32 %v11262_v49, %v4829_v50 }
 0x437   : > { %v4986_v8 = vadd.f32 %v11259_v35, %v4842_v40 }
 0x438   : > { %v5085_v30 = vmax.f32 %v4973_v27, 0.0  ;;  %v4741_v60 = vpop.f32.mrf.mxu3 }
 0x439   : > { %v4712_v53 = vpop.f32.mrf.mxu2  ;;  %v4656_v25 = vpop.f32.mrf.mxu0  ;;  %v5098_v6 = vmax.f32 %v4986_v8, 0.0  ;;  %v12698_v8 = vld [vmem:[#allocation57_spill] sm:$0xff] }
 0x43a   : > { %v4742_v21 = vadd.f32 %v4741_v60, %v4712_v53  ;;  %v4685_v24 = vpop.f32.mrf.mxu1  ;;  %v5155_v44 = vpack.c.bf16 %v5085_v30, %v5084_v55 }
 0x43b   : > { %v4686_v20 = vadd.f32 %v4685_v24, %v4656_v25 }
 0x43c   : > { %v4843_v18 = vmax.f32 %v12692_v0, %v4742_v21  ;;  %v6907_v43 = vunpack.c.l.b16 %v5155_v44  ;;  %v12696_v21 = vld [vmem:[#allocation15_spill] sm:$0xff] }
 0x43d   : > { %v4856_v22 = vmax.f32 %v12693_v15, %v4686_v20 }
 0x43e   : > { %v4987_v26 = vadd.f32 %v11262_v49, %v4843_v18  ;;  %v11340_v50 = vpack.c.b16 %v6907_v43, %v6905_v62  ;;  %v12699_v18 = vld [vmem:[#allocation58_spill] sm:$0xff] }
 0x43f   : > { %v5000_v60 = vadd.f32 %v11259_v35, %v4856_v22 }
 0x440   : > { %12694 = vst [vmem:[#allocation76_spill] sm:$0xff] %v11340_v50  ;;  %v5099_v19 = vmax.f32 %v4987_v26, 0.0  ;;  %v4743_v51 = vpop.f32.mrf.mxu3 }
 0x441   : > { %v4714_v27 = vpop.f32.mrf.mxu2  ;;  %v11342_v53 = vpop.f32.mrf.mxu0  ;;  %v5112_v44 = vmax.f32 %v5000_v60, 0.0 }
 0x442   : > { %v4744_v55 = vadd.f32 %v4743_v51, %v4714_v27  ;;  %v11344_v30 = vpop.f32.mrf.mxu1  ;;  %v5162_v40 = vpack.c.bf16 %v5099_v19, %v5098_v6  ;;  %v12697_v51 = vld [vmem:[#allocation56_spill] sm:$0xff]  ;;  %v12701_v27 = vld [vmem:[#allocation61_spill] sm:$0xff] }
 0x444   : > { %v4857_v25 = vmax.f32 %v12695_v37, %v4744_v55  ;;  %5866 = vmatmul.bf16.vlgmr.msra.gmra.mxu0 %v12696_v21  ;;  %5895 = vmatmul.bf16.vlgmr.msra.gmra.mxu1 %v10711_v13  ;;  %v6909_v62 = vunpack.c.l.b16 %v5162_v40  ;;  %v12702_v55 = vld [vmem:[#allocation17_spill] sm:$0xff]  ;;  %v12703_v40 = vld [vmem:[#allocation62_spill] sm:$0xff] }
 0x445   : > { %5953 = vmatmul.bf16.vlgmr.msra.gmra.mxu3 %v12696_v21  ;;  %6227 = vmatpush.bf16.msra.mxu1 %v12697_v51  ;;  %v12704_v37 = vld [vmem:[#allocation65_spill] sm:$0xff] }
 0x446   : > { %5924 = vmatmul.bf16.vlgmr.msra.gmra.mxu2 %v12669_v41  ;;  %v5001_v24 = vadd.f32 %v11262_v49, %v4857_v25  ;;  %6393 = vmatpush.bf16.msra.mxu3 %v10901_v17  ;;  %v5562_v17 = vadd.f32 %v11344_v30, %v11342_v53 }
 0x447   : > { %6364 = vmatpush.bf16.msra.mxu2 %v12670_v4  ;;  %6198 = vmatpush.bf16.msra.mxu0 %v12698_v8 }
 0x448   : > { %v5113_v35 = vmax.f32 %v5001_v24, 0.0  ;;  %v11359_v0 = vpop.f32.mrf.mxu3 }
 0x449   : > { %v11356_v20 = vpop.f32.mrf.mxu2  ;;  %v11361_v13 = vpop.f32.mrf.mxu0  ;;  %6228 = vmatpush.bf16.msra.mxu1 %v11094_v42 }
 0x44a   : > { %v11363_v41 = vpop.f32.mrf.mxu1  ;;  %v5169_v49 = vpack.c.bf16 %v5113_v35, %v5112_v44  ;;  %6394 = vmatpush.bf16.msra.mxu3 %v10918_v38  ;;  %v12707_v35 = vld [vmem:[#allocation104_spill] sm:$0xff] }
 0x44b   : > { %6365 = vmatpush.bf16.msra.mxu2 %v10921_v1  ;;  %6199 = vmatpush.bf16.msra.mxu0 %v12699_v18 }
 0x44c   : > { %v6911_v43 = vunpack.c.l.b16 %v5169_v49 }
 0x44d   : > { %6229 = vmatpush.bf16.msra.mxu1 %v11115_v14 }
 0x44e   : > { %v11370_v15 = vpack.c.b16 %v6911_v43, %v6909_v62  ;;  %6395 = vmatpush.bf16.msra.mxu3 %v10945_v52  ;;  %v12708_v62 = vld [vmem:[#allocation67_spill] sm:$0xff] }
 0x44f   : > { %6366 = vmatpush.bf16.msra.mxu2 %v10949_v48  ;;  %6200 = vmatpush.bf16.msra.mxu0 %v11119_v63 }
 0x450   : > { %12700 = vst [vmem:[#allocation77_spill] sm:$0xff] %v11370_v15  ;;  %v11377_v26 = vpop.f32.mrf.mxu3 }
 0x451   : > { %v11374_v22 = vpop.f32.mrf.mxu2  ;;  %v11379_v6 = vpop.f32.mrf.mxu0  ;;  %6230 = vmatpush.bf16.msra.mxu1 %v12701_v27 }
 0x452   : > { %v11381_v19 = vpop.f32.mrf.mxu1  ;;  %6396 = vmatpush.bf16.msra.mxu3 %v10967_v23 }
 0x453   : > { %6367 = vmatpush.bf16.msra.mxu2 %v10970_v46  ;;  %6201 = vmatpush.bf16.msra.mxu0 %v12703_v40 }
 0x454   : > { %5871 = vmatmul.bf16.gmra.mxu0 %v12702_v55  ;;  %5900 = vmatmul.bf16.gmra.mxu1 %v10727_v61  ;;  %v12705_v61 = vld [vmem:[#allocation66_spill] sm:$0xff] }
 0x455   : > { %5958 = vmatmul.bf16.gmra.mxu3 %v12702_v55  ;;  %6231 = vmatpush.bf16.msra.mxu1 %v12704_v37 }
 0x456   : > { %5929 = vmatmul.bf16.gmra.mxu2 %v12677_v59  ;;  %6397 = vmatpush.bf16.msra.mxu3 %v10995_v10  ;;  %v12706_v59 = vld [vmem:[#allocation103_spill] sm:$0xff] }
 0x457   : > { %6368 = vmatpush.bf16.msra.mxu2 %v12678_v58  ;;  %6202 = vmatpush.bf16.msra.mxu0 %v12705_v61 }
 0x458   : > { %v11396_v25 = vpop.f32.mrf.mxu3 }
 0x459   : > { %v11393_v60 = vpop.f32.mrf.mxu2  ;;  %v11398_v24 = vpop.f32.mrf.mxu0  ;;  %6232 = vmatpush.bf16.msra.mxu1 %v12706_v59 }
 0x45a   : > { %v11400_v44 = vpop.f32.mrf.mxu1  ;;  %6398 = vmatpush.bf16.msra.mxu3 %v11009_v47  ;;  %v12710_v47 = vld [vmem:[#allocation19_spill] sm:$0xff] }
 0x45b   : > { %6369 = vmatpush.bf16.msra.mxu2 %v11012_v2  ;;  %6203 = vmatpush.bf16.msra.mxu0 %v12707_v35  ;;  %v12709_v2 = vld [vmem:[#allocation106_spill] sm:$0xff] }
 0x45d   : > { %6233 = vmatpush.bf16.msra.mxu1 %v12708_v62 }
 0x45e   : > { %6399 = vmatpush.bf16.msra.mxu3 %v11025_v16  ;;  %v12712_v16 = vld [vmem:[#allocation107_spill] sm:$0xff] }
 0x45f   : > { %6370 = vmatpush.bf16.msra.mxu2 %v11029_v29  ;;  %6204 = vmatpush.bf16.msra.mxu0 %v12709_v2  ;;  %v12711_v29 = vld [vmem:[#allocation108_spill] sm:$0xff] }
 0x460   : > { %v11412_v43 = vpop.f32.mrf.mxu3 }
 0x461   : > { %v11409_v49 = vpop.f32.mrf.mxu2  ;;  %v11414_v15 = vpop.f32.mrf.mxu0  ;;  %6234 = vmatpush.bf16.msra.mxu1 %v12711_v29 }
 0x462   : > { %v11416_v50 = vpop.f32.mrf.mxu1  ;;  %6400 = vmatpush.bf16.msra.mxu3 %v11048_v12 }
 0x463   : > { %6371 = vmatpush.bf16.msra.mxu2 %v12685_v56  ;;  %6205 = vmatpush.bf16.msra.mxu0 %v12712_v16 }
 0x464   : > { %5876 = vmatmul.bf16.gmra.mxu0 %v12710_v47  ;;  %5905 = vmatmul.bf16.gmra.mxu1 %v10743_v11 }
 0x465   : > { %5963 = vmatmul.bf16.gmra.mxu3 %v12710_v47 }
 0x466   : > { %5934 = vmatmul.bf16.gmra.mxu2 %v12684_v57  ;;  %v12716_v57 = vld [vmem:[#allocation21_spill] sm:$0xff] }
 0x468   : > { %v11429_v10 = vpop.f32.mrf.mxu3 }
 0x469   : > { %v11427_v58 = vpop.f32.mrf.mxu2  ;;  %v11431_v46 = vpop.f32.mrf.mxu0 }
 0x46a   : > { %v11433_v56 = vpop.f32.mrf.mxu1 }
 0x470   : > { %v11437_v23 = vpop.f32.mrf.mxu3 }
 0x471   : > { %v11435_v12 = vpop.f32.mrf.mxu2  ;;  %12713 = vst [vmem:[#allocation78_spill] sm:$0xff] %v11437_v23  ;;  %v11439_v48 = vpop.f32.mrf.mxu0  ;;  %v11462_v23 = vld [vmem:[#allocation8] ss:$0 sm:$0xff] }
 0x472   : > { %12714 = vst [vmem:[#allocation94_spill] sm:$0xff] %v11439_v48  ;;  %v11441_v11 = vpop.f32.mrf.mxu1 }
 0x473   : > { %12715 = vst [vmem:[#allocation79_spill] sm:$0xff] %v11441_v11 }
 0x474   : > { %5881 = vmatmul.bf16.gmra.mxu0 %v12716_v57  ;;  %5910 = vmatmul.bf16.gmra.mxu1 %v10771_v7 }
 0x475   : > { %5968 = vmatmul.bf16.gmra.mxu3 %v12716_v57 }
 0x476   : > { %5939 = vmatmul.bf16.gmra.mxu2 %v12691_v33  ;;  %v5591_v33 = vadd.f32 %v11356_v20, %v5562_v17  ;;  %v5564_v17 = vadd.f32 %v11363_v41, %v11361_v13 }
 0x478   : > { %v11449_v1 = vpop.f32.mrf.mxu3  ;;  %v5700_v53 = vadd.f32 %v11462_v23, %v5591_v33 }
 0x479   : > { %v11447_v52 = vpop.f32.mrf.mxu2  ;;  %12718 = vst [vmem:[#allocation81_spill] sm:$0xff] %v11449_v1  ;;  %v11451_v38 = vpop.f32.mrf.mxu0 }
 0x47a   : > { %12717 = vst [vmem:[#allocation80_spill] sm:$0xff] %v11447_v52  ;;  %v11453_v4 = vpop.f32.mrf.mxu1 }
 0x47b   : > { %12719 = vst [vmem:[#allocation82_spill] sm:$0xff] %v11451_v38  ;;  %v12721_v38 = vld [vmem:[#allocation16_spill] sm:$0xff] }
 0x47c   : > { %12720 = vst [vmem:[#allocation95_spill] sm:$0xff] %v11453_v4  ;;  %v12722_v4 = vld [vmem:[#allocation23_spill] sm:$0xff] }
 0x480   : > { %v11459_v48 = vpop.f32.mrf.mxu3 }
 0x481   : > { %v11457_v11 = vpop.f32.mrf.mxu2  ;;  %v5648_v7 = vpop.f32.mrf.mxu0 }
 0x482   : > { %v5649_v57 = vadd.f32 %v5648_v7, %v11359_v0  ;;  %v5677_v52 = vpop.f32.mrf.mxu1  ;;  %v11478_v0 = vld [vmem:[#allocation10] ss:$0 sm:$0xff] }
 0x484   : > { %v5678_v1 = vadd.f32 %v5677_v52, %v5649_v57  ;;  %6090 = vmatmul.bf16.vlgmr.msrb.gmra.mxu0 %v12696_v21  ;;  %6119 = vmatmul.bf16.vlgmr.msrb.gmra.mxu1 %v12721_v38 }
 0x485   : > { %6177 = vmatmul.bf16.vlgmr.msrb.gmra.mxu3 %v12696_v21  ;;  %6451 = vmatpush.bf16.msrb.mxu1 %v10885_v31  ;;  %v5593_v21 = vadd.f32 %v11374_v22, %v5564_v17  ;;  %v5567_v22 = vadd.f32 %v11381_v19, %v11379_v6 }
 0x486   : > { %6148 = vmatmul.bf16.vlgmr.msrb.gmra.mxu2 %v12722_v4  ;;  %v5708_v30 = vadd.f32 %v11462_v23, %v5678_v1  ;;  %6509 = vmatpush.bf16.msrb.mxu3 %v12697_v51 }
 0x487   : > { %6480 = vmatpush.bf16.msrb.mxu2 %v12698_v8  ;;  %6422 = vmatpush.bf16.msrb.mxu0 %v10881_v28 }
 0x488   : > { %v5716_v20 = vmax.f32 %v5700_v53, %v5708_v30  ;;  %v11481_v57 = vpop.f32.mrf.mxu3  ;;  %v5701_v53 = vadd.f32 %v11462_v23, %v5593_v21 }
 0x489   : > { %v11476_v52 = vpop.f32.mrf.mxu2  ;;  %v5650_v1 = vpop.f32.mrf.mxu0  ;;  %6452 = vmatpush.bf16.msrb.mxu1 %v10910_v39 }
 0x48a   : > { %v5651_v7 = vadd.f32 %v5650_v1, %v11377_v26  ;;  %v5679_v33 = vpop.f32.mrf.mxu1  ;;  %v5724_v8 = vmax.f32 %v5716_v20, 0.0  ;;  %6510 = vmatpush.bf16.msrb.mxu3 %v11094_v42  ;;  %v5596_v1 = vadd.f32 %v11393_v60, %v5567_v22 }
 0x48b   : > { %6481 = vmatpush.bf16.msrb.mxu2 %v12699_v18  ;;  %6423 = vmatpush.bf16.msrb.mxu0 %v10907_v32 }
 0x48c   : > { %v5680_v13 = vadd.f32 %v5679_v33, %v5651_v7  ;;  %v5736_v41 = vmul.f32 %v11478_v0, %v5724_v8  ;;  %v5702_v60 = vadd.f32 %v11462_v23, %v5596_v1 }
 0x48d   : > { %6453 = vmatpush.bf16.msrb.mxu1 %v10928_v3 }
 0x48e   : > { %v5709_v30 = vadd.f32 %v11462_v23, %v5680_v13  ;;  %5744 = vadd.xlane.f32.xlu0 %v5736_v41  ;;  %6511 = vmatpush.bf16.msrb.mxu3 %v11115_v14  ;;  %v12723_v13 = vld [vmem:[#allocation18_spill] sm:$0xff]  ;;  %v12724_v41 = vld [vmem:[#allocation25_spill] sm:$0xff] }
 0x48f   : > { %6482 = vmatpush.bf16.msrb.mxu2 %v11119_v63  ;;  %6424 = vmatpush.bf16.msrb.mxu0 %v10923_v5 }
 0x490   : > { %v5717_v17 = vmax.f32 %v5701_v53, %v5709_v30  ;;  %v11500_v8 = vpop.f32.mrf.mxu3  ;;  %v5569_v53 = vadd.f32 %v11400_v44, %v11398_v24 }
 0x491   : > { %v11497_v26 = vpop.f32.mrf.mxu2  ;;  %v5653_v20 = vpop.f32.mrf.mxu0  ;;  %6454 = vmatpush.bf16.msrb.mxu1 %v10957_v45 }
 0x492   : > { %v5654_v21 = vadd.f32 %v5653_v20, %v11396_v25  ;;  %v5682_v7 = vpop.f32.mrf.mxu1  ;;  %v5725_v33 = vmax.f32 %v5717_v17, 0.0  ;;  %6512 = vmatpush.bf16.msrb.mxu3 %v12701_v27 }
 0x493   : > { %6483 = vmatpush.bf16.msrb.mxu2 %v12703_v40  ;;  %6425 = vmatpush.bf16.msrb.mxu0 %v10951_v9 }
 0x494   : > { %v5683_v6 = vadd.f32 %v5682_v7, %v5654_v21  ;;  %6095 = vmatmul.bf16.gmra.mxu0 %v12702_v55  ;;  %v5737_v19 = vmul.f32 %v11478_v0, %v5725_v33  ;;  %6124 = vmatmul.bf16.gmra.mxu1 %v12723_v13 }
 0x495   : > { %6182 = vmatmul.bf16.gmra.mxu3 %v12702_v55  ;;  %6455 = vmatpush.bf16.msrb.mxu1 %v12658_v36  ;;  %v5598_v55 = vadd.f32 %v11409_v49, %v5569_v53  ;;  %v12725_v49 = vld [vmem:[#allocation46_spill] sm:$0xff] }
 0x496   : > { %6153 = vmatmul.bf16.gmra.mxu2 %v12724_v41  ;;  %v5710_v25 = vadd.f32 %v11462_v23, %v5683_v6  ;;  %5746 = vadd.xlane.f32.xlu0 %v5737_v19 }
 0x497   : > { %6484 = vmatpush.bf16.msrb.mxu2 %v12705_v61  ;;  %6513 = vmatpush.bf16.msrb.mxu3 %v12704_v37  ;;  %v5703_v33 = vadd.f32 %v11462_v23, %v5598_v55 }
 0x498   : > { %v5718_v22 = vmax.f32 %v5702_v60, %v5710_v25  ;;  %v11522_v17 = vpop.f32.mrf.mxu3  ;;  %6426 = vmatpush.bf16.msrb.mxu0 %v10972_v34  ;;  %v12726_v25 = vld [vmem:[#allocation51_spill] sm:$0xff] }
 0x499   : > { %v11518_v30 = vpop.f32.mrf.mxu2  ;;  %v5655_v20 = vpop.f32.mrf.mxu0  ;;  %6456 = vmatpush.bf16.msrb.mxu1 %v12661_v54 }
 0x49a   : > { %v5656_v1 = vadd.f32 %v5655_v20, %v11412_v43  ;;  %v5684_v21 = vpop.f32.mrf.mxu1  ;;  %v5726_v7 = vmax.f32 %v5718_v22, 0.0  ;;  %v5572_v43 = vadd.f32 %v11416_v50, %v11414_v15 }
 0x49b   : > { %6485 = vmatpush.bf16.msrb.mxu2 %v12707_v35  ;;  %6514 = vmatpush.bf16.msrb.mxu3 %v12706_v59 }
 0x49c   : > { %v5685_v24 = vadd.f32 %v5684_v21, %v5656_v1  ;;  %v5738_v44 = vmul.f32 %v11478_v0, %v5726_v7  ;;  %6427 = vmatpush.bf16.msrb.mxu0 %v12725_v49  ;;  %v5601_v20 = vadd.f32 %v11427_v58, %v5572_v43  ;;  %v12727_v7 = vld [vmem:[#allocation50_spill] sm:$0xff]  ;;  %v5574_v43 = vadd.f32 %v11433_v56, %v11431_v46  ;;  %v12734_v56 = vld [vmem:[#allocation79_spill] sm:$0xff] }
 0x49d   : > { %6457 = vmatpush.bf16.msrb.mxu1 %v12726_v25  ;;  %v12733_v46 = vld [vmem:[#allocation94_spill] sm:$0xff] }
 0x49e   : > { %v5711_v6 = vadd.f32 %v11462_v23, %v5685_v24  ;;  %5748 = vadd.xlane.f32.xlu1 %v5738_v44  ;;  %v12728_v24 = vld [vmem:[#allocation20_spill] sm:$0xff]  ;;  %v12729_v44 = vld [vmem:[#allocation33_spill] sm:$0xff]  ;;  %v5704_v58 = vadd.f32 %v11462_v23, %v5601_v20  ;;  %v5603_v20 = vadd.f32 %v11435_v12, %v5574_v43 }
 0x49f   : > { %6486 = vmatpush.bf16.msrb.mxu2 %v12709_v2  ;;  %6515 = vmatpush.bf16.msrb.mxu3 %v12708_v62  ;;  %v12735_v43 = vld [vmem:[#allocation80_spill] sm:$0xff] }
 0x4a0   : > { %v5719_v60 = vmax.f32 %v5703_v33, %v5711_v6  ;;  %v11541_v53 = vpop.f32.mrf.mxu3  ;;  %6428 = vmatpush.bf16.msrb.mxu0 %v12727_v7  ;;  %v12730_v33 = vld [vmem:[#allocation100_spill] sm:$0xff]  ;;  %v12731_v6 = vld [vmem:[#allocation101_spill] sm:$0xff]  ;;  %v5705_v2 = vadd.f32 %v11462_v23, %v5603_v20 }
 0x4a1   : > { %v11537_v19 = vpop.f32.mrf.mxu2  ;;  %v5658_v22 = vpop.f32.mrf.mxu0  ;;  %6458 = vmatpush.bf16.msrb.mxu1 %v12731_v6  ;;  %v12737_v20 = vld [vmem:[#allocation21_spill] sm:$0xff] }
 0x4a2   : > { %v5659_v55 = vadd.f32 %v5658_v22, %v11429_v10  ;;  %v5687_v1 = vpop.f32.mrf.mxu1  ;;  %v5727_v21 = vmax.f32 %v5719_v60, 0.0 }
 0x4a3   : > { %6487 = vmatpush.bf16.msrb.mxu2 %v12712_v16  ;;  %6516 = vmatpush.bf16.msrb.mxu3 %v12711_v29 }
 0x4a4   : > { %v5688_v50 = vadd.f32 %v5687_v1, %v5659_v55  ;;  %6100 = vmatmul.bf16.gmra.mxu0 %v12710_v47  ;;  %v5739_v15 = vmul.f32 %v11478_v0, %v5727_v21  ;;  %6129 = vmatmul.bf16.gmra.mxu1 %v12728_v24  ;;  %v12732_v21 = vld [vmem:[#allocation78_spill] sm:$0xff] }
 0x4a5   : > { %6187 = vmatmul.bf16.gmra.mxu3 %v12710_v47  ;;  %6429 = vmatpush.bf16.msrb.mxu0 %v12730_v33 }
 0x4a6   : > { %6158 = vmatmul.bf16.gmra.mxu2 %v12729_v44  ;;  %v5712_v10 = vadd.f32 %v11462_v23, %v5688_v50  ;;  %5750 = vadd.xlane.f32.xlu1 %v5739_v15 }
 0x4a8   : > { %v5720_v22 = vmax.f32 %v5704_v58, %v5712_v10  ;;  %v11561_v55 = vpop.f32.mrf.mxu3  ;;  %v5577_v58 = vadd.f32 %v12734_v56, %v12733_v46  ;;  %v12739_v46 = vld [vmem:[#allocation42_spill] sm:$0xff] }
 0x4a9   : > { %v11559_v60 = vpop.f32.mrf.mxu2  ;;  %v5660_v1 = vpop.f32.mrf.mxu0  ;;  %v12740_v56 = vld [vmem:[#allocation82_spill] sm:$0xff] }
 0x4aa   : > { %v5661_v50 = vadd.f32 %v5660_v1, %v12732_v21  ;;  %v5689_v16 = vpop.f32.mrf.mxu1  ;;  %v5728_v47 = vmax.f32 %v5720_v22, 0.0  ;;  %v5606_v1 = vadd.f32 %v12735_v43, %v5577_v58  ;;  %v12736_v22 = vld [vmem:[#allocation81_spill] sm:$0xff]  ;;  %v12741_v58 = vld [vmem:[#allocation95_spill] sm:$0xff] }
 0x4ac   : > { %v5690_v15 = vadd.f32 %v5689_v16, %v5661_v50  ;;  %v5740_v29 = vmul.f32 %v11478_v0, %v5728_v47 }
 0x4ae   : > { %v5713_v62 = vadd.f32 %v11462_v23, %v5690_v15  ;;  %5752 = vadd.xlane.f32.xlu2 %v5740_v29  ;;  %v12738_v15 = vld [vmem:[#allocation22_spill] sm:$0xff] }
 0x4b0   : > { %v5721_v35 = vmax.f32 %v5705_v2, %v5713_v62  ;;  %v11572_v59 = vpop.f32.mrf.mxu3  ;;  %v5706_v2 = vadd.f32 %v11462_v23, %v5606_v1 }
 0x4b1   : > { %v11570_v10 = vpop.f32.mrf.mxu2  ;;  %v5663_v12 = vpop.f32.mrf.mxu0 }
 0x4b2   : > { %v5664_v16 = vadd.f32 %v5663_v12, %v12736_v22  ;;  %v5692_v21 = vpop.f32.mrf.mxu1  ;;  %v5729_v50 = vmax.f32 %v5721_v35, 0.0  ;;  %v5579_v12 = vadd.f32 %v12741_v58, %v12740_v56 }
 0x4b4   : > { %v5693_v47 = vadd.f32 %v5692_v21, %v5664_v16  ;;  %6105 = vmatmul.bf16.gmra.mxu0 %v12737_v20  ;;  %v5741_v29 = vmul.f32 %v11478_v0, %v5729_v50  ;;  %6134 = vmatmul.bf16.gmra.mxu1 %v12738_v15  ;;  %v5608_v21 = vadd.f32 %v11457_v11, %v5579_v12 }
 0x4b5   : > { %6192 = vmatmul.bf16.gmra.mxu3 %v12737_v20 }
 0x4b6   : > { %6163 = vmatmul.bf16.gmra.mxu2 %v12739_v46  ;;  %v5714_v62 = vadd.f32 %v11462_v23, %v5693_v47  ;;  %5754 = vadd.xlane.f32.xlu2 %v5741_v29  ;;  %v5707_v20 = vadd.f32 %v11462_v23, %v5608_v21 }
 0x4b8   : > { %v5722_v43 = vmax.f32 %v5706_v2, %v5714_v62  ;;  %v11587_v22 = vpop.f32.mrf.mxu3 }
 0x4b9   : > { %v11585_v35 = vpop.f32.mrf.mxu2  ;;  %v5665_v16 = vpop.f32.mrf.mxu0 }
 0x4ba   : > { %v5666_v50 = vadd.f32 %v5665_v16, %v11459_v48  ;;  %v5694_v61 = vpop.f32.mrf.mxu1  ;;  %v5730_v1 = vmax.f32 %v5722_v43, 0.0  ;;  %v12743_v43 = vld [vmem:[#allocation27_spill] sm:$0xff] }
 0x4bc   : > { %v5695_v37 = vadd.f32 %v5694_v61, %v5666_v50  ;;  %v5742_v47 = vmul.f32 %v11478_v0, %v5730_v1  ;;  %v12742_v61 = vld [vmem:[#allocation24_spill] sm:$0xff] }
 0x4be   : > { %v5715_v29 = vadd.f32 %v11462_v23, %v5695_v37  ;;  %5756 = vadd.xlane.f32.xlu0 %v5742_v47  ;;  %v5839_v37 = vadd.f32 %v11481_v57, %v11476_v52  ;;  %v12745_v52 = vld [vmem:[#allocation31_spill] sm:$0xff]  ;;  %v12746_v57 = vld [vmem:[#allocation32_spill] sm:$0xff] }
 0x4c0   : > { %v5723_v2 = vmax.f32 %v5707_v20, %v5715_v29  ;;  %v11596_v62 = vpop.f32.mrf.mxu3 }
 0x4c1   : > { %v11594_v56 = vpop.f32.mrf.mxu2  ;;  %v5867_v58 = vpop.f32.mrf.mxu0 }
 0x4c2   : > { %v5896_v40 = vpop.f32.mrf.mxu1  ;;  %v5731_v11 = vmax.f32 %v5723_v2, 0.0  ;;  %v5841_v2 = vadd.f32 %v11500_v8, %v11497_v26  ;;  %v12749_v8 = vld [vmem:[#allocation39_spill] sm:$0xff] }
 0x4c4   : > { %6206 = vmatmul.bf16.vlgmr.msra.gmra.mxu0 %v12721_v38  ;;  %v5743_v48 = vmul.f32 %v11478_v0, %v5731_v11  ;;  %6235 = vmatmul.bf16.vlgmr.msra.gmra.mxu1 %v12722_v4  ;;  %v12744_v38 = vld [vmem:[#allocation28_spill] sm:$0xff]  ;;  %v5868_v0 = vadd.f32 %v5867_v58, %v5839_v37  ;;  %v11617_v58 = vld [vmem:[#allocation10 + $0x1] ss:$0 sm:$0xff] }
 0x4c5   : > { %6401 = vmatmul.bf16.vlgmr.msra.gmra.mxu3 %v12742_v61  ;;  %6675 = vmatpush.bf16.msra.mxu1 %v12743_v43  ;;  %v12748_v37 = vld [vmem:[#allocation36_spill] sm:$0xff] }
 0x4c6   : > { %6372 = vmatmul.bf16.vlgmr.msra.gmra.mxu2 %v12722_v4  ;;  %5758 = vadd.xlane.f32.xlu1 %v5743_v48  ;;  %v5974_v20 = vadd.f32 %v11462_v23, %v5868_v0  ;;  %v12747_v48 = vld [vmem:[#allocation35_spill] sm:$0xff] }
 0x4c7   : > { %6704 = vmatpush.bf16.msra.mxu2 %v10881_v28  ;;  %6733 = vmatpush.bf16.msra.mxu3 %v10885_v31 }
 0x4c8   : > { %6646 = vmatpush.bf16.msra.mxu0 %v12744_v38  ;;  %v5954_v21 = vpop.f32.mrf.mxu3 }
 0x4c9   : > { %v5925_v12 = vpop.f32.mrf.mxu2  ;;  %v5869_v50 = vpop.f32.mrf.mxu0  ;;  %6676 = vmatpush.bf16.msra.mxu1 %v12745_v52 }
 0x4ca   : > { %v5926_v16 = vadd.f32 %v5925_v12, %v5896_v40  ;;  %v5898_v1 = vpop.f32.mrf.mxu1  ;;  %v5870_v12 = vadd.f32 %v5869_v50, %v5841_v2 }
 0x4cb   : > { %6705 = vmatpush.bf16.msra.mxu2 %v10907_v32  ;;  %6734 = vmatpush.bf16.msra.mxu3 %v10910_v39 }
 0x4cc   : > { %v5955_v47 = vadd.f32 %v5954_v21, %v5926_v16  ;;  %6647 = vmatpush.bf16.msra.mxu0 %v12746_v57 }
 0x4cd   : > { %6677 = vmatpush.bf16.msra.mxu1 %v12747_v48 }
 0x4ce   : > { %v5982_v29 = vadd.f32 %v11462_v23, %v5955_v47 }
 0x4cf   : > { %6706 = vmatpush.bf16.msra.mxu2 %v10923_v5  ;;  %6735 = vmatpush.bf16.msra.mxu3 %v10928_v3 }
 0x4d0   : > { %v5990_v40 = vmax.f32 %v5974_v20, %v5982_v29  ;;  %6648 = vmatpush.bf16.msra.mxu0 %v12748_v37  ;;  %v5956_v0 = vpop.f32.mrf.mxu3  ;;  %v5975_v20 = vadd.f32 %v11462_v23, %v5870_v12  ;;  %v5844_v29 = vadd.f32 %v11522_v17, %v11518_v30  ;;  %v12753_v30 = vld [vmem:[#allocation45_spill] sm:$0xff]  ;;  %v12754_v17 = vld [vmem:[#allocation48_spill] sm:$0xff] }
 0x4d1   : > { %v5927_v11 = vpop.f32.mrf.mxu2  ;;  %v5872_v21 = vpop.f32.mrf.mxu0  ;;  %6678 = vmatpush.bf16.msra.mxu1 %v12749_v8 }
 0x4d2   : > { %v5928_v16 = vadd.f32 %v5927_v11, %v5898_v1  ;;  %v5998_v47 = vmax.f32 %v5990_v40, 0.0  ;;  %v5901_v32 = vpop.f32.mrf.mxu1  ;;  %v12750_v1 = vld [vmem:[#allocation26_spill] sm:$0xff]  ;;  %v12751_v40 = vld [vmem:[#allocation40_spill] sm:$0xff] }
 0x4d3   : > { %6707 = vmatpush.bf16.msra.mxu2 %v10951_v9  ;;  %6736 = vmatpush.bf16.msra.mxu3 %v10957_v45  ;;  %v12752_v11 = vld [vmem:[#allocation44_spill] sm:$0xff] }
 0x4d4   : > { %v5957_v39 = vadd.f32 %v5956_v0, %v5928_v16  ;;  %v6010_v26 = vmul.f32 %v11617_v58, %v5998_v47  ;;  %6211 = vmatmul.bf16.gmra.mxu0 %v12723_v13  ;;  %6240 = vmatmul.bf16.gmra.mxu1 %v12724_v41 }
 0x4d5   : > { %6406 = vmatmul.bf16.gmra.mxu3 %v12750_v1  ;;  %6649 = vmatpush.bf16.msra.mxu0 %v12751_v40 }
 0x4d6   : > { %v5983_v50 = vadd.f32 %v11462_v23, %v5957_v39  ;;  %6377 = vmatmul.bf16.gmra.mxu2 %v12724_v41  ;;  %6018 = vadd.xlane.f32.xlu2 %v6010_v26  ;;  %v5873_v39 = vadd.f32 %v5872_v21, %v5844_v29  ;;  %v12755_v29 = vld [vmem:[#allocation49_spill] sm:$0xff] }
 0x4d7   : > { %6708 = vmatpush.bf16.msra.mxu2 %v10972_v34  ;;  %6737 = vmatpush.bf16.msra.mxu3 %v12658_v36 }
 0x4d8   : > { %v5991_v2 = vmax.f32 %v5975_v20, %v5983_v50  ;;  %6679 = vmatpush.bf16.msra.mxu1 %v12752_v11  ;;  %v5959_v16 = vpop.f32.mrf.mxu3  ;;  %v5976_v20 = vadd.f32 %v11462_v23, %v5873_v39 }
 0x4d9   : > { %v5930_v13 = vpop.f32.mrf.mxu2  ;;  %v5874_v0 = vpop.f32.mrf.mxu0  ;;  %6650 = vmatpush.bf16.msra.mxu0 %v12753_v30 }
 0x4da   : > { %v5931_v12 = vadd.f32 %v5930_v13, %v5901_v32  ;;  %v5999_v47 = vmax.f32 %v5991_v2, 0.0  ;;  %v5903_v9 = vpop.f32.mrf.mxu1  ;;  %v5846_v32 = vadd.f32 %v11541_v53, %v11537_v19  ;;  %v12756_v13 = vld [vmem:[#allocation52_spill] sm:$0xff]  ;;  %v12757_v19 = vld [vmem:[#allocation97_spill] sm:$0xff] }
 0x4db   : > { %6709 = vmatpush.bf16.msra.mxu2 %v12725_v49  ;;  %6738 = vmatpush.bf16.msra.mxu3 %v12661_v54 }
 0x4dc   : > { %v5960_v26 = vadd.f32 %v5959_v16, %v5931_v12  ;;  %v6011_v45 = vmul.f32 %v11617_v58, %v5999_v47  ;;  %6680 = vmatpush.bf16.msra.mxu1 %v12754_v17  ;;  %v5875_v12 = vadd.f32 %v5874_v0, %v5846_v32 }
 0x4dd   : > { %6651 = vmatpush.bf16.msra.mxu0 %v12755_v29 }
 0x4de   : > { %v5984_v21 = vadd.f32 %v11462_v23, %v5960_v26  ;;  %6020 = vadd.xlane.f32.xlu0 %v6011_v45  ;;  %v5977_v53 = vadd.f32 %v11462_v23, %v5875_v12 }
 0x4df   : > { %6710 = vmatpush.bf16.msra.mxu2 %v12727_v7  ;;  %6739 = vmatpush.bf16.msra.mxu3 %v12726_v25 }
 0x4e0   : > { %v5992_v50 = vmax.f32 %v5976_v20, %v5984_v21  ;;  %6681 = vmatpush.bf16.msra.mxu1 %v12756_v13  ;;  %v5961_v47 = vpop.f32.mrf.mxu3  ;;  %v12759_v21 = vld [vmem:[#allocation102_spill] sm:$0xff] }
 0x4e1   : > { %v5932_v2 = vpop.f32.mrf.mxu2  ;;  %v5877_v39 = vpop.f32.mrf.mxu0  ;;  %6652 = vmatpush.bf16.msra.mxu0 %v12757_v19 }
 0x4e2   : > { %v5933_v16 = vadd.f32 %v5932_v2, %v5903_v9  ;;  %v6000_v49 = vmax.f32 %v5992_v50, 0.0  ;;  %v5906_v26 = vpop.f32.mrf.mxu1  ;;  %v12758_v9 = vld [vmem:[#allocation34_spill] sm:$0xff] }
 0x4e3   : > { %6711 = vmatpush.bf16.msra.mxu2 %v12730_v33  ;;  %6740 = vmatpush.bf16.msra.mxu3 %v12731_v6 }
 0x4e4   : > { %v5962_v45 = vadd.f32 %v5961_v47, %v5933_v16  ;;  %v6012_v54 = vmul.f32 %v11617_v58, %v6000_v49  ;;  %6216 = vmatmul.bf16.gmra.mxu0 %v12728_v24  ;;  %6245 = vmatmul.bf16.gmra.mxu1 %v12729_v44  ;;  %v5849_v49 = vadd.f32 %v11561_v55, %v11559_v60  ;;  %v12760_v24 = vld [vmem:[#allocation53_spill] sm:$0xff] }
 0x4e5   : > { %6411 = vmatmul.bf16.gmra.mxu3 %v12758_v9  ;;  %6653 = vmatpush.bf16.msra.mxu0 %v12759_v21  ;;  %v5851_v60 = vadd.f32 %v11572_v59, %v11570_v10  ;;  %v12761_v59 = vld [vmem:[#allocation43_spill] sm:$0xff] }
 0x4e6   : > { %v5985_v0 = vadd.f32 %v11462_v23, %v5962_v45  ;;  %6382 = vmatmul.bf16.gmra.mxu2 %v12729_v44  ;;  %6022 = vadd.xlane.f32.xlu1 %v6012_v54  ;;  %v5878_v50 = vadd.f32 %v5877_v39, %v5849_v49 }
 0x4e7   : > { %6682 = vmatpush.bf16.msra.mxu1 %v12760_v24 }
 0x4e8   : > { %v5993_v20 = vmax.f32 %v5977_v53, %v5985_v0  ;;  %v5964_v12 = vpop.f32.mrf.mxu3  ;;  %v5978_v54 = vadd.f32 %v11462_v23, %v5878_v50 }
 0x4e9   : > { %v5935_v32 = vpop.f32.mrf.mxu2  ;;  %v5879_v16 = vpop.f32.mrf.mxu0 }
 0x4ea   : > { %v5936_v2 = vadd.f32 %v5935_v32, %v5906_v26  ;;  %v6001_v47 = vmax.f32 %v5993_v20, 0.0  ;;  %v5908_v45 = vpop.f32.mrf.mxu1  ;;  %v5880_v0 = vadd.f32 %v5879_v16, %v5851_v60 }
 0x4ec   : > { %v5965_v6 = vadd.f32 %v5964_v12, %v5936_v2  ;;  %v6013_v33 = vmul.f32 %v11617_v58, %v6001_v47  ;;  %v5979_v50 = vadd.f32 %v11462_v23, %v5880_v0  ;;  %v5856_v0 = vadd.f32 %v11596_v62, %v11594_v56 }
 0x4ee   : > { %v5986_v7 = vadd.f32 %v11462_v23, %v5965_v6  ;;  %6024 = vadd.xlane.f32.xlu2 %v6013_v33 }
 0x4f0   : > { %v5994_v55 = vmax.f32 %v5978_v54, %v5986_v7  ;;  %v5966_v26 = vpop.f32.mrf.mxu3  ;;  %v5854_v7 = vadd.f32 %v11587_v22, %v11585_v35 }
 0x4f1   : > { %v5937_v53 = vpop.f32.mrf.mxu2  ;;  %v5882_v49 = vpop.f32.mrf.mxu0 }
 0x4f2   : > { %v5938_v39 = vadd.f32 %v5937_v53, %v5908_v45  ;;  %v6002_v32 = vmax.f32 %v5994_v55, 0.0  ;;  %v5911_v20 = vpop.f32.mrf.mxu1  ;;  %v5883_v12 = vadd.f32 %v5882_v49, %v5854_v7  ;;  %v12762_v7 = vld [vmem:[#allocation98_spill] sm:$0xff] }
 0x4f4   : > { %v5967_v25 = vadd.f32 %v5966_v26, %v5938_v39  ;;  %v6014_v2 = vmul.f32 %v11617_v58, %v6002_v32  ;;  %6221 = vmatmul.bf16.gmra.mxu0 %v12738_v15  ;;  %6250 = vmatmul.bf16.gmra.mxu1 %v12739_v46  ;;  %v5980_v55 = vadd.f32 %v11462_v23, %v5883_v12  ;;  %v12763_v12 = vld [vmem:[#allocation57_spill] sm:$0xff] }
 0x4f5   : > { %6416 = vmatmul.bf16.gmra.mxu3 %v12761_v59 }
 0x4f6   : > { %v5987_v33 = vadd.f32 %v11462_v23, %v5967_v25  ;;  %6387 = vmatmul.bf16.gmra.mxu2 %v12739_v46  ;;  %6026 = vadd.xlane.f32.xlu0 %v6014_v2 }
 0x4f8   : > { %v5995_v6 = vmax.f32 %v5979_v50, %v5987_v33  ;;  %v5969_v47 = vpop.f32.mrf.mxu3 }
 0x4f9   : > { %v5940_v10 = vpop.f32.mrf.mxu2  ;;  %v5884_v15 = vpop.f32.mrf.mxu0 }
 0x4fa   : > { %v5941_v16 = vadd.f32 %v5940_v10, %v5911_v20  ;;  %v6003_v45 = vmax.f32 %v5995_v6, 0.0  ;;  %v5913_v54 = vpop.f32.mrf.mxu1  ;;  %v5885_v39 = vadd.f32 %v5884_v15, %v5856_v0 }
 0x4fc   : > { %v5970_v60 = vadd.f32 %v5969_v47, %v5941_v16  ;;  %v6015_v25 = vmul.f32 %v11617_v58, %v6003_v45  ;;  %v5981_v6 = vadd.f32 %v11462_v23, %v5885_v39 }
 0x4fe   : > { %v5988_v53 = vadd.f32 %v11462_v23, %v5970_v60  ;;  %6028 = vadd.xlane.f32.xlu1 %v6015_v25  ;;  %v12770_v60 = vld [vmem:[#allocation67_spill] sm:$0xff] }
 0x500   : > { %v5996_v35 = vmax.f32 %v5980_v55, %v5988_v53  ;;  %v5971_v49 = vpop.f32.mrf.mxu3 }
 0x501   : > { %v5942_v22 = vpop.f32.mrf.mxu2  ;;  %v11685_v32 = vpop.f32.mrf.mxu0 }
 0x502   : > { %v5943_v26 = vadd.f32 %v5942_v22, %v5913_v54  ;;  %v6004_v20 = vmax.f32 %v5996_v35, 0.0  ;;  %v11687_v2 = vpop.f32.mrf.mxu1 }
 0x504   : > { %v5972_v50 = vadd.f32 %v5971_v49, %v5943_v26  ;;  %v6016_v33 = vmul.f32 %v11617_v58, %v6004_v20  ;;  %6430 = vmatmul.bf16.vlgmr.msrb.gmra.mxu0 %v12762_v7  ;;  %6459 = vmatmul.bf16.vlgmr.msrb.gmra.mxu1 %v12722_v4  ;;  %v5745_v49 = vpop.xlane.xlu0 %5744 }
 0x505   : > { %6517 = vmatmul.bf16.vlgmr.msrb.gmra.mxu3 %v12762_v7  ;;  %6791 = vmatpush.bf16.msrb.mxu1 %v12697_v51 }
 0x506   : > { %v5989_v10 = vadd.f32 %v11462_v23, %v5972_v50  ;;  %6488 = vmatmul.bf16.vlgmr.msrb.gmra.mxu2 %v12742_v61  ;;  %6030 = vadd.xlane.f32.xlu2 %v6016_v33 }
 0x507   : > { %6928 = vmatpush.bf16.msrb.mxu2 %v12744_v38  ;;  %6957 = vmatpush.bf16.msrb.mxu3 %v12743_v43 }
 0x508   : > { %v5997_v56 = vmax.f32 %v5981_v6, %v5989_v10  ;;  %6762 = vmatpush.bf16.msrb.mxu0 %v12763_v12  ;;  %v11702_v16 = vpop.f32.mrf.mxu3 }
 0x509   : > { %v11698_v62 = vpop.f32.mrf.mxu2  ;;  %v11704_v47 = vpop.f32.mrf.mxu0  ;;  %6792 = vmatpush.bf16.msrb.mxu1 %v11094_v42 }
 0x50a   : > { %v6005_v4 = vmax.f32 %v5997_v56, 0.0  ;;  %v11706_v61 = vpop.f32.mrf.mxu1 }
 0x50b   : > { %6929 = vmatpush.bf16.msrb.mxu2 %v12746_v57  ;;  %6958 = vmatpush.bf16.msrb.mxu3 %v12745_v52 }
 0x50c   : > { %v6017_v15 = vmul.f32 %v11617_v58, %v6005_v4  ;;  %6763 = vmatpush.bf16.msrb.mxu0 %v12699_v18  ;;  %v12764_v58 = vld [vmem:[#allocation54_spill] sm:$0xff]  ;;  %v5747_v4 = vpop.xlane.xlu0 %5746 }
 0x50d   : > { %6793 = vmatpush.bf16.msrb.mxu1 %v11115_v14 }
 0x50e   : > { %6032 = vadd.xlane.f32.xlu0 %v6017_v15 }
 0x50f   : > { %6930 = vmatpush.bf16.msrb.mxu2 %v12748_v37  ;;  %6959 = vmatpush.bf16.msrb.mxu3 %v12747_v48  ;;  %v12765_v48 = vld [vmem:[#allocation62_spill] sm:$0xff] }
 0x510   : > { %6764 = vmatpush.bf16.msrb.mxu0 %v11119_v63  ;;  %v11719_v38 = vpop.f32.mrf.mxu3 }
 0x511   : > { %v11715_v43 = vpop.f32.mrf.mxu2  ;;  %v11721_v57 = vpop.f32.mrf.mxu0  ;;  %6794 = vmatpush.bf16.msrb.mxu1 %v12701_v27 }
 0x512   : > { %v11723_v52 = vpop.f32.mrf.mxu1  ;;  %v11799_v56 = vpop.xlane.xlu1 %5748 }
 0x513   : > { %6931 = vmatpush.bf16.msrb.mxu2 %v12751_v40  ;;  %6960 = vmatpush.bf16.msrb.mxu3 %v12749_v8  ;;  %v12766_v40 = vld [vmem:[#allocation65_spill] sm:$0xff] }
 0x514   : > { %6435 = vmatmul.bf16.gmra.mxu0 %v12764_v58  ;;  %6464 = vmatmul.bf16.gmra.mxu1 %v12724_v41  ;;  %v12767_v41 = vld [vmem:[#allocation66_spill] sm:$0xff] }
 0x515   : > { %6522 = vmatmul.bf16.gmra.mxu3 %v12764_v58  ;;  %6765 = vmatpush.bf16.msrb.mxu0 %v12765_v48 }
 0x516   : > { %6493 = vmatmul.bf16.gmra.mxu2 %v12750_v1  ;;  %6795 = vmatpush.bf16.msrb.mxu1 %v12766_v40  ;;  %v12768_v1 = vld [vmem:[#allocation103_spill] sm:$0xff] }
 0x517   : > { %6932 = vmatpush.bf16.msrb.mxu2 %v12753_v30  ;;  %6961 = vmatpush.bf16.msrb.mxu3 %v12752_v11  ;;  %v12769_v30 = vld [vmem:[#allocation104_spill] sm:$0xff] }
 0x518   : > { %v11738_v8 = vpop.f32.mrf.mxu3 }
 0x519   : > { %v11735_v37 = vpop.f32.mrf.mxu2  ;;  %v11740_v45 = vpop.f32.mrf.mxu0  ;;  %6766 = vmatpush.bf16.msrb.mxu0 %v12767_v41 }
 0x51a   : > { %v11742_v54 = vpop.f32.mrf.mxu1  ;;  %6796 = vmatpush.bf16.msrb.mxu1 %v12768_v1 }
 0x51b   : > { %6933 = vmatpush.bf16.msrb.mxu2 %v12755_v29  ;;  %6962 = vmatpush.bf16.msrb.mxu3 %v12754_v17  ;;  %v12771_v29 = vld [vmem:[#allocation106_spill] sm:$0xff]  ;;  %v12772_v17 = vld [vmem:[#allocation59_spill] sm:$0xff] }
 0x51d   : > { %6767 = vmatpush.bf16.msrb.mxu0 %v12769_v30 }
 0x51e   : > { %6797 = vmatpush.bf16.msrb.mxu1 %v12770_v60 }
 0x51f   : > { %6934 = vmatpush.bf16.msrb.mxu2 %v12757_v19  ;;  %6963 = vmatpush.bf16.msrb.mxu3 %v12756_v13  ;;  %v12773_v19 = vld [vmem:[#allocation108_spill] sm:$0xff]  ;;  %v12774_v13 = vld [vmem:[#allocation107_spill] sm:$0xff] }
 0x520   : > { %v11754_v25 = vpop.f32.mrf.mxu3 }
 0x521   : > { %v11751_v11 = vpop.f32.mrf.mxu2  ;;  %v11756_v55 = vpop.f32.mrf.mxu0  ;;  %6768 = vmatpush.bf16.msrb.mxu0 %v12771_v29 }
 0x522   : > { %v11758_v53 = vpop.f32.mrf.mxu1  ;;  %6798 = vmatpush.bf16.msrb.mxu1 %v12773_v19  ;;  %v11788_v20 = vpop.xlane.xlu2 %5752 }
 0x523   : > { %6935 = vmatpush.bf16.msrb.mxu2 %v12759_v21  ;;  %6964 = vmatpush.bf16.msrb.mxu3 %v12760_v24 }
 0x524   : > { %6440 = vmatmul.bf16.gmra.mxu0 %v12772_v17  ;;  %6469 = vmatmul.bf16.gmra.mxu1 %v12729_v44 }
 0x525   : > { %6527 = vmatmul.bf16.gmra.mxu3 %v12772_v17  ;;  %6769 = vmatpush.bf16.msrb.mxu0 %v12774_v13 }
 0x526   : > { %6498 = vmatmul.bf16.gmra.mxu2 %v12758_v9  ;;  %v12778_v9 = vld [vmem:[#allocation63_spill] sm:$0xff] }
 0x528   : > { %v11771_v35 = vpop.f32.mrf.mxu3 }
 0x529   : > { %v11769_v0 = vpop.f32.mrf.mxu2  ;;  %v11773_v22 = vpop.f32.mrf.mxu0 }
 0x52a   : > { %v11775_v21 = vpop.f32.mrf.mxu1  ;;  %v11803_v15 = vpop.xlane.xlu2 %5754 }
 0x52b   : > { %12783 = vst [vmem:[#allocation89_spill] sm:$0xff] %v11803_v15  ;;  %v11818_v15 = vpop.xlane.xlu1 %5750 }
 0x530   : > { %v11779_v39 = vpop.f32.mrf.mxu3 }
 0x531   : > { %v11777_v24 = vpop.f32.mrf.mxu2  ;;  %12775 = vst [vmem:[#allocation83_spill] sm:$0xff] %v11779_v39  ;;  %v11781_v26 = vpop.f32.mrf.mxu0  ;;  %v12785_v39 = vld [vmem:[#allocation68_spill] sm:$0xff] }
 0x532   : > { %12776 = vst [vmem:[#allocation84_spill] sm:$0xff] %v11781_v26  ;;  %v11783_v44 = vpop.f32.mrf.mxu1 }
 0x533   : > { %12777 = vst [vmem:[#allocation85_spill] sm:$0xff] %v11783_v44 }
 0x534   : > { %6445 = vmatmul.bf16.gmra.mxu0 %v12778_v9  ;;  %6474 = vmatmul.bf16.gmra.mxu1 %v12739_v46  ;;  %v6121_v46 = vadd.f32 %v11687_v2, %v11685_v32 }
 0x535   : > { %6532 = vmatmul.bf16.gmra.mxu3 %v12778_v9 }
 0x536   : > { %6503 = vmatmul.bf16.gmra.mxu2 %v12761_v59 }
 0x538   : > { %v11793_v33 = vpop.f32.mrf.mxu3 }
 0x539   : > { %v11791_v50 = vpop.f32.mrf.mxu2  ;;  %12780 = vst [vmem:[#allocation96_spill] sm:$0xff] %v11793_v33  ;;  %v11795_v6 = vpop.f32.mrf.mxu0 }
 0x53a   : > { %12779 = vst [vmem:[#allocation86_spill] sm:$0xff] %v11791_v50  ;;  %v11797_v10 = vpop.f32.mrf.mxu1  ;;  %v6150_v50 = vadd.f32 %v11698_v62, %v6121_v46  ;;  %v11822_v62 = vpop.xlane.xlu0 %5756 }
 0x53b   : > { %12781 = vst [vmem:[#allocation87_spill] sm:$0xff] %v11795_v6 }
 0x53c   : > { %12782 = vst [vmem:[#allocation88_spill] sm:$0xff] %v11797_v10  ;;  %v12784_v10 = vld [vmem:[#allocation99_spill] sm:$0xff]  ;;  %v6256_v32 = vadd.f32 %v11462_v23, %v6150_v50 }
 0x540   : > { %v11807_v44 = vpop.f32.mrf.mxu3 }
 0x541   : > { %v11805_v59 = vpop.f32.mrf.mxu2  ;;  %v6207_v9 = vpop.f32.mrf.mxu0 }
 0x542   : > { %v6208_v33 = vadd.f32 %v6207_v9, %v11702_v16  ;;  %v6236_v6 = vpop.f32.mrf.mxu1 }
 0x544   : > { %v6237_v26 = vadd.f32 %v6236_v6, %v6208_v33  ;;  %6654 = vmatmul.bf16.vlgmr.msra.gmra.mxu0 %v12762_v7  ;;  %6683 = vmatmul.bf16.vlgmr.msra.gmra.mxu1 %v12784_v10  ;;  %v11826_v33 = vld [vmem:[#allocation10 + $0x2] ss:$0 sm:$0xff] }
 0x545   : > { %6741 = vmatmul.bf16.vlgmr.msra.gmra.mxu3 %v12762_v7  ;;  %7015 = vmatpush.bf16.msra.mxu1 %v10885_v31  ;;  %v6123_v7 = vadd.f32 %v11706_v61, %v11704_v47  ;;  %v12787_v61 = vld [vmem:[#allocation29_spill] sm:$0xff] }
 0x546   : > { %6712 = vmatmul.bf16.vlgmr.msra.gmra.mxu2 %v12785_v39  ;;  %v6264_v2 = vadd.f32 %v11462_v23, %v6237_v26  ;;  %7073 = vmatpush.bf16.msra.mxu3 %v12697_v51 }
 0x547   : > { %7044 = vmatpush.bf16.msra.mxu2 %v12763_v12  ;;  %6986 = vmatpush.bf16.msra.mxu0 %v10881_v28  ;;  %v6152_v46 = vadd.f32 %v11715_v43, %v6123_v7  ;;  %v12786_v28 = vld [vmem:[#allocation30_spill] sm:$0xff] }
 0x548   : > { %v6272_v9 = vmax.f32 %v6256_v32, %v6264_v2  ;;  %v11831_v26 = vpop.f32.mrf.mxu3 }
 0x549   : > { %v11824_v16 = vpop.f32.mrf.mxu2  ;;  %v6019_v12 = vpop.xlane.xlu2 %6018  ;;  %7016 = vmatpush.bf16.msra.mxu1 %v12786_v28 }
 0x54a   : > { %v11833_v50 = vadd.f32 %v6019_v12, %v5745_v49  ;;  %v6209_v51 = vpop.f32.mrf.mxu0  ;;  %v6238_v6 = vpop.f32.mrf.mxu1  ;;  %v6280_v31 = vmax.f32 %v6272_v9, 0.0  ;;  %7074 = vmatpush.bf16.msra.mxu3 %v11094_v42  ;;  %v6257_v49 = vadd.f32 %v11462_v23, %v6152_v46 }
 0x54b   : > { %7045 = vmatpush.bf16.msra.mxu2 %v12699_v18  ;;  %v6210_v32 = vadd.f32 %v6209_v51, %v11719_v38  ;;  %6987 = vmatpush.bf16.msra.mxu0 %v12787_v61  ;;  %v6126_v38 = vadd.f32 %v11723_v52, %v11721_v57  ;;  %v11852_v9 = vpop.xlane.xlu1 %5758  ;;  %v12789_v52 = vld [vmem:[#allocation55_spill] sm:$0xff] }
 0x54c   : > { %v6292_v47 = vmul.f32 %v11826_v33, %v6280_v31 }
 0x54d   : > { %v6239_v2 = vadd.f32 %v6238_v6, %v6210_v32  ;;  %7017 = vmatpush.bf16.msra.mxu1 %v10928_v3  ;;  %v6155_v3 = vadd.f32 %v11735_v37, %v6126_v38  ;;  %v6128_v32 = vadd.f32 %v11742_v54, %v11740_v45 }
 0x54e   : > { %6300 = vadd.xlane.f32.xlu1 %v6292_v47  ;;  %7075 = vmatpush.bf16.msra.mxu3 %v11115_v14 }
 0x54f   : > { %7046 = vmatpush.bf16.msra.mxu2 %v11119_v63  ;;  %v6265_v18 = vadd.f32 %v11462_v23, %v6239_v2  ;;  %6988 = vmatpush.bf16.msra.mxu0 %v10923_v5  ;;  %v12788_v5 = vld [vmem:[#allocation38_spill] sm:$0xff]  ;;  %v6258_v37 = vadd.f32 %v11462_v23, %v6155_v3 }
 0x550   : > { %v11854_v7 = vpop.f32.mrf.mxu3  ;;  %v12795_v3 = vld [vmem:[#allocation50_spill] sm:$0xff] }
 0x551   : > { %v11847_v43 = vpop.f32.mrf.mxu2  ;;  %v6021_v42 = vpop.xlane.xlu0 %6020  ;;  %v6273_v12 = vmax.f32 %v6257_v49, %v6265_v18  ;;  %7018 = vmatpush.bf16.msra.mxu1 %v12788_v5  ;;  %v12798_v5 = vld [vmem:[#allocation100_spill] sm:$0xff] }
 0x552   : > { %v11856_v63 = vadd.f32 %v6021_v42, %v5747_v4  ;;  %v6212_v51 = vpop.f32.mrf.mxu0  ;;  %v6241_v6 = vpop.f32.mrf.mxu1  ;;  %7076 = vmatpush.bf16.msra.mxu3 %v12701_v27  ;;  %v12790_v4 = vld [vmem:[#allocation69_spill] sm:$0xff] }
 0x553   : > { %7047 = vmatpush.bf16.msra.mxu2 %v12765_v48  ;;  %v6213_v14 = vadd.f32 %v6212_v51, %v11738_v8  ;;  %v6281_v31 = vmax.f32 %v6273_v12, 0.0  ;;  %v12791_v48 = vld [vmem:[#allocation37_spill] sm:$0xff] }
 0x554   : > { %6659 = vmatmul.bf16.gmra.mxu0 %v12764_v58  ;;  %6688 = vmatmul.bf16.gmra.mxu1 %v12789_v52 }
 0x555   : > { %v6242_v57 = vadd.f32 %v6241_v6, %v6213_v14  ;;  %v6293_v46 = vmul.f32 %v11826_v33, %v6281_v31  ;;  %6746 = vmatmul.bf16.gmra.mxu3 %v12764_v58  ;;  %6989 = vmatpush.bf16.msra.mxu0 %v12791_v48 }
 0x556   : > { %6717 = vmatmul.bf16.gmra.mxu2 %v12790_v4  ;;  %7077 = vmatpush.bf16.msra.mxu3 %v12766_v40 }
 0x557   : > { %v6266_v8 = vadd.f32 %v11462_v23, %v6242_v57  ;;  %6302 = vadd.xlane.f32.xlu2 %v6293_v46  ;;  %7048 = vmatpush.bf16.msra.mxu2 %v12767_v41  ;;  %v6157_v41 = vadd.f32 %v11751_v11, %v6128_v32  ;;  %v12799_v57 = vld [vmem:[#allocation101_spill] sm:$0xff]  ;;  %v6133_v46 = vadd.f32 %v11775_v21, %v11773_v22 }
 0x558   : > { %7019 = vmatpush.bf16.msra.mxu1 %v12658_v36  ;;  %v11878_v28 = vpop.f32.mrf.mxu3  ;;  %v12792_v36 = vld [vmem:[#allocation47_spill] sm:$0xff] }
 0x559   : > { %v11872_v27 = vpop.f32.mrf.mxu2  ;;  %v6023_v58 = vpop.xlane.xlu1 %6022  ;;  %v6274_v47 = vmax.f32 %v6258_v37, %v6266_v8  ;;  %6990 = vmatpush.bf16.msra.mxu0 %v10972_v34  ;;  %v6259_v42 = vadd.f32 %v11462_v23, %v6157_v41 }
 0x55a   : > { %v11881_v61 = vadd.f32 %v6023_v58, %v11799_v56  ;;  %v6214_v2 = vpop.f32.mrf.mxu0  ;;  %v6243_v49 = vpop.f32.mrf.mxu1  ;;  %7078 = vmatpush.bf16.msra.mxu3 %v12768_v1  ;;  %v12793_v56 = vld [vmem:[#allocation46_spill] sm:$0xff]  ;;  %v12794_v1 = vld [vmem:[#allocation51_spill] sm:$0xff] }
 0x55b   : > { %v6215_v40 = vadd.f32 %v6214_v2, %v11754_v25  ;;  %v6282_v18 = vmax.f32 %v6274_v47, 0.0  ;;  %7049 = vmatpush.bf16.msra.mxu2 %v12769_v30  ;;  %v6131_v30 = vadd.f32 %v11758_v53, %v11756_v55  ;;  %v12796_v53 = vld [vmem:[#allocation60_spill] sm:$0xff]  ;;  %v6162_v47 = vadd.f32 %v11777_v24, %v6133_v46  ;;  %v12800_v2 = vld [vmem:[#allocation83_spill] sm:$0xff] }
 0x55c   : > { %7020 = vmatpush.bf16.msra.mxu1 %v12792_v36 }
 0x55d   : > { %v6244_v45 = vadd.f32 %v6243_v49, %v6215_v40  ;;  %v6294_v54 = vmul.f32 %v11826_v33, %v6282_v18  ;;  %6991 = vmatpush.bf16.msra.mxu0 %v12793_v56 }
 0x55e   : > { %7079 = vmatpush.bf16.msra.mxu3 %v12770_v60 }
 0x55f   : > { %v6267_v34 = vadd.f32 %v11462_v23, %v6244_v45  ;;  %6304 = vadd.xlane.f32.xlu0 %v6294_v54  ;;  %7050 = vmatpush.bf16.msra.mxu2 %v12771_v29  ;;  %v6160_v29 = vadd.f32 %v11769_v0, %v6131_v30  ;;  %v11916_v0 = vld [vmem:[#allocation8] ss:$0 sm:$0xff]  ;;  %v12801_v45 = vld [vmem:[#allocation84_spill] sm:$0xff] }
 0x560   : > { %7021 = vmatpush.bf16.msra.mxu1 %v12794_v1  ;;  %v11900_v38 = vpop.f32.mrf.mxu3  ;;  %v6261_v36 = vadd.f32 %v11916_v0, %v6162_v47  ;;  %v12804_v30 = vld [vmem:[#allocation96_spill] sm:$0xff] }
 0x561   : > { %v11894_v11 = vpop.f32.mrf.mxu2  ;;  %v6025_v25 = vpop.xlane.xlu2 %6024  ;;  %v6275_v51 = vmax.f32 %v6259_v42, %v6267_v34  ;;  %6992 = vmatpush.bf16.msra.mxu0 %v12795_v3 }
 0x562   : > { %v11903_v12 = vadd.f32 %v6025_v25, %v11818_v15  ;;  %v6217_v23 = vpop.f32.mrf.mxu0  ;;  %v6246_v6 = vpop.f32.mrf.mxu1  ;;  %7080 = vmatpush.bf16.msra.mxu3 %v12773_v19  ;;  %v12797_v15 = vld [vmem:[#allocation71_spill] sm:$0xff]  ;;  %v12803_v25 = vld [vmem:[#allocation86_spill] sm:$0xff] }
 0x563   : > { %v6218_v14 = vadd.f32 %v6217_v23, %v11771_v35  ;;  %v6283_v60 = vmax.f32 %v6275_v51, 0.0  ;;  %7051 = vmatpush.bf16.msra.mxu2 %v12774_v13  ;;  %v6260_v35 = vadd.f32 %v11916_v0, %v6160_v29  ;;  %v12806_v29 = vld [vmem:[#allocation64_spill] sm:$0xff] }
 0x564   : > { %6664 = vmatmul.bf16.gmra.mxu0 %v12772_v17  ;;  %6693 = vmatmul.bf16.gmra.mxu1 %v12796_v53 }
 0x565   : > { %v6247_v55 = vadd.f32 %v6246_v6, %v6218_v14  ;;  %v6295_v31 = vmul.f32 %v11826_v33, %v6283_v60  ;;  %6751 = vmatmul.bf16.gmra.mxu3 %v12772_v17  ;;  %6993 = vmatpush.bf16.msra.mxu0 %v12798_v5  ;;  %v12805_v6 = vld [vmem:[#allocation63_spill] sm:$0xff]  ;;  %v12807_v14 = vld [vmem:[#allocation73_spill] sm:$0xff] }
 0x566   : > { %6722 = vmatmul.bf16.gmra.mxu2 %v12797_v15  ;;  %7022 = vmatpush.bf16.msra.mxu1 %v12799_v57 }
 0x567   : > { %v6268_v13 = vadd.f32 %v11916_v0, %v6247_v55  ;;  %6306 = vadd.xlane.f32.xlu1 %v6295_v31 }
 0x568   : > { %v11925_v48 = vpop.f32.mrf.mxu3 }
 0x569   : > { %v11921_v19 = vpop.f32.mrf.mxu2  ;;  %v6027_v37 = vpop.xlane.xlu0 %6026  ;;  %v6276_v17 = vmax.f32 %v6260_v35, %v6268_v13  ;;  %v12808_v35 = vld [vmem:[#allocation87_spill] sm:$0xff]  ;;  %v12809_v13 = vld [vmem:[#allocation88_spill] sm:$0xff] }
 0x56a   : > { %v11928_v8 = vadd.f32 %v6027_v37, %v11788_v20  ;;  %v6219_v32 = vpop.f32.mrf.mxu0  ;;  %v6248_v58 = vpop.f32.mrf.mxu1  ;;  %v12802_v20 = vld [vmem:[#allocation85_spill] sm:$0xff]  ;;  %v6138_v57 = vadd.f32 %v12809_v13, %v12808_v35 }
 0x56b   : > { %v6220_v49 = vadd.f32 %v6219_v32, %v12800_v2  ;;  %v6284_v41 = vmax.f32 %v6276_v17, 0.0  ;;  %v6136_v54 = vadd.f32 %v12802_v20, %v12801_v45 }
 0x56d   : > { %v6249_v40 = vadd.f32 %v6248_v58, %v6220_v49  ;;  %v6296_v18 = vmul.f32 %v11826_v33, %v6284_v41  ;;  %v6165_v1 = vadd.f32 %v12803_v25, %v6136_v54  ;;  %v6167_v58 = vadd.f32 %v11805_v59, %v6138_v57  ;;  %v12810_v59 = vld [vmem:[#allocation105_spill] sm:$0xff] }
 0x56f   : > { %v6269_v22 = vadd.f32 %v11916_v0, %v6249_v40  ;;  %6308 = vadd.xlane.f32.xlu2 %v6296_v18  ;;  %v6262_v55 = vadd.f32 %v11916_v0, %v6165_v1  ;;  %v6263_v40 = vadd.f32 %v11916_v0, %v6167_v58 }
 0x570   : > { %v11939_v56 = vpop.f32.mrf.mxu3 }
 0x571   : > { %v11935_v21 = vpop.f32.mrf.mxu2  ;;  %v6277_v42 = vmax.f32 %v6261_v36, %v6269_v22 }
 0x572   : > { %v6222_v24 = vpop.f32.mrf.mxu0  ;;  %v6251_v34 = vpop.f32.mrf.mxu1 }
 0x573   : > { %v6223_v51 = vadd.f32 %v6222_v24, %v12804_v30  ;;  %v6285_v23 = vmax.f32 %v6277_v42, 0.0  ;;  %v6403_v24 = vadd.f32 %v11831_v26, %v11824_v16 }
 0x574   : > { %6669 = vmatmul.bf16.gmra.mxu0 %v12805_v6  ;;  %6698 = vmatmul.bf16.gmra.mxu1 %v12806_v29 }
 0x575   : > { %v6252_v3 = vadd.f32 %v6251_v34, %v6223_v51  ;;  %v6297_v60 = vmul.f32 %v11826_v33, %v6285_v23  ;;  %6756 = vmatmul.bf16.gmra.mxu3 %v12805_v6 }
 0x576   : > { %6727 = vmatmul.bf16.gmra.mxu2 %v12807_v14 }
 0x577   : > { %v6270_v31 = vadd.f32 %v11916_v0, %v6252_v3  ;;  %6310 = vadd.xlane.f32.xlu0 %v6297_v60 }
 0x578   : > { %v11954_v46 = vpop.f32.mrf.mxu3 }
 0x579   : > { %v11950_v5 = vpop.f32.mrf.mxu2  ;;  %v6278_v37 = vmax.f32 %v6262_v55, %v6270_v31  ;;  %v11976_v55 = vld [vmem:[#allocation10 + $0x3] ss:$0 sm:$0xff] }
 0x57a   : > { %v6224_v17 = vpop.f32.mrf.mxu0  ;;  %v6253_v32 = vpop.f32.mrf.mxu1 }
 0x57b   : > { %v6225_v47 = vadd.f32 %v6224_v17, %v11807_v44  ;;  %v6286_v2 = vmax.f32 %v6278_v37, 0.0 }
 0x57d   : > { %v6254_v49 = vadd.f32 %v6253_v32, %v6225_v47  ;;  %v6298_v41 = vmul.f32 %v11826_v33, %v6286_v2 }
 0x57f   : > { %v6271_v18 = vadd.f32 %v11916_v0, %v6254_v49  ;;  %6312 = vadd.xlane.f32.xlu1 %v6298_v41 }
 0x580   : > { %v11963_v22 = vpop.f32.mrf.mxu3 }
 0x581   : > { %v11961_v36 = vpop.f32.mrf.mxu2  ;;  %v6279_v45 = vmax.f32 %v6263_v40, %v6271_v18 }
 0x582   : > { %v6431_v20 = vpop.f32.mrf.mxu0  ;;  %v6460_v54 = vpop.f32.mrf.mxu1 }
 0x583   : > { %v6287_v42 = vmax.f32 %v6279_v45, 0.0  ;;  %v6432_v25 = vadd.f32 %v6431_v20, %v6403_v24 }
 0x584   : > { %6770 = vmatmul.bf16.vlgmr.msrb.gmra.mxu0 %v12784_v10  ;;  %6799 = vmatmul.bf16.vlgmr.msrb.gmra.mxu1 %v12785_v39 }
 0x585   : > { %v6299_v44 = vmul.f32 %v11826_v33, %v6287_v42  ;;  %6965 = vmatmul.bf16.vlgmr.msrb.gmra.mxu3 %v12810_v59  ;;  %v6538_v10 = vadd.f32 %v11916_v0, %v6432_v25  ;;  %v6405_v33 = vadd.f32 %v11854_v7, %v11847_v43  ;;  %v12811_v43 = vld [vmem:[#allocation70_spill] sm:$0xff]  ;;  %v6408_v7 = vadd.f32 %v11878_v28, %v11872_v27 }
 0x586   : > { %6936 = vmatmul.bf16.vlgmr.msrb.gmra.mxu2 %v12785_v39 }
 0x587   : > { %6314 = vadd.xlane.f32.xlu2 %v6299_v44 }
 0x588   : > { %v6518_v30 = vpop.f32.mrf.mxu3 }
 0x589   : > { %v6489_v34 = vpop.f32.mrf.mxu2 }
 0x58a   : > { %v6490_v1 = vadd.f32 %v6489_v34, %v6460_v54  ;;  %v6433_v51 = vpop.f32.mrf.mxu0  ;;  %v6462_v23 = vpop.f32.mrf.mxu1  ;;  %v6410_v34 = vadd.f32 %v11900_v38, %v11894_v11  ;;  %v12812_v11 = vld [vmem:[#allocation72_spill] sm:$0xff]  ;;  %v6413_v38 = vadd.f32 %v11925_v48, %v11921_v19 }
 0x58b   : > { %v6434_v16 = vadd.f32 %v6433_v51, %v6405_v33 }
 0x58c   : > { %v6519_v6 = vadd.f32 %v6518_v30, %v6490_v1 }
 0x58d   : > { %v6539_v58 = vadd.f32 %v11916_v0, %v6434_v16 }
 0x58e   : > { %v6546_v3 = vadd.f32 %v11916_v0, %v6519_v6 }
 0x590   : > { %v6554_v60 = vmax.f32 %v6538_v10, %v6546_v3  ;;  %v6520_v35 = vpop.f32.mrf.mxu3 }
 0x591   : > { %v6491_v31 = vpop.f32.mrf.mxu2 }
 0x592   : > { %v6492_v26 = vadd.f32 %v6491_v31, %v6462_v23  ;;  %v6562_v13 = vmax.f32 %v6554_v60, 0.0  ;;  %v6436_v57 = vpop.f32.mrf.mxu0  ;;  %v6465_v37 = vpop.f32.mrf.mxu1 }
 0x593   : > { %v6437_v41 = vadd.f32 %v6436_v57, %v6408_v7  ;;  %v6415_v7 = vadd.f32 %v11939_v56, %v11935_v21  ;;  %v12813_v21 = vld [vmem:[#allocation74_spill] sm:$0xff]  ;;  %v6418_v56 = vadd.f32 %v11954_v46, %v11950_v5 }
 0x594   : > { %v6521_v17 = vadd.f32 %v6520_v35, %v6492_v26  ;;  %v6574_v32 = vmul.f32 %v11976_v55, %v6562_v13  ;;  %6775 = vmatmul.bf16.gmra.mxu0 %v12789_v52  ;;  %6804 = vmatmul.bf16.gmra.mxu1 %v12790_v4 }
 0x595   : > { %6970 = vmatmul.bf16.gmra.mxu3 %v12811_v43  ;;  %v6540_v44 = vadd.f32 %v11916_v0, %v6437_v41 }
 0x596   : > { %v6547_v47 = vadd.f32 %v11916_v0, %v6521_v17  ;;  %6941 = vmatmul.bf16.gmra.mxu2 %v12790_v4  ;;  %6582 = vadd.xlane.f32.xlu0 %v6574_v32 }
 0x598   : > { %v6555_v2 = vmax.f32 %v6539_v58, %v6547_v47  ;;  %v6523_v18 = vpop.f32.mrf.mxu3 }
 0x599   : > { %v6494_v49 = vpop.f32.mrf.mxu2 }
 0x59a   : > { %v6495_v40 = vadd.f32 %v6494_v49, %v6465_v37  ;;  %v6563_v52 = vmax.f32 %v6555_v2, 0.0  ;;  %v6438_v45 = vpop.f32.mrf.mxu0  ;;  %v6467_v20 = vpop.f32.mrf.mxu1 }
 0x59b   : > { %v6439_v25 = vadd.f32 %v6438_v45, %v6410_v34 }
 0x59c   : > { %v6524_v54 = vadd.f32 %v6523_v18, %v6495_v40  ;;  %v6575_v42 = vmul.f32 %v11976_v55, %v6563_v52 }
 0x59d   : > { %v6541_v33 = vadd.f32 %v11916_v0, %v6439_v25 }
 0x59e   : > { %v6548_v24 = vadd.f32 %v11916_v0, %v6524_v54  ;;  %6584 = vadd.xlane.f32.xlu1 %v6575_v42 }
 0x5a0   : > { %v6556_v27 = vmax.f32 %v6540_v44, %v6548_v24  ;;  %v6525_v30 = vpop.f32.mrf.mxu3 }
 0x5a1   : > { %v6496_v28 = vpop.f32.mrf.mxu2 }
 0x5a2   : > { %v6497_v1 = vadd.f32 %v6496_v28, %v6467_v20  ;;  %v6564_v51 = vmax.f32 %v6556_v27, 0.0  ;;  %v6441_v23 = vpop.f32.mrf.mxu0  ;;  %v6470_v6 = vpop.f32.mrf.mxu1 }
 0x5a3   : > { %v6442_v26 = vadd.f32 %v6441_v23, %v6413_v38 }
 0x5a4   : > { %v6526_v10 = vadd.f32 %v6525_v30, %v6497_v1  ;;  %v6576_v3 = vmul.f32 %v11976_v55, %v6564_v51  ;;  %6780 = vmatmul.bf16.gmra.mxu0 %v12796_v53  ;;  %6809 = vmatmul.bf16.gmra.mxu1 %v12797_v15 }
 0x5a5   : > { %6975 = vmatmul.bf16.gmra.mxu3 %v12812_v11  ;;  %v6542_v58 = vadd.f32 %v11916_v0, %v6442_v26 }
 0x5a6   : > { %v6549_v60 = vadd.f32 %v11916_v0, %v6526_v10  ;;  %6946 = vmatmul.bf16.gmra.mxu2 %v12797_v15  ;;  %6586 = vadd.xlane.f32.xlu2 %v6576_v3  ;;  %v6420_v10 = vadd.f32 %v11963_v22, %v11961_v36 }
 0x5a8   : > { %v6557_v31 = vmax.f32 %v6541_v33, %v6549_v60  ;;  %v6528_v13 = vpop.f32.mrf.mxu3 }
 0x5a9   : > { %v6499_v16 = vpop.f32.mrf.mxu2 }
 0x5aa   : > { %v6500_v35 = vadd.f32 %v6499_v16, %v6470_v6  ;;  %v6565_v53 = vmax.f32 %v6557_v31, 0.0  ;;  %v6443_v57 = vpop.f32.mrf.mxu0  ;;  %v6472_v37 = vpop.f32.mrf.mxu1 }
 0x5ab   : > { %v6444_v2 = vadd.f32 %v6443_v57, %v6415_v7 }
 0x5ac   : > { %v6529_v17 = vadd.f32 %v6528_v13, %v6500_v35  ;;  %v6577_v32 = vmul.f32 %v11976_v55, %v6565_v53  ;;  %v12814_v13 = vld [vmem:[#allocation41_spill] sm:$0xff] }
 0x5ad   : > { %v6543_v54 = vadd.f32 %v11916_v0, %v6444_v2  ;;  %v6031_v2 = vpop.xlane.xlu2 %6030 }
 0x5ae   : > { %v6550_v47 = vadd.f32 %v11916_v0, %v6529_v17  ;;  %6588 = vadd.xlane.f32.xlu0 %v6577_v32 }
 0x5b0   : > { %v6558_v19 = vmax.f32 %v6542_v58, %v6550_v47  ;;  %v6530_v41 = vpop.f32.mrf.mxu3  ;;  %v6029_v47 = vpop.xlane.xlu1 %6028 }
 0x5b1   : > { %v6501_v48 = vpop.f32.mrf.mxu2 }
 0x5b2   : > { %v6502_v49 = vadd.f32 %v6501_v48, %v6472_v37  ;;  %v6566_v40 = vmax.f32 %v6558_v19, 0.0  ;;  %v6446_v18 = vpop.f32.mrf.mxu0  ;;  %v6475_v52 = vpop.f32.mrf.mxu1 }
 0x5b3   : > { %v6447_v34 = vadd.f32 %v6446_v18, %v6418_v56 }
 0x5b4   : > { %v6531_v45 = vadd.f32 %v6530_v41, %v6502_v49  ;;  %v6578_v20 = vmul.f32 %v11976_v55, %v6566_v40  ;;  %6785 = vmatmul.bf16.gmra.mxu0 %v12806_v29  ;;  %6814 = vmatmul.bf16.gmra.mxu1 %v12807_v14  ;;  %v12815_v41 = vld [vmem:[#allocation75_spill] sm:$0xff]  ;;  %v6033_v40 = vpop.xlane.xlu0 %6032 }
 0x5b5   : > { %6980 = vmatmul.bf16.gmra.mxu3 %v12813_v21  ;;  %v6544_v23 = vadd.f32 %v11916_v0, %v6447_v34 }
 0x5b6   : > { %v6551_v42 = vadd.f32 %v11916_v0, %v6531_v45  ;;  %6951 = vmatmul.bf16.gmra.mxu2 %v12807_v14  ;;  %6590 = vadd.xlane.f32.xlu1 %v6578_v20 }
 0x5b8   : > { %v6559_v44 = vmax.f32 %v6543_v54, %v6551_v42  ;;  %v6533_v28 = vpop.f32.mrf.mxu3 }
 0x5b9   : > { %v6504_v24 = vpop.f32.mrf.mxu2 }
 0x5ba   : > { %v6505_v27 = vadd.f32 %v6504_v24, %v6475_v52  ;;  %v6567_v29 = vmax.f32 %v6559_v44, 0.0  ;;  %v6448_v25 = vpop.f32.mrf.mxu0  ;;  %v6477_v1 = vpop.f32.mrf.mxu1 }
 0x5bb   : > { %v6449_v3 = vadd.f32 %v6448_v25, %v6420_v10  ;;  %v12817_v25 = vld [vmem:[#allocation89_spill] sm:$0xff] }
 0x5bc   : > { %v6534_v30 = vadd.f32 %v6533_v28, %v6505_v27  ;;  %v6579_v51 = vmul.f32 %v11976_v55, %v6567_v29  ;;  %v12816_v28 = vld [vmem:[#allocation76_spill] sm:$0xff] }
 0x5bd   : > { %v6545_v53 = vadd.f32 %v11916_v0, %v6449_v3 }
 0x5be   : > { %v6552_v6 = vadd.f32 %v11916_v0, %v6534_v30  ;;  %6592 = vadd.xlane.f32.xlu2 %v6579_v51 }
 0x5c0   : > { %v6560_v5 = vmax.f32 %v6544_v23, %v6552_v6  ;;  %v6535_v60 = vpop.f32.mrf.mxu3 }
 0x5c1   : > { %v6506_v46 = vpop.f32.mrf.mxu2  ;;  %v12048_v49 = vpop.xlane.xlu1 %6300 }
 0x5c2   : > { %v6507_v33 = vadd.f32 %v6506_v46, %v6477_v1  ;;  %v6568_v38 = vmax.f32 %v6560_v5, 0.0  ;;  %v12020_v31 = vpop.f32.mrf.mxu0  ;;  %v12022_v16 = vpop.f32.mrf.mxu1  ;;  %v6039_v1 = vadd.f32 %v6029_v47, %v12817_v25 }
 0x5c4   : > { %v6536_v26 = vadd.f32 %v6535_v60, %v6507_v33  ;;  %v6580_v35 = vmul.f32 %v11976_v55, %v6568_v38  ;;  %6994 = vmatmul.bf16.vlgmr.msra.gmra.mxu0 %v12814_v13  ;;  %7023 = vmatmul.bf16.vlgmr.msra.gmra.mxu1 %v12785_v39  ;;  %v12818_v33 = vld [vmem:[#allocation77_spill] sm:$0xff] }
 0x5c5   : > { %7081 = vmatmul.bf16.vlgmr.msra.gmra.mxu3 %v12814_v13 }
 0x5c6   : > { %v6553_v57 = vadd.f32 %v11916_v0, %v6536_v26  ;;  %7052 = vmatmul.bf16.vlgmr.msra.gmra.mxu2 %v12810_v59  ;;  %6594 = vadd.xlane.f32.xlu0 %v6580_v35 }
 0x5c8   : > { %v6561_v36 = vmax.f32 %v6545_v53, %v6553_v57  ;;  %v12033_v37 = vpop.f32.mrf.mxu3 }
 0x5c9   : > { %v12031_v22 = vpop.f32.mrf.mxu2 }
 0x5ca   : > { %v6569_v17 = vmax.f32 %v6561_v36, 0.0  ;;  %v12035_v32 = vpop.f32.mrf.mxu0  ;;  %v12037_v58 = vpop.f32.mrf.mxu1 }
 0x5cb   : > { %v12062_v20 = vpop.xlane.xlu2 %6302 }
 0x5cc   : > { %v6581_v7 = vmul.f32 %v11976_v55, %v6569_v17 }
 0x5ce   : > { %6596 = vadd.xlane.f32.xlu1 %v6581_v7 }
 0x5d0   : > { %v12042_v59 = vpop.f32.mrf.mxu3 }
 0x5d1   : > { %v12040_v39 = vpop.f32.mrf.mxu2 }
 0x5d2   : > { %v12044_v19 = vpop.f32.mrf.mxu0  ;;  %v12046_v48 = vpop.f32.mrf.mxu1 }
 0x5d3   : > { %v12075_v24 = vpop.xlane.xlu0 %6304 }
 0x5d4   : > { %6999 = vmatmul.bf16.gmra.mxu0 %v12815_v41  ;;  %7028 = vmatmul.bf16.gmra.mxu1 %v12790_v4 }
 0x5d5   : > { %7086 = vmatmul.bf16.gmra.mxu3 %v12815_v41 }
 0x5d6   : > { %7057 = vmatmul.bf16.gmra.mxu2 %v12811_v43 }
 0x5d8   : > { %v12056_v18 = vpop.f32.mrf.mxu3 }
 0x5d9   : > { %v12054_v55 = vpop.f32.mrf.mxu2 }
 0x5da   : > { %v12058_v52 = vpop.f32.mrf.mxu0  ;;  %v12060_v45 = vpop.f32.mrf.mxu1 }
 0x5db   : > { %v6307_v54 = vpop.xlane.xlu1 %6306 }
 0x5dc   : > { %v12065_v42 = vadd.f32 %v6307_v54, %v11903_v12  ;;  %v6687_v54 = vadd.f32 %v12037_v58, %v12035_v32  ;;  %v6690_v58 = vadd.f32 %v12046_v48, %v12044_v19  ;;  %v6692_v19 = vadd.f32 %v12060_v45, %v12058_v52 }
 0x5e0   : > { %v12069_v43 = vpop.f32.mrf.mxu3 }
 0x5e1   : > { %v12067_v4 = vpop.f32.mrf.mxu2 }
 0x5e2   : > { %v12071_v56 = vpop.f32.mrf.mxu0  ;;  %v12073_v44 = vpop.f32.mrf.mxu1 }
 0x5e3   : > { %v6309_v34 = vpop.xlane.xlu2 %6308  ;;  %v6695_v52 = vadd.f32 %v12073_v44, %v12071_v56 }
 0x5e4   : > { %v12078_v27 = vadd.f32 %v6309_v34, %v11928_v8  ;;  %7004 = vmatmul.bf16.gmra.mxu0 %v12816_v28  ;;  %7033 = vmatmul.bf16.gmra.mxu1 %v12797_v15 }
 0x5e5   : > { %7091 = vmatmul.bf16.gmra.mxu3 %v12816_v28 }
 0x5e6   : > { %7062 = vmatmul.bf16.gmra.mxu2 %v12812_v11  ;;  %v6040_v11 = vadd.f32 %v6031_v2, %v11822_v62  ;;  %v6041_v62 = vadd.f32 %v6033_v40, %v11852_v9 }
 0x5e8   : > { %v12086_v29 = vpop.f32.mrf.mxu3 }
 0x5e9   : > { %v12084_v12 = vpop.f32.mrf.mxu2 }
 0x5ea   : > { %v12089_v30 = vpop.f32.mrf.mxu0  ;;  %v12091_v51 = vpop.f32.mrf.mxu1 }
 0x5eb   : > { %v6311_v8 = vpop.xlane.xlu0 %6310  ;;  %v6697_v56 = vadd.f32 %v12091_v51, %v12089_v30 }
 0x5ec   : > { %v12093_v23 = vadd.f32 %v6311_v8, %v6039_v1 }
 0x5f0   : > { %v12097_v15 = vpop.f32.mrf.mxu3 }
 0x5f1   : > { %v12095_v6 = vpop.f32.mrf.mxu2 }
 0x5f2   : > { %v12100_v10 = vpop.f32.mrf.mxu0  ;;  %v12102_v5 = vpop.f32.mrf.mxu1 }
 0x5f3   : > { %v6313_v46 = vpop.xlane.xlu1 %6312  ;;  %v6700_v30 = vadd.f32 %v12102_v5, %v12100_v10 }
 0x5f4   : > { %v12104_v3 = vadd.f32 %v6313_v46, %v6040_v11  ;;  %7009 = vmatmul.bf16.gmra.mxu0 %v12818_v33  ;;  %7038 = vmatmul.bf16.gmra.mxu1 %v12807_v14  ;;  %v6685_v14 = vadd.f32 %v12022_v16, %v12020_v31  ;;  %v12137_v16 = vld [vmem:[#allocation10 + $0x4] ss:$0 sm:$0xff] }
 0x5f5   : > { %7096 = vmatmul.bf16.gmra.mxu3 %v12818_v33 }
 0x5f6   : > { %7067 = vmatmul.bf16.gmra.mxu2 %v12813_v21  ;;  %v6714_v47 = vadd.f32 %v12031_v22, %v6685_v14  ;;  %v6716_v22 = vadd.f32 %v12040_v39, %v6687_v54 }
 0x5f8   : > { %v12112_v38 = vpop.f32.mrf.mxu3  ;;  %v6820_v2 = vadd.f32 %v11916_v0, %v6714_v47  ;;  %v6821_v46 = vadd.f32 %v11916_v0, %v6716_v22 }
 0x5f9   : > { %v12110_v60 = vpop.f32.mrf.mxu2 }
 0x5fa   : > { %v12115_v26 = vpop.f32.mrf.mxu0  ;;  %v12117_v35 = vpop.f32.mrf.mxu1 }
 0x5fb   : > { %v6315_v13 = vpop.xlane.xlu2 %6314  ;;  %v6702_v10 = vadd.f32 %v12117_v35, %v12115_v26 }
 0x5fc   : > { %v12119_v53 = vadd.f32 %v6315_v13, %v6041_v62 }
 0x600   : > { %v12125_v21 = vpop.f32.mrf.mxu3 }
 0x601   : > { %v12121_v57 = vpop.f32.mrf.mxu2 }
 0x602   : > { %v6771_v36 = vpop.f32.mrf.mxu0  ;;  %v6800_v17 = vpop.f32.mrf.mxu1 }
 0x603   : > { %v6772_v9 = vadd.f32 %v6771_v36, %v12033_v37 }
 0x605   : > { %v6801_v7 = vadd.f32 %v6800_v17, %v6772_v9 }
 0x607   : > { %v6828_v41 = vadd.f32 %v11916_v0, %v6801_v7 }
 0x608   : > { %v12135_v34 = vpop.f32.mrf.mxu3 }
 0x609   : > { %v12131_v40 = vpop.f32.mrf.mxu2  ;;  %v6836_v31 = vmax.f32 %v6820_v2, %v6828_v41 }
 0x60a   : > { %v6773_v28 = vpop.f32.mrf.mxu0  ;;  %v6802_v25 = vpop.f32.mrf.mxu1 }
 0x60b   : > { %v6774_v37 = vadd.f32 %v6773_v28, %v12042_v59  ;;  %v6844_v1 = vmax.f32 %v6836_v31, 0.0  ;;  %v6719_v59 = vadd.f32 %v12054_v55, %v6690_v58 }
 0x60d   : > { %v6803_v8 = vadd.f32 %v6802_v25, %v6774_v37  ;;  %v6856_v11 = vmul.f32 %v12137_v16, %v6844_v1  ;;  %v6822_v7 = vadd.f32 %v11916_v0, %v6719_v59 }
 0x60f   : > { %v6829_v33 = vadd.f32 %v11916_v0, %v6803_v8  ;;  %6864 = vadd.xlane.f32.xlu2 %v6856_v11 }
 0x610   : > { %v12148_v62 = vpop.f32.mrf.mxu3 }
 0x611   : > { %v12144_v32 = vpop.f32.mrf.mxu2  ;;  %v6837_v13 = vmax.f32 %v6821_v46, %v6829_v33 }
 0x612   : > { %v6776_v39 = vpop.f32.mrf.mxu0  ;;  %v6805_v14 = vpop.f32.mrf.mxu1 }
 0x613   : > { %v6777_v36 = vadd.f32 %v6776_v39, %v12056_v18  ;;  %v6845_v17 = vmax.f32 %v6837_v13, 0.0  ;;  %v6721_v18 = vadd.f32 %v12067_v4, %v6692_v19 }
 0x615   : > { %v6806_v47 = vadd.f32 %v6805_v14, %v6777_v36  ;;  %v6857_v9 = vmul.f32 %v12137_v16, %v6845_v17  ;;  %v6823_v1 = vadd.f32 %v11916_v0, %v6721_v18 }
 0x617   : > { %v6830_v2 = vadd.f32 %v11916_v0, %v6806_v47  ;;  %6866 = vadd.xlane.f32.xlu0 %v6857_v9 }
 0x618   : > { %v12159_v48 = vpop.f32.mrf.mxu3 }
 0x619   : > { %v12155_v41 = vpop.f32.mrf.mxu2  ;;  %v6838_v54 = vmax.f32 %v6822_v7, %v6830_v2 }
 0x61a   : > { %v6778_v55 = vpop.f32.mrf.mxu0  ;;  %v6807_v31 = vpop.f32.mrf.mxu1 }
 0x61b   : > { %v6779_v28 = vadd.f32 %v6778_v55, %v12069_v43  ;;  %v6846_v25 = vmax.f32 %v6838_v54, 0.0  ;;  %v6724_v43 = vadd.f32 %v12084_v12, %v6695_v52 }
 0x61d   : > { %v6808_v22 = vadd.f32 %v6807_v31, %v6779_v28  ;;  %v6858_v37 = vmul.f32 %v12137_v16, %v6846_v25  ;;  %v6824_v59 = vadd.f32 %v11916_v0, %v6724_v43 }
 0x61f   : > { %v6831_v8 = vadd.f32 %v11916_v0, %v6808_v22  ;;  %6868 = vadd.xlane.f32.xlu1 %v6858_v37 }
 0x620   : > { %v12170_v45 = vpop.f32.mrf.mxu3 }
 0x621   : > { %v12166_v11 = vpop.f32.mrf.mxu2  ;;  %v6839_v46 = vmax.f32 %v6823_v1, %v6831_v8 }
 0x622   : > { %v6781_v4 = vpop.f32.mrf.mxu0  ;;  %v6810_v33 = vpop.f32.mrf.mxu1 }
 0x623   : > { %v6782_v58 = vadd.f32 %v6781_v4, %v12086_v29  ;;  %v6847_v13 = vmax.f32 %v6839_v46, 0.0  ;;  %v6726_v29 = vadd.f32 %v12095_v6, %v6697_v56 }
 0x625   : > { %v6811_v39 = vadd.f32 %v6810_v33, %v6782_v58  ;;  %v6859_v14 = vmul.f32 %v12137_v16, %v6847_v13  ;;  %v6825_v55 = vadd.f32 %v11916_v0, %v6726_v29 }
 0x627   : > { %v6832_v36 = vadd.f32 %v11916_v0, %v6811_v39  ;;  %6870 = vadd.xlane.f32.xlu2 %v6859_v14 }
 0x628   : > { %v12181_v44 = vpop.f32.mrf.mxu3 }
 0x629   : > { %v12177_v17 = vpop.f32.mrf.mxu2  ;;  %v6840_v47 = vmax.f32 %v6824_v59, %v6832_v36 }
 0x62a   : > { %v6783_v12 = vpop.f32.mrf.mxu0  ;;  %v6812_v9 = vpop.f32.mrf.mxu1 }
 0x62b   : > { %v6784_v7 = vadd.f32 %v6783_v12, %v12097_v15  ;;  %v6848_v2 = vmax.f32 %v6840_v47, 0.0  ;;  %v6729_v15 = vadd.f32 %v12110_v60, %v6700_v30 }
 0x62d   : > { %v6813_v19 = vadd.f32 %v6812_v9, %v6784_v7  ;;  %v6860_v54 = vmul.f32 %v12137_v16, %v6848_v2  ;;  %v6826_v52 = vadd.f32 %v11916_v0, %v6729_v15 }
 0x62f   : > { %v6833_v31 = vadd.f32 %v11916_v0, %v6813_v19  ;;  %6872 = vadd.xlane.f32.xlu0 %v6860_v54 }
 0x630   : > { %v12192_v51 = vpop.f32.mrf.mxu3 }
 0x631   : > { %v12188_v18 = vpop.f32.mrf.mxu2  ;;  %v6841_v28 = vmax.f32 %v6825_v55, %v6833_v31 }
 0x632   : > { %v6786_v6 = vpop.f32.mrf.mxu0  ;;  %v6815_v25 = vpop.f32.mrf.mxu1 }
 0x633   : > { %v6787_v22 = vadd.f32 %v6786_v6, %v12112_v38  ;;  %v6849_v37 = vmax.f32 %v6841_v28, 0.0  ;;  %v6731_v38 = vadd.f32 %v12121_v57, %v6702_v10  ;;  %v6969_v6 = vadd.f32 %v12148_v62, %v12144_v32 }
 0x634   : > { %v6972_v32 = vadd.f32 %v12159_v48, %v12155_v41 }
 0x635   : > { %v6816_v1 = vadd.f32 %v6815_v25, %v6787_v22  ;;  %v6861_v8 = vmul.f32 %v12137_v16, %v6849_v37  ;;  %v6827_v59 = vadd.f32 %v11916_v0, %v6731_v38 }
 0x637   : > { %v6834_v46 = vadd.f32 %v11916_v0, %v6816_v1  ;;  %6874 = vadd.xlane.f32.xlu1 %v6861_v8 }
 0x638   : > { %v12203_v5 = vpop.f32.mrf.mxu3 }
 0x639   : > { %v12199_v4 = vpop.f32.mrf.mxu2  ;;  %v6842_v33 = vmax.f32 %v6826_v52, %v6834_v46 }
 0x63a   : > { %v6788_v60 = vpop.f32.mrf.mxu0  ;;  %v6817_v43 = vpop.f32.mrf.mxu1 }
 0x63b   : > { %v6789_v58 = vadd.f32 %v6788_v60, %v12125_v21  ;;  %v6850_v13 = vmax.f32 %v6842_v33, 0.0  ;;  %v6967_v21 = vadd.f32 %v12135_v34, %v12131_v40 }
 0x63d   : > { %v6818_v39 = vadd.f32 %v6817_v43, %v6789_v58  ;;  %v6862_v14 = vmul.f32 %v12137_v16, %v6850_v13 }
 0x63f   : > { %v6835_v36 = vadd.f32 %v11916_v0, %v6818_v39  ;;  %6876 = vadd.xlane.f32.xlu2 %v6862_v14 }
 0x640   : > { %v12212_v26 = vpop.f32.mrf.mxu3 }
 0x641   : > { %v12210_v56 = vpop.f32.mrf.mxu2  ;;  %v6843_v35 = vmax.f32 %v6827_v59, %v6835_v36 }
 0x642   : > { %v6995_v47 = vpop.f32.mrf.mxu0  ;;  %v7024_v12 = vpop.f32.mrf.mxu1 }
 0x643   : > { %v6851_v9 = vmax.f32 %v6843_v35, 0.0  ;;  %v6996_v7 = vadd.f32 %v6995_v47, %v6967_v21 }
 0x645   : > { %v6863_v57 = vmul.f32 %v12137_v16, %v6851_v9  ;;  %v7102_v30 = vadd.f32 %v11916_v0, %v6996_v7  ;;  %v12221_v16 = vld [vmem:[#allocation10 + $0x5] ss:$0 sm:$0xff] }
 0x647   : > { %6878 = vadd.xlane.f32.xlu0 %v6863_v57 }
 0x648   : > { %v7082_v19 = vpop.f32.mrf.mxu3 }
 0x649   : > { %v7053_v29 = vpop.f32.mrf.mxu2 }
 0x64a   : > { %v7054_v2 = vadd.f32 %v7053_v29, %v7024_v12  ;;  %v6997_v54 = vpop.f32.mrf.mxu0  ;;  %v7026_v55 = vpop.f32.mrf.mxu1  ;;  %v6974_v12 = vadd.f32 %v12170_v45, %v12166_v11 }
 0x64b   : > { %v6998_v40 = vadd.f32 %v6997_v54, %v6969_v6 }
 0x64c   : > { %v7083_v31 = vadd.f32 %v7082_v19, %v7054_v2 }
 0x64d   : > { %v7103_v10 = vadd.f32 %v11916_v0, %v6998_v40 }
 0x64e   : > { %v7110_v28 = vadd.f32 %v11916_v0, %v7083_v31 }
 0x650   : > { %v7118_v25 = vmax.f32 %v7102_v30, %v7110_v28  ;;  %v7084_v22 = vpop.f32.mrf.mxu3  ;;  %v6977_v30 = vadd.f32 %v12181_v44, %v12177_v17 }
 0x651   : > { %v7055_v15 = vpop.f32.mrf.mxu2 }
 0x652   : > { %v7056_v34 = vadd.f32 %v7055_v15, %v7026_v55  ;;  %v7126_v37 = vmax.f32 %v7118_v25, 0.0  ;;  %v7000_v1 = vpop.f32.mrf.mxu0  ;;  %v7029_v8 = vpop.f32.mrf.mxu1 }
 0x653   : > { %v7001_v43 = vadd.f32 %v7000_v1, %v6972_v32 }
 0x654   : > { %v7085_v52 = vadd.f32 %v7084_v22, %v7056_v34  ;;  %v7138_v46 = vmul.f32 %v12221_v16, %v7126_v37 }
 0x655   : > { %v7104_v35 = vadd.f32 %v11916_v0, %v7001_v43 }
 0x656   : > { %v7111_v33 = vadd.f32 %v11916_v0, %v7085_v52  ;;  %7146 = vadd.xlane.f32.xlu1 %v7138_v46  ;;  %v6979_v52 = vadd.f32 %v12192_v51, %v12188_v18 }
 0x658   : > { %v7119_v62 = vmax.f32 %v7103_v10, %v7111_v33  ;;  %v7087_v58 = vpop.f32.mrf.mxu3 }
 0x659   : > { %v7058_v60 = vpop.f32.mrf.mxu2 }
 0x65a   : > { %v7059_v38 = vadd.f32 %v7058_v60, %v7029_v8  ;;  %v7127_v13 = vmax.f32 %v7119_v62, 0.0  ;;  %v7002_v39 = vpop.f32.mrf.mxu0  ;;  %v7031_v14 = vpop.f32.mrf.mxu1 }
 0x65b   : > { %v7003_v9 = vadd.f32 %v7002_v39, %v6974_v12  ;;  %v6982_v39 = vadd.f32 %v12203_v5, %v12199_v4 }
 0x65c   : > { %v7088_v59 = vadd.f32 %v7087_v58, %v7059_v38  ;;  %v7139_v36 = vmul.f32 %v12221_v16, %v7127_v13 }
 0x65d   : > { %v7105_v55 = vadd.f32 %v11916_v0, %v7003_v9 }
 0x65e   : > { %v7112_v47 = vadd.f32 %v11916_v0, %v7088_v59  ;;  %7148 = vadd.xlane.f32.xlu2 %v7139_v36 }
 0x660   : > { %v7120_v41 = vmax.f32 %v7104_v35, %v7112_v47  ;;  %v7089_v21 = vpop.f32.mrf.mxu3 }
 0x661   : > { %v7060_v48 = vpop.f32.mrf.mxu2 }
 0x662   : > { %v7061_v57 = vadd.f32 %v7060_v48, %v7031_v14  ;;  %v7128_v29 = vmax.f32 %v7120_v41, 0.0  ;;  %v7005_v7 = vpop.f32.mrf.mxu0  ;;  %v7034_v2 = vpop.f32.mrf.mxu1 }
 0x663   : > { %v7006_v28 = vadd.f32 %v7005_v7, %v6977_v30 }
 0x664   : > { %v7090_v19 = vadd.f32 %v7089_v21, %v7061_v57  ;;  %v7140_v54 = vmul.f32 %v12221_v16, %v7128_v29  ;;  %v6984_v57 = vadd.f32 %v12212_v26, %v12210_v56  ;;  %v6585_v56 = vpop.xlane.xlu1 %6584  ;;  %v6583_v26 = vpop.xlane.xlu0 %6582 }
 0x665   : > { %v7106_v1 = vadd.f32 %v11916_v0, %v7006_v28 }
 0x666   : > { %v7113_v31 = vadd.f32 %v11916_v0, %v7090_v19  ;;  %7150 = vadd.xlane.f32.xlu0 %v7140_v54 }
 0x668   : > { %v7121_v11 = vmax.f32 %v7105_v55, %v7113_v31  ;;  %v7092_v25 = vpop.f32.mrf.mxu3 }
 0x669   : > { %v7063_v45 = vpop.f32.mrf.mxu2 }
 0x66a   : > { %v7064_v6 = vadd.f32 %v7063_v45, %v7034_v2  ;;  %v7129_v15 = vmax.f32 %v7121_v11, 0.0  ;;  %v7007_v40 = vpop.f32.mrf.mxu0  ;;  %v7036_v37 = vpop.f32.mrf.mxu1 }
 0x66b   : > { %v7008_v46 = vadd.f32 %v7007_v40, %v6979_v52 }
 0x66c   : > { %v7093_v34 = vadd.f32 %v7092_v25, %v7064_v6  ;;  %v7141_v22 = vmul.f32 %v12221_v16, %v7129_v15  ;;  %v6587_v6 = vpop.xlane.xlu2 %6586  ;;  %v6591_v25 = vpop.xlane.xlu1 %6590 }
 0x66d   : > { %v7107_v38 = vadd.f32 %v11916_v0, %v7008_v46  ;;  %v6589_v15 = vpop.xlane.xlu0 %6588 }
 0x66e   : > { %v7114_v8 = vadd.f32 %v11916_v0, %v7093_v34  ;;  %7152 = vadd.xlane.f32.xlu1 %v7141_v22 }
 0x670   : > { %v7122_v17 = vmax.f32 %v7106_v1, %v7114_v8  ;;  %v7094_v33 = vpop.f32.mrf.mxu3 }
 0x671   : > { %v7065_v44 = vpop.f32.mrf.mxu2 }
 0x672   : > { %v7066_v10 = vadd.f32 %v7065_v44, %v7036_v37  ;;  %v7130_v32 = vmax.f32 %v7122_v17, 0.0  ;;  %v7010_v43 = vpop.f32.mrf.mxu0  ;;  %v7039_v13 = vpop.f32.mrf.mxu1  ;;  %v6316_v17 = vadd.f32 %v12048_v49, %v11833_v50 }
 0x673   : > { %v7011_v14 = vadd.f32 %v7010_v43, %v6982_v39  ;;  %v6318_v39 = vadd.f32 %v12075_v24, %v11881_v61  ;;  %v6602_v61 = vadd.f32 %v6591_v25, %v12078_v27 }
 0x674   : > { %v7095_v62 = vadd.f32 %v7094_v33, %v7066_v10  ;;  %v7142_v60 = vmul.f32 %v12221_v16, %v7130_v32  ;;  %v6593_v40 = vpop.xlane.xlu2 %6592  ;;  %v6597_v34 = vpop.xlane.xlu1 %6596  ;;  %v6598_v44 = vadd.f32 %v6583_v26, %v6316_v17  ;;  %v9882_v10 = vld [vmem:[#allocation2] ss:$0 sm:$0xff] }
 0x675   : > { %v7108_v41 = vadd.f32 %v11916_v0, %v7011_v14  ;;  %v6595_v22 = vpop.xlane.xlu0 %6594 }
 0x676   : > { %v7115_v58 = vadd.f32 %v11916_v0, %v7095_v62  ;;  %7154 = vadd.xlane.f32.xlu2 %v7142_v60  ;;  %v6317_v60 = vadd.f32 %v12062_v20, %v11856_v63 }
 0x678   : > { %v7123_v18 = vmax.f32 %v7107_v38, %v7115_v58  ;;  %v7097_v36 = vpop.f32.mrf.mxu3  ;;  %v6599_v50 = vadd.f32 %v6585_v56, %v6317_v60 }
 0x679   : > { %v7068_v51 = vpop.f32.mrf.mxu2 }
 0x67a   : > { %v7069_v59 = vadd.f32 %v7068_v51, %v7039_v13  ;;  %v7131_v35 = vmax.f32 %v7123_v18, 0.0  ;;  %v7012_v9 = vpop.f32.mrf.mxu0  ;;  %v7041_v4 = vpop.f32.mrf.mxu1  ;;  %v6600_v51 = vadd.f32 %v6587_v6, %v6318_v39 }
 0x67b   : > { %v7013_v29 = vadd.f32 %v7012_v9, %v6984_v57 }
 0x67c   : > { %v7098_v47 = vadd.f32 %v7097_v36, %v7069_v59  ;;  %v7143_v12 = vmul.f32 %v12221_v16, %v7131_v35  ;;  %v6601_v36 = vadd.f32 %v6589_v15, %v12065_v42 }
 0x67d   : > { %v7109_v31 = vadd.f32 %v11916_v0, %v7013_v29 }
 0x67e   : > { %v7116_v48 = vadd.f32 %v11916_v0, %v7098_v47  ;;  %7156 = vadd.xlane.f32.xlu0 %v7143_v12 }
 0x680   : > { %v7124_v21 = vmax.f32 %v7108_v41, %v7116_v48  ;;  %v7099_v19 = vpop.f32.mrf.mxu3 }
 0x681   : > { %v7070_v5 = vpop.f32.mrf.mxu2 }
 0x682   : > { %v7071_v7 = vadd.f32 %v7070_v5, %v7041_v4  ;;  %v7132_v2 = vmax.f32 %v7124_v21, 0.0  ;;  %v6865_v37 = vpop.xlane.xlu2 %6864  ;;  %v6603_v21 = vadd.f32 %v6593_v40, %v12093_v23 }
 0x684   : > { %v7100_v54 = vadd.f32 %v7099_v19, %v7071_v7  ;;  %v7144_v55 = vmul.f32 %v12221_v16, %v7132_v2  ;;  %v6604_v7 = vadd.f32 %v6595_v22, %v12104_v3 }
 0x686   : > { %v7117_v30 = vadd.f32 %v11916_v0, %v7100_v54  ;;  %7158 = vadd.xlane.f32.xlu1 %v7144_v55  ;;  %v6605_v55 = vadd.f32 %v6597_v34, %v12119_v53 }
 0x688   : > { %v7125_v11 = vmax.f32 %v7109_v31, %v7117_v30 }
 0x68a   : > { %v7133_v45 = vmax.f32 %v7125_v11, 0.0  ;;  %v6867_v8 = vpop.xlane.xlu0 %6866 }
 0x68b   : > { %v6881_v49 = vadd.f32 %v6867_v8, %v6599_v50 }
 0x68c   : > { %v7145_v28 = vmul.f32 %v12221_v16, %v7133_v45  ;;  %v6880_v16 = vadd.f32 %v6865_v37, %v6598_v44 }
 0x68e   : > { %7160 = vadd.xlane.f32.xlu2 %v7145_v28 }
 0x692   : > { %v6869_v1 = vpop.xlane.xlu1 %6868 }
 0x693   : > { %v6882_v14 = vadd.f32 %v6869_v1, %v6600_v51 }
 0x69a   : > { %v6871_v52 = vpop.xlane.xlu2 %6870 }
 0x69b   : > { %v6883_v35 = vadd.f32 %v6871_v52, %v6601_v36 }
 0x6a2   : > { %v6873_v46 = vpop.xlane.xlu0 %6872 }
 0x6a3   : > { %v6884_v24 = vadd.f32 %v6873_v46, %v6602_v61 }
 0x6aa   : > { %v6875_v0 = vpop.xlane.xlu1 %6874 }
 0x6ab   : > { %v6885_v42 = vadd.f32 %v6875_v0, %v6603_v21 }
 0x6b2   : > { %v6877_v33 = vpop.xlane.xlu2 %6876 }
 0x6b3   : > { %v6886_v27 = vadd.f32 %v6877_v33, %v6604_v7 }
 0x6ba   : > { %v6879_v38 = vpop.xlane.xlu0 %6878 }
 0x6bb   : > { %v6887_v23 = vadd.f32 %v6879_v38, %v6605_v55 }
 0x6c9   : > { %v7147_v32 = vpop.xlane.xlu1 %7146 }
 0x6ca   : > { %v7162_v62 = vadd.f32 %v7147_v32, %v6880_v16 }
 0x6cc   : > { %v7174_v43 = vadd.f32 %v9882_v10, %v7162_v62 }
 0x6ce   : > { %7183 = vst.msk [vmem:[%s12263_s28] sm:$0xff] %vm7182_vm0, %v7174_v43 }
 0x6d1   : > { %v7149_v58 = vpop.xlane.xlu2 %7148 }
 0x6d2   : > { %v7163_v13 = vadd.f32 %v7149_v58, %v6881_v49 }
 0x6d4   : > { %v7175_v18 = vadd.f32 %v9882_v10, %v7163_v13 }
 0x6d6   : > { %7184 = vst.msk [vmem:[%s12263_s28 + $0x8] sm:$0xff] %vm7182_vm0, %v7175_v18 }
 0x6d9   : > { %v7151_v59 = vpop.xlane.xlu0 %7150 }
 0x6da   : > { %v7164_v63 = vadd.f32 %v7151_v59, %v6882_v14 }
 0x6dc   : > { %v7176_v20 = vadd.f32 %v9882_v10, %v7164_v63 }
 0x6de   : > { %7185 = vst.msk [vmem:[%s12263_s28 + $0x10] sm:$0xff] %vm7182_vm0, %v7176_v20 }
 0x6e1   : > { %v7153_v47 = vpop.xlane.xlu1 %7152 }
 0x6e2   : > { %v7165_v12 = vadd.f32 %v7153_v47, %v6883_v35 }
 0x6e4   : > { %v7177_v41 = vadd.f32 %v9882_v10, %v7165_v12 }
 0x6e6   : > { %7186 = vst.msk [vmem:[%s12263_s28 + $0x18] sm:$0xff] %vm7182_vm0, %v7177_v41 }
 0x6e9   : > { %v7155_v48 = vpop.xlane.xlu2 %7154 }
 0x6ea   : > { %v7166_v9 = vadd.f32 %v7155_v48, %v6884_v24 }
 0x6ec   : > { %v7178_v57 = vadd.f32 %v9882_v10, %v7166_v9 }
 0x6ee   : > { %7187 = vst.msk [vmem:[%s12263_s28 + $0x20] sm:$0xff] %vm7182_vm0, %v7178_v57 }
 0x6f1   : > { %v7157_v4 = vpop.xlane.xlu0 %7156 }
 0x6f2   : > { %v7167_v5 = vadd.f32 %v7157_v4, %v6885_v42 }
 0x6f4   : > { %v7179_v29 = vadd.f32 %v9882_v10, %v7167_v5 }
 0x6f6   : > { %7188 = vst.msk [vmem:[%s12263_s28 + $0x28] sm:$0xff] %vm7182_vm0, %v7179_v29 }
 0x6f9   : > { %v7159_v2 = vpop.xlane.xlu1 %7158 }
 0x6fa   : > { %v7168_v19 = vadd.f32 %v7159_v2, %v6886_v27 }
 0x6fc   : > { %v7180_v54 = vadd.f32 %v9882_v10, %v7168_v19 }
 0x6fe   : > { %7189 = vst.msk [vmem:[%s12263_s28 + $0x30] sm:$0xff] %vm7182_vm0, %v7180_v54 }
 0x701   : > { %v7161_v31 = vpop.xlane.xlu2 %7160 }
 0x702   : > { %v7169_v30 = vadd.f32 %v7161_v31, %v6887_v23 }
 0x704   : > { %v7181_v11 = vadd.f32 %v9882_v10, %v7169_v30 }
 0x706   : > { %7190 = vst.msk [vmem:[%s12263_s28 + $0x38] sm:$0xff] %vm7182_vm0, %v7181_v11 }
 0x707 PF: > { %s23_s29 = sadd.s32 1, %s10054_s29  }
 0x708   : > { %p20_p7 = scmp.ge.s32.totalorder %s23_s29, 4  }
 0x70a   :  { %22 = sbr.rel (!%p20_p7) target bundleno = 6 (0x6), region = 106 }
 0x70f   :  { %7213 = vsyncpa [#allocation4], 1 }
 0x710   :  { %7215 = vsyncpa [#allocation4 + $0x1], 1 }
 0x711   :  { %7216 = vsyncpa [#allocation6], 1 }
 0x712   :  { %7217 = vsyncpa [#allocation9], 1 }

</bundles_post_ra>
